<compile_context>
chip_gen: v6e
topology: v6e:2x2x1
jax: 0.10.0
libtpu: 0.0.40
codegen_flags: <defaults>
</compile_context>

<pallas_src>
import functools

import jax
import jax.numpy as jnp
import numpy as np
from jax import lax
from jax.experimental import pallas as pl
from jax.experimental.pallas import tpu as pltpu

BN_EPS = 1e-5


# ----------------------------------------------------------------------------
# In-kernel helpers
# ----------------------------------------------------------------------------
def _bn_train(v, gamma, beta):
    """Training-mode BatchNorm over the rows of a (M, C) slab (biased var)."""
    mean = jnp.mean(v, axis=0, keepdims=True)
    var = jnp.mean(jnp.square(v - mean), axis=0, keepdims=True)
    return (v - mean) * lax.rsqrt(var + BN_EPS) * gamma + beta


def _pad_hw1(x):
    """Zero-pad a (N, H, W, C) value by 1 on each side of H and W (in VMEM)."""
    n, h, w, c = x.shape
    zc = jnp.zeros((n, h, 1, c), x.dtype)
    x = jnp.concatenate([zc, x, zc], axis=2)          # (N, H, W+2, C)
    zr = jnp.zeros((n, 1, w + 2, c), x.dtype)
    return jnp.concatenate([zr, x, zr], axis=1)       # (N, H+2, W+2, C)


# ----------------------------------------------------------------------------
# Fused BasicBlock kernel
# ----------------------------------------------------------------------------
def make_basic_block_kernel(N, H, W, cin, cout, stride, down_sample):
    Ho, Wo = H // stride, W // stride
    M1 = N * H * W          # pixels of the stride-1 intermediate
    M2 = N * Ho * Wo        # pixels of the block output

    def kernel(*refs):
        # ---- unpack refs ---------------------------------------------------
        x_ref, w1_ref, g1_ref, be1_ref, w2_ref, g2_ref, be2_ref = refs[:7]
        i = 7
        if down_sample:
            wd_ref, gd_ref, bed_ref = refs[i:i + 3]
            i += 3
        o_ref = refs[i]
        scratch = list(refs[i + 1:])
        if stride > 1:
            y1p_ref = scratch.pop(0)   # padded y1 (ref: needed for strided reads)
            row2_ref = scratch.pop(0)  # row-subsampled padded y1
        if down_sample:
            rowd_ref = scratch.pop(0)  # row-subsampled x for the 1x1 conv

        # ---- conv1: 3x3, stride 1, pad 1 -- single im2col matmul (K=9*cin) --
        xp = _pad_hw1(x_ref[...])                                  # (N,H+2,W+2,cin)
        cols = [xp[:, kh:kh + H, kw:kw + W, :].reshape(M1, cin)
                for kh in range(3) for kw in range(3)]
        a1 = jnp.concatenate(cols, axis=1)                         # (M1, 9*cin)
        c1 = jnp.dot(a1, w1_ref[...], preferred_element_type=jnp.float32)
        # conv bias is a no-op before training-mode BN -> dropped.
        y1 = jnp.maximum(_bn_train(c1, g1_ref[...], be1_ref[...]), 0.0)

        # ---- conv2: 3x3, stride s, pad 1 -- computed directly at stride -----
        y1p = _pad_hw1(y1.reshape(N, H, W, cout))                  # (N,H+2,W+2,cout)
        cols2 = []
        if stride == 1:
            for kh in range(3):
                for kw in range(3):
                    cols2.append(
                        y1p[:, kh:kh + H, kw:kw + W, :].reshape(M2, cout))
        else:
            y1p_ref[...] = y1p
            for kh in range(3):
                # padded rows kh, kh+s, ..., kh+s*(Ho-1)
                row2_ref[...] = y1p_ref[:, pl.ds(kh, Ho, stride=stride), :, :]
                for kw in range(3):
                    # padded cols kw, kw+s, ..., kw+s*(Wo-1)
                    win = row2_ref[:, :, pl.ds(kw, Wo, stride=stride), :]
                    cols2.append(win.reshape(M2, cout))
        a2 = jnp.concatenate(cols2, axis=1)                        # (M2, 9*cout)
        c2 = jnp.dot(a2, w2_ref[...], preferred_element_type=jnp.float32)
        y2 = _bn_train(c2, g2_ref[...], be2_ref[...])

        # ---- residual path ---------------------------------------------------
        if down_sample:
            # DownSample: 1x1 conv, stride 2, pad 0 -> BN (training mode)
            rowd_ref[...] = x_ref[:, pl.ds(0, Ho, stride=2), :, :]
            xs = rowd_ref[:, :, pl.ds(0, Wo, stride=2), :]         # (N,Ho,Wo,cin)
            d = jnp.dot(xs.reshape(M2, cin), wd_ref[...],
                        preferred_element_type=jnp.float32)
            res = _bn_train(d, gd_ref[...], bed_ref[...])
        else:
            res = x_ref[...].reshape(M2, cout)

        # ---- bn2 + residual add + relu, single store -------------------------
        o_ref[...] = jnp.maximum(y2 + res, 0.0).astype(o_ref.dtype)

    return kernel


# ----------------------------------------------------------------------------
# pallas_call wrapper (NHWC in, NHWC out)
# ----------------------------------------------------------------------------
def basic_block_pallas(x_nhwc, params, stride, down_sample):
    N, H, W, cin = x_nhwc.shape
    cout = params["w1"].shape[-1]
    Ho, Wo = H // stride, W // stride
    M2 = N * Ho * Wo

    def full_spec(shape):
        return pl.BlockSpec(shape, lambda i: (0,) * len(shape))

    # Weights reshaped so im2col column order (kh, kw, cin) matches the K axis.
    inputs = [
        x_nhwc,
        params["w1"].reshape(9 * cin, cout),
        params["g1"].reshape(1, cout), params["be1"].reshape(1, cout),
        params["w2"].reshape(9 * cout, cout),
        params["g2"].reshape(1, cout), params["be2"].reshape(1, cout),
    ]
    in_specs = [
        full_spec((N, H, W, cin)),
        full_spec((9 * cin, cout)),
        full_spec((1, cout)), full_spec((1, cout)),
        full_spec((9 * cout, cout)),
        full_spec((1, cout)), full_spec((1, cout)),
    ]

    scratch = []
    if stride > 1:
        scratch += [pltpu.VMEM((N, H + 2, W + 2, cout), jnp.float32),
                    pltpu.VMEM((N, Ho, W + 2, cout), jnp.float32)]
    if down_sample:
        inputs += [params["wd"].reshape(cin, cout),
                   params["gd"].reshape(1, cout),
                   params["bed"].reshape(1, cout)]
        in_specs += [full_spec((cin, cout)),
                     full_spec((1, cout)), full_spec((1, cout))]
        scratch += [pltpu.VMEM((N, Ho, W, cin), jnp.float32)]

    out2d = pl.pallas_call(
        make_basic_block_kernel(N, H, W, cin, cout, stride, down_sample),
        out_shape=jax.ShapeDtypeStruct((M2, cout), jnp.float32),
        grid=(1,),
        in_specs=in_specs,
        out_specs=pl.BlockSpec((M2, cout), lambda i: (0, 0)),
        scratch_shapes=scratch,
        compiler_params=pltpu.CompilerParams(
            dimension_semantics=("arbitrary",),
            vmem_limit_bytes=64 * 1024 * 1024),
    )(*inputs)
    return out2d.reshape(N, Ho, Wo, cout)


# ----------------------------------------------------------------------------
# BasicBlock forward (NCHW in / out, like the PyTorch module)
# ----------------------------------------------------------------------------
@functools.partial(jax.jit, static_argnames=("stride", "down_sample"))
def basic_block_forward(x_nchw, params, stride, down_sample):
    x = jnp.transpose(x_nchw, (0, 2, 3, 1))                        # NCHW -> NHWC
    out = basic_block_pallas(x, params, stride, down_sample)
    return jnp.transpose(out, (0, 3, 1, 2))                        # NHWC -> NCHW


# ----------------------------------------------------------------------------
# Pure-JAX reference (for validation; keeps the conv biases explicitly)
# ----------------------------------------------------------------------------
def ref_forward(x_nchw, params, stride, down_sample):
    x = jnp.transpose(x_nchw, (0, 2, 3, 1))
    dn = ("NHWC", "HWIO", "NHWC")
    hi = lax.Precision.HIGHEST

    def bn(v, g, b):
        mean = jnp.mean(v, axis=(0, 1, 2), keepdims=True)
        var = jnp.mean(jnp.square(v - mean), axis=(0, 1, 2), keepdims=True)
        return (v - mean) / jnp.sqrt(var + BN_EPS) * g.reshape(1, 1, 1, -1) \
               + b.reshape(1, 1, 1, -1)

    c1 = lax.conv_general_dilated(x, params["w1"], (1, 1), ((1, 1), (1, 1)),
                                  dimension_numbers=dn, precision=hi)
    c1 = c1 + params["b1"].reshape(1, 1, 1, -1)
    y1 = jnp.maximum(bn(c1, params["g1"], params["be1"]), 0.0)

    c2 = lax.conv_general_dilated(y1, params["w2"], (stride, stride),
                                  ((1, 1), (1, 1)), dimension_numbers=dn,
                                  precision=hi)
    c2 = c2 + params["b2"].reshape(1, 1, 1, -1)
    y2 = bn(c2, params["g2"], params["be2"])

    if down_sample:
        d = lax.conv_general_dilated(x, params["wd"], (2, 2), ((0, 0), (0, 0)),
                                     dimension_numbers=dn, precision=hi)
        d = d + params["bd"].reshape(1, 1, 1, -1)
        res = bn(d, params["gd"], params["bed"])
    else:
        res = x

    out = jnp.maximum(y2 + res, 0.0)
    return jnp.transpose(out, (0, 3, 1, 2))


# ----------------------------------------------------------------------------
# Deterministic parameter init (shapes per BasicBlock.__init__)
# ----------------------------------------------------------------------------
def init_params(key, cin, cout, down_sample):
    ks = jax.random.split(key, 16)

    def cw(k, kh, kw, ci, co):
        return jax.random.normal(k, (kh, kw, ci, co), jnp.float32) / np.sqrt(kh * kw * ci)

    p = {
        "w1": cw(ks[0], 3, 3, cin, cout),
        "b1": 0.01 * jax.random.normal(ks[1], (cout,), jnp.float32),
        "g1": 1.0 + 0.1 * jax.random.normal(ks[2], (cout,), jnp.float32),
        "be1": 0.1 * jax.random.normal(ks[3], (cout,), jnp.float32),
        "w2": cw(ks[4], 3, 3, cout, cout),
        "b2": 0.01 * jax.random.normal(ks[5], (cout,), jnp.float32),
        "g2": 1.0 + 0.1 * jax.random.normal(ks[6], (cout,), jnp.float32),
        "be2": 0.1 * jax.random.normal(ks[7], (cout,), jnp.float32),
    }
    if down_sample:
        p.update({
            "wd": cw(ks[8], 1, 1, cin, cout),
            "bd": 0.01 * jax.random.normal(ks[9], (cout,), jnp.float32),
            "gd": 1.0 + 0.1 * jax.random.normal(ks[10], (cout,), jnp.float32),
            "bed": 0.1 * jax.random.normal(ks[11], (cout,), jnp.float32),
        })
    return p


if __name__ == "__main__":
    key = jax.random.PRNGKey(0)
    k_x1, k_x2, k_p1, k_p2 = jax.random.split(key, 4)

    # Case 1: downsampling block (in=4 -> out=8, stride=2, down_sample=True)
    x1 = jax.random.normal(k_x1, (2, 4, 16, 16), jnp.float32)       # NCHW
    p1 = init_params(k_p1, 4, 8, down_sample=True)
    out1 = jax.block_until_ready(basic_block_forward(x1, p1, 2, True))
    ref1 = ref_forward(x1, p1, 2, True)
    np.testing.assert_allclose(np.asarray(out1), np.asarray(ref1),
                               rtol=1e-2, atol=1e-2)

    # Case 2: identity block (in=out=8, stride=1, down_sample=False)
    x2 = jax.random.normal(k_x2, (2, 8, 16, 16), jnp.float32)       # NCHW
    p2 = init_params(k_p2, 8, 8, down_sample=False)
    out2 = jax.block_until_ready(basic_block_forward(x2, p2, 1, False))
    ref2 = ref_forward(x2, p2, 1, False)
    np.testing.assert_allclose(np.asarray(out2), np.asarray(ref2),
                               rtol=1e-2, atol=1e-2)

    print("KERNEL_OK")
</pallas_src>

<mosaic_0001>
module attributes {stable_mosaic.version = 11 : i64} {
  func.func @kernel(%arg0: i32, %arg1: memref<2x16x16x4xf32, #tpu.memory_space<vmem>>, %arg2: memref<36x8xf32, #tpu.memory_space<vmem>>, %arg3: memref<1x8xf32, #tpu.memory_space<vmem>>, %arg4: memref<1x8xf32, #tpu.memory_space<vmem>>, %arg5: memref<72x8xf32, #tpu.memory_space<vmem>>, %arg6: memref<1x8xf32, #tpu.memory_space<vmem>>, %arg7: memref<1x8xf32, #tpu.memory_space<vmem>>, %arg8: memref<4x8xf32, #tpu.memory_space<vmem>>, %arg9: memref<1x8xf32, #tpu.memory_space<vmem>>, %arg10: memref<1x8xf32, #tpu.memory_space<vmem>>, %arg11: memref<128x8xf32, #tpu.memory_space<vmem>>, %arg12: memref<2x18x18x8xf32, #tpu.memory_space<vmem>>, %arg13: memref<2x8x18x8xf32, #tpu.memory_space<vmem>>, %arg14: memref<2x8x16x4xf32, #tpu.memory_space<vmem>>) attributes {dimension_semantics = [#tpu.dimension_semantics<arbitrary>], iteration_bounds = array<i64: 1>, scalar_prefetch = 0 : i64, scratch_operands = 3 : i64, tpu.core_type = #tpu.core_type<tc>, window_params = [{pipeline_mode = #tpu.pipeline_mode<synchronous>, transform_indices = @transform_0, window_bounds = array<i64: 2, 16, 16, 4>}, {pipeline_mode = #tpu.pipeline_mode<synchronous>, transform_indices = @transform_1, window_bounds = array<i64: 36, 8>}, {pipeline_mode = #tpu.pipeline_mode<synchronous>, transform_indices = @transform_2, window_bounds = array<i64: 1, 8>}, {pipeline_mode = #tpu.pipeline_mode<synchronous>, transform_indices = @transform_3, window_bounds = array<i64: 1, 8>}, {pipeline_mode = #tpu.pipeline_mode<synchronous>, transform_indices = @transform_4, window_bounds = array<i64: 72, 8>}, {pipeline_mode = #tpu.pipeline_mode<synchronous>, transform_indices = @transform_5, window_bounds = array<i64: 1, 8>}, {pipeline_mode = #tpu.pipeline_mode<synchronous>, transform_indices = @transform_6, window_bounds = array<i64: 1, 8>}, {pipeline_mode = #tpu.pipeline_mode<synchronous>, transform_indices = @transform_7, window_bounds = array<i64: 4, 8>}, {pipeline_mode = #tpu.pipeline_mode<synchronous>, transform_indices = @transform_8, window_bounds = array<i64: 1, 8>}, {pipeline_mode = #tpu.pipeline_mode<synchronous>, transform_indices = @transform_9, window_bounds = array<i64: 1, 8>}, {pipeline_mode = #tpu.pipeline_mode<synchronous>, transform_indices = @transform_10, window_bounds = array<i64: 128, 8>}]} {
    %c0 = arith.constant 0 : index
    %c0_0 = arith.constant 0 : index
    %c0_1 = arith.constant 0 : index
    %c0_2 = arith.constant 0 : index
    %0 = vector.load %arg1[%c0, %c0_0, %c0_1, %c0_2] : memref<2x16x16x4xf32, #tpu.memory_space<vmem>>, vector<2x16x16x4xf32>
    %cst = arith.constant 0.000000e+00 : f32
    %1 = vector.broadcast %cst : f32 to vector<2x16x1x4xf32>
    %2 = tpu.concatenate %1, %0, %1 in 2 : vector<2x16x1x4xf32>, vector<2x16x16x4xf32>, vector<2x16x1x4xf32> -> vector<2x16x18x4xf32>
    %cst_3 = arith.constant 0.000000e+00 : f32
    %3 = vector.broadcast %cst_3 : f32 to vector<2x1x18x4xf32>
    %4 = tpu.concatenate %3, %2, %3 in 1 : vector<2x1x18x4xf32>, vector<2x16x18x4xf32>, vector<2x1x18x4xf32> -> vector<2x18x18x4xf32>
    %5 = vector.extract_strided_slice %4 {offsets = [0, 0, 0, 0], sizes = [2, 16, 16, 4], strides = [1, 1, 1, 1]} : vector<2x18x18x4xf32> to vector<2x16x16x4xf32>
    %6 = vector.shape_cast %5 : vector<2x16x16x4xf32> to vector<512x4xf32>
    %7 = vector.extract_strided_slice %4 {offsets = [0, 0, 1, 0], sizes = [2, 16, 16, 4], strides = [1, 1, 1, 1]} : vector<2x18x18x4xf32> to vector<2x16x16x4xf32>
    %8 = vector.shape_cast %7 : vector<2x16x16x4xf32> to vector<512x4xf32>
    %9 = vector.extract_strided_slice %4 {offsets = [0, 0, 2, 0], sizes = [2, 16, 16, 4], strides = [1, 1, 1, 1]} : vector<2x18x18x4xf32> to vector<2x16x16x4xf32>
    %10 = vector.shape_cast %9 : vector<2x16x16x4xf32> to vector<512x4xf32>
    %11 = vector.extract_strided_slice %4 {offsets = [0, 1, 0, 0], sizes = [2, 16, 16, 4], strides = [1, 1, 1, 1]} : vector<2x18x18x4xf32> to vector<2x16x16x4xf32>
    %12 = vector.shape_cast %11 : vector<2x16x16x4xf32> to vector<512x4xf32>
    %13 = vector.extract_strided_slice %4 {offsets = [0, 1, 1, 0], sizes = [2, 16, 16, 4], strides = [1, 1, 1, 1]} : vector<2x18x18x4xf32> to vector<2x16x16x4xf32>
    %14 = vector.shape_cast %13 : vector<2x16x16x4xf32> to vector<512x4xf32>
    %15 = vector.extract_strided_slice %4 {offsets = [0, 1, 2, 0], sizes = [2, 16, 16, 4], strides = [1, 1, 1, 1]} : vector<2x18x18x4xf32> to vector<2x16x16x4xf32>
    %16 = vector.shape_cast %15 : vector<2x16x16x4xf32> to vector<512x4xf32>
    %17 = vector.extract_strided_slice %4 {offsets = [0, 2, 0, 0], sizes = [2, 16, 16, 4], strides = [1, 1, 1, 1]} : vector<2x18x18x4xf32> to vector<2x16x16x4xf32>
    %18 = vector.shape_cast %17 : vector<2x16x16x4xf32> to vector<512x4xf32>
    %19 = vector.extract_strided_slice %4 {offsets = [0, 2, 1, 0], sizes = [2, 16, 16, 4], strides = [1, 1, 1, 1]} : vector<2x18x18x4xf32> to vector<2x16x16x4xf32>
    %20 = vector.shape_cast %19 : vector<2x16x16x4xf32> to vector<512x4xf32>
    %21 = vector.extract_strided_slice %4 {offsets = [0, 2, 2, 0], sizes = [2, 16, 16, 4], strides = [1, 1, 1, 1]} : vector<2x18x18x4xf32> to vector<2x16x16x4xf32>
    %22 = vector.shape_cast %21 : vector<2x16x16x4xf32> to vector<512x4xf32>
    %23 = tpu.concatenate %6, %8, %10, %12, %14, %16, %18, %20, %22 in 1 : vector<512x4xf32>, vector<512x4xf32>, vector<512x4xf32>, vector<512x4xf32>, vector<512x4xf32>, vector<512x4xf32>, vector<512x4xf32>, vector<512x4xf32>, vector<512x4xf32> -> vector<512x36xf32>
    %c0_4 = arith.constant 0 : index
    %c0_5 = arith.constant 0 : index
    %24 = vector.load %arg2[%c0_4, %c0_5] : memref<36x8xf32, #tpu.memory_space<vmem>>, vector<36x8xf32>
    %cst_6 = arith.constant dense<0.000000e+00> : vector<512x8xf32>
    %25 = tpu.matmul %23, %24, %cst_6 {dimension_numbers = #tpu.dot_dimension_numbers<[1], [0], [0], [1], [0, 0, 1, 1], [], []>} : vector<512x36xf32>, vector<36x8xf32>, vector<512x8xf32> -> vector<512x8xf32>
    %c0_7 = arith.constant 0 : index
    %c0_8 = arith.constant 0 : index
    %26 = vector.load %arg3[%c0_7, %c0_8] : memref<1x8xf32, #tpu.memory_space<vmem>>, vector<1x8xf32>
    %c0_9 = arith.constant 0 : index
    %c0_10 = arith.constant 0 : index
    %27 = vector.load %arg4[%c0_9, %c0_10] : memref<1x8xf32, #tpu.memory_space<vmem>>, vector<1x8xf32>
    %cst_11 = arith.constant dense<0.000000e+00> : vector<8xf32>
    %28 = vector.multi_reduction <add>, %25, %cst_11 [0] : vector<512x8xf32> to vector<8xf32>
    %29 = vector.shape_cast %28 : vector<8xf32> to vector<1x8xf32>
    %cst_12 = arith.constant 5.120000e+02 : f32
    %30 = vector.broadcast %cst_12 : f32 to vector<1x8xf32>
    %31 = arith.divf %29, %30 : vector<1x8xf32>
    %32 = vector.broadcast %31 : vector<1x8xf32> to vector<512x8xf32>
    %33 = arith.subf %25, %32 : vector<512x8xf32>
    %34 = arith.mulf %33, %33 : vector<512x8xf32>
    %cst_13 = arith.constant dense<0.000000e+00> : vector<8xf32>
    %35 = vector.multi_reduction <add>, %34, %cst_13 [0] : vector<512x8xf32> to vector<8xf32>
    %36 = vector.shape_cast %35 : vector<8xf32> to vector<1x8xf32>
    %cst_14 = arith.constant 5.120000e+02 : f32
    %37 = vector.broadcast %cst_14 : f32 to vector<1x8xf32>
    %38 = arith.divf %36, %37 : vector<1x8xf32>
    %39 = vector.broadcast %31 : vector<1x8xf32> to vector<512x8xf32>
    %40 = arith.subf %25, %39 : vector<512x8xf32>
    %cst_15 = arith.constant 9.99999974E-6 : f32
    %41 = vector.broadcast %cst_15 : f32 to vector<1x8xf32>
    %42 = arith.addf %38, %41 : vector<1x8xf32>
    %43 = math.rsqrt %42 : vector<1x8xf32>
    %44 = vector.broadcast %43 : vector<1x8xf32> to vector<512x8xf32>
    %45 = arith.mulf %40, %44 : vector<512x8xf32>
    %46 = vector.broadcast %26 : vector<1x8xf32> to vector<512x8xf32>
    %47 = arith.mulf %45, %46 : vector<512x8xf32>
    %48 = vector.broadcast %27 : vector<1x8xf32> to vector<512x8xf32>
    %49 = arith.addf %47, %48 : vector<512x8xf32>
    %cst_16 = arith.constant 0.000000e+00 : f32
    %50 = vector.broadcast %cst_16 : f32 to vector<512x8xf32>
    %51 = arith.maximumf %49, %50 : vector<512x8xf32>
    %52 = vector.shape_cast %51 : vector<512x8xf32> to vector<2x16x16x8xf32>
    %cst_17 = arith.constant 0.000000e+00 : f32
    %53 = vector.broadcast %cst_17 : f32 to vector<2x16x1x8xf32>
    %54 = tpu.concatenate %53, %52, %53 in 2 : vector<2x16x1x8xf32>, vector<2x16x16x8xf32>, vector<2x16x1x8xf32> -> vector<2x16x18x8xf32>
    %cst_18 = arith.constant 0.000000e+00 : f32
    %55 = vector.broadcast %cst_18 : f32 to vector<2x1x18x8xf32>
    %56 = tpu.concatenate %55, %54, %55 in 1 : vector<2x1x18x8xf32>, vector<2x16x18x8xf32>, vector<2x1x18x8xf32> -> vector<2x18x18x8xf32>
    %c0_19 = arith.constant 0 : index
    %c0_20 = arith.constant 0 : index
    %c0_21 = arith.constant 0 : index
    %c0_22 = arith.constant 0 : index
    %57 = vector.load %arg12[%c0_19, %c0_20, %c0_21, %c0_22] : memref<2x18x18x8xf32, #tpu.memory_space<vmem>>, vector<2x18x18x8xf32>
    tpu.vector_store %arg12[%c0_19, %c0_20, %c0_21, %c0_22], %56 {strides = array<i32>} : memref<2x18x18x8xf32, #tpu.memory_space<vmem>>, vector<2x18x18x8xf32>,
    %c0_23 = arith.constant 0 : index
    %c0_24 = arith.constant 0 : index
    %c0_25 = arith.constant 0 : index
    %c0_26 = arith.constant 0 : index
    %58 = tpu.strided_load %arg12[%c0_23, %c0_24, %c0_25, %c0_26] {strides = array<i32: 1, 2, 1, 1>} : memref<2x18x18x8xf32, #tpu.memory_space<vmem>>, vector<2x8x18x8xf32>
    %c0_27 = arith.constant 0 : index
    %c0_28 = arith.constant 0 : index
    %c0_29 = arith.constant 0 : index
    %c0_30 = arith.constant 0 : index
    %59 = vector.load %arg13[%c0_27, %c0_28, %c0_29, %c0_30] : memref<2x8x18x8xf32, #tpu.memory_space<vmem>>, vector<2x8x18x8xf32>
    tpu.vector_store %arg13[%c0_27, %c0_28, %c0_29, %c0_30], %58 {strides = array<i32>} : memref<2x8x18x8xf32, #tpu.memory_space<vmem>>, vector<2x8x18x8xf32>,
    %c0_31 = arith.constant 0 : index
    %c0_32 = arith.constant 0 : index
    %c0_33 = arith.constant 0 : index
    %c0_34 = arith.constant 0 : index
    %60 = tpu.strided_load %arg13[%c0_31, %c0_32, %c0_33, %c0_34] {strides = array<i32: 1, 1, 2, 1>} : memref<2x8x18x8xf32, #tpu.memory_space<vmem>>, vector<2x8x8x8xf32>
    %61 = vector.shape_cast %60 : vector<2x8x8x8xf32> to vector<128x8xf32>
    %c0_35 = arith.constant 0 : index
    %c0_36 = arith.constant 0 : index
    %c1 = arith.constant 1 : index
    %c0_37 = arith.constant 0 : index
    %62 = tpu.strided_load %arg13[%c0_35, %c0_36, %c1, %c0_37] {strides = array<i32: 1, 1, 2, 1>} : memref<2x8x18x8xf32, #tpu.memory_space<vmem>>, vector<2x8x8x8xf32>
    %63 = vector.shape_cast %62 : vector<2x8x8x8xf32> to vector<128x8xf32>
    %c0_38 = arith.constant 0 : index
    %c0_39 = arith.constant 0 : index
    %c2 = arith.constant 2 : index
    %c0_40 = arith.constant 0 : index
    %64 = tpu.strided_load %arg13[%c0_38, %c0_39, %c2, %c0_40] {strides = array<i32: 1, 1, 2, 1>} : memref<2x8x18x8xf32, #tpu.memory_space<vmem>>, vector<2x8x8x8xf32>
    %65 = vector.shape_cast %64 : vector<2x8x8x8xf32> to vector<128x8xf32>
    %c0_41 = arith.constant 0 : index
    %c1_42 = arith.constant 1 : index
    %c0_43 = arith.constant 0 : index
    %c0_44 = arith.constant 0 : index
    %66 = tpu.strided_load %arg12[%c0_41, %c1_42, %c0_43, %c0_44] {strides = array<i32: 1, 2, 1, 1>} : memref<2x18x18x8xf32, #tpu.memory_space<vmem>>, vector<2x8x18x8xf32>
    %c0_45 = arith.constant 0 : index
    %c0_46 = arith.constant 0 : index
    %c0_47 = arith.constant 0 : index
    %c0_48 = arith.constant 0 : index
    %67 = vector.load %arg13[%c0_45, %c0_46, %c0_47, %c0_48] : memref<2x8x18x8xf32, #tpu.memory_space<vmem>>, vector<2x8x18x8xf32>
    tpu.vector_store %arg13[%c0_45, %c0_46, %c0_47, %c0_48], %66 {strides = array<i32>} : memref<2x8x18x8xf32, #tpu.memory_space<vmem>>, vector<2x8x18x8xf32>,
    %c0_49 = arith.constant 0 : index
    %c0_50 = arith.constant 0 : index
    %c0_51 = arith.constant 0 : index
    %c0_52 = arith.constant 0 : index
    %68 = tpu.strided_load %arg13[%c0_49, %c0_50, %c0_51, %c0_52] {strides = array<i32: 1, 1, 2, 1>} : memref<2x8x18x8xf32, #tpu.memory_space<vmem>>, vector<2x8x8x8xf32>
    %69 = vector.shape_cast %68 : vector<2x8x8x8xf32> to vector<128x8xf32>
    %c0_53 = arith.constant 0 : index
    %c0_54 = arith.constant 0 : index
    %c1_55 = arith.constant 1 : index
    %c0_56 = arith.constant 0 : index
    %70 = tpu.strided_load %arg13[%c0_53, %c0_54, %c1_55, %c0_56] {strides = array<i32: 1, 1, 2, 1>} : memref<2x8x18x8xf32, #tpu.memory_space<vmem>>, vector<2x8x8x8xf32>
    %71 = vector.shape_cast %70 : vector<2x8x8x8xf32> to vector<128x8xf32>
    %c0_57 = arith.constant 0 : index
    %c0_58 = arith.constant 0 : index
    %c2_59 = arith.constant 2 : index
    %c0_60 = arith.constant 0 : index
    %72 = tpu.strided_load %arg13[%c0_57, %c0_58, %c2_59, %c0_60] {strides = array<i32: 1, 1, 2, 1>} : memref<2x8x18x8xf32, #tpu.memory_space<vmem>>, vector<2x8x8x8xf32>
    %73 = vector.shape_cast %72 : vector<2x8x8x8xf32> to vector<128x8xf32>
    %c0_61 = arith.constant 0 : index
    %c2_62 = arith.constant 2 : index
    %c0_63 = arith.constant 0 : index
    %c0_64 = arith.constant 0 : index
    %74 = tpu.strided_load %arg12[%c0_61, %c2_62, %c0_63, %c0_64] {strides = array<i32: 1, 2, 1, 1>} : memref<2x18x18x8xf32, #tpu.memory_space<vmem>>, vector<2x8x18x8xf32>
    %c0_65 = arith.constant 0 : index
    %c0_66 = arith.constant 0 : index
    %c0_67 = arith.constant 0 : index
    %c0_68 = arith.constant 0 : index
    %75 = vector.load %arg13[%c0_65, %c0_66, %c0_67, %c0_68] : memref<2x8x18x8xf32, #tpu.memory_space<vmem>>, vector<2x8x18x8xf32>
    tpu.vector_store %arg13[%c0_65, %c0_66, %c0_67, %c0_68], %74 {strides = array<i32>} : memref<2x8x18x8xf32, #tpu.memory_space<vmem>>, vector<2x8x18x8xf32>,
    %c0_69 = arith.constant 0 : index
    %c0_70 = arith.constant 0 : index
    %c0_71 = arith.constant 0 : index
    %c0_72 = arith.constant 0 : index
    %76 = tpu.strided_load %arg13[%c0_69, %c0_70, %c0_71, %c0_72] {strides = array<i32: 1, 1, 2, 1>} : memref<2x8x18x8xf32, #tpu.memory_space<vmem>>, vector<2x8x8x8xf32>
    %77 = vector.shape_cast %76 : vector<2x8x8x8xf32> to vector<128x8xf32>
    %c0_73 = arith.constant 0 : index
    %c0_74 = arith.constant 0 : index
    %c1_75 = arith.constant 1 : index
    %c0_76 = arith.constant 0 : index
    %78 = tpu.strided_load %arg13[%c0_73, %c0_74, %c1_75, %c0_76] {strides = array<i32: 1, 1, 2, 1>} : memref<2x8x18x8xf32, #tpu.memory_space<vmem>>, vector<2x8x8x8xf32>
    %79 = vector.shape_cast %78 : vector<2x8x8x8xf32> to vector<128x8xf32>
    %c0_77 = arith.constant 0 : index
    %c0_78 = arith.constant 0 : index
    %c2_79 = arith.constant 2 : index
    %c0_80 = arith.constant 0 : index
    %80 = tpu.strided_load %arg13[%c0_77, %c0_78, %c2_79, %c0_80] {strides = array<i32: 1, 1, 2, 1>} : memref<2x8x18x8xf32, #tpu.memory_space<vmem>>, vector<2x8x8x8xf32>
    %81 = vector.shape_cast %80 : vector<2x8x8x8xf32> to vector<128x8xf32>
    %82 = tpu.concatenate %61, %63, %65, %69, %71, %73, %77, %79, %81 in 1 : vector<128x8xf32>, vector<128x8xf32>, vector<128x8xf32>, vector<128x8xf32>, vector<128x8xf32>, vector<128x8xf32>, vector<128x8xf32>, vector<128x8xf32>, vector<128x8xf32> -> vector<128x72xf32>
    %c0_81 = arith.constant 0 : index
    %c0_82 = arith.constant 0 : index
    %83 = vector.load %arg5[%c0_81, %c0_82] : memref<72x8xf32, #tpu.memory_space<vmem>>, vector<72x8xf32>
    %cst_83 = arith.constant dense<0.000000e+00> : vector<128x8xf32>
    %84 = tpu.matmul %82, %83, %cst_83 {dimension_numbers = #tpu.dot_dimension_numbers<[1], [0], [0], [1], [0, 0, 1, 1], [], []>} : vector<128x72xf32>, vector<72x8xf32>, vector<128x8xf32> -> vector<128x8xf32>
    %c0_84 = arith.constant 0 : index
    %c0_85 = arith.constant 0 : index
    %85 = vector.load %arg6[%c0_84, %c0_85] : memref<1x8xf32, #tpu.memory_space<vmem>>, vector<1x8xf32>
    %c0_86 = arith.constant 0 : index
    %c0_87 = arith.constant 0 : index
    %86 = vector.load %arg7[%c0_86, %c0_87] : memref<1x8xf32, #tpu.memory_space<vmem>>, vector<1x8xf32>
    %cst_88 = arith.constant dense<0.000000e+00> : vector<8xf32>
    %87 = vector.multi_reduction <add>, %84, %cst_88 [0] : vector<128x8xf32> to vector<8xf32>
    %88 = vector.shape_cast %87 : vector<8xf32> to vector<1x8xf32>
    %cst_89 = arith.constant 1.280000e+02 : f32
    %89 = vector.broadcast %cst_89 : f32 to vector<1x8xf32>
    %90 = arith.divf %88, %89 : vector<1x8xf32>
    %91 = vector.broadcast %90 : vector<1x8xf32> to vector<128x8xf32>
    %92 = arith.subf %84, %91 : vector<128x8xf32>
    %93 = arith.mulf %92, %92 : vector<128x8xf32>
    %cst_90 = arith.constant dense<0.000000e+00> : vector<8xf32>
    %94 = vector.multi_reduction <add>, %93, %cst_90 [0] : vector<128x8xf32> to vector<8xf32>
    %95 = vector.shape_cast %94 : vector<8xf32> to vector<1x8xf32>
    %cst_91 = arith.constant 1.280000e+02 : f32
    %96 = vector.broadcast %cst_91 : f32 to vector<1x8xf32>
    %97 = arith.divf %95, %96 : vector<1x8xf32>
    %98 = vector.broadcast %90 : vector<1x8xf32> to vector<128x8xf32>
    %99 = arith.subf %84, %98 : vector<128x8xf32>
    %cst_92 = arith.constant 9.99999974E-6 : f32
    %100 = vector.broadcast %cst_92 : f32 to vector<1x8xf32>
    %101 = arith.addf %97, %100 : vector<1x8xf32>
    %102 = math.rsqrt %101 : vector<1x8xf32>
    %103 = vector.broadcast %102 : vector<1x8xf32> to vector<128x8xf32>
    %104 = arith.mulf %99, %103 : vector<128x8xf32>
    %105 = vector.broadcast %85 : vector<1x8xf32> to vector<128x8xf32>
    %106 = arith.mulf %104, %105 : vector<128x8xf32>
    %107 = vector.broadcast %86 : vector<1x8xf32> to vector<128x8xf32>
    %108 = arith.addf %106, %107 : vector<128x8xf32>
    %c0_93 = arith.constant 0 : index
    %c0_94 = arith.constant 0 : index
    %c0_95 = arith.constant 0 : index
    %c0_96 = arith.constant 0 : index
    %109 = tpu.strided_load %arg1[%c0_93, %c0_94, %c0_95, %c0_96] {strides = array<i32: 1, 2, 1, 1>} : memref<2x16x16x4xf32, #tpu.memory_space<vmem>>, vector<2x8x16x4xf32>
    %c0_97 = arith.constant 0 : index
    %c0_98 = arith.constant 0 : index
    %c0_99 = arith.constant 0 : index
    %c0_100 = arith.constant 0 : index
    %110 = vector.load %arg14[%c0_97, %c0_98, %c0_99, %c0_100] : memref<2x8x16x4xf32, #tpu.memory_space<vmem>>, vector<2x8x16x4xf32>
    tpu.vector_store %arg14[%c0_97, %c0_98, %c0_99, %c0_100], %109 {strides = array<i32>} : memref<2x8x16x4xf32, #tpu.memory_space<vmem>>, vector<2x8x16x4xf32>,
    %c0_101 = arith.constant 0 : index
    %c0_102 = arith.constant 0 : index
    %c0_103 = arith.constant 0 : index
    %c0_104 = arith.constant 0 : index
    %111 = tpu.strided_load %arg14[%c0_101, %c0_102, %c0_103, %c0_104] {strides = array<i32: 1, 1, 2, 1>} : memref<2x8x16x4xf32, #tpu.memory_space<vmem>>, vector<2x8x8x4xf32>
    %112 = vector.shape_cast %111 : vector<2x8x8x4xf32> to vector<128x4xf32>
    %c0_105 = arith.constant 0 : index
    %c0_106 = arith.constant 0 : index
    %113 = vector.load %arg8[%c0_105, %c0_106] : memref<4x8xf32, #tpu.memory_space<vmem>>, vector<4x8xf32>
    %cst_107 = arith.constant dense<0.000000e+00> : vector<128x8xf32>
    %114 = tpu.matmul %112, %113, %cst_107 {dimension_numbers = #tpu.dot_dimension_numbers<[1], [0], [0], [1], [0, 0, 1, 1], [], []>} : vector<128x4xf32>, vector<4x8xf32>, vector<128x8xf32> -> vector<128x8xf32>
    %c0_108 = arith.constant 0 : index
    %c0_109 = arith.constant 0 : index
    %115 = vector.load %arg9[%c0_108, %c0_109] : memref<1x8xf32, #tpu.memory_space<vmem>>, vector<1x8xf32>
    %c0_110 = arith.constant 0 : index
    %c0_111 = arith.constant 0 : index
    %116 = vector.load %arg10[%c0_110, %c0_111] : memref<1x8xf32, #tpu.memory_space<vmem>>, vector<1x8xf32>
    %cst_112 = arith.constant dense<0.000000e+00> : vector<8xf32>
    %117 = vector.multi_reduction <add>, %114, %cst_112 [0] : vector<128x8xf32> to vector<8xf32>
    %118 = vector.shape_cast %117 : vector<8xf32> to vector<1x8xf32>
    %cst_113 = arith.constant 1.280000e+02 : f32
    %119 = vector.broadcast %cst_113 : f32 to vector<1x8xf32>
    %120 = arith.divf %118, %119 : vector<1x8xf32>
    %121 = vector.broadcast %120 : vector<1x8xf32> to vector<128x8xf32>
    %122 = arith.subf %114, %121 : vector<128x8xf32>
    %123 = arith.mulf %122, %122 : vector<128x8xf32>
    %cst_114 = arith.constant dense<0.000000e+00> : vector<8xf32>
    %124 = vector.multi_reduction <add>, %123, %cst_114 [0] : vector<128x8xf32> to vector<8xf32>
    %125 = vector.shape_cast %124 : vector<8xf32> to vector<1x8xf32>
    %cst_115 = arith.constant 1.280000e+02 : f32
    %126 = vector.broadcast %cst_115 : f32 to vector<1x8xf32>
    %127 = arith.divf %125, %126 : vector<1x8xf32>
    %128 = vector.broadcast %120 : vector<1x8xf32> to vector<128x8xf32>
    %129 = arith.subf %114, %128 : vector<128x8xf32>
    %cst_116 = arith.constant 9.99999974E-6 : f32
    %130 = vector.broadcast %cst_116 : f32 to vector<1x8xf32>
    %131 = arith.addf %127, %130 : vector<1x8xf32>
    %132 = math.rsqrt %131 : vector<1x8xf32>
    %133 = vector.broadcast %132 : vector<1x8xf32> to vector<128x8xf32>
    %134 = arith.mulf %129, %133 : vector<128x8xf32>
    %135 = vector.broadcast %115 : vector<1x8xf32> to vector<128x8xf32>
    %136 = arith.mulf %134, %135 : vector<128x8xf32>
    %137 = vector.broadcast %116 : vector<1x8xf32> to vector<128x8xf32>
    %138 = arith.addf %136, %137 : vector<128x8xf32>
    %139 = arith.addf %108, %138 : vector<128x8xf32>
    %cst_117 = arith.constant 0.000000e+00 : f32
    %140 = vector.broadcast %cst_117 : f32 to vector<128x8xf32>
    %141 = arith.maximumf %139, %140 : vector<128x8xf32>
    %c0_118 = arith.constant 0 : index
    %c0_119 = arith.constant 0 : index
    %142 = vector.load %arg11[%c0_118, %c0_119] : memref<128x8xf32, #tpu.memory_space<vmem>>, vector<128x8xf32>
    tpu.vector_store %arg11[%c0_118, %c0_119], %141 {strides = array<i32>} : memref<128x8xf32, #tpu.memory_space<vmem>>, vector<128x8xf32>,
    return
  }
  func.func @transform_0(%arg0: i32) -> (i32, i32, i32, i32) {
    %c0_i32 = arith.constant 0 : i32
    %c0_i32_0 = arith.constant 0 : i32
    %c0_i32_1 = arith.constant 0 : i32
    %c0_i32_2 = arith.constant 0 : i32
    %c0_i32_3 = arith.constant 0 : i32
    return %c0_i32, %c0_i32_0, %c0_i32_1, %c0_i32_2 : i32, i32, i32, i32
  }
  func.func @transform_1(%arg0: i32) -> (i32, i32) {
    %c0_i32 = arith.constant 0 : i32
    %c0_i32_0 = arith.constant 0 : i32
    %c0_i32_1 = arith.constant 0 : i32
    return %c0_i32, %c0_i32_0 : i32, i32
  }
  func.func @transform_2(%arg0: i32) -> (i32, i32) {
    %c0_i32 = arith.constant 0 : i32
    %c0_i32_0 = arith.constant 0 : i32
    %c0_i32_1 = arith.constant 0 : i32
    return %c0_i32, %c0_i32_0 : i32, i32
  }
  func.func @transform_3(%arg0: i32) -> (i32, i32) {
    %c0_i32 = arith.constant 0 : i32
    %c0_i32_0 = arith.constant 0 : i32
    %c0_i32_1 = arith.constant 0 : i32
    return %c0_i32, %c0_i32_0 : i32, i32
  }
  func.func @transform_4(%arg0: i32) -> (i32, i32) {
    %c0_i32 = arith.constant 0 : i32
    %c0_i32_0 = arith.constant 0 : i32
    %c0_i32_1 = arith.constant 0 : i32
    return %c0_i32, %c0_i32_0 : i32, i32
  }
  func.func @transform_5(%arg0: i32) -> (i32, i32) {
    %c0_i32 = arith.constant 0 : i32
    %c0_i32_0 = arith.constant 0 : i32
    %c0_i32_1 = arith.constant 0 : i32
    return %c0_i32, %c0_i32_0 : i32, i32
  }
  func.func @transform_6(%arg0: i32) -> (i32, i32) {
    %c0_i32 = arith.constant 0 : i32
    %c0_i32_0 = arith.constant 0 : i32
    %c0_i32_1 = arith.constant 0 : i32
    return %c0_i32, %c0_i32_0 : i32, i32
  }
  func.func @transform_7(%arg0: i32) -> (i32, i32) {
    %c0_i32 = arith.constant 0 : i32
    %c0_i32_0 = arith.constant 0 : i32
    %c0_i32_1 = arith.constant 0 : i32
    return %c0_i32, %c0_i32_0 : i32, i32
  }
  func.func @transform_8(%arg0: i32) -> (i32, i32) {
    %c0_i32 = arith.constant 0 : i32
    %c0_i32_0 = arith.constant 0 : i32
    %c0_i32_1 = arith.constant 0 : i32
    return %c0_i32, %c0_i32_0 : i32, i32
  }
  func.func @transform_9(%arg0: i32) -> (i32, i32) {
    %c0_i32 = arith.constant 0 : i32
    %c0_i32_0 = arith.constant 0 : i32
    %c0_i32_1 = arith.constant 0 : i32
    return %c0_i32, %c0_i32_0 : i32, i32
  }
  func.func @transform_10(%arg0: i32) -> (i32, i32) {
    %c0_i32 = arith.constant 0 : i32
    %c0_i32_0 = arith.constant 0 : i32
    %c0_i32_1 = arith.constant 0 : i32
    return %c0_i32, %c0_i32_0 : i32, i32
  }
}

</mosaic_0001>

<bundles_post_ra>
// kernel: basic_block_forward.1
= control target key start
LH: loop header
LB: loop body
LE: loop exit
PB: predicated region body
PF: predicated region fallthrough
CT: control target
= control target key end

     0   :  { %vm2362_vm0 = vcmask 64512   ;;  %vm4392_vm1 = vcmask 58368   ;;  %v13655_v0 = vmov 0.0   ;;  %vm163_vm2 = vcmask 1040384   ;;  %s6935_s25 = smov 4   ;;  %s6936_s19 = smov 8   ;;  %s13644_s0 = inlined_call_operand.vmem [shape: f32[2,16,16,4], index: 0, kind: input, shape index: {}]   ;;  %s13645_s1 = inlined_call_operand.vmem [shape: f32[36,8], index: 1, kind: input, shape index: {}]   ;;  %s13646_s2 = inlined_call_operand.vmem [shape: f32[1,8], index: 2, kind: input, shape index: {}]   ;;  %s13647_s3 = inlined_call_operand.vmem [shape: f32[1,8], index: 3, kind: input, shape index: {}]   ;;  %s13648_s4 = inlined_call_operand.vmem [shape: f32[72,8], index: 4, kind: input, shape index: {}]   ;;  %s13649_s7 = inlined_call_operand.vmem [shape: f32[4,8], index: 7, kind: input, shape index: {}]   ;;  %s13650_s5 = inlined_call_operand.vmem [shape: f32[1,8], index: 5, kind: input, shape index: {}]   ;;  %s13651_s6 = inlined_call_operand.vmem [shape: f32[1,8], index: 6, kind: input, shape index: {}]   ;;  %s13652_s8 = inlined_call_operand.vmem [shape: f32[1,8], index: 8, kind: input, shape index: {}]   ;;  %s13653_s9 = inlined_call_operand.vmem [shape: f32[1,8], index: 9, kind: input, shape index: {}]   ;;  %s13654_s10 = inlined_call_operand.vmem [shape: f32[128,8], index: 10, kind: output, shape index: {}]  }
   0x1   :  { %v7003_v1 = vrot.slane %v13655_v0, 1  ;;  %4390 = vst.msk [vmem:[#allocation2] sm:$0xff] %vm2362_vm0, %v13655_v0  ;;  %4391 = vst.msk [vmem:[#allocation2 + $0x8] sm:$0xff] %vm2362_vm0, %v13655_v0  ;;  %v35_v2 = vld [vmem:[%s13644_s0] sm:$0xff]  ;;  %v36_v3 = vld [vmem:[%s13644_s0 + $0x8] sm:$0xff]  ;;  %vm479_vm3 = vcmask 1046528  }
   0x2   :  { %4393 = vst.msk [vmem:[#allocation2 + $0x10] sm:$0x3] %vm4392_vm1, %v13655_v0  ;;  %4447 = vst.msk [vmem:[#allocation2 + $0x1c0] sm:$0x3] %vm4392_vm1, %v13655_v0  ;;  %v37_v4 = vld [vmem:[%s13644_s0 + $0x10] sm:$0xff]  ;;  %v164_v5 = vrot.slane %v35_v2, 7 }
   0x3   :  { %13994 = vst [vmem:[#allocation5_spill] sm:$0xff] %v7003_v1  ;;  %4445 = vst.msk [vmem:[#allocation2 + $0x1b0] sm:$0xff] %vm2362_vm0, %v13655_v0  ;;  %v165_v6 = vrot.slane %v36_v3, 7  ;;  %v38_v7 = vld [vmem:[%s13644_s0 + $0x18] sm:$0xff]  ;;  %v167_v8 = vrot.slane %v37_v4, 7  ;;  %v39_v9 = vld [vmem:[%s13644_s0 + $0x20] sm:$0xff]  ;;  %809 = vrot.lane.b32.xlu0 %v7003_v1, %s6935_s25 }
   0x4   :  { %4446 = vst.msk [vmem:[#allocation2 + $0x1b8] sm:$0xff] %vm2362_vm0, %v13655_v0  ;;  %v40_v10 = vld [vmem:[%s13644_s0 + $0x28] sm:$0xff]  ;;  %v168_v11 = vrot.slane %v38_v7, 7  ;;  %v170_v12 = vrot.slane %v39_v9, 7  ;;  %v7044_v16 = vsel %vm163_vm2, 0.0, %v164_v5  ;;  %v41_v26 = vld [vmem:[%s13644_s0 + $0x30] sm:$0xff] }
   0x5   :  { %v171_v13 = vrot.slane %v40_v10, 7  ;;  %v7038_v14 = vsel %vm163_vm2, %v164_v5, %v165_v6  ;;  %v7041_v15 = vsel %vm163_vm2, %v165_v6, 0.0  ;;  %v7047_v17 = vsel %vm163_vm2, 0.0, %v167_v8  ;;  %v42_v27 = vld [vmem:[%s13644_s0 + $0x38] sm:$0xff]  ;;  %v43_v32 = vld [vmem:[%s13644_s0 + $0x40] sm:$0xff]  ;;  %v44_v33 = vld [vmem:[%s13644_s0 + $0x48] sm:$0xff] }
   0x6   :  { %v483_v18 = vrot.slane %v7038_v14, 1  ;;  %v485_v19 = vrot.slane %v7041_v15, 1  ;;  %v482_v20 = vrot.slane %v7044_v16, 1  ;;  %v7053_v21 = vsel %vm163_vm2, %v167_v8, %v168_v11  ;;  %v45_v38 = vld [vmem:[%s13644_s0 + $0x50] sm:$0xff]  ;;  %v46_v46 = vld [vmem:[%s13644_s0 + $0x58] sm:$0xff]  ;;  %v47_v59 = vld [vmem:[%s13644_s0 + $0x60] sm:$0xff] }
   0x7   :  { %v487_v22 = vrot.slane %v7047_v17, 1  ;;  %v488_v23 = vrot.slane %v7053_v21, 1  ;;  %v7058_v24 = vsel %vm163_vm2, %v168_v11, 0.0  ;;  %v7061_v25 = vsel %vm163_vm2, %v170_v12, %v171_v13  ;;  %v48_v60 = vld [vmem:[%s13644_s0 + $0x68] sm:$0xff]  ;;  %v49_v9 = vld [vmem:[%s13644_s0 + $0x70] sm:$0xff]  ;;  %v50_v10 = vld [vmem:[%s13644_s0 + $0x78] sm:$0xff] }
   0x8   :  { %v7070_v28 = vsel %vm479_vm3, %v483_v18, %v485_v19  ;;  %v7073_v29 = vsel %vm479_vm3, %v482_v20, %v483_v18  ;;  %v490_v30 = vrot.slane %v7058_v24, 1  ;;  %v7077_v31 = vsel %vm163_vm2, 0.0, %v170_v12  ;;  %s6938_s20 = smov 16   ;;  %s6939_s21 = smov 20  }
   0x9   :  { %13995 = vst [vmem:[#allocation6_spill] sm:$0xff] %v7070_v28  ;;  %13996 = vst [vmem:[#allocation7_spill] sm:$0xff] %v7073_v29  ;;  %813 = vrot.lane.b32.xlu1 %v7070_v28, %s6935_s25  ;;  %811 = vrot.lane.b32.xlu0 %v7073_v29, %s6935_s25  ;;  %v7090_v34 = vsel %vm479_vm3, %v487_v22, %v488_v23  ;;  %v492_v35 = vrot.slane %v7077_v31, 1  ;;  %v493_v36 = vrot.slane %v7061_v25, 1  ;;  %v7095_v37 = vsel %vm163_vm2, %v171_v13, 0.0  ;;  %v74_v29 = vld [vmem:[%s13644_s0 + $0x138] sm:$0xff] }
   0xa   :  { %13997 = vst [vmem:[#allocation8_spill] sm:$0xff] %v7090_v34  ;;  %v7101_v39 = vsel %vm479_vm3, %v488_v23, %v490_v30  ;;  %v495_v40 = vrot.slane %v7095_v37, 1  ;;  %v173_v41 = vrot.slane %v41_v26, 7  ;;  %v174_v42 = vrot.slane %v42_v27, 7  ;;  %v51_v27 = vld [vmem:[%s13644_s0 + $0x80] sm:$0xff]  ;;  %s6940_s27 = smov 24  }
   0xb   :  { %13998 = vst [vmem:[#allocation9_spill] sm:$0xff] %v7101_v39  ;;  %v7105_v43 = vsel %vm479_vm3, %v492_v35, %v493_v36  ;;  %v176_v44 = vrot.slane %v43_v32, 7  ;;  %v177_v45 = vrot.slane %v44_v33, 7  ;;  %v179_v50 = vrot.slane %v45_v38, 7  ;;  %v52_v32 = vld [vmem:[%s13644_s0 + $0x88] sm:$0xff]  ;;  %s6941_s12 = smov 28  }
   0xc   :  { %13999 = vst [vmem:[#allocation10_spill] sm:$0xff] %v7105_v43  ;;  %v7111_v47 = vsel %vm163_vm2, %v173_v41, %v174_v42  ;;  %v7114_v48 = vsel %vm163_vm2, 0.0, %v173_v41  ;;  %v7117_v49 = vsel %vm163_vm2, %v174_v42, 0.0  ;;  %v7124_v51 = vsel %vm479_vm3, %v493_v36, %v495_v40  ;;  %s6945_s30 = smov 56   ;;  %s6946_s11 = smov 64  }
   0xd   :  { %815 = vrot.lane.b32.xlu1 %v7090_v34, %s6935_s25  ;;  %817 = vrot.lane.b32.xlu0 %v7101_v39, %s6935_s25  ;;  %14000 = vst [vmem:[#allocation11_spill] sm:$0xff] %v7124_v51  ;;  %v497_v52 = vrot.slane %v7114_v48, 1  ;;  %v498_v53 = vrot.slane %v7111_v47, 1  ;;  %v7129_v54 = vsel %vm163_vm2, %v176_v44, %v177_v45  ;;  %v500_v55 = vrot.slane %v7117_v49, 1 }
   0xe   :  { %v7133_v56 = vsel %vm163_vm2, 0.0, %v176_v44  ;;  %v7136_v57 = vsel %vm163_vm2, %v177_v45, 0.0  ;;  %v180_v58 = vrot.slane %v46_v46, 7  ;;  %v503_v62 = vrot.slane %v7129_v54, 1 }
   0xf   :  { %v7145_v61 = vsel %vm479_vm3, %v497_v52, %v498_v53  ;;  %v502_v63 = vrot.slane %v7133_v56, 1  ;;  %v505_v2 = vrot.slane %v7136_v57, 1  ;;  %v7158_v4 = vsel %vm163_vm2, 0.0, %v179_v50  ;;  %v54_v52 = vld [vmem:[%s13644_s0 + $0x98] sm:$0xff] }
  0x10   :  { %14001 = vst [vmem:[#allocation12_spill] sm:$0xff] %v7145_v61  ;;  %v7155_v3 = vsel %vm163_vm2, %v179_v50, %v180_v58  ;;  %v7161_v5 = vsel %vm479_vm3, %v498_v53, %v500_v55  ;;  %v7164_v6 = vsel %vm163_vm2, %v180_v58, 0.0  ;;  %v182_v7 = vrot.slane %v47_v59, 7  ;;  %v53_v50 = vld [vmem:[%s13644_s0 + $0x90] sm:$0xff] }
  0x11   :  { %819 = vrot.lane.b32.xlu1 %v7105_v43, %s6935_s25  ;;  %821 = vrot.lane.b32.xlu0 %v7124_v51, %s6935_s25  ;;  %14002 = vst [vmem:[#allocation13_spill] sm:$0xff] %v7161_v5  ;;  %v183_v8 = vrot.slane %v48_v60, 7  ;;  %v507_v11 = vrot.slane %v7158_v4, 1  ;;  %v508_v12 = vrot.slane %v7155_v3, 1  ;;  %v7179_v13 = vsel %vm479_vm3, %v502_v63, %v503_v62 }
  0x12   :  { %14003 = vst [vmem:[#allocation14_spill] sm:$0xff] %v7179_v13  ;;  %v7182_v18 = vsel %vm479_vm3, %v503_v62, %v505_v2  ;;  %v510_v19 = vrot.slane %v7164_v6, 1  ;;  %v7189_v22 = vsel %vm163_vm2, 0.0, %v182_v7  ;;  %v185_v23 = vrot.slane %v49_v9, 7 }
  0x13   :  { %14004 = vst [vmem:[#allocation15_spill] sm:$0xff] %v7182_v18  ;;  %v7186_v20 = vsel %vm163_vm2, %v182_v7, %v183_v8  ;;  %14005 = vst [vmem:[#allocation16_spill] sm:$0xff] %v7189_v22  ;;  %v186_v26 = vrot.slane %v50_v10, 7  ;;  %v7195_v30 = vsel %vm163_vm2, %v183_v8, 0.0  ;;  %v7201_v33 = vsel %vm479_vm3, %v507_v11, %v508_v12  ;;  %v55_v7 = vld [vmem:[%s13644_s0 + $0xa0] sm:$0xff]  ;;  %v56_v10 = vld [vmem:[%s13644_s0 + $0xa8] sm:$0xff] }
  0x14   :  { %14006 = vst [vmem:[#allocation17_spill] sm:$0xff] %v7201_v33  ;;  %v7208_v35 = vsel %vm479_vm3, %v508_v12, %v510_v19  ;;  %v512_v36 = vrot.slane %v7189_v22, 1  ;;  %v513_v38 = vrot.slane %v7186_v20, 1  ;;  %v188_v40 = vrot.slane %v51_v27, 7 }
  0x15   :  { %823 = vrot.lane.b32.xlu1 %v7145_v61, %s6935_s25  ;;  %825 = vrot.lane.b32.xlu0 %v7161_v5, %s6935_s25  ;;  %14007 = vst [vmem:[#allocation18_spill] sm:$0xff] %v7208_v35  ;;  %v515_v41 = vrot.slane %v7195_v30, 1  ;;  %v7214_v42 = vsel %vm163_vm2, %v185_v23, %v186_v26  ;;  %v7217_v44 = vsel %vm163_vm2, 0.0, %v185_v23  ;;  %v189_v45 = vrot.slane %v52_v32, 7 }
  0x16   :  { %14008 = vst [vmem:[#allocation19_spill] sm:$0xff] %v7214_v42  ;;  %v7220_v46 = vsel %vm163_vm2, %v186_v26, 0.0  ;;  %v7233_v53 = vsel %vm479_vm3, %v512_v36, %v513_v38  ;;  %v517_v55 = vrot.slane %v7217_v44, 1  ;;  %v518_v58 = vrot.slane %v7214_v42, 1  ;;  %v57_v26 = vld [vmem:[%s13644_s0 + $0xb0] sm:$0xff] }
  0x17   :  { %14009 = vst [vmem:[#allocation20_spill] sm:$0xff] %v7233_v53  ;;  %v7238_v59 = vsel %vm163_vm2, 0.0, %v188_v40  ;;  %v7241_v60 = vsel %vm479_vm3, %v513_v38, %v515_v41  ;;  %v520_v62 = vrot.slane %v7220_v46, 1  ;;  %v7245_v63 = vsel %vm163_vm2, %v188_v40, %v189_v45  ;;  %v58_v38 = vld [vmem:[%s13644_s0 + $0xb8] sm:$0xff] }
  0x18   :  { %14010 = vst [vmem:[#allocation21_spill] sm:$0xff] %v7241_v60  ;;  %14011 = vst [vmem:[#allocation22_spill] sm:$0xff] %v7245_v63  ;;  %v7248_v2 = vsel %vm163_vm2, %v189_v45, 0.0  ;;  %v191_v8 = vrot.slane %v53_v50, 7  ;;  %v192_v9 = vrot.slane %v54_v52, 7  ;;  %v522_v11 = vrot.slane %v7238_v59, 1 }
  0x19   :  { %827 = vrot.lane.b32.xlu1 %v7179_v13, %s6935_s25  ;;  %829 = vrot.lane.b32.xlu0 %v7182_v18, %s6935_s25  ;;  %v523_v12 = vrot.slane %v7245_v63, 1  ;;  %v525_v19 = vrot.slane %v7248_v2, 1  ;;  %v194_v23 = vrot.slane %v55_v7, 7  ;;  %v7267_v27 = vsel %vm479_vm3, %v517_v55, %v518_v58 }
  0x1a   :  { %14012 = vst [vmem:[#allocation23_spill] sm:$0xff] %v7267_v27  ;;  %v7270_v32 = vsel %vm479_vm3, %v518_v58, %v520_v62  ;;  %v195_v36 = vrot.slane %v56_v10, 7  ;;  %v7276_v40 = vsel %vm163_vm2, %v191_v8, %v192_v9  ;;  %v7279_v41 = vsel %vm163_vm2, 0.0, %v191_v8 }
  0x1b   :  { %14013 = vst [vmem:[#allocation24_spill] sm:$0xff] %v7270_v32  ;;  %14014 = vst [vmem:[#allocation25_spill] sm:$0xff] %v7276_v40  ;;  %v7282_v45 = vsel %vm163_vm2, %v192_v9, 0.0  ;;  %v197_v50 = vrot.slane %v57_v26, 7  ;;  %v7289_v52 = vsel %vm479_vm3, %v522_v11, %v523_v12  ;;  %v7292_v55 = vsel %vm479_vm3, %v523_v12, %v525_v19  ;;  %v59_v11 = vld [vmem:[%s13644_s0 + $0xc0] sm:$0xff]  ;;  %v60_v26 = vld [vmem:[%s13644_s0 + $0xc8] sm:$0xff] }
  0x1c   :  { %14015 = vst [vmem:[#allocation26_spill] sm:$0xff] %v7289_v52  ;;  %14016 = vst [vmem:[#allocation27_spill] sm:$0xff] %v7292_v55  ;;  %v7295_v58 = vsel %vm163_vm2, 0.0, %v194_v23  ;;  %v198_v62 = vrot.slane %v58_v38, 7  ;;  %v527_v7 = vrot.slane %v7279_v41, 1  ;;  %v528_v8 = vrot.slane %v7276_v40, 1 }
  0x1d   :  { %831 = vrot.lane.b32.xlu1 %v7201_v33, %s6935_s25  ;;  %833 = vrot.lane.b32.xlu0 %v7208_v35, %s6935_s25  ;;  %v530_v9 = vrot.slane %v7282_v45, 1  ;;  %v7301_v10 = vsel %vm163_vm2, %v194_v23, %v195_v36  ;;  %v7307_v12 = vsel %vm163_vm2, %v195_v36, 0.0  ;;  %v532_v19 = vrot.slane %v7295_v58, 1 }
  0x1e   :  { %14017 = vst [vmem:[#allocation28_spill] sm:$0xff] %v7301_v10  ;;  %v533_v23 = vrot.slane %v7301_v10, 1  ;;  %v7319_v38 = vsel %vm163_vm2, %v197_v50, %v198_v62  ;;  %v7322_v36 = vsel %vm163_vm2, 0.0, %v197_v50  ;;  %v200_v0 = vrot.slane %v59_v11, 7  ;;  %v62_v50 = vld [vmem:[%s13644_s0 + $0xd8] sm:$0xff] }
  0x1f   :  { %14018 = vst [vmem:[#allocation29_spill] sm:$0xff] %v7319_v38  ;;  %v7325_v1 = vsel %vm479_vm3, %v527_v7, %v528_v8  ;;  %v201_v11 = vrot.slane %v60_v26, 7  ;;  %v537_v7 = vrot.slane %v7322_v36, 1  ;;  %vm632_vm4 = vcmask 1045504  }
  0x20   :  { %14019 = vst [vmem:[#allocation30_spill] sm:$0xff] %v7325_v1  ;;  %v7351_v35 = vsel %vm479_vm3, %v532_v19, %v533_v23  ;;  %vm3012_vm5 = vcmask 1043456   ;;  %vm2300_vm6 = vcmask 31744   ;;  %vm2424_vm7 = vcmask 97280  }
  0x21   :  { %835 = vrot.lane.b32.xlu1 %v7233_v53, %s6935_s25  ;;  %837 = vrot.lane.b32.xlu0 %v7241_v60, %s6935_s25  ;;  %v538_v60 = vrot.slane %v7319_v38, 1  ;;  %v204_v53 = vrot.slane %v62_v50, 7  ;;  %14021 = vst [vmem:[#allocation32_spill] sm:$0xff] %v7351_v35  ;;  %v7357_v33 = vsel %vm163_vm2, %v200_v0, %v201_v11  ;;  %vm2489_vm8 = vcmask 130048  }
  0x22   :  { %14023 = vst [vmem:[#allocation34_spill] sm:$0xff] %v7357_v33  ;;  %v543_v50 = vrot.slane %v7357_v33, 1  ;;  %vm2554_vm9 = vcmask 162816   ;;  %vm2619_vm10 = vcmask 195584   ;;  %vm2684_vm11 = vcmask 228352  }
  0x23   :  { %vm2749_vm12 = vcmask 261120   ;;  %vm2819_vm13 = vcmask 293888   ;;  %vm5556_vm14 = vcmask 326656   ;;  %vm5573_vm15 = vcmask 392192  }
  0x25   :  { %839 = vrot.lane.b32.xlu1 %v7267_v27, %s6935_s25  ;;  %841 = vrot.lane.b32.xlu0 %v7270_v32, %s6935_s25  ;;  %v7328_v32 = vsel %vm479_vm3, %v528_v8, %v530_v9  ;;  %v7332_v27 = vsel %vm163_vm2, %v198_v62, 0.0  ;;  %v7348_v8 = vsel %vm163_vm2, 0.0, %v200_v0  ;;  %v7374_v0 = vsel %vm479_vm3, %v537_v7, %v538_v60  ;;  %v67_v7 = vld [vmem:[%s13644_s0 + $0x100] sm:$0xff] }
  0x26   :  { %14020 = vst [vmem:[#allocation31_spill] sm:$0xff] %v7328_v32  ;;  %v540_v62 = vrot.slane %v7332_v27, 1  ;;  %v542_v18 = vrot.slane %v7348_v8, 1  ;;  %14024 = vst [vmem:[#allocation35_spill] sm:$0xff] %v7374_v0 }
  0x28   :  { %v7404_v5 = vsel %vm479_vm3, %v542_v18, %v543_v50  ;;  %v70_v18 = vld [vmem:[%s13644_s0 + $0x118] sm:$0xff] }
  0x29   :  { %843 = vrot.lane.b32.xlu1 %v7289_v52, %s6935_s25  ;;  %845 = vrot.lane.b32.xlu0 %v7292_v55, %s6935_s25  ;;  %v535_v52 = vrot.slane %v7307_v12, 1  ;;  %v61_v55 = vld [vmem:[%s13644_s0 + $0xd0] sm:$0xff]  ;;  %14028 = vst [vmem:[#allocation39_spill] sm:$0xff] %v7404_v5 }
  0x2a   :  { %v203_v9 = vrot.slane %v61_v55, 7  ;;  %v64_v55 = vld [vmem:[%s13644_s0 + $0xe8] sm:$0xff] }
  0x2b   :  { %v7354_v26 = vsel %vm479_vm3, %v533_v23, %v535_v52  ;;  %v7377_v52 = vsel %vm479_vm3, %v538_v60, %v540_v62  ;;  %v207_v60 = vrot.slane %v64_v55, 7  ;;  %v68_v62 = vld [vmem:[%s13644_s0 + $0x108] sm:$0xff] }
  0x2c   :  { %14022 = vst [vmem:[#allocation33_spill] sm:$0xff] %v7354_v26  ;;  %14025 = vst [vmem:[#allocation36_spill] sm:$0xff] %v7377_v52  ;;  %v7380_v19 = vsel %vm163_vm2, %v203_v9, %v204_v53  ;;  %v7383_v23 = vsel %vm163_vm2, 0.0, %v203_v9  ;;  %v213_v51 = vrot.slane %v68_v62, 7 }
  0x2d   :  { %847 = vrot.lane.b32.xlu1 %v7325_v1, %s6935_s25  ;;  %849 = vrot.lane.b32.xlu0 %v7328_v32, %s6935_s25  ;;  %v7360_v1 = vsel %vm163_vm2, %v201_v11, 0.0  ;;  %v63_v32 = vld [vmem:[%s13644_s0 + $0xe0] sm:$0xff]  ;;  %14026 = vst [vmem:[#allocation37_spill] sm:$0xff] %v7380_v19  ;;  %14027 = vst [vmem:[#allocation38_spill] sm:$0xff] %v7383_v23  ;;  %v547_v9 = vrot.slane %v7383_v23, 1  ;;  %v548_v13 = vrot.slane %v7380_v19, 1 }
  0x2e   :  { %v545_v11 = vrot.slane %v7360_v1, 1  ;;  %v7444_v34 = vsel %vm163_vm2, %v213_v51, 0.0 }
  0x2f   :  { %14037 = vst [vmem:[#allocation48_spill] sm:$0xff] %v7444_v34  ;;  %v560_v28 = vrot.slane %v7444_v34, 1  ;;  %v222_v34 = vrot.slane %v74_v29, 7 }
  0x30   :  { %v7407_v55 = vsel %vm479_vm3, %v543_v50, %v545_v11  ;;  %v7425_v50 = vsel %vm479_vm3, %v547_v9, %v548_v13 }
  0x31   :  { %851 = vrot.lane.b32.xlu1 %v7351_v35, %s6935_s25  ;;  %853 = vrot.lane.b32.xlu0 %v7354_v26, %s6935_s25  ;;  %v7388_v35 = vsel %vm163_vm2, %v204_v53, 0.0  ;;  %v206_v26 = vrot.slane %v63_v32, 7  ;;  %v212_v32 = vrot.slane %v67_v7, 7  ;;  %14029 = vst [vmem:[#allocation40_spill] sm:$0xff] %v7407_v55  ;;  %14033 = vst [vmem:[#allocation44_spill] sm:$0xff] %v7425_v50 }
  0x32   :  { %v550_v53 = vrot.slane %v7388_v35, 1 }
  0x33   :  { %v7410_v61 = vsel %vm163_vm2, 0.0, %v206_v26  ;;  %v7416_v43 = vsel %vm163_vm2, %v206_v26, %v207_v60  ;;  %v7436_v7 = vsel %vm163_vm2, 0.0, %v212_v32  ;;  %v7441_v39 = vsel %vm163_vm2, %v212_v32, %v213_v51 }
  0x34   :  { %14030 = vst [vmem:[#allocation41_spill] sm:$0xff] %v7410_v61  ;;  %14031 = vst [vmem:[#allocation42_spill] sm:$0xff] %v7416_v43  ;;  %v7432_v11 = vsel %vm479_vm3, %v548_v13, %v550_v53  ;;  %v552_v26 = vrot.slane %v7410_v61, 1  ;;  %v553_v62 = vrot.slane %v7416_v43, 1  ;;  %v71_v13 = vld [vmem:[%s13644_s0 + $0x120] sm:$0xff]  ;;  %v72_v53 = vld [vmem:[%s13644_s0 + $0x128] sm:$0xff] }
  0x35   :  { %855 = vrot.lane.b32.xlu1 %v7374_v0, %s6935_s25  ;;  %857 = vrot.lane.b32.xlu0 %v7377_v52, %s6935_s25  ;;  %v69_v0 = vld [vmem:[%s13644_s0 + $0x110] sm:$0xff]  ;;  %v7419_v52 = vsel %vm163_vm2, %v207_v60, 0.0  ;;  %14034 = vst [vmem:[#allocation45_spill] sm:$0xff] %v7432_v11  ;;  %14035 = vst [vmem:[#allocation46_spill] sm:$0xff] %v7436_v7  ;;  %v558_v32 = vrot.slane %v7441_v39, 1 }
  0x36   :  { %14032 = vst [vmem:[#allocation43_spill] sm:$0xff] %v7419_v52  ;;  %v215_v60 = vrot.slane %v69_v0, 7  ;;  %v555_v9 = vrot.slane %v7419_v52, 1  ;;  %14036 = vst [vmem:[#allocation47_spill] sm:$0xff] %v7441_v39  ;;  %v557_v0 = vrot.slane %v7436_v7, 1  ;;  %v219_v7 = vrot.slane %v72_v53, 7 }
  0x37   :  { %v75_v53 = vld [vmem:[%s13644_s0 + $0x140] sm:$0xff] }
  0x38   :  { %v7459_v51 = vsel %vm163_vm2, 0.0, %v215_v60  ;;  %v7487_v52 = vsel %vm479_vm3, %v557_v0, %v558_v32  ;;  %v7503_v29 = vsel %vm163_vm2, %v219_v7, 0.0 }
  0x39   :  { %859 = vrot.lane.b32.xlu1 %v7404_v5, %s6935_s25  ;;  %861 = vrot.lane.b32.xlu0 %v7407_v55, %s6935_s25  ;;  %v216_v5 = vrot.slane %v70_v18, 7  ;;  %14038 = vst [vmem:[#allocation49_spill] sm:$0xff] %v7459_v51  ;;  %v7462_v18 = vsel %vm479_vm3, %v552_v26, %v553_v62  ;;  %v7465_v55 = vsel %vm479_vm3, %v553_v62, %v555_v9  ;;  %v218_v26 = vrot.slane %v71_v13, 7 }
  0x3a   :  { %14039 = vst [vmem:[#allocation50_spill] sm:$0xff] %v7462_v18  ;;  %14040 = vst [vmem:[#allocation51_spill] sm:$0xff] %v7465_v55 }
  0x3b   :  { %v7478_v39 = vsel %vm163_vm2, %v216_v5, 0.0  ;;  %14043 = vst [vmem:[#allocation54_spill] sm:$0xff] %v7487_v52  ;;  %14047 = vst [vmem:[#allocation58_spill] sm:$0xff] %v7503_v29 }
  0x3c   :  { %14042 = vst [vmem:[#allocation53_spill] sm:$0xff] %v7478_v39  ;;  %v565_v13 = vrot.slane %v7478_v39, 1 }
  0x3d   :  { %863 = vrot.lane.b32.xlu1 %v7425_v50, %s6935_s25  ;;  %865 = vrot.lane.b32.xlu0 %v7432_v11, %s6935_s25  ;;  %v7469_v50 = vsel %vm163_vm2, %v215_v60, %v216_v5  ;;  %v73_v11 = vld [vmem:[%s13644_s0 + $0x130] sm:$0xff]  ;;  %v562_v60 = vrot.slane %v7459_v51, 1  ;;  %v7490_v5 = vsel %vm479_vm3, %v558_v32, %v560_v28  ;;  %v76_v28 = vld [vmem:[%s13644_s0 + $0x148] sm:$0xff] }
  0x3e   :  { %14041 = vst [vmem:[#allocation52_spill] sm:$0xff] %v7469_v50  ;;  %v563_v62 = vrot.slane %v7469_v50, 1  ;;  %v221_v9 = vrot.slane %v73_v11, 7  ;;  %14044 = vst [vmem:[#allocation55_spill] sm:$0xff] %v7490_v5  ;;  %v570_v50 = vrot.slane %v7503_v29, 1 }
  0x40   :  { %v7513_v11 = vsel %vm479_vm3, %v562_v60, %v563_v62  ;;  %v7516_v0 = vsel %vm163_vm2, %v221_v9, %v222_v34  ;;  %v7519_v32 = vsel %vm163_vm2, 0.0, %v221_v9  ;;  %v77_v60 = vld [vmem:[%s13644_s0 + $0x150] sm:$0xff]  ;;  %v7534_v9 = vsel %vm163_vm2, %v222_v34, 0.0 }
  0x41   :  { %867 = vrot.lane.b32.xlu1 %v7462_v18, %s6935_s25  ;;  %869 = vrot.lane.b32.xlu0 %v7465_v55, %s6935_s25  ;;  %v7497_v55 = vsel %vm163_vm2, %v218_v26, %v219_v7  ;;  %v7500_v18 = vsel %vm163_vm2, 0.0, %v218_v26  ;;  %14048 = vst [vmem:[#allocation59_spill] sm:$0xff] %v7513_v11  ;;  %14049 = vst [vmem:[#allocation60_spill] sm:$0xff] %v7516_v0  ;;  %v224_v7 = vrot.slane %v75_v53, 7  ;;  %v225_v53 = vrot.slane %v76_v28, 7 }
  0x42   :  { %14045 = vst [vmem:[#allocation56_spill] sm:$0xff] %v7497_v55  ;;  %14046 = vst [vmem:[#allocation57_spill] sm:$0xff] %v7500_v18  ;;  %v7522_v26 = vsel %vm479_vm3, %v563_v62, %v565_v13  ;;  %v567_v39 = vrot.slane %v7500_v18, 1  ;;  %v572_v62 = vrot.slane %v7519_v32, 1  ;;  %v573_v13 = vrot.slane %v7516_v0, 1 }
  0x43   :  { %14050 = vst [vmem:[#allocation61_spill] sm:$0xff] %v7519_v32  ;;  %14051 = vst [vmem:[#allocation62_spill] sm:$0xff] %v7522_v26  ;;  %v227_v29 = vrot.slane %v77_v60, 7  ;;  %v575_v34 = vrot.slane %v7534_v9, 1  ;;  %v7550_v28 = vsel %vm163_vm2, 0.0, %v224_v7  ;;  %v7553_v0 = vsel %vm163_vm2, %v224_v7, %v225_v53 }
  0x44   :  { %14052 = vst [vmem:[#allocation63_spill] sm:$0xff] %v7534_v9  ;;  %14055 = vst [vmem:[#allocation66_spill] sm:$0xff] %v7550_v28 }
  0x45   :  { %871 = vrot.lane.b32.xlu1 %v7487_v52, %s6935_s25  ;;  %873 = vrot.lane.b32.xlu0 %v7490_v5, %s6935_s25  ;;  %v568_v52 = vrot.slane %v7497_v55, 1  ;;  %v78_v5 = vld [vmem:[%s13644_s0 + $0x158] sm:$0xff]  ;;  %14056 = vst [vmem:[#allocation67_spill] sm:$0xff] %v7553_v0  ;;  %v7576_v60 = vsel %vm163_vm2, 0.0, %v227_v29 }
  0x46   :  { %v228_v55 = vrot.slane %v78_v5, 7  ;;  %v79_v5 = vld [vmem:[%s13644_s0 + $0x160] sm:$0xff]  ;;  %14060 = vst [vmem:[#allocation71_spill] sm:$0xff] %v7576_v60 }
  0x47   :  { %v7543_v18 = vsel %vm479_vm3, %v567_v39, %v568_v52  ;;  %v7546_v51 = vsel %vm479_vm3, %v568_v52, %v570_v50  ;;  %v7562_v39 = vsel %vm479_vm3, %v572_v62, %v573_v13  ;;  %v80_v52 = vld [vmem:[%s13644_s0 + $0x168] sm:$0xff]  ;;  %v577_v50 = vrot.slane %v7550_v28, 1 }
  0x48   :  { %14053 = vst [vmem:[#allocation64_spill] sm:$0xff] %v7543_v18  ;;  %14054 = vst [vmem:[#allocation65_spill] sm:$0xff] %v7546_v51  ;;  %v7573_v7 = vsel %vm163_vm2, %v227_v29, %v228_v55  ;;  %v7582_v62 = vsel %vm479_vm3, %v573_v13, %v575_v34  ;;  %v230_v9 = vrot.slane %v79_v5, 7  ;;  %v231_v28 = vrot.slane %v80_v52, 7  ;;  %v82_v29 = vld [vmem:[%s13644_s0 + $0x178] sm:$0xff] }
  0x49   :  { %875 = vrot.lane.b32.xlu1 %v7513_v11, %s6935_s25  ;;  %877 = vrot.lane.b32.xlu0 %v7522_v26, %s6935_s25  ;;  %v7556_v11 = vsel %vm163_vm2, %v225_v53, 0.0  ;;  %14058 = vst [vmem:[#allocation69_spill] sm:$0xff] %v7562_v39  ;;  %14059 = vst [vmem:[#allocation70_spill] sm:$0xff] %v7573_v7  ;;  %v7579_v53 = vsel %vm163_vm2, %v228_v55, 0.0  ;;  %v578_v26 = vrot.slane %v7553_v0, 1  ;;  %v582_v55 = vrot.slane %v7576_v60, 1 }
  0x4a   :  { %14057 = vst [vmem:[#allocation68_spill] sm:$0xff] %v7556_v11  ;;  %14061 = vst [vmem:[#allocation72_spill] sm:$0xff] %v7579_v53  ;;  %v583_v32 = vrot.slane %v7573_v7, 1  ;;  %v585_v13 = vrot.slane %v7579_v53, 1  ;;  %v234_v60 = vrot.slane %v82_v29, 7  ;;  %v83_v53 = vld [vmem:[%s13644_s0 + $0x180] sm:$0xff] }
  0x4b   :  { %14062 = vst [vmem:[#allocation73_spill] sm:$0xff] %v7582_v62  ;;  %v7600_v5 = vsel %vm479_vm3, %v577_v50, %v578_v26  ;;  %v7618_v50 = vsel %vm163_vm2, %v231_v28, 0.0 }
  0x4c   :  { %14063 = vst [vmem:[#allocation74_spill] sm:$0xff] %v7600_v5  ;;  %14067 = vst [vmem:[#allocation78_spill] sm:$0xff] %v7618_v50 }
  0x4d   :  { %879 = vrot.lane.b32.xlu1 %v7543_v18, %s6935_s25  ;;  %881 = vrot.lane.b32.xlu0 %v7546_v51, %s6935_s25  ;;  %v580_v18 = vrot.slane %v7556_v11, 1  ;;  %v81_v51 = vld [vmem:[%s13644_s0 + $0x170] sm:$0xff]  ;;  %v7606_v11 = vsel %vm163_vm2, 0.0, %v230_v9 }
  0x4e   :  { %v233_v34 = vrot.slane %v81_v51, 7  ;;  %14065 = vst [vmem:[#allocation76_spill] sm:$0xff] %v7606_v11  ;;  %v7615_v51 = vsel %vm163_vm2, %v230_v9, %v231_v28  ;;  %v587_v29 = vrot.slane %v7606_v11, 1  ;;  %v86_v11 = vld [vmem:[%s13644_s0 + $0x198] sm:$0xff] }
  0x4f   :  { %v7603_v52 = vsel %vm479_vm3, %v578_v26, %v580_v18  ;;  %14066 = vst [vmem:[#allocation77_spill] sm:$0xff] %v7615_v51  ;;  %v7621_v18 = vsel %vm479_vm3, %v582_v55, %v583_v32  ;;  %v7624_v26 = vsel %vm479_vm3, %v583_v32, %v585_v13  ;;  %v85_v55 = vld [vmem:[%s13644_s0 + $0x190] sm:$0xff]  ;;  %v588_v32 = vrot.slane %v7615_v51, 1 }
  0x50   :  { %14064 = vst [vmem:[#allocation75_spill] sm:$0xff] %v7603_v52  ;;  %14068 = vst [vmem:[#allocation79_spill] sm:$0xff] %v7621_v18  ;;  %v7632_v9 = vsel %vm163_vm2, 0.0, %v233_v34  ;;  %v590_v13 = vrot.slane %v7618_v50, 1 }
  0x51   :  { %883 = vrot.lane.b32.xlu1 %v7562_v39, %s6935_s25  ;;  %885 = vrot.lane.b32.xlu0 %v7582_v62, %s6935_s25  ;;  %v84_v39 = vld [vmem:[%s13644_s0 + $0x188] sm:$0xff]  ;;  %14069 = vst [vmem:[#allocation80_spill] sm:$0xff] %v7624_v26  ;;  %14070 = vst [vmem:[#allocation81_spill] sm:$0xff] %v7632_v9  ;;  %v236_v62 = vrot.slane %v83_v53, 7  ;;  %v239_v53 = vrot.slane %v85_v55, 7  ;;  %v7662_v7 = vsel %vm479_vm3, %v587_v29, %v588_v32 }
  0x52   :  { %v237_v28 = vrot.slane %v84_v39, 7  ;;  %v592_v39 = vrot.slane %v7632_v9, 1  ;;  %14075 = vst [vmem:[#allocation86_spill] sm:$0xff] %v7662_v7  ;;  %v7665_v55 = vsel %vm479_vm3, %v588_v32, %v590_v13 }
  0x53   :  { %v7659_v51 = vsel %vm163_vm2, 0.0, %v236_v62  ;;  %14076 = vst [vmem:[#allocation87_spill] sm:$0xff] %v7665_v55  ;;  %v7690_v13 = vsel %vm163_vm2, 0.0, %v239_v53 }
  0x54   :  { %14074 = vst [vmem:[#allocation85_spill] sm:$0xff] %v7659_v51  ;;  %14080 = vst [vmem:[#allocation91_spill] sm:$0xff] %v7690_v13 }
  0x55   :  { %887 = vrot.lane.b32.xlu1 %v7600_v5, %s6935_s25  ;;  %889 = vrot.lane.b32.xlu0 %v7603_v52, %s6935_s25  ;;  %v7640_v5 = vsel %vm163_vm2, %v233_v34, %v234_v60  ;;  %v7643_v52 = vsel %vm163_vm2, %v234_v60, 0.0  ;;  %v7656_v60 = vsel %vm163_vm2, %v236_v62, %v237_v28  ;;  %v597_v62 = vrot.slane %v7659_v51, 1 }
  0x56   :  { %14071 = vst [vmem:[#allocation82_spill] sm:$0xff] %v7640_v5  ;;  %14072 = vst [vmem:[#allocation83_spill] sm:$0xff] %v7643_v52  ;;  %v593_v50 = vrot.slane %v7640_v5, 1  ;;  %v595_v34 = vrot.slane %v7643_v52, 1  ;;  %v87_v52 = vld [vmem:[%s13644_s0 + $0x1a0] sm:$0xff]  ;;  %v88_v5 = vld [vmem:[%s13644_s0 + $0x1a8] sm:$0xff] }
  0x57   :  { %14073 = vst [vmem:[#allocation84_spill] sm:$0xff] %v7656_v60  ;;  %v598_v29 = vrot.slane %v7656_v60, 1  ;;  %v243_v9 = vrot.slane %v88_v5, 7 }
  0x59   :  { %891 = vrot.lane.b32.xlu1 %v7621_v18, %s6935_s25  ;;  %893 = vrot.lane.b32.xlu0 %v7624_v26, %s6935_s25  ;;  %v7668_v18 = vsel %vm163_vm2, %v237_v28, 0.0  ;;  %v240_v26 = vrot.slane %v86_v11, 7  ;;  %v7683_v11 = vsel %vm479_vm3, %v592_v39, %v593_v50  ;;  %v7686_v28 = vsel %vm479_vm3, %v593_v50, %v595_v34  ;;  %v89_v39 = vld [vmem:[%s13644_s0 + $0x1b0] sm:$0xff]  ;;  %v90_v50 = vld [vmem:[%s13644_s0 + $0x1b8] sm:$0xff] }
  0x5a   :  { %14077 = vst [vmem:[#allocation88_spill] sm:$0xff] %v7668_v18  ;;  %14078 = vst [vmem:[#allocation89_spill] sm:$0xff] %v7683_v11  ;;  %v600_v32 = vrot.slane %v7668_v18, 1  ;;  %v602_v34 = vrot.slane %v7690_v13, 1  ;;  %v7727_v18 = vsel %vm163_vm2, %v243_v9, 0.0 }
  0x5b   :  { %14079 = vst [vmem:[#allocation90_spill] sm:$0xff] %v7686_v28  ;;  %v7693_v51 = vsel %vm163_vm2, %v239_v53, %v240_v26  ;;  %v7696_v60 = vsel %vm163_vm2, %v240_v26, 0.0  ;;  %v7710_v26 = vsel %vm479_vm3, %v597_v62, %v598_v29  ;;  %v246_v62 = vrot.slane %v90_v50, 7  ;;  %14087 = vst [vmem:[#allocation98_spill] sm:$0xff] %v7727_v18 }
  0x5c   :  { %14081 = vst [vmem:[#allocation92_spill] sm:$0xff] %v7693_v51  ;;  %14082 = vst [vmem:[#allocation93_spill] sm:$0xff] %v7696_v60  ;;  %v7713_v5 = vsel %vm479_vm3, %v598_v29, %v600_v32  ;;  %v605_v53 = vrot.slane %v7696_v60, 1  ;;  %v92_v29 = vld [vmem:[%s13644_s0 + $0x1c8] sm:$0xff]  ;;  %v610_v50 = vrot.slane %v7727_v18, 1 }
  0x5d   :  { %895 = vrot.lane.b32.xlu1 %v7662_v7, %s6935_s25  ;;  %897 = vrot.lane.b32.xlu0 %v7665_v55, %s6935_s25  ;;  %v242_v7 = vrot.slane %v87_v52, 7  ;;  %14083 = vst [vmem:[#allocation94_spill] sm:$0xff] %v7710_v26  ;;  %14084 = vst [vmem:[#allocation95_spill] sm:$0xff] %v7713_v5  ;;  %v603_v52 = vrot.slane %v7693_v51, 1  ;;  %v91_v55 = vld [vmem:[%s13644_s0 + $0x1c0] sm:$0xff] }
  0x5e   :  { %v248_v32 = vrot.slane %v91_v55, 7 }
  0x5f   :  { %v7721_v13 = vsel %vm163_vm2, %v242_v7, %v243_v9  ;;  %v7737_v60 = vsel %vm479_vm3, %v602_v34, %v603_v52  ;;  %v249_v34 = vrot.slane %v92_v29, 7 }
  0x60   :  { %14085 = vst [vmem:[#allocation96_spill] sm:$0xff] %v7721_v13  ;;  %14088 = vst [vmem:[#allocation99_spill] sm:$0xff] %v7737_v60 }
  0x61   :  { %899 = vrot.lane.b32.xlu1 %v7683_v11, %s6935_s25  ;;  %901 = vrot.lane.b32.xlu0 %v7686_v28, %s6935_s25  ;;  %v7724_v11 = vsel %vm163_vm2, 0.0, %v242_v7  ;;  %v245_v28 = vrot.slane %v89_v39, 7  ;;  %v7740_v7 = vsel %vm479_vm3, %v603_v52, %v605_v53  ;;  %v608_v39 = vrot.slane %v7721_v13, 1  ;;  %v93_v52 = vld [vmem:[%s13644_s0 + $0x1d0] sm:$0xff]  ;;  %v94_v53 = vld [vmem:[%s13644_s0 + $0x1d8] sm:$0xff] }
  0x62   :  { %14086 = vst [vmem:[#allocation97_spill] sm:$0xff] %v7724_v11  ;;  %14089 = vst [vmem:[#allocation100_spill] sm:$0xff] %v7740_v7  ;;  %v607_v9 = vrot.slane %v7724_v11, 1  ;;  %v7774_v11 = vsel %vm163_vm2, 0.0, %v248_v32  ;;  %v251_v51 = vrot.slane %v93_v52, 7  ;;  %v7777_v0 = vsel %vm163_vm2, %v248_v32, %v249_v34 }
  0x63   :  { %v7746_v55 = vsel %vm163_vm2, %v245_v28, %v246_v62  ;;  %v7771_v13 = vsel %vm479_vm3, %v608_v39, %v610_v50  ;;  %14095 = vst [vmem:[#allocation106_spill] sm:$0xff] %v7774_v11  ;;  %14096 = vst [vmem:[#allocation107_spill] sm:$0xff] %v7777_v0  ;;  %v618_v52 = vrot.slane %v7777_v0, 1 }
  0x64   :  { %14090 = vst [vmem:[#allocation101_spill] sm:$0xff] %v7746_v55  ;;  %v613_v29 = vrot.slane %v7746_v55, 1  ;;  %14094 = vst [vmem:[#allocation105_spill] sm:$0xff] %v7771_v13 }
  0x65   :  { %903 = vrot.lane.b32.xlu1 %v7710_v26, %s6935_s25  ;;  %905 = vrot.lane.b32.xlu0 %v7713_v5, %s6935_s25  ;;  %v7749_v26 = vsel %vm163_vm2, 0.0, %v245_v28  ;;  %v7752_v5 = vsel %vm163_vm2, %v246_v62, 0.0  ;;  %v7765_v28 = vsel %vm479_vm3, %v607_v9, %v608_v39  ;;  %v7780_v9 = vsel %vm163_vm2, %v249_v34, 0.0  ;;  %v96_v39 = vld [vmem:[%s13644_s0 + $0x1e8] sm:$0xff] }
  0x66   :  { %14091 = vst [vmem:[#allocation102_spill] sm:$0xff] %v7749_v26  ;;  %14092 = vst [vmem:[#allocation103_spill] sm:$0xff] %v7752_v5  ;;  %v612_v62 = vrot.slane %v7749_v26, 1  ;;  %v615_v18 = vrot.slane %v7752_v5, 1  ;;  %v617_v34 = vrot.slane %v7774_v11, 1  ;;  %v255_v55 = vrot.slane %v96_v39, 7 }
  0x67   :  { %14093 = vst [vmem:[#allocation104_spill] sm:$0xff] %v7765_v28  ;;  %14097 = vst [vmem:[#allocation108_spill] sm:$0xff] %v7780_v9 }
  0x68   :  { %v7793_v32 = vsel %vm479_vm3, %v612_v62, %v613_v29  ;;  %v7796_v50 = vsel %vm479_vm3, %v613_v29, %v615_v18 }
  0x69   :  { %907 = vrot.lane.b32.xlu1 %v7737_v60, %s6935_s25  ;;  %909 = vrot.lane.b32.xlu0 %v7740_v7, %s6935_s25  ;;  %v252_v60 = vrot.slane %v94_v53, 7  ;;  %v95_v7 = vld [vmem:[%s13644_s0 + $0x1e0] sm:$0xff]  ;;  %14098 = vst [vmem:[#allocation109_spill] sm:$0xff] %v7793_v32  ;;  %14099 = vst [vmem:[#allocation110_spill] sm:$0xff] %v7796_v50  ;;  %v620_v53 = vrot.slane %v7780_v9, 1  ;;  %v7817_v9 = vsel %vm479_vm3, %v617_v34, %v618_v52 }
  0x6a   :  { %v254_v62 = vrot.slane %v95_v7, 7  ;;  %14103 = vst [vmem:[#allocation114_spill] sm:$0xff] %v7817_v9 }
  0x6b   :  { %v7802_v5 = vsel %vm163_vm2, %v251_v51, %v252_v60 }
  0x6c   :  { %14100 = vst [vmem:[#allocation111_spill] sm:$0xff] %v7802_v5  ;;  %v623_v29 = vrot.slane %v7802_v5, 1  ;;  %v7824_v7 = vsel %vm163_vm2, %v254_v62, %v255_v55  ;;  %v7827_v39 = vsel %vm163_vm2, 0.0, %v254_v62 }
  0x6d   :  { %911 = vrot.lane.b32.xlu1 %v7765_v28, %s6935_s25  ;;  %913 = vrot.lane.b32.xlu0 %v7771_v13, %s6935_s25  ;;  %v7805_v28 = vsel %vm163_vm2, 0.0, %v251_v51  ;;  %v7808_v13 = vsel %vm163_vm2, %v252_v60, 0.0  ;;  %v7820_v51 = vsel %vm479_vm3, %v618_v52, %v620_v53  ;;  %14105 = vst [vmem:[#allocation116_spill] sm:$0xff] %v7824_v7  ;;  %14106 = vst [vmem:[#allocation117_spill] sm:$0xff] %v7827_v39  ;;  %v627_v62 = vrot.slane %v7827_v39, 1 }
  0x6e   :  { %14101 = vst [vmem:[#allocation112_spill] sm:$0xff] %v7805_v28  ;;  %14102 = vst [vmem:[#allocation113_spill] sm:$0xff] %v7808_v13  ;;  %v622_v18 = vrot.slane %v7805_v28, 1  ;;  %v625_v60 = vrot.slane %v7808_v13, 1  ;;  %v628_v13 = vrot.slane %v7824_v7, 1 }
  0x6f   :  { %14104 = vst [vmem:[#allocation115_spill] sm:$0xff] %v7820_v51 }
  0x70   :  { %v7837_v34 = vsel %vm479_vm3, %v622_v18, %v623_v29  ;;  %v7842_v53 = vsel %vm479_vm3, %v623_v29, %v625_v60  ;;  %v7852_v18 = vsel %vm479_vm3, %v627_v62, %v628_v13  ;;  %v635_v29 = vrot.slane %v7044_v16, 2 }
  0x71   :  { %915 = vrot.lane.b32.xlu1 %v7793_v32, %s6935_s25  ;;  %917 = vrot.lane.b32.xlu0 %v7796_v50, %s6935_s25  ;;  %v7830_v50 = vsel %vm163_vm2, %v255_v55, 0.0  ;;  %14108 = vst [vmem:[#allocation119_spill] sm:$0xff] %v7837_v34  ;;  %14109 = vst [vmem:[#allocation120_spill] sm:$0xff] %v7842_v53  ;;  %v636_v60 = vrot.slane %v7038_v14, 2  ;;  %v14114_v62 = vmov 0.0  }
  0x72   :  { %14107 = vst [vmem:[#allocation118_spill] sm:$0xff] %v7830_v50  ;;  %v630_v55 = vrot.slane %v7830_v50, 1  ;;  %14110 = vst [vmem:[#allocation121_spill] sm:$0xff] %v7852_v18  ;;  %v7868_v50 = vrot.slane %v14114_v62, 2 }
  0x74   :  { %v7855_v5 = vsel %vm479_vm3, %v628_v13, %v630_v55  ;;  %14115 = vst [vmem:[#allocation125_spill] sm:$0xff] %v7868_v50  ;;  %v7871_v13 = vsel %vm632_vm4, %v635_v29, %v636_v60  ;;  %v638_v55 = vrot.slane %v7041_v15, 2  ;;  %v643_v29 = vrot.slane %v7058_v24, 2 }
  0x75   :  { %919 = vrot.lane.b32.xlu1 %v7817_v9, %s6935_s25  ;;  %921 = vrot.lane.b32.xlu0 %v7820_v51, %s6935_s25  ;;  %v7839_v52 = vpop.permute.xlu0 %809  ;;  %14111 = vst [vmem:[#allocation122_spill] sm:$0xff] %v7855_v5  ;;  %v646_v9 = vrot.slane %v7061_v25, 2  ;;  %v648_v24 = vrot.slane %v7095_v37, 2  ;;  %v653_v37 = vrot.slane %v7117_v49, 2 }
  0x79   :  { %923 = vrot.lane.b32.xlu1 %v7837_v34, %s6935_s25  ;;  %925 = vrot.lane.b32.xlu0 %v7842_v53, %s6935_s25  ;;  %v640_v53 = vrot.slane %v7047_v17, 2  ;;  %v641_v34 = vrot.slane %v7053_v21, 2 }
  0x7b   :  { %v7859_v39 = vpop.permute.xlu1 %813  ;;  %v7861_v7 = vpop.permute.xlu0 %811  ;;  %v7889_v15 = vsel %vm632_vm4, %v640_v53, %v641_v34 }
  0x7c   :  { %14112 = vst [vmem:[#allocation123_spill] sm:$0xff] %v7859_v39  ;;  %14113 = vst [vmem:[#allocation124_spill] sm:$0xff] %v7861_v7 }
  0x7d   :  { %927 = vrot.lane.b32.xlu1 %v7852_v18, %s6935_s25  ;;  %929 = vrot.lane.b32.xlu0 %v7855_v5, %s6935_s25  ;;  %v7886_v5 = vsel %vm632_vm4, %v636_v60, %v638_v55  ;;  %v645_v18 = vrot.slane %v7077_v31, 2  ;;  %v7903_v60 = vsel %vm632_vm4, %v641_v34, %v643_v29  ;;  %v650_v55 = vrot.slane %v7114_v48, 2  ;;  %s6937_s25 = smov 12  }
  0x7e   :  { %v7920_v34 = vsel %vm632_vm4, %v646_v9, %v648_v24  ;;  %v655_v29 = vrot.slane %v7133_v56, 2  ;;  %v658_v24 = vrot.slane %v7136_v57, 2 }
  0x7f   :  { %v7876_v28 = vpop.permute.xlu1 %815  ;;  %v7878_v51 = vpop.permute.xlu0 %817  ;;  %v7906_v53 = vsel %vm632_vm4, %v645_v18, %v646_v9 }
  0x80   :  { %14116 = vst [vmem:[#allocation126_spill] sm:$0xff] %v7876_v28  ;;  %14117 = vst [vmem:[#allocation127_spill] sm:$0xff] %v7878_v51 }
  0x81   :  { %992 = vrot.lane.b32.xlu1 %v7868_v50, %s6936_s19  ;;  %994 = vrot.lane.b32.xlu0 %v7871_v13, %s6936_s19  ;;  %v651_v50 = vrot.slane %v7111_v47, 2 }
  0x83   :  { %v7893_v32 = vpop.permute.xlu1 %819  ;;  %v7895_v62 = vpop.permute.xlu0 %821  ;;  %v7923_v18 = vsel %vm632_vm4, %v650_v55, %v651_v50  ;;  %v7936_v49 = vsel %vm632_vm4, %v651_v50, %v653_v37  ;;  %v660_v55 = vrot.slane %v7158_v4, 2  ;;  %v663_v50 = vrot.slane %v7164_v6, 2 }
  0x84   :  { %14118 = vst [vmem:[#allocation128_spill] sm:$0xff] %v7893_v32  ;;  %14119 = vst [vmem:[#allocation129_spill] sm:$0xff] %v7895_v62  ;;  %v668_v6 = vrot.slane %v7195_v30, 2  ;;  %v673_v30 = vrot.slane %v7220_v46, 2 }
  0x85   :  { %996 = vrot.lane.b32.xlu1 %v7886_v5, %s6936_s19  ;;  %998 = vrot.lane.b32.xlu0 %v7889_v15, %s6936_s19 }
  0x87   :  { %v7910_v32 = vpop.permute.xlu1 %823  ;;  %v7912_v62 = vpop.permute.xlu0 %825 }
  0x88   :  { %14120 = vst [vmem:[#allocation130_spill] sm:$0xff] %v7910_v32  ;;  %14121 = vst [vmem:[#allocation131_spill] sm:$0xff] %v7912_v62  ;;  %v656_v32 = vrot.slane %v7129_v54, 2 }
  0x89   :  { %1000 = vrot.lane.b32.xlu1 %v7903_v60, %s6936_s19  ;;  %1002 = vrot.lane.b32.xlu0 %v7906_v53, %s6936_s19 }
  0x8a   :  { %v7939_v9 = vsel %vm632_vm4, %v655_v29, %v656_v32  ;;  %v7954_v37 = vsel %vm632_vm4, %v656_v32, %v658_v24  ;;  %v665_v29 = vrot.slane %v7189_v22, 2 }
  0x8b   :  { %v7927_v51 = vpop.permute.xlu1 %827  ;;  %v7929_v62 = vpop.permute.xlu0 %829 }
  0x8c   :  { %14122 = vst [vmem:[#allocation132_spill] sm:$0xff] %v7927_v51  ;;  %14123 = vst [vmem:[#allocation133_spill] sm:$0xff] %v7929_v62  ;;  %v661_v51 = vrot.slane %v7155_v3, 2 }
  0x8d   :  { %1004 = vrot.lane.b32.xlu1 %v7920_v34, %s6936_s19  ;;  %1006 = vrot.lane.b32.xlu0 %v7923_v18, %s6936_s19 }
  0x8e   :  { %v7957_v57 = vsel %vm632_vm4, %v660_v55, %v661_v51  ;;  %v7971_v32 = vsel %vm632_vm4, %v661_v51, %v663_v50  ;;  %v670_v55 = vrot.slane %v7217_v44, 2 }
  0x8f   :  { %v7944_v28 = vpop.permute.xlu1 %831  ;;  %v7946_v62 = vpop.permute.xlu0 %833 }
  0x90   :  { %14124 = vst [vmem:[#allocation134_spill] sm:$0xff] %v7944_v28  ;;  %14125 = vst [vmem:[#allocation135_spill] sm:$0xff] %v7946_v62  ;;  %v666_v28 = vrot.slane %v7186_v20, 2 }
  0x91   :  { %1008 = vrot.lane.b32.xlu1 %v7936_v49, %s6936_s19  ;;  %1010 = vrot.lane.b32.xlu0 %v7939_v9, %s6936_s19 }
  0x92   :  { %v7974_v24 = vsel %vm632_vm4, %v665_v29, %v666_v28  ;;  %v7988_v51 = vsel %vm632_vm4, %v666_v28, %v668_v6  ;;  %v675_v29 = vrot.slane %v7238_v59, 2  ;;  %v678_v6 = vrot.slane %v7248_v2, 2 }
  0x93   :  { %v7961_v39 = vpop.permute.xlu1 %835  ;;  %v7963_v62 = vpop.permute.xlu0 %837 }
  0x94   :  { %14126 = vst [vmem:[#allocation136_spill] sm:$0xff] %v7961_v39  ;;  %14127 = vst [vmem:[#allocation137_spill] sm:$0xff] %v7963_v62  ;;  %v671_v39 = vrot.slane %v7214_v42, 2 }
  0x95   :  { %1012 = vrot.lane.b32.xlu1 %v7954_v37, %s6936_s19  ;;  %1014 = vrot.lane.b32.xlu0 %v7957_v57, %s6936_s19 }
  0x96   :  { %v7991_v50 = vsel %vm632_vm4, %v670_v55, %v671_v39  ;;  %v8004_v46 = vsel %vm632_vm4, %v671_v39, %v673_v30  ;;  %v680_v55 = vrot.slane %v7279_v41, 2  ;;  %v683_v39 = vrot.slane %v7282_v45, 2 }
  0x97   :  { %v7978_v7 = vpop.permute.xlu1 %839  ;;  %v7980_v62 = vpop.permute.xlu0 %841  ;;  %v688_v45 = vrot.slane %v7307_v12, 2 }
  0x98   :  { %14128 = vst [vmem:[#allocation138_spill] sm:$0xff] %v7978_v7  ;;  %14129 = vst [vmem:[#allocation139_spill] sm:$0xff] %v7980_v62  ;;  %v676_v7 = vrot.slane %v7245_v63, 2 }
  0x99   :  { %1016 = vrot.lane.b32.xlu1 %v7971_v32, %s6936_s19  ;;  %1018 = vrot.lane.b32.xlu0 %v7974_v24, %s6936_s19 }
  0x9a   :  { %v8007_v28 = vsel %vm632_vm4, %v675_v29, %v676_v7  ;;  %v8022_v30 = vsel %vm632_vm4, %v676_v7, %v678_v6  ;;  %v685_v29 = vrot.slane %v7295_v58, 2 }
  0x9b   :  { %v7995_v42 = vpop.permute.xlu1 %843  ;;  %v7997_v62 = vpop.permute.xlu0 %845 }
  0x9c   :  { %14130 = vst [vmem:[#allocation140_spill] sm:$0xff] %v7995_v42  ;;  %14131 = vst [vmem:[#allocation141_spill] sm:$0xff] %v7997_v62  ;;  %v681_v42 = vrot.slane %v7276_v40, 2 }
  0x9d   :  { %1020 = vrot.lane.b32.xlu1 %v7988_v51, %s6936_s19  ;;  %1022 = vrot.lane.b32.xlu0 %v7991_v50, %s6936_s19 }
  0x9e   :  { %v8025_v2 = vsel %vm632_vm4, %v680_v55, %v681_v42  ;;  %v8039_v7 = vsel %vm632_vm4, %v681_v42, %v683_v39  ;;  %v690_v55 = vrot.slane %v7322_v36, 2  ;;  %v693_v42 = vrot.slane %v7332_v27, 2 }
  0x9f   :  { %v8012_v63 = vpop.permute.xlu1 %847  ;;  %v8014_v62 = vpop.permute.xlu0 %849 }
  0xa0   :  { %14132 = vst [vmem:[#allocation142_spill] sm:$0xff] %v8012_v63  ;;  %14133 = vst [vmem:[#allocation143_spill] sm:$0xff] %v8014_v62  ;;  %v686_v63 = vrot.slane %v7301_v10, 2 }
  0xa1   :  { %1024 = vrot.lane.b32.xlu1 %v8004_v46, %s6936_s19  ;;  %1026 = vrot.lane.b32.xlu0 %v8007_v28, %s6936_s19 }
  0xa2   :  { %v8042_v6 = vsel %vm632_vm4, %v685_v29, %v686_v63  ;;  %v8056_v12 = vsel %vm632_vm4, %v686_v63, %v688_v45  ;;  %v695_v29 = vrot.slane %v7348_v8, 2  ;;  %v698_v45 = vrot.slane %v7360_v1, 2 }
  0xa3   :  { %v8029_v40 = vpop.permute.xlu1 %851  ;;  %v8031_v62 = vpop.permute.xlu0 %853 }
  0xa4   :  { %14134 = vst [vmem:[#allocation144_spill] sm:$0xff] %v8029_v40  ;;  %14135 = vst [vmem:[#allocation145_spill] sm:$0xff] %v8031_v62  ;;  %v691_v40 = vrot.slane %v7319_v38, 2 }
  0xa5   :  { %1028 = vrot.lane.b32.xlu1 %v8022_v30, %s6936_s19  ;;  %1030 = vrot.lane.b32.xlu0 %v8025_v2, %s6936_s19 }
  0xa6   :  { %v8059_v39 = vsel %vm632_vm4, %v690_v55, %v691_v40  ;;  %v8072_v63 = vsel %vm632_vm4, %v691_v40, %v693_v42  ;;  %v700_v55 = vrot.slane %v7383_v23, 2  ;;  %v703_v40 = vrot.slane %v7388_v35, 2  ;;  %v14147_v35 = vld [vmem:[#allocation43_spill] sm:$0xff] }
  0xa7   :  { %v8046_v10 = vpop.permute.xlu1 %855  ;;  %v8048_v62 = vpop.permute.xlu0 %857  ;;  %v14151_v23 = vld [vmem:[#allocation47_spill] sm:$0xff] }
  0xa8   :  { %14136 = vst [vmem:[#allocation146_spill] sm:$0xff] %v8046_v10  ;;  %14137 = vst [vmem:[#allocation147_spill] sm:$0xff] %v8048_v62  ;;  %v696_v10 = vrot.slane %v7357_v33, 2 }
  0xa9   :  { %1032 = vrot.lane.b32.xlu1 %v8039_v7, %s6936_s19  ;;  %1034 = vrot.lane.b32.xlu0 %v8042_v6, %s6936_s19 }
  0xaa   :  { %v8075_v27 = vsel %vm632_vm4, %v695_v29, %v696_v10  ;;  %v8090_v42 = vsel %vm632_vm4, %v696_v10, %v698_v45  ;;  %v705_v29 = vrot.slane %v7410_v61, 2  ;;  %v708_v10 = vrot.slane %v14147_v35, 2  ;;  %v14150_v61 = vld [vmem:[#allocation46_spill] sm:$0xff]  ;;  %v14154_v35 = vld [vmem:[#allocation48_spill] sm:$0xff] }
  0xab   :  { %v8063_v38 = vpop.permute.xlu1 %859  ;;  %v8065_v62 = vpop.permute.xlu0 %861  ;;  %14140 = vst [vmem:[#allocation150_spill] sm:$0xff] %v8075_v27  ;;  %14143 = vst [vmem:[#allocation153_spill] sm:$0xff] %v8090_v42 }
  0xac   :  { %14138 = vst [vmem:[#allocation148_spill] sm:$0xff] %v8063_v38  ;;  %14139 = vst [vmem:[#allocation149_spill] sm:$0xff] %v8065_v62  ;;  %v701_v38 = vrot.slane %v7380_v19, 2 }
  0xad   :  { %1036 = vrot.lane.b32.xlu1 %v8056_v12, %s6936_s19  ;;  %1038 = vrot.lane.b32.xlu0 %v8059_v39, %s6936_s19 }
  0xae   :  { %v8093_v1 = vsel %vm632_vm4, %v700_v55, %v701_v38  ;;  %v8107_v45 = vsel %vm632_vm4, %v701_v38, %v703_v40  ;;  %v713_v38 = vrot.slane %v14154_v35, 2 }
  0xaf   :  { %v8080_v33 = vpop.permute.xlu1 %863  ;;  %v8082_v62 = vpop.permute.xlu0 %865  ;;  %14144 = vst [vmem:[#allocation154_spill] sm:$0xff] %v8093_v1  ;;  %14148 = vst [vmem:[#allocation43_spill] sm:$0xff] %v8107_v45 }
  0xb0   :  { %14141 = vst [vmem:[#allocation151_spill] sm:$0xff] %v8080_v33  ;;  %14142 = vst [vmem:[#allocation152_spill] sm:$0xff] %v8082_v62  ;;  %v706_v33 = vrot.slane %v7416_v43, 2  ;;  %v710_v43 = vrot.slane %v14150_v61, 2  ;;  %v14157_v61 = vld [vmem:[#allocation49_spill] sm:$0xff] }
  0xb1   :  { %1040 = vrot.lane.b32.xlu1 %v8072_v63, %s6936_s19  ;;  %1042 = vrot.lane.b32.xlu0 %v8075_v27, %s6936_s19 }
  0xb2   :  { %v8110_v55 = vsel %vm632_vm4, %v705_v29, %v706_v33  ;;  %v8124_v40 = vsel %vm632_vm4, %v706_v33, %v708_v10  ;;  %v14163_v10 = vld [vmem:[#allocation53_spill] sm:$0xff] }
  0xb3   :  { %v8097_v19 = vpop.permute.xlu1 %867  ;;  %v8099_v62 = vpop.permute.xlu0 %869  ;;  %14149 = vst [vmem:[#allocation157_spill] sm:$0xff] %v8110_v55  ;;  %14155 = vst [vmem:[#allocation48_spill] sm:$0xff] %v8124_v40  ;;  %v718_v35 = vrot.slane %v14163_v10, 2 }
  0xb4   :  { %14145 = vst [vmem:[#allocation155_spill] sm:$0xff] %v8097_v19  ;;  %14146 = vst [vmem:[#allocation156_spill] sm:$0xff] %v8099_v62  ;;  %v711_v19 = vrot.slane %v14151_v23, 2  ;;  %v715_v23 = vrot.slane %v14157_v61, 2  ;;  %v14164_v61 = vld [vmem:[#allocation57_spill] sm:$0xff] }
  0xb5   :  { %1044 = vrot.lane.b32.xlu1 %v8090_v42, %s6936_s19  ;;  %1046 = vrot.lane.b32.xlu0 %v8093_v1, %s6936_s19  ;;  %v14158_v1 = vld [vmem:[#allocation52_spill] sm:$0xff] }
  0xb6   :  { %v8127_v29 = vsel %vm632_vm4, %v710_v43, %v711_v19  ;;  %v8140_v33 = vsel %vm632_vm4, %v711_v19, %v713_v38  ;;  %v14168_v19 = vld [vmem:[#allocation58_spill] sm:$0xff] }
  0xb7   :  { %v8114_v27 = vpop.permute.xlu1 %871  ;;  %v8116_v62 = vpop.permute.xlu0 %873  ;;  %14156 = vst [vmem:[#allocation160_spill] sm:$0xff] %v8127_v29  ;;  %14161 = vst [vmem:[#allocation163_spill] sm:$0xff] %v8140_v33  ;;  %v723_v38 = vrot.slane %v14168_v19, 2  ;;  %v14175_v19 = vld [vmem:[#allocation63_spill] sm:$0xff] }
  0xb8   :  { %14152 = vst [vmem:[#allocation158_spill] sm:$0xff] %v8114_v27  ;;  %14153 = vst [vmem:[#allocation159_spill] sm:$0xff] %v8116_v62  ;;  %v716_v27 = vrot.slane %v14158_v1, 2  ;;  %v720_v1 = vrot.slane %v14164_v61, 2  ;;  %v14171_v61 = vld [vmem:[#allocation61_spill] sm:$0xff] }
  0xb9   :  { %1048 = vrot.lane.b32.xlu1 %v8107_v45, %s6936_s19  ;;  %1050 = vrot.lane.b32.xlu0 %v8110_v55, %s6936_s19  ;;  %v14165_v55 = vld [vmem:[#allocation56_spill] sm:$0xff] }
  0xba   :  { %v8143_v43 = vsel %vm632_vm4, %v715_v23, %v716_v27  ;;  %v8158_v23 = vsel %vm632_vm4, %v716_v27, %v718_v35  ;;  %v728_v27 = vrot.slane %v14175_v19, 2  ;;  %v14182_v19 = vld [vmem:[#allocation68_spill] sm:$0xff] }
  0xbb   :  { %v8131_v42 = vpop.permute.xlu1 %875  ;;  %v8133_v62 = vpop.permute.xlu0 %877  ;;  %14162 = vst [vmem:[#allocation164_spill] sm:$0xff] %v8143_v43  ;;  %14169 = vst [vmem:[#allocation58_spill] sm:$0xff] %v8158_v23 }
  0xbc   :  { %14159 = vst [vmem:[#allocation161_spill] sm:$0xff] %v8131_v42  ;;  %14160 = vst [vmem:[#allocation162_spill] sm:$0xff] %v8133_v62  ;;  %v721_v42 = vrot.slane %v14165_v55, 2  ;;  %v725_v55 = vrot.slane %v14171_v61, 2  ;;  %v14178_v61 = vld [vmem:[#allocation66_spill] sm:$0xff] }
  0xbd   :  { %1052 = vrot.lane.b32.xlu1 %v8124_v40, %s6936_s19  ;;  %1054 = vrot.lane.b32.xlu0 %v8127_v29, %s6936_s19  ;;  %v14172_v29 = vld [vmem:[#allocation60_spill] sm:$0xff] }
  0xbe   :  { %v8161_v10 = vsel %vm632_vm4, %v720_v1, %v721_v42  ;;  %v8175_v35 = vsel %vm632_vm4, %v721_v42, %v723_v38  ;;  %v733_v42 = vrot.slane %v14182_v19, 2 }
  0xbf   :  { %v8148_v45 = vpop.permute.xlu1 %879  ;;  %v8150_v62 = vpop.permute.xlu0 %881  ;;  %14170 = vst [vmem:[#allocation166_spill] sm:$0xff] %v8161_v10  ;;  %14176 = vst [vmem:[#allocation63_spill] sm:$0xff] %v8175_v35 }
  0xc0   :  { %14166 = vst [vmem:[#allocation53_spill] sm:$0xff] %v8148_v45  ;;  %14167 = vst [vmem:[#allocation165_spill] sm:$0xff] %v8150_v62  ;;  %v726_v45 = vrot.slane %v14172_v29, 2  ;;  %v730_v29 = vrot.slane %v14178_v61, 2  ;;  %v14185_v61 = vld [vmem:[#allocation71_spill] sm:$0xff] }
  0xc1   :  { %1056 = vrot.lane.b32.xlu1 %v8140_v33, %s6936_s19  ;;  %1058 = vrot.lane.b32.xlu0 %v8143_v43, %s6936_s19  ;;  %v14179_v43 = vld [vmem:[#allocation67_spill] sm:$0xff] }
  0xc2   :  { %v8178_v1 = vsel %vm632_vm4, %v725_v55, %v726_v45  ;;  %v8192_v38 = vsel %vm632_vm4, %v726_v45, %v728_v27  ;;  %v14191_v27 = vld [vmem:[#allocation72_spill] sm:$0xff] }
  0xc3   :  { %v8165_v40 = vpop.permute.xlu1 %883  ;;  %v8167_v62 = vpop.permute.xlu0 %885  ;;  %14177 = vst [vmem:[#allocation169_spill] sm:$0xff] %v8178_v1  ;;  %14183 = vst [vmem:[#allocation68_spill] sm:$0xff] %v8192_v38  ;;  %v738_v19 = vrot.slane %v14191_v27, 2 }
  0xc4   :  { %14173 = vst [vmem:[#allocation167_spill] sm:$0xff] %v8165_v40  ;;  %14174 = vst [vmem:[#allocation168_spill] sm:$0xff] %v8167_v62  ;;  %v731_v40 = vrot.slane %v14179_v43, 2  ;;  %v735_v43 = vrot.slane %v14185_v61, 2  ;;  %v14192_v61 = vld [vmem:[#allocation76_spill] sm:$0xff] }
  0xc5   :  { %1060 = vrot.lane.b32.xlu1 %v8158_v23, %s6936_s19  ;;  %1062 = vrot.lane.b32.xlu0 %v8161_v10, %s6936_s19  ;;  %v14186_v10 = vld [vmem:[#allocation70_spill] sm:$0xff] }
  0xc6   :  { %v8195_v55 = vsel %vm632_vm4, %v730_v29, %v731_v40  ;;  %v8208_v45 = vsel %vm632_vm4, %v731_v40, %v733_v42  ;;  %v14196_v40 = vld [vmem:[#allocation78_spill] sm:$0xff] }
  0xc7   :  { %v8182_v33 = vpop.permute.xlu1 %887  ;;  %v8184_v62 = vpop.permute.xlu0 %889  ;;  %14184 = vst [vmem:[#allocation172_spill] sm:$0xff] %v8195_v55  ;;  %14189 = vst [vmem:[#allocation175_spill] sm:$0xff] %v8208_v45  ;;  %v743_v42 = vrot.slane %v14196_v40, 2  ;;  %v14203_v40 = vld [vmem:[#allocation83_spill] sm:$0xff] }
  0xc8   :  { %14180 = vst [vmem:[#allocation170_spill] sm:$0xff] %v8182_v33  ;;  %14181 = vst [vmem:[#allocation171_spill] sm:$0xff] %v8184_v62  ;;  %v736_v33 = vrot.slane %v14186_v10, 2  ;;  %v740_v10 = vrot.slane %v14192_v61, 2  ;;  %v14199_v61 = vld [vmem:[#allocation81_spill] sm:$0xff] }
  0xc9   :  { %1064 = vrot.lane.b32.xlu1 %v8175_v35, %s6936_s19  ;;  %1066 = vrot.lane.b32.xlu0 %v8178_v1, %s6936_s19  ;;  %v14193_v1 = vld [vmem:[#allocation77_spill] sm:$0xff] }
  0xca   :  { %v8211_v29 = vsel %vm632_vm4, %v735_v43, %v736_v33  ;;  %v8226_v43 = vsel %vm632_vm4, %v736_v33, %v738_v19  ;;  %v748_v33 = vrot.slane %v14203_v40, 2  ;;  %v14210_v40 = vld [vmem:[#allocation88_spill] sm:$0xff] }
  0xcb   :  { %v8199_v23 = vpop.permute.xlu1 %891  ;;  %v8201_v62 = vpop.permute.xlu0 %893  ;;  %14190 = vst [vmem:[#allocation176_spill] sm:$0xff] %v8211_v29  ;;  %14197 = vst [vmem:[#allocation78_spill] sm:$0xff] %v8226_v43 }
  0xcc   :  { %14187 = vst [vmem:[#allocation173_spill] sm:$0xff] %v8199_v23  ;;  %14188 = vst [vmem:[#allocation174_spill] sm:$0xff] %v8201_v62  ;;  %v741_v23 = vrot.slane %v14193_v1, 2  ;;  %v745_v1 = vrot.slane %v14199_v61, 2  ;;  %v14206_v61 = vld [vmem:[#allocation85_spill] sm:$0xff] }
  0xcd   :  { %1068 = vrot.lane.b32.xlu1 %v8192_v38, %s6936_s19  ;;  %1070 = vrot.lane.b32.xlu0 %v8195_v55, %s6936_s19  ;;  %v14200_v55 = vld [vmem:[#allocation82_spill] sm:$0xff] }
  0xce   :  { %v8229_v27 = vsel %vm632_vm4, %v740_v10, %v741_v23  ;;  %v8243_v19 = vsel %vm632_vm4, %v741_v23, %v743_v42  ;;  %v753_v23 = vrot.slane %v14210_v40, 2 }
  0xcf   :  { %v8216_v35 = vpop.permute.xlu1 %895  ;;  %v8218_v62 = vpop.permute.xlu0 %897  ;;  %14198 = vst [vmem:[#allocation178_spill] sm:$0xff] %v8229_v27  ;;  %14204 = vst [vmem:[#allocation83_spill] sm:$0xff] %v8243_v19 }
  0xd0   :  { %14194 = vst [vmem:[#allocation72_spill] sm:$0xff] %v8216_v35  ;;  %14195 = vst [vmem:[#allocation177_spill] sm:$0xff] %v8218_v62  ;;  %v746_v35 = vrot.slane %v14200_v55, 2  ;;  %v750_v55 = vrot.slane %v14206_v61, 2  ;;  %v14213_v61 = vld [vmem:[#allocation91_spill] sm:$0xff] }
  0xd1   :  { %1072 = vrot.lane.b32.xlu1 %v8208_v45, %s6936_s19  ;;  %1074 = vrot.lane.b32.xlu0 %v8211_v29, %s6936_s19  ;;  %v14207_v29 = vld [vmem:[#allocation84_spill] sm:$0xff] }
  0xd2   :  { %v8246_v10 = vsel %vm632_vm4, %v745_v1, %v746_v35  ;;  %v8260_v42 = vsel %vm632_vm4, %v746_v35, %v748_v33  ;;  %v14219_v33 = vld [vmem:[#allocation93_spill] sm:$0xff] }
  0xd3   :  { %v8233_v38 = vpop.permute.xlu1 %899  ;;  %v8235_v62 = vpop.permute.xlu0 %901  ;;  %14205 = vst [vmem:[#allocation181_spill] sm:$0xff] %v8246_v10  ;;  %14211 = vst [vmem:[#allocation88_spill] sm:$0xff] %v8260_v42  ;;  %v758_v40 = vrot.slane %v14219_v33, 2 }
  0xd4   :  { %14201 = vst [vmem:[#allocation179_spill] sm:$0xff] %v8233_v38  ;;  %14202 = vst [vmem:[#allocation180_spill] sm:$0xff] %v8235_v62  ;;  %v751_v38 = vrot.slane %v14207_v29, 2  ;;  %v755_v29 = vrot.slane %v14213_v61, 2  ;;  %v14220_v61 = vld [vmem:[#allocation97_spill] sm:$0xff] }
  0xd5   :  { %1076 = vrot.lane.b32.xlu1 %v8226_v43, %s6936_s19  ;;  %1078 = vrot.lane.b32.xlu0 %v8229_v27, %s6936_s19  ;;  %v14214_v27 = vld [vmem:[#allocation92_spill] sm:$0xff] }
  0xd6   :  { %v8263_v1 = vsel %vm632_vm4, %v750_v55, %v751_v38  ;;  %v8276_v35 = vsel %vm632_vm4, %v751_v38, %v753_v23  ;;  %v14224_v38 = vld [vmem:[#allocation98_spill] sm:$0xff] }
  0xd7   :  { %v8250_v45 = vpop.permute.xlu1 %903  ;;  %v8252_v62 = vpop.permute.xlu0 %905  ;;  %14212 = vst [vmem:[#allocation184_spill] sm:$0xff] %v8263_v1  ;;  %14217 = vst [vmem:[#allocation187_spill] sm:$0xff] %v8276_v35  ;;  %v763_v23 = vrot.slane %v14224_v38, 2  ;;  %v14230_v38 = vld [vmem:[#allocation103_spill] sm:$0xff] }
  0xd8   :  { %14208 = vst [vmem:[#allocation182_spill] sm:$0xff] %v8250_v45  ;;  %14209 = vst [vmem:[#allocation183_spill] sm:$0xff] %v8252_v62  ;;  %v756_v45 = vrot.slane %v14214_v27, 2  ;;  %v760_v27 = vrot.slane %v14220_v61, 2  ;;  %v14227_v61 = vld [vmem:[#allocation101_spill] sm:$0xff] }
  0xd9   :  { %1080 = vrot.lane.b32.xlu1 %v8243_v19, %s6936_s19  ;;  %1082 = vrot.lane.b32.xlu0 %v8246_v10, %s6936_s19  ;;  %v14221_v10 = vld [vmem:[#allocation96_spill] sm:$0xff] }
  0xda   :  { %v8279_v55 = vsel %vm632_vm4, %v755_v29, %v756_v45  ;;  %v8294_v29 = vsel %vm632_vm4, %v756_v45, %v758_v40  ;;  %v768_v45 = vrot.slane %v14230_v38, 2 }
  0xdb   :  { %v8267_v43 = vpop.permute.xlu1 %907  ;;  %v8269_v62 = vpop.permute.xlu0 %909  ;;  %14218 = vst [vmem:[#allocation188_spill] sm:$0xff] %v8279_v55  ;;  %14225 = vst [vmem:[#allocation98_spill] sm:$0xff] %v8294_v29 }
  0xdc   :  { %14215 = vst [vmem:[#allocation185_spill] sm:$0xff] %v8267_v43  ;;  %14216 = vst [vmem:[#allocation186_spill] sm:$0xff] %v8269_v62  ;;  %v761_v43 = vrot.slane %v14221_v10, 2  ;;  %v765_v10 = vrot.slane %v7749_v26, 2 }
  0xdd   :  { %1084 = vrot.lane.b32.xlu1 %v8260_v42, %s6936_s19  ;;  %1086 = vrot.lane.b32.xlu0 %v8263_v1, %s6936_s19 }
  0xde   :  { %v8297_v33 = vsel %vm632_vm4, %v760_v27, %v761_v43  ;;  %v8311_v40 = vsel %vm632_vm4, %v761_v43, %v763_v23 }
  0xdf   :  { %v8284_v19 = vpop.permute.xlu1 %911  ;;  %v8286_v62 = vpop.permute.xlu0 %913  ;;  %14226 = vst [vmem:[#allocation190_spill] sm:$0xff] %v8297_v33  ;;  %14231 = vst [vmem:[#allocation103_spill] sm:$0xff] %v8311_v40 }
  0xe0   :  { %14222 = vst [vmem:[#allocation93_spill] sm:$0xff] %v8284_v19  ;;  %14223 = vst [vmem:[#allocation189_spill] sm:$0xff] %v8286_v62  ;;  %v766_v19 = vrot.slane %v14227_v61, 2  ;;  %v770_v61 = vrot.slane %v7774_v11, 2 }
  0xe1   :  { %1088 = vrot.lane.b32.xlu1 %v8276_v35, %s6936_s19  ;;  %1090 = vrot.lane.b32.xlu0 %v8279_v55, %s6936_s19  ;;  %v14252_v35 = vld [vmem:[#allocation10_spill] sm:$0xff] }
  0xe2   :  { %v8314_v27 = vsel %vm632_vm4, %v765_v10, %v766_v19  ;;  %v8327_v43 = vsel %vm632_vm4, %v766_v19, %v768_v45  ;;  %v14241_v45 = vld [vmem:[#allocation7_spill] sm:$0xff] }
  0xe3   :  { %v8301_v1 = vpop.permute.xlu1 %915  ;;  %v8303_v62 = vpop.permute.xlu0 %917  ;;  %14232 = vst [vmem:[#allocation193_spill] sm:$0xff] %v8314_v27  ;;  %14235 = vst [vmem:[#allocation196_spill] sm:$0xff] %v8327_v43 }
  0xe4   :  { %14228 = vst [vmem:[#allocation191_spill] sm:$0xff] %v8301_v1  ;;  %14229 = vst [vmem:[#allocation192_spill] sm:$0xff] %v8303_v62  ;;  %v13909_v1 = vrot.slane %v7777_v0, 2  ;;  %v14243_v0 = vld [vmem:[#allocation8_spill] sm:$0xff] }
  0xe5   :  { %1092 = vrot.lane.b32.xlu1 %v8294_v29, %s6936_s19  ;;  %1094 = vrot.lane.b32.xlu0 %v8297_v33, %s6936_s19 }
  0xe6   :  { %v8332_v10 = vsel %vm632_vm4, %v770_v61, %v13909_v1  ;;  %v14242_v1 = vld [vmem:[#allocation6_spill] sm:$0xff] }
  0xe7   :  { %v8318_v26 = vpop.permute.xlu1 %919  ;;  %v8320_v62 = vpop.permute.xlu0 %921  ;;  %14236 = vst [vmem:[#allocation197_spill] sm:$0xff] %v8332_v10 }
  0xe8   :  { %14233 = vst [vmem:[#allocation194_spill] sm:$0xff] %v8318_v26  ;;  %14234 = vst [vmem:[#allocation195_spill] sm:$0xff] %v8320_v62 }
  0xe9   :  { %1096 = vrot.lane.b32.xlu1 %v8311_v40, %s6936_s19  ;;  %1098 = vrot.lane.b32.xlu0 %v8314_v27, %s6936_s19  ;;  %v14244_v40 = vld [vmem:[#allocation9_spill] sm:$0xff] }
  0xeb   :  { %v8334_v23 = vpop.permute.xlu1 %923  ;;  %v8336_v38 = vpop.permute.xlu0 %925 }
  0xec   :  { %14237 = vst [vmem:[#allocation198_spill] sm:$0xff] %v8334_v23  ;;  %14238 = vst [vmem:[#allocation199_spill] sm:$0xff] %v8336_v38  ;;  %v2818_v38 = vld [vmem:[%s13645_s1 + $0x20] sm:$0xf] }
  0xed   :  { %1100 = vrot.lane.b32.xlu1 %v8327_v43, %s6936_s19  ;;  %1102 = vrot.lane.b32.xlu0 %v8332_v10, %s6936_s19 }
  0xee   :  { %6731 = vmatprep.subr.msk.mxu0 %vm3012_vm5, %v2818_v38  ;;  %6905 = vmatprep.subr.msk.mxu1 %vm3012_vm5, %v2818_v38 }
  0xef   :  { %v8342_v62 = vpop.permute.xlu1 %927  ;;  %v8344_v26 = vpop.permute.xlu0 %929  ;;  %6732 = vmatpush3.msk.msra.mxu0 %vm3012_vm5, %v2818_v38  ;;  %6910 = vmatpush3.msk.msra.mxu1 %vm3012_vm5, %v2818_v38  ;;  %v2815_v38 = vld [vmem:[%s13645_s1 + $0x8] sm:$0xff] }
  0xf0   :  { %14239 = vst [vmem:[#allocation200_spill] sm:$0xff] %v8342_v62  ;;  %14240 = vst [vmem:[#allocation201_spill] sm:$0xff] %v8344_v26 }
  0xf1   :  { %1175 = vrot.lane.b32.xlu1 %v7044_v16, %s6937_s25  ;;  %1177 = vrot.lane.b32.xlu0 %v7038_v14, %s6937_s25 }
  0xf3   :  { %v8350_v61 = vpop.permute.xlu1 %992  ;;  %v8352_v19 = vpop.permute.xlu0 %994 }
  0xf5   :  { %1367 = vrot.lane.b32.xlu1 %v14241_v45, %s6938_s20  ;;  %1369 = vrot.lane.b32.xlu0 %v14242_v1, %s6938_s20 }
  0xf7   :  { %v8358_v62 = vpop.permute.xlu1 %996  ;;  %v8360_v26 = vpop.permute.xlu0 %998 }
  0xf9   :  { %1559 = vrot.lane.b32.xlu1 %v7871_v13, %s6939_s21  ;;  %1561 = vrot.lane.b32.xlu0 %v7886_v5, %s6939_s21  ;;  %v2817_v13 = vld [vmem:[%s13645_s1 + $0x18] sm:$0xff]  ;;  %v2816_v5 = vld [vmem:[%s13645_s1 + $0x10] sm:$0xff] }
  0xfa   :  { %6733 = vmatprep.subr.mxu0 %v2817_v13  ;;  %6906 = vmatprep.subr.mxu1 %v2817_v13 }
  0xfb   :  { %v8369_v45 = vpop.permute.xlu1 %1000  ;;  %v8371_v23 = vpop.permute.xlu0 %1002  ;;  %6734 = vmatpush3.msra.mxu0 %v2817_v13  ;;  %6911 = vmatpush3.msra.mxu1 %v2817_v13  ;;  %v2814_v13 = vld [vmem:[%s13645_s1] sm:$0xff]  ;;  %s6942_s1 = smov 32  }
  0xfc   :  { %6735 = vmatprep.subr.mxu0 %v2816_v5  ;;  %6907 = vmatprep.subr.mxu1 %v2816_v5 }
  0xfd   :  { %1751 = vrot.lane.b32.xlu1 %v7047_v17, %s6940_s27  ;;  %1179 = vrot.lane.b32.xlu0 %v7047_v17, %s6937_s25 }
  0xfe   :  { %6736 = vmatpush3.msra.mxu0 %v2816_v5  ;;  %6912 = vmatpush3.msra.mxu1 %v2816_v5 }
  0xff   :  { %v8387_v1 = vpop.permute.xlu1 %1004  ;;  %v8389_v10 = vpop.permute.xlu0 %1006  ;;  %6737 = vmatprep.subr.mxu0 %v2815_v38  ;;  %6908 = vmatprep.subr.mxu1 %v2815_v38 }
 0x100   :  { %6738 = vmatpush3.msra.mxu0 %v2815_v38  ;;  %6913 = vmatpush3.msra.mxu1 %v2815_v38 }
 0x101   :  { %1753 = vrot.lane.b32.xlu1 %v7053_v21, %s6940_s27  ;;  %1934 = vrot.lane.b32.xlu0 %v14243_v0, %s6941_s12 }
 0x102   :  { %6739 = vmatprep.subr.mxu0 %v2814_v13  ;;  %6909 = vmatprep.subr.mxu1 %v2814_v13 }
 0x103   :  { %v8398_v11 = vpop.permute.xlu1 %1008  ;;  %v8400_v43 = vpop.permute.xlu0 %1010  ;;  %6740 = vmatpush3.msra.mxu0 %v2814_v13  ;;  %6914 = vmatpush3.msra.mxu1 %v2814_v13 }
 0x105   :  { %1181 = vrot.lane.b32.xlu1 %v7053_v21, %s6937_s25  ;;  %1371 = vrot.lane.b32.xlu0 %v14243_v0, %s6938_s20 }
 0x107   :  { %v8409_v5 = vpop.permute.xlu1 %1012  ;;  %v8411_v27 = vpop.permute.xlu0 %1014 }
 0x109   :  { %1936 = vrot.lane.b32.xlu1 %v14244_v40, %s6941_s12  ;;  %2117 = vrot.lane.b32.xlu0 %v7889_v15, %s6942_s1 }
 0x10b   :  { %v8417_v38 = vpop.permute.xlu1 %1016  ;;  %v8419_v33 = vpop.permute.xlu0 %1018 }
 0x10c   :  { %14245 = vst [vmem:[#allocation7_spill] sm:$0xff] %v8419_v33 }
 0x10d   :  { %1373 = vrot.lane.b32.xlu1 %v14244_v40, %s6938_s20  ;;  %1563 = vrot.lane.b32.xlu0 %v7889_v15, %s6939_s21 }
 0x10f   :  { %v8425_v0 = vpop.permute.xlu1 %1020  ;;  %v8427_v13 = vpop.permute.xlu0 %1022 }
 0x110   :  { %14246 = vst [vmem:[#allocation6_spill] sm:$0xff] %v8425_v0  ;;  %14247 = vst [vmem:[#allocation8_spill] sm:$0xff] %v8427_v13  ;;  %v14296_v0 = vld [vmem:[#allocation20_spill] sm:$0xff] }
 0x111   :  { %2119 = vrot.lane.b32.xlu1 %v7903_v60, %s6942_s1  ;;  %1565 = vrot.lane.b32.xlu0 %v7903_v60, %s6939_s21 }
 0x113   :  { %v8433_v29 = vpop.permute.xlu1 %1024  ;;  %v8435_v55 = vpop.permute.xlu0 %1026 }
 0x114   :  { %14248 = vst [vmem:[#allocation9_spill] sm:$0xff] %v8433_v29  ;;  %14249 = vst [vmem:[#allocation202_spill] sm:$0xff] %v8435_v55 }
 0x115   :  { %1755 = vrot.lane.b32.xlu1 %v7077_v31, %s6940_s27  ;;  %1183 = vrot.lane.b32.xlu0 %v7077_v31, %s6937_s25 }
 0x117   :  { %v8441_v15 = vpop.permute.xlu1 %1028  ;;  %v8443_v40 = vpop.permute.xlu0 %1030 }
 0x118   :  { %14250 = vst [vmem:[#allocation203_spill] sm:$0xff] %v8441_v15  ;;  %14251 = vst [vmem:[#allocation204_spill] sm:$0xff] %v8443_v40  ;;  %v14257_v40 = vld [vmem:[#allocation11_spill] sm:$0xff] }
 0x119   :  { %1757 = vrot.lane.b32.xlu1 %v7061_v25, %s6940_s27  ;;  %1938 = vrot.lane.b32.xlu0 %v14252_v35, %s6941_s12 }
 0x11b   :  { %v8449_v60 = vpop.permute.xlu1 %1032  ;;  %v8451_v42 = vpop.permute.xlu0 %1034 }
 0x11c   :  { %14253 = vst [vmem:[#allocation10_spill] sm:$0xff] %v8449_v60  ;;  %14254 = vst [vmem:[#allocation205_spill] sm:$0xff] %v8451_v42 }
 0x11d   :  { %1185 = vrot.lane.b32.xlu1 %v7061_v25, %s6937_s25  ;;  %1375 = vrot.lane.b32.xlu0 %v14252_v35, %s6938_s20 }
 0x11f   :  { %v8457_v55 = vpop.permute.xlu1 %1036  ;;  %v8459_v15 = vpop.permute.xlu0 %1038 }
 0x120   :  { %14255 = vst [vmem:[#allocation206_spill] sm:$0xff] %v8457_v55  ;;  %14256 = vst [vmem:[#allocation207_spill] sm:$0xff] %v8459_v15 }
 0x121   :  { %1940 = vrot.lane.b32.xlu1 %v14257_v40, %s6941_s12  ;;  %2121 = vrot.lane.b32.xlu0 %v7906_v53, %s6942_s1 }
 0x123   :  { %v8465_v29 = vpop.permute.xlu1 %1040  ;;  %v8467_v60 = vpop.permute.xlu0 %1042 }
 0x124   :  { %14258 = vst [vmem:[#allocation11_spill] sm:$0xff] %v8465_v29  ;;  %14259 = vst [vmem:[#allocation208_spill] sm:$0xff] %v8467_v60  ;;  %v2301_v60 = vsel %vm2300_vm6, 0.0, %v7839_v52 }
 0x125   :  { %1377 = vrot.lane.b32.xlu1 %v14257_v40, %s6938_s20  ;;  %1567 = vrot.lane.b32.xlu0 %v7906_v53, %s6939_s21 }
 0x127   :  { %v8473_v35 = vpop.permute.xlu1 %1044  ;;  %v8475_v55 = vpop.permute.xlu0 %1046 }
 0x128   :  { %14260 = vst [vmem:[#allocation209_spill] sm:$0xff] %v8473_v35  ;;  %14261 = vst [vmem:[#allocation210_spill] sm:$0xff] %v8475_v55  ;;  %v14266_v55 = vld [vmem:[#allocation12_spill] sm:$0xff] }
 0x129   :  { %2123 = vrot.lane.b32.xlu1 %v7920_v34, %s6942_s1  ;;  %1569 = vrot.lane.b32.xlu0 %v7920_v34, %s6939_s21 }
 0x12b   :  { %v8481_v15 = vpop.permute.xlu1 %1048  ;;  %v8483_v29 = vpop.permute.xlu0 %1050 }
 0x12c   :  { %14262 = vst [vmem:[#allocation211_spill] sm:$0xff] %v8481_v15  ;;  %14263 = vst [vmem:[#allocation212_spill] sm:$0xff] %v8483_v29 }
 0x12d   :  { %1759 = vrot.lane.b32.xlu1 %v7114_v48, %s6940_s27  ;;  %1187 = vrot.lane.b32.xlu0 %v7114_v48, %s6937_s25 }
 0x12f   :  { %v8489_v53 = vpop.permute.xlu1 %1052  ;;  %v8491_v40 = vpop.permute.xlu0 %1054 }
 0x130   :  { %14264 = vst [vmem:[#allocation213_spill] sm:$0xff] %v8489_v53  ;;  %14265 = vst [vmem:[#allocation214_spill] sm:$0xff] %v8491_v40  ;;  %v14271_v40 = vld [vmem:[#allocation13_spill] sm:$0xff] }
 0x131   :  { %1761 = vrot.lane.b32.xlu1 %v7111_v47, %s6940_s27  ;;  %1942 = vrot.lane.b32.xlu0 %v14266_v55, %s6941_s12 }
 0x133   :  { %v8497_v34 = vpop.permute.xlu1 %1056  ;;  %v8499_v15 = vpop.permute.xlu0 %1058 }
 0x134   :  { %14267 = vst [vmem:[#allocation12_spill] sm:$0xff] %v8497_v34  ;;  %14268 = vst [vmem:[#allocation215_spill] sm:$0xff] %v8499_v15 }
 0x135   :  { %1189 = vrot.lane.b32.xlu1 %v7111_v47, %s6937_s25  ;;  %1379 = vrot.lane.b32.xlu0 %v14266_v55, %s6938_s20 }
 0x137   :  { %v8505_v29 = vpop.permute.xlu1 %1060  ;;  %v8507_v53 = vpop.permute.xlu0 %1062 }
 0x138   :  { %14269 = vst [vmem:[#allocation216_spill] sm:$0xff] %v8505_v29  ;;  %14270 = vst [vmem:[#allocation217_spill] sm:$0xff] %v8507_v53 }
 0x139   :  { %1944 = vrot.lane.b32.xlu1 %v14271_v40, %s6941_s12  ;;  %2125 = vrot.lane.b32.xlu0 %v7923_v18, %s6942_s1 }
 0x13b   :  { %v8513_v35 = vpop.permute.xlu1 %1064  ;;  %v8515_v34 = vpop.permute.xlu0 %1066 }
 0x13c   :  { %14272 = vst [vmem:[#allocation13_spill] sm:$0xff] %v8513_v35  ;;  %14273 = vst [vmem:[#allocation218_spill] sm:$0xff] %v8515_v34 }
 0x13d   :  { %1381 = vrot.lane.b32.xlu1 %v14271_v40, %s6938_s20  ;;  %1571 = vrot.lane.b32.xlu0 %v7923_v18, %s6939_s21 }
 0x13f   :  { %v8521_v55 = vpop.permute.xlu1 %1068  ;;  %v8523_v29 = vpop.permute.xlu0 %1070 }
 0x140   :  { %14274 = vst [vmem:[#allocation219_spill] sm:$0xff] %v8521_v55  ;;  %14275 = vst [vmem:[#allocation220_spill] sm:$0xff] %v8523_v29  ;;  %v14280_v29 = vld [vmem:[#allocation14_spill] sm:$0xff] }
 0x141   :  { %2127 = vrot.lane.b32.xlu1 %v7936_v49, %s6942_s1  ;;  %1573 = vrot.lane.b32.xlu0 %v7936_v49, %s6939_s21 }
 0x143   :  { %v8529_v53 = vpop.permute.xlu1 %1072  ;;  %v8531_v35 = vpop.permute.xlu0 %1074 }
 0x144   :  { %14276 = vst [vmem:[#allocation221_spill] sm:$0xff] %v8529_v53  ;;  %14277 = vst [vmem:[#allocation222_spill] sm:$0xff] %v8531_v35 }
 0x145   :  { %1763 = vrot.lane.b32.xlu1 %v7133_v56, %s6940_s27  ;;  %1191 = vrot.lane.b32.xlu0 %v7133_v56, %s6937_s25 }
 0x147   :  { %v8537_v18 = vpop.permute.xlu1 %1076  ;;  %v8539_v40 = vpop.permute.xlu0 %1078 }
 0x148   :  { %14278 = vst [vmem:[#allocation223_spill] sm:$0xff] %v8537_v18  ;;  %14279 = vst [vmem:[#allocation224_spill] sm:$0xff] %v8539_v40  ;;  %v14285_v40 = vld [vmem:[#allocation15_spill] sm:$0xff] }
 0x149   :  { %1765 = vrot.lane.b32.xlu1 %v7129_v54, %s6940_s27  ;;  %1946 = vrot.lane.b32.xlu0 %v14280_v29, %s6941_s12 }
 0x14b   :  { %v8545_v49 = vpop.permute.xlu1 %1080  ;;  %v8547_v53 = vpop.permute.xlu0 %1082 }
 0x14c   :  { %14281 = vst [vmem:[#allocation14_spill] sm:$0xff] %v8545_v49  ;;  %14282 = vst [vmem:[#allocation225_spill] sm:$0xff] %v8547_v53 }
 0x14d   :  { %1193 = vrot.lane.b32.xlu1 %v7129_v54, %s6937_s25  ;;  %1383 = vrot.lane.b32.xlu0 %v14280_v29, %s6938_s20 }
 0x14f   :  { %v8553_v35 = vpop.permute.xlu1 %1084  ;;  %v8555_v18 = vpop.permute.xlu0 %1086 }
 0x150   :  { %14283 = vst [vmem:[#allocation226_spill] sm:$0xff] %v8553_v35  ;;  %14284 = vst [vmem:[#allocation227_spill] sm:$0xff] %v8555_v18 }
 0x151   :  { %1948 = vrot.lane.b32.xlu1 %v14285_v40, %s6941_s12  ;;  %2129 = vrot.lane.b32.xlu0 %v7939_v9, %s6942_s1 }
 0x153   :  { %v8561_v55 = vpop.permute.xlu1 %1088  ;;  %v8563_v49 = vpop.permute.xlu0 %1090 }
 0x154   :  { %14286 = vst [vmem:[#allocation15_spill] sm:$0xff] %v8561_v55  ;;  %14287 = vst [vmem:[#allocation228_spill] sm:$0xff] %v8563_v49 }
 0x155   :  { %1385 = vrot.lane.b32.xlu1 %v14285_v40, %s6938_s20  ;;  %1575 = vrot.lane.b32.xlu0 %v7939_v9, %s6939_s21 }
 0x157   :  { %v8569_v29 = vpop.permute.xlu1 %1092  ;;  %v8571_v35 = vpop.permute.xlu0 %1094 }
 0x158   :  { %14288 = vst [vmem:[#allocation229_spill] sm:$0xff] %v8569_v29  ;;  %14289 = vst [vmem:[#allocation230_spill] sm:$0xff] %v8571_v35  ;;  %v14294_v35 = vld [vmem:[#allocation17_spill] sm:$0xff] }
 0x159   :  { %2131 = vrot.lane.b32.xlu1 %v7954_v37, %s6942_s1  ;;  %1577 = vrot.lane.b32.xlu0 %v7954_v37, %s6939_s21 }
 0x15b   :  { %v8577_v18 = vpop.permute.xlu1 %1096  ;;  %v8579_v55 = vpop.permute.xlu0 %1098 }
 0x15c   :  { %14290 = vst [vmem:[#allocation231_spill] sm:$0xff] %v8577_v18  ;;  %14291 = vst [vmem:[#allocation232_spill] sm:$0xff] %v8579_v55 }
 0x15d   :  { %1767 = vrot.lane.b32.xlu1 %v7158_v4, %s6940_s27  ;;  %1195 = vrot.lane.b32.xlu0 %v7158_v4, %s6937_s25 }
 0x15f   :  { %v8585_v9 = vpop.permute.xlu1 %1100  ;;  %v8587_v40 = vpop.permute.xlu0 %1102 }
 0x160   :  { %14292 = vst [vmem:[#allocation233_spill] sm:$0xff] %v8585_v9  ;;  %14293 = vst [vmem:[#allocation234_spill] sm:$0xff] %v8587_v40  ;;  %v14295_v9 = vld [vmem:[#allocation18_spill] sm:$0xff] }
 0x161   :  { %1769 = vrot.lane.b32.xlu1 %v7155_v3, %s6940_s27  ;;  %1950 = vrot.lane.b32.xlu0 %v14294_v35, %s6941_s12 }
 0x163   :  { %v1176_v37 = vpop.permute.xlu1 %1175  ;;  %v1178_v18 = vpop.permute.xlu0 %1177 }
 0x165   :  { %1197 = vrot.lane.b32.xlu1 %v7155_v3, %s6937_s25  ;;  %1387 = vrot.lane.b32.xlu0 %v14294_v35, %s6938_s20 }
 0x167   :  { %v1368_v55 = vpop.permute.xlu1 %1367  ;;  %v1370_v29 = vpop.permute.xlu0 %1369 }
 0x169   :  { %1952 = vrot.lane.b32.xlu1 %v14295_v9, %s6941_s12  ;;  %2133 = vrot.lane.b32.xlu0 %v7957_v57, %s6942_s1 }
 0x16b   :  { %v1560_v40 = vpop.permute.xlu1 %1559  ;;  %v1562_v49 = vpop.permute.xlu0 %1561 }
 0x16d   :  { %1389 = vrot.lane.b32.xlu1 %v14295_v9, %s6938_s20  ;;  %1579 = vrot.lane.b32.xlu0 %v7957_v57, %s6939_s21  ;;  %v8617_v57 = vsel %vm2362_vm0, %v2301_v60, %v8350_v61 }
 0x16f   :  { %v1752_v53 = vpop.permute.xlu1 %1751  ;;  %v1180_v34 = vpop.permute.xlu0 %1179 }
 0x171   :  { %2135 = vrot.lane.b32.xlu1 %v7971_v32, %s6942_s1  ;;  %1581 = vrot.lane.b32.xlu0 %v7971_v32, %s6939_s21  ;;  %v2425_v32 = vsel %vm2424_vm7, %v8617_v57, %v1176_v37 }
 0x172   :  { %v2490_v52 = vsel %vm2489_vm8, %v2425_v32, %v1368_v55  ;;  %v2426_v55 = vsel %vm2424_vm7, %v8617_v57, %v1178_v18  ;;  %v14297_v32 = vld [vmem:[#allocation21_spill] sm:$0xff] }
 0x173   :  { %v1754_v35 = vpop.permute.xlu1 %1753  ;;  %v1935_v15 = vpop.permute.xlu0 %1934  ;;  %v2555_v13 = vsel %vm2554_vm9, %v2490_v52, %v1560_v40 }
 0x174   :  { %v2620_v61 = vsel %vm2619_vm10, %v2555_v13, %v1752_v53 }
 0x175   :  { %1771 = vrot.lane.b32.xlu1 %v7189_v22, %s6940_s27  ;;  %1199 = vrot.lane.b32.xlu0 %v7189_v22, %s6937_s25  ;;  %v2685_v60 = vsel %vm2684_vm11, %v2620_v61, %v1935_v15  ;;  %v2491_v15 = vsel %vm2489_vm8, %v2426_v55, %v1370_v29 }
 0x176   :  { %v2556_v53 = vsel %vm2554_vm9, %v2491_v15, %v1562_v49 }
 0x177   :  { %v1182_v9 = vpop.permute.xlu1 %1181  ;;  %v1372_v42 = vpop.permute.xlu0 %1371 }
 0x179   :  { %1773 = vrot.lane.b32.xlu1 %v7186_v20, %s6940_s27  ;;  %1954 = vrot.lane.b32.xlu0 %v14296_v0, %s6941_s12 }
 0x17b   :  { %v1937_v37 = vpop.permute.xlu1 %1936  ;;  %v2118_v33 = vpop.permute.xlu0 %2117 }
 0x17c   :  { %v2750_v22 = vsel %vm2749_vm12, %v2685_v60, %v2118_v33  ;;  %v2621_v33 = vsel %vm2619_vm10, %v2556_v53, %v1754_v35  ;;  %v14298_v60 = vld [vmem:[#allocation124_spill] sm:$0xff] }
 0x17d   :  { %1201 = vrot.lane.b32.xlu1 %v7186_v20, %s6937_s25  ;;  %1391 = vrot.lane.b32.xlu0 %v14296_v0, %s6938_s20  ;;  %v2686_v0 = vsel %vm2684_vm11, %v2621_v33, %v1937_v37  ;;  %v2302_v37 = vsel %vm2300_vm6, %v7044_v16, %v14298_v60  ;;  %v14299_v33 = vld [vmem:[#allocation19_spill] sm:$0xff] }
 0x17e   :  { %6741 = vmatprep.mubr.msk.f32.mxu0 %vm2819_vm13, %v2750_v22  ;;  %v14300_v16 = vld [vmem:[#allocation23_spill] sm:$0xff] }
 0x17f   :  { %v1374_v40 = vpop.permute.xlu1 %1373  ;;  %v1564_v13 = vpop.permute.xlu0 %1563  ;;  %v14301_v60 = vld [vmem:[#allocation123_spill] sm:$0xff] }
 0x181   :  { %1956 = vrot.lane.b32.xlu1 %v14297_v32, %s6941_s12  ;;  %2137 = vrot.lane.b32.xlu0 %v7974_v24, %s6942_s1 }
 0x183   :  { %v2120_v22 = vpop.permute.xlu1 %2119  ;;  %v1566_v52 = vpop.permute.xlu0 %1565 }
 0x184   :  { %v2751_v18 = vsel %vm2749_vm12, %v2686_v0, %v2120_v22 }
 0x185   :  { %1393 = vrot.lane.b32.xlu1 %v14297_v32, %s6938_s20  ;;  %1583 = vrot.lane.b32.xlu0 %v7974_v24, %s6939_s21  ;;  %v2364_v24 = vsel %vm2362_vm0, %v2302_v37, %v8352_v19 }
 0x186   :  { %6742 = vmatmul.mubr.msk.f32.vlgmr.msra.gmra.mxu0 %vm2819_vm13, %v2751_v18  ;;  %v2427_v55 = vsel %vm2424_vm7, %v2364_v24, %v1180_v34 }
 0x187   :  { %v1756_v49 = vpop.permute.xlu1 %1755  ;;  %v1184_v29 = vpop.permute.xlu0 %1183 }
 0x189   :  { %2139 = vrot.lane.b32.xlu1 %v7988_v51, %s6942_s1  ;;  %1585 = vrot.lane.b32.xlu0 %v7988_v51, %s6939_s21  ;;  %v2492_v51 = vsel %vm2489_vm8, %v2427_v55, %v1372_v42  ;;  %v2303_v42 = vsel %vm2300_vm6, %v7038_v14, %v14301_v60  ;;  %v14302_v14 = vld [vmem:[#allocation24_spill] sm:$0xff] }
 0x18a   :  { %v2557_v32 = vsel %vm2554_vm9, %v2492_v51, %v1564_v13  ;;  %v2365_v13 = vsel %vm2362_vm0, %v2303_v42, %v8358_v62 }
 0x18b   :  { %v1758_v35 = vpop.permute.xlu1 %1757  ;;  %v1939_v61 = vpop.permute.xlu0 %1938  ;;  %v2622_v0 = vsel %vm2619_vm10, %v2557_v32, %v1756_v49  ;;  %v2428_v49 = vsel %vm2424_vm7, %v2365_v13, %v1182_v9  ;;  %v14304_v13 = vld [vmem:[#allocation22_spill] sm:$0xff] }
 0x18c   :  { %v2687_v22 = vsel %vm2684_vm11, %v2622_v0, %v1939_v61  ;;  %v2493_v24 = vsel %vm2489_vm8, %v2428_v49, %v1374_v40 }
 0x18d   :  { %1775 = vrot.lane.b32.xlu1 %v7217_v44, %s6940_s27  ;;  %1203 = vrot.lane.b32.xlu0 %v7217_v44, %s6937_s25  ;;  %v2558_v55 = vsel %vm2554_vm9, %v2493_v24, %v1566_v52 }
 0x18e   :  { %v2623_v51 = vsel %vm2619_vm10, %v2558_v55, %v1758_v35 }
 0x18f   :  { %v1186_v15 = vpop.permute.xlu1 %1185  ;;  %v1376_v53 = vpop.permute.xlu0 %1375 }
 0x191   :  { %1777 = vrot.lane.b32.xlu1 %v14299_v33, %s6940_s27  ;;  %1958 = vrot.lane.b32.xlu0 %v14300_v16, %s6941_s12 }
 0x193   :  { %v1941_v18 = vpop.permute.xlu1 %1940  ;;  %v2122_v19 = vpop.permute.xlu0 %2121 }
 0x194   :  { %v2752_v34 = vsel %vm2749_vm12, %v2687_v22, %v2122_v19  ;;  %v2688_v62 = vsel %vm2684_vm11, %v2623_v51, %v1941_v18  ;;  %v14303_v22 = vld [vmem:[#allocation126_spill] sm:$0xff] }
 0x195   :  { %1205 = vrot.lane.b32.xlu1 %v14299_v33, %s6937_s25  ;;  %1395 = vrot.lane.b32.xlu0 %v14300_v16, %s6938_s20  ;;  %v2304_v18 = vsel %vm2300_vm6, %v7047_v17, %v14303_v22  ;;  %v14305_v17 = vld [vmem:[#allocation26_spill] sm:$0xff] }
 0x196   :  { %6744 = vmatprep.mubr.msk.f32.mxu0 %vm2819_vm13, %v2752_v34 }
 0x197   :  { %v1378_v61 = vpop.permute.xlu1 %1377  ;;  %v1568_v37 = vpop.permute.xlu0 %1567 }
 0x199   :  { %1960 = vrot.lane.b32.xlu1 %v14302_v14, %s6941_s12  ;;  %2141 = vrot.lane.b32.xlu0 %v7991_v50, %s6942_s1 }
 0x19b   :  { %v2124_v32 = vpop.permute.xlu1 %2123  ;;  %v1570_v16 = vpop.permute.xlu0 %1569 }
 0x19c   :  { %v2753_v9 = vsel %vm2749_vm12, %v2688_v62, %v2124_v32 }
 0x19d   :  { %1397 = vrot.lane.b32.xlu1 %v14302_v14, %s6938_s20  ;;  %1587 = vrot.lane.b32.xlu0 %v7991_v50, %s6939_s21  ;;  %v2366_v50 = vsel %vm2362_vm0, %v2304_v18, %v8360_v26  ;;  %v14306_v14 = vld [vmem:[#allocation127_spill] sm:$0xff] }
 0x19e   :  { %6745 = vmatmul.mubr.msk.f32.gmra.mxu0 %vm2819_vm13, %v2753_v9  ;;  %v2429_v19 = vsel %vm2424_vm7, %v2366_v50, %v1184_v29 }
 0x19f   :  { %v1760_v40 = vpop.permute.xlu1 %1759  ;;  %v1188_v52 = vpop.permute.xlu0 %1187 }
 0x1a1   :  { %2143 = vrot.lane.b32.xlu1 %v8004_v46, %s6942_s1  ;;  %1589 = vrot.lane.b32.xlu0 %v8004_v46, %s6939_s21  ;;  %v2494_v46 = vsel %vm2489_vm8, %v2429_v19, %v1376_v53  ;;  %v2305_v53 = vsel %vm2300_vm6, %v7053_v21, %v14306_v14  ;;  %v14307_v21 = vld [vmem:[#allocation27_spill] sm:$0xff]  ;;  %v14308_v19 = vld [vmem:[#allocation128_spill] sm:$0xff] }
 0x1a2   :  { %v2559_v42 = vsel %vm2554_vm9, %v2494_v46, %v1568_v37  ;;  %v2367_v37 = vsel %vm2362_vm0, %v2305_v53, %v8369_v45  ;;  %v2306_v46 = vsel %vm2300_vm6, %v7077_v31, %v14308_v19  ;;  %v14310_v31 = vld [vmem:[#allocation30_spill] sm:$0xff]  ;;  %v14311_v53 = vld [vmem:[#allocation129_spill] sm:$0xff] }
 0x1a3   :  { %v1762_v35 = vpop.permute.xlu1 %1761  ;;  %v1943_v0 = vpop.permute.xlu0 %1942  ;;  %v2624_v49 = vsel %vm2619_vm10, %v2559_v42, %v1760_v40  ;;  %v2430_v51 = vsel %vm2424_vm7, %v2367_v37, %v1186_v15 }
 0x1a4   :  { %v2689_v24 = vsel %vm2684_vm11, %v2624_v49, %v1943_v0  ;;  %v2495_v9 = vsel %vm2489_vm8, %v2430_v51, %v1378_v61 }
 0x1a5   :  { %1779 = vrot.lane.b32.xlu1 %v7238_v59, %s6940_s27  ;;  %1207 = vrot.lane.b32.xlu0 %v7238_v59, %s6937_s25  ;;  %v2560_v40 = vsel %vm2554_vm9, %v2495_v9, %v1570_v16 }
 0x1a6   :  { %v2625_v0 = vsel %vm2619_vm10, %v2560_v40, %v1762_v35 }
 0x1a7   :  { %v1190_v34 = vpop.permute.xlu1 %1189  ;;  %v1380_v60 = vpop.permute.xlu0 %1379 }
 0x1a9   :  { %1781 = vrot.lane.b32.xlu1 %v14304_v13, %s6940_s27  ;;  %1962 = vrot.lane.b32.xlu0 %v14305_v17, %s6941_s12 }
 0x1ab   :  { %v1945_v55 = vpop.permute.xlu1 %1944  ;;  %v2126_v26 = vpop.permute.xlu0 %2125 }
 0x1ac   :  { %v2754_v29 = vsel %vm2749_vm12, %v2689_v24, %v2126_v26  ;;  %v2690_v45 = vsel %vm2684_vm11, %v2625_v0, %v1945_v55  ;;  %v14309_v55 = vld [vmem:[#allocation25_spill] sm:$0xff] }
 0x1ad   :  { %1209 = vrot.lane.b32.xlu1 %v14304_v13, %s6937_s25  ;;  %1399 = vrot.lane.b32.xlu0 %v14305_v17, %s6938_s20 }
 0x1ae   :  { %6747 = vmatprep.mubr.msk.f32.mxu0 %vm2819_vm13, %v2754_v29 }
 0x1af   :  { %v1382_v62 = vpop.permute.xlu1 %1381  ;;  %v1572_v32 = vpop.permute.xlu0 %1571 }
 0x1b1   :  { %1964 = vrot.lane.b32.xlu1 %v14307_v21, %s6941_s12  ;;  %2145 = vrot.lane.b32.xlu0 %v8007_v28, %s6942_s1 }
 0x1b3   :  { %v2128_v22 = vpop.permute.xlu1 %2127  ;;  %v1574_v18 = vpop.permute.xlu0 %1573 }
 0x1b4   :  { %v2755_v15 = vsel %vm2749_vm12, %v2690_v45, %v2128_v22 }
 0x1b5   :  { %1401 = vrot.lane.b32.xlu1 %v14307_v21, %s6938_s20  ;;  %1591 = vrot.lane.b32.xlu0 %v8007_v28, %s6939_s21  ;;  %v2368_v28 = vsel %vm2362_vm0, %v2306_v46, %v8371_v23 }
 0x1b6   :  { %6748 = vmatmul.mubr.msk.f32.gmra.mxu0 %vm2819_vm13, %v2755_v15  ;;  %v2431_v42 = vsel %vm2424_vm7, %v2368_v28, %v1188_v52 }
 0x1b7   :  { %v1764_v61 = vpop.permute.xlu1 %1763  ;;  %v1192_v16 = vpop.permute.xlu0 %1191 }
 0x1b9   :  { %2147 = vrot.lane.b32.xlu1 %v8022_v30, %s6942_s1  ;;  %1593 = vrot.lane.b32.xlu0 %v8022_v30, %s6939_s21  ;;  %v2496_v30 = vsel %vm2489_vm8, %v2431_v42, %v1380_v60  ;;  %v2307_v60 = vsel %vm2300_vm6, %v7061_v25, %v14311_v53  ;;  %v14312_v25 = vld [vmem:[#allocation31_spill] sm:$0xff] }
 0x1ba   :  { %v2561_v24 = vsel %vm2554_vm9, %v2496_v30, %v1572_v32  ;;  %v2369_v37 = vsel %vm2362_vm0, %v2307_v60, %v8387_v1  ;;  %v14314_v30 = vld [vmem:[#allocation28_spill] sm:$0xff] }
 0x1bb   :  { %v1766_v35 = vpop.permute.xlu1 %1765  ;;  %v1947_v50 = vpop.permute.xlu0 %1946  ;;  %v2626_v26 = vsel %vm2619_vm10, %v2561_v24, %v1764_v61  ;;  %v2432_v51 = vsel %vm2424_vm7, %v2369_v37, %v1190_v34 }
 0x1bc   :  { %v2691_v29 = vsel %vm2684_vm11, %v2626_v26, %v1947_v50  ;;  %v2497_v40 = vsel %vm2489_vm8, %v2432_v51, %v1382_v62 }
 0x1bd   :  { %1783 = vrot.lane.b32.xlu1 %v7279_v41, %s6940_s27  ;;  %1211 = vrot.lane.b32.xlu0 %v7279_v41, %s6937_s25  ;;  %v2562_v21 = vsel %vm2554_vm9, %v2497_v40, %v1574_v18 }
 0x1be   :  { %v2627_v0 = vsel %vm2619_vm10, %v2562_v21, %v1766_v35  ;;  %v14313_v35 = vld [vmem:[#allocation130_spill] sm:$0xff] }
 0x1bf   :  { %v1194_v17 = vpop.permute.xlu1 %1193  ;;  %v1384_v49 = vpop.permute.xlu0 %1383  ;;  %v2308_v50 = vsel %vm2300_vm6, %v7114_v48, %v14313_v35  ;;  %v14315_v48 = vld [vmem:[#allocation32_spill] sm:$0xff] }
 0x1c1   :  { %1785 = vrot.lane.b32.xlu1 %v14309_v55, %s6940_s27  ;;  %1966 = vrot.lane.b32.xlu0 %v14310_v31, %s6941_s12 }
 0x1c3   :  { %v1949_v14 = vpop.permute.xlu1 %1948  ;;  %v2130_v23 = vpop.permute.xlu0 %2129 }
 0x1c4   :  { %v2756_v52 = vsel %vm2749_vm12, %v2691_v29, %v2130_v23  ;;  %v2692_v1 = vsel %vm2684_vm11, %v2627_v0, %v1949_v14  ;;  %v14316_v29 = vld [vmem:[#allocation131_spill] sm:$0xff] }
 0x1c5   :  { %1213 = vrot.lane.b32.xlu1 %v14309_v55, %s6937_s25  ;;  %1403 = vrot.lane.b32.xlu0 %v14310_v31, %s6938_s20 }
 0x1c6   :  { %6750 = vmatprep.mubr.msk.f32.mxu0 %vm2819_vm13, %v2756_v52 }
 0x1c7   :  { %v1386_v32 = vpop.permute.xlu1 %1385  ;;  %v1576_v9 = vpop.permute.xlu0 %1575 }
 0x1c9   :  { %1968 = vrot.lane.b32.xlu1 %v14312_v25, %s6941_s12  ;;  %2149 = vrot.lane.b32.xlu0 %v8025_v2, %s6942_s1 }
 0x1cb   :  { %v2132_v45 = vpop.permute.xlu1 %2131  ;;  %v1578_v22 = vpop.permute.xlu0 %1577 }
 0x1cc   :  { %v2757_v34 = vsel %vm2749_vm12, %v2692_v1, %v2132_v45  ;;  %v14318_v1 = vld [vmem:[#allocation132_spill] sm:$0xff] }
 0x1cd   :  { %1405 = vrot.lane.b32.xlu1 %v14312_v25, %s6938_s20  ;;  %1595 = vrot.lane.b32.xlu0 %v8025_v2, %s6939_s21  ;;  %v2370_v2 = vsel %vm2362_vm0, %v2308_v50, %v8389_v10  ;;  %v2310_v45 = vsel %vm2300_vm6, %v7133_v56, %v14318_v1  ;;  %v14320_v56 = vld [vmem:[#allocation35_spill] sm:$0xff] }
 0x1ce   :  { %6751 = vmatmul.mubr.msk.f32.gmra.mxu0 %vm2819_vm13, %v2757_v34  ;;  %v2433_v19 = vsel %vm2424_vm7, %v2370_v2, %v1192_v16 }
 0x1cf   :  { %v1768_v62 = vpop.permute.xlu1 %1767  ;;  %v1196_v18 = vpop.permute.xlu0 %1195 }
 0x1d1   :  { %2151 = vrot.lane.b32.xlu1 %v8039_v7, %s6942_s1  ;;  %1597 = vrot.lane.b32.xlu0 %v8039_v7, %s6939_s21  ;;  %v2498_v7 = vsel %vm2489_vm8, %v2433_v19, %v1384_v49  ;;  %v2309_v49 = vsel %vm2300_vm6, %v7111_v47, %v14316_v29  ;;  %v14317_v47 = vld [vmem:[#allocation33_spill] sm:$0xff] }
 0x1d2   :  { %v2563_v42 = vsel %vm2554_vm9, %v2498_v7, %v1576_v9  ;;  %v2371_v14 = vsel %vm2362_vm0, %v2309_v49, %v8398_v11  ;;  %v14321_v19 = vld [vmem:[#allocation133_spill] sm:$0xff] }
 0x1d3   :  { %v1770_v15 = vpop.permute.xlu1 %1769  ;;  %v1951_v61 = vpop.permute.xlu0 %1950  ;;  %v2628_v24 = vsel %vm2619_vm10, %v2563_v42, %v1768_v62  ;;  %v2434_v23 = vsel %vm2424_vm7, %v2371_v14, %v1194_v17 }
 0x1d4   :  { %v2693_v31 = vsel %vm2684_vm11, %v2628_v24, %v1951_v61  ;;  %v2499_v60 = vsel %vm2489_vm8, %v2434_v23, %v1386_v32  ;;  %v14319_v61 = vld [vmem:[#allocation29_spill] sm:$0xff] }
 0x1d5   :  { %1787 = vrot.lane.b32.xlu1 %v7295_v58, %s6940_s27  ;;  %1215 = vrot.lane.b32.xlu0 %v7295_v58, %s6937_s25  ;;  %v2564_v37 = vsel %vm2554_vm9, %v2499_v60, %v1578_v22 }
 0x1d6   :  { %v2629_v51 = vsel %vm2619_vm10, %v2564_v37, %v1770_v15 }
 0x1d7   :  { %v1198_v46 = vpop.permute.xlu1 %1197  ;;  %v1388_v28 = vpop.permute.xlu0 %1387 }
 0x1d9   :  { %1789 = vrot.lane.b32.xlu1 %v14314_v30, %s6940_s27  ;;  %1970 = vrot.lane.b32.xlu0 %v14315_v48, %s6941_s12 }
 0x1db   :  { %v1953_v26 = vpop.permute.xlu1 %1952  ;;  %v2134_v10 = vpop.permute.xlu0 %2133 }
 0x1dc   :  { %v2758_v16 = vsel %vm2749_vm12, %v2693_v31, %v2134_v10  ;;  %v2694_v11 = vsel %vm2684_vm11, %v2629_v51, %v1953_v26 }
 0x1dd   :  { %1217 = vrot.lane.b32.xlu1 %v14314_v30, %s6937_s25  ;;  %1407 = vrot.lane.b32.xlu0 %v14315_v48, %s6938_s20 }
 0x1de   :  { %6753 = vmatprep.mubr.msk.f32.mxu0 %vm2819_vm13, %v2758_v16 }
 0x1df   :  { %v1390_v52 = vpop.permute.xlu1 %1389  ;;  %v1580_v53 = vpop.permute.xlu0 %1579 }
 0x1e1   :  { %1972 = vrot.lane.b32.xlu1 %v14317_v47, %s6941_s12  ;;  %2153 = vrot.lane.b32.xlu0 %v8042_v6, %s6942_s1 }
 0x1e3   :  { %v2136_v9 = vpop.permute.xlu1 %2135  ;;  %v1582_v40 = vpop.permute.xlu0 %1581 }
 0x1e4   :  { %v2759_v17 = vsel %vm2749_vm12, %v2694_v11, %v2136_v9  ;;  %v14324_v9 = vld [vmem:[#allocation34_spill] sm:$0xff] }
 0x1e5   :  { %1409 = vrot.lane.b32.xlu1 %v14317_v47, %s6938_s20  ;;  %1599 = vrot.lane.b32.xlu0 %v8042_v6, %s6939_s21  ;;  %v2372_v6 = vsel %vm2362_vm0, %v2310_v45, %v8400_v43 }
 0x1e6   :  { %6754 = vmatmul.mubr.msk.f32.gmra.mxu0 %vm2819_vm13, %v2759_v17  ;;  %v2435_v22 = vsel %vm2424_vm7, %v2372_v6, %v1196_v18 }
 0x1e7   :  { %v1772_v32 = vpop.permute.xlu1 %1771  ;;  %v1200_v21 = vpop.permute.xlu0 %1199 }
 0x1e9   :  { %2155 = vrot.lane.b32.xlu1 %v8056_v12, %s6942_s1  ;;  %1601 = vrot.lane.b32.xlu0 %v8056_v12, %s6939_s21  ;;  %v2500_v12 = vsel %vm2489_vm8, %v2435_v22, %v1388_v28  ;;  %v2311_v28 = vsel %vm2300_vm6, %v7129_v54, %v14321_v19  ;;  %v14322_v54 = vld [vmem:[#allocation36_spill] sm:$0xff] }
 0x1ea   :  { %v2565_v15 = vsel %vm2554_vm9, %v2500_v12, %v1580_v53  ;;  %v2373_v7 = vsel %vm2362_vm0, %v2311_v28, %v8409_v5  ;;  %v14323_v53 = vld [vmem:[#allocation134_spill] sm:$0xff] }
 0x1eb   :  { %v1774_v25 = vpop.permute.xlu1 %1773  ;;  %v1955_v0 = vpop.permute.xlu0 %1954  ;;  %v2630_v35 = vsel %vm2619_vm10, %v2565_v15, %v1772_v32  ;;  %v2436_v42 = vsel %vm2424_vm7, %v2373_v7, %v1198_v46  ;;  %v2312_v60 = vsel %vm2300_vm6, %v7158_v4, %v14323_v53  ;;  %v14325_v4 = vld [vmem:[#allocation39_spill] sm:$0xff]  ;;  %v14328_v15 = vld [vmem:[#allocation150_spill] sm:$0xff]  ;;  %v14330_v7 = vld [vmem:[#allocation136_spill] sm:$0xff] }
 0x1ec   :  { %v2695_v50 = vsel %vm2684_vm11, %v2630_v35, %v1955_v0  ;;  %v2501_v31 = vsel %vm2489_vm8, %v2436_v42, %v1390_v52  ;;  %v14331_v42 = vld [vmem:[#allocation16_spill] sm:$0xff] }
 0x1ed   :  { %1791 = vrot.lane.b32.xlu1 %v7322_v36, %s6940_s27  ;;  %1219 = vrot.lane.b32.xlu0 %v7322_v36, %s6937_s25  ;;  %v2566_v26 = vsel %vm2554_vm9, %v2501_v31, %v1582_v40  ;;  %v14333_v31 = vld [vmem:[#allocation7_spill] sm:$0xff] }
 0x1ee   :  { %v2631_v10 = vsel %vm2619_vm10, %v2566_v26, %v1774_v25  ;;  %v14326_v25 = vld [vmem:[#allocation135_spill] sm:$0xff] }
 0x1ef   :  { %v1202_v34 = vpop.permute.xlu1 %1201  ;;  %v1392_v62 = vpop.permute.xlu0 %1391  ;;  %v2313_v0 = vsel %vm2300_vm6, %v7155_v3, %v14326_v25  ;;  %v14327_v3 = vld [vmem:[#allocation40_spill] sm:$0xff] }
 0x1f0   :  { %v2375_v1 = vsel %vm2362_vm0, %v2313_v0, %v8417_v38 }
 0x1f1   :  { %1793 = vrot.lane.b32.xlu1 %v14319_v61, %s6940_s27  ;;  %1974 = vrot.lane.b32.xlu0 %v14320_v56, %s6941_s12  ;;  %v2438_v45 = vsel %vm2424_vm7, %v2375_v1, %v1202_v34 }
 0x1f3   :  { %v1957_v2 = vpop.permute.xlu1 %1956  ;;  %v2138_v43 = vpop.permute.xlu0 %2137 }
 0x1f4   :  { %v2760_v18 = vsel %vm2749_vm12, %v2695_v50, %v2138_v43  ;;  %v2696_v5 = vsel %vm2684_vm11, %v2631_v10, %v1957_v2 }
 0x1f5   :  { %1221 = vrot.lane.b32.xlu1 %v14319_v61, %s6937_s25  ;;  %1411 = vrot.lane.b32.xlu0 %v14320_v56, %s6938_s20 }
 0x1f6   :  { %6756 = vmatprep.mubr.msk.f32.mxu0 %vm2819_vm13, %v2760_v18  ;;  %v14329_v18 = vld [vmem:[#allocation153_spill] sm:$0xff] }
 0x1f7   :  { %v1394_v48 = vpop.permute.xlu1 %1393  ;;  %v1584_v24 = vpop.permute.xlu0 %1583 }
 0x1f9   :  { %1976 = vrot.lane.b32.xlu1 %v14322_v54, %s6941_s12  ;;  %2157 = vrot.lane.b32.xlu0 %v8059_v39, %s6942_s1 }
 0x1fb   :  { %v2140_v16 = vpop.permute.xlu1 %2139  ;;  %v1586_v29 = vpop.permute.xlu0 %1585 }
 0x1fc   :  { %v2761_v46 = vsel %vm2749_vm12, %v2696_v5, %v2140_v16 }
 0x1fd   :  { %1413 = vrot.lane.b32.xlu1 %v14322_v54, %s6938_s20  ;;  %1603 = vrot.lane.b32.xlu0 %v8059_v39, %s6939_s21  ;;  %v2374_v39 = vsel %vm2362_vm0, %v2312_v60, %v8411_v27 }
 0x1fe   :  { %6757 = vmatmul.mubr.msk.f32.gmra.mxu0 %vm2819_vm13, %v2761_v46  ;;  %v2437_v37 = vsel %vm2424_vm7, %v2374_v39, %v1200_v21  ;;  %v14334_v46 = vld [vmem:[#allocation37_spill] sm:$0xff] }
 0x1ff   :  { %v1776_v49 = vpop.permute.xlu1 %1775  ;;  %v1204_v14 = vpop.permute.xlu0 %1203  ;;  %v14336_v39 = vld [vmem:[#allocation137_spill] sm:$0xff] }
 0x201   :  { %2159 = vrot.lane.b32.xlu1 %v8072_v63, %s6942_s1  ;;  %1605 = vrot.lane.b32.xlu0 %v8072_v63, %s6939_s21  ;;  %v2502_v63 = vsel %vm2489_vm8, %v2437_v37, %v1392_v62  ;;  %v2503_v62 = vsel %vm2489_vm8, %v2438_v45, %v1394_v48  ;;  %v2314_v48 = vsel %vm2300_vm6, %v14331_v42, %v14330_v7 }
 0x202   :  { %v2567_v11 = vsel %vm2554_vm9, %v2502_v63, %v1584_v24  ;;  %v2568_v12 = vsel %vm2554_vm9, %v2503_v62, %v1586_v29  ;;  %v14332_v24 = vld [vmem:[#allocation38_spill] sm:$0xff]  ;;  %v2376_v26 = vsel %vm2362_vm0, %v2314_v48, %v14333_v31  ;;  %v2315_v37 = vsel %vm2300_vm6, %v7186_v20, %v14336_v39  ;;  %v14338_v20 = vld [vmem:[#allocation45_spill] sm:$0xff] }
 0x203   :  { %v1778_v23 = vpop.permute.xlu1 %1777  ;;  %v1959_v52 = vpop.permute.xlu0 %1958  ;;  %v2632_v40 = vsel %vm2619_vm10, %v2567_v11, %v1776_v49  ;;  %v2439_v54 = vsel %vm2424_vm7, %v2376_v26, %v1204_v14  ;;  %v14335_v49 = vld [vmem:[#allocation44_spill] sm:$0xff]  ;;  %v14346_v26 = vld [vmem:[#allocation139_spill] sm:$0xff]  ;;  %v14349_v39 = vld [vmem:[#allocation157_spill] sm:$0xff] }
 0x204   :  { %v2697_v17 = vsel %vm2684_vm11, %v2632_v40, %v1959_v52  ;;  %v2633_v56 = vsel %vm2619_vm10, %v2568_v12, %v1778_v23 }
 0x205   :  { %1795 = vrot.lane.b32.xlu1 %v7348_v8, %s6940_s27  ;;  %1223 = vrot.lane.b32.xlu0 %v7348_v8, %s6937_s25 }
 0x207   :  { %v1206_v47 = vpop.permute.xlu1 %1205  ;;  %v1396_v51 = vpop.permute.xlu0 %1395 }
 0x208   :  { %v2504_v16 = vsel %vm2489_vm8, %v2439_v54, %v1396_v51  ;;  %v14337_v51 = vld [vmem:[#allocation6_spill] sm:$0xff]  ;;  %v2317_v54 = vsel %vm2300_vm6, %v14299_v33, %v14346_v26  ;;  %v65_v33 = vld [vmem:[%s13644_s0 + $0xf0] sm:$0xff]  ;;  %v14353_v26 = vld [vmem:[#allocation141_spill] sm:$0xff] }
 0x209   :  { %1797 = vrot.lane.b32.xlu1 %v14324_v9, %s6940_s27  ;;  %1978 = vrot.lane.b32.xlu0 %v14325_v4, %s6941_s12  ;;  %v2377_v63 = vsel %vm2362_vm0, %v2315_v37, %v14337_v51 }
 0x20a   :  { %v2440_v11 = vsel %vm2424_vm7, %v2377_v63, %v1206_v47 }
 0x20b   :  { %v1961_v32 = vpop.permute.xlu1 %1960  ;;  %v2142_v27 = vpop.permute.xlu0 %2141 }
 0x20c   :  { %v2762_v21 = vsel %vm2749_vm12, %v2697_v17, %v2142_v27  ;;  %v2698_v38 = vsel %vm2684_vm11, %v2633_v56, %v1961_v32  ;;  %v14339_v27 = vld [vmem:[#allocation154_spill] sm:$0xff]  ;;  %v14342_v56 = vld [vmem:[#allocation41_spill] sm:$0xff] }
 0x20d   :  { %1225 = vrot.lane.b32.xlu1 %v14324_v9, %s6937_s25  ;;  %1415 = vrot.lane.b32.xlu0 %v14325_v4, %s6938_s20 }
 0x20e   :  { %6759 = vmatprep.mubr.msk.f32.mxu0 %vm2819_vm13, %v2762_v21 }
 0x20f   :  { %v1398_v6 = vpop.permute.xlu1 %1397  ;;  %v1588_v22 = vpop.permute.xlu0 %1587 }
 0x210   :  { %v2569_v29 = vsel %vm2554_vm9, %v2504_v16, %v1588_v22  ;;  %v2505_v17 = vsel %vm2489_vm8, %v2440_v11, %v1398_v6  ;;  %v14340_v22 = vld [vmem:[#allocation43_spill] sm:$0xff]  ;;  %v209_v11 = vrot.slane %v65_v33, 7 }
 0x211   :  { %1980 = vrot.lane.b32.xlu1 %v14327_v3, %s6941_s12  ;;  %2161 = vrot.lane.b32.xlu0 %v14328_v15, %s6942_s1 }
 0x213   :  { %v2144_v35 = vpop.permute.xlu1 %2143  ;;  %v1590_v50 = vpop.permute.xlu0 %1589 }
 0x214   :  { %v2763_v34 = vsel %vm2749_vm12, %v2698_v38, %v2144_v35  ;;  %v2570_v32 = vsel %vm2554_vm9, %v2505_v17, %v1590_v50  ;;  %v14343_v38 = vld [vmem:[#allocation8_spill] sm:$0xff] }
 0x215   :  { %1417 = vrot.lane.b32.xlu1 %v14327_v3, %s6938_s20  ;;  %1607 = vrot.lane.b32.xlu0 %v14328_v15, %s6939_s21  ;;  %v14341_v3 = vld [vmem:[#allocation138_spill] sm:$0xff] }
 0x216   :  { %6760 = vmatmul.mubr.msk.f32.gmra.mxu0 %vm2819_vm13, %v2763_v34  ;;  %v2316_v15 = vsel %vm2300_vm6, %v7217_v44, %v14341_v3  ;;  %v14344_v44 = vld [vmem:[#allocation42_spill] sm:$0xff] }
 0x217   :  { %v1780_v2 = vpop.permute.xlu1 %1779  ;;  %v1208_v43 = vpop.permute.xlu0 %1207  ;;  %v2378_v35 = vsel %vm2362_vm0, %v2316_v15, %v14343_v38 }
 0x218   :  { %v2634_v23 = vsel %vm2619_vm10, %v2569_v29, %v1780_v2  ;;  %v2441_v50 = vsel %vm2424_vm7, %v2378_v35, %v1208_v43 }
 0x219   :  { %2163 = vrot.lane.b32.xlu1 %v14329_v18, %s6942_s1  ;;  %1609 = vrot.lane.b32.xlu0 %v14329_v18, %s6939_s21 }
 0x21b   :  { %v1782_v19 = vpop.permute.xlu1 %1781  ;;  %v1963_v28 = vpop.permute.xlu0 %1962 }
 0x21c   :  { %v2699_v52 = vsel %vm2684_vm11, %v2634_v23, %v1963_v28  ;;  %v2635_v21 = vsel %vm2619_vm10, %v2570_v32, %v1782_v19  ;;  %v14345_v28 = vld [vmem:[#allocation50_spill] sm:$0xff] }
 0x21d   :  { %1799 = vrot.lane.b32.xlu1 %v14332_v24, %s6940_s27  ;;  %1227 = vrot.lane.b32.xlu0 %v14332_v24, %s6937_s25 }
 0x21f   :  { %v1210_v10 = vpop.permute.xlu1 %1209  ;;  %v1400_v5 = vpop.permute.xlu0 %1399 }
 0x220   :  { %v2506_v18 = vsel %vm2489_vm8, %v2441_v50, %v1400_v5  ;;  %v14347_v5 = vld [vmem:[#allocation9_spill] sm:$0xff] }
 0x221   :  { %1801 = vrot.lane.b32.xlu1 %v14334_v46, %s6940_s27  ;;  %1982 = vrot.lane.b32.xlu0 %v14335_v49, %s6941_s12  ;;  %v2379_v16 = vsel %vm2362_vm0, %v2317_v54, %v14347_v5  ;;  %v14354_v54 = vld [vmem:[#allocation203_spill] sm:$0xff] }
 0x222   :  { %v2442_v29 = vsel %vm2424_vm7, %v2379_v16, %v1210_v10 }
 0x223   :  { %v1965_v53 = vpop.permute.xlu1 %1964  ;;  %v2146_v60 = vpop.permute.xlu0 %2145 }
 0x224   :  { %v2764_v14 = vsel %vm2749_vm12, %v2699_v52, %v2146_v60  ;;  %v2700_v25 = vsel %vm2684_vm11, %v2635_v21, %v1965_v53  ;;  %v66_v53 = vld [vmem:[%s13644_s0 + $0xf8] sm:$0xff] }
 0x225   :  { %1229 = vrot.lane.b32.xlu1 %v14334_v46, %s6937_s25  ;;  %1419 = vrot.lane.b32.xlu0 %v14335_v49, %s6938_s20  ;;  %v14350_v21 = vld [vmem:[#allocation48_spill] sm:$0xff] }
 0x226   :  { %6762 = vmatprep.mubr.msk.f32.mxu0 %vm2819_vm13, %v2764_v14  ;;  %v14348_v14 = vld [vmem:[#allocation51_spill] sm:$0xff] }
 0x227   :  { %v1402_v4 = vpop.permute.xlu1 %1401  ;;  %v1592_v40 = vpop.permute.xlu0 %1591 }
 0x228   :  { %v2571_v19 = vsel %vm2554_vm9, %v2506_v18, %v1592_v40  ;;  %v2507_v52 = vsel %vm2489_vm8, %v2442_v29, %v1402_v4  ;;  %v210_v4 = vrot.slane %v66_v53, 7 }
 0x229   :  { %1984 = vrot.lane.b32.xlu1 %v14338_v20, %s6941_s12  ;;  %2165 = vrot.lane.b32.xlu0 %v14339_v27, %s6942_s1 }
 0x22a   :  { %v401_v50 = vsel %vm163_vm2, %v210_v4, 0.0 }
 0x22b   :  { %v2148_v0 = vpop.permute.xlu1 %2147  ;;  %v1594_v1 = vpop.permute.xlu0 %1593 }
 0x22c   :  { %v2765_v47 = vsel %vm2749_vm12, %v2700_v25, %v2148_v0  ;;  %v2572_v60 = vsel %vm2554_vm9, %v2507_v52, %v1594_v1 }
 0x22d   :  { %1421 = vrot.lane.b32.xlu1 %v14338_v20, %s6938_s20  ;;  %1611 = vrot.lane.b32.xlu0 %v14339_v27, %s6939_s21  ;;  %v369_v20 = vsel %vm163_vm2, 0.0, %v209_v11  ;;  %v211_v27 = vsel %vm163_vm2, %v209_v11, %v210_v4 }
 0x22e   :  { %6763 = vmatmul.mubr.msk.f32.gmra.mxu0 %vm2819_vm13, %v2765_v47  ;;  %v789_v25 = vrot.slane %v369_v20, 1  ;;  %v790_v0 = vrot.slane %v211_v27, 1 }
 0x22f   :  { %v1784_v45 = vpop.permute.xlu1 %1783  ;;  %v1212_v6 = vpop.permute.xlu0 %1211 }
 0x230   :  { %v2636_v7 = vsel %vm2619_vm10, %v2571_v19, %v1784_v45  ;;  %v14351_v45 = vld [vmem:[#allocation140_spill] sm:$0xff]  ;;  %v791_v3 = vsel %vm479_vm3, %v789_v25, %v790_v0 }
 0x231   :  { %2167 = vrot.lane.b32.xlu1 %v14340_v22, %s6942_s1  ;;  %1613 = vrot.lane.b32.xlu0 %v14340_v22, %s6939_s21  ;;  %v2318_v22 = vsel %vm2300_vm6, %v7238_v59, %v14351_v45 }
 0x233   :  { %v1786_v62 = vpop.permute.xlu1 %1785  ;;  %v1967_v12 = vpop.permute.xlu0 %1966 }
 0x234   :  { %v2701_v42 = vsel %vm2684_vm11, %v2636_v7, %v1967_v12  ;;  %v2637_v10 = vsel %vm2619_vm10, %v2572_v60, %v1786_v62  ;;  %v14352_v62 = vld [vmem:[#allocation202_spill] sm:$0xff]  ;;  %v800_v7 = vrot.slane %v211_v27, 2 }
 0x235   :  { %1803 = vrot.lane.b32.xlu1 %v14342_v56, %s6940_s27  ;;  %1231 = vrot.lane.b32.xlu0 %v14342_v56, %s6937_s25  ;;  %v2380_v12 = vsel %vm2362_vm0, %v2318_v22, %v14352_v62  ;;  %v14360_v62 = vld [vmem:[#allocation47_spill] sm:$0xff] }
 0x236   :  { %v2443_v15 = vsel %vm2424_vm7, %v2380_v12, %v1212_v6 }
 0x237   :  { %v9001_v34 = vpop.permute.xlu1 %1213  ;;  %v1404_v2 = vpop.permute.xlu0 %1403 }
 0x238   :  { %v2508_v18 = vsel %vm2489_vm8, %v2443_v15, %v1404_v2  ;;  %v2319_v2 = vsel %vm2300_vm6, %v14304_v13, %v14353_v26  ;;  %v14366_v26 = vld [vmem:[#allocation160_spill] sm:$0xff] }
 0x239   :  { %1805 = vrot.lane.b32.xlu1 %v14344_v44, %s6940_s27  ;;  %1986 = vrot.lane.b32.xlu0 %v14345_v28, %s6941_s12  ;;  %v2381_v5 = vsel %vm2362_vm0, %v2319_v2, %v14354_v54 }
 0x23b   :  { %v1969_v48 = vpop.permute.xlu1 %1968  ;;  %v2150_v31 = vpop.permute.xlu0 %2149 }
 0x23c   :  { %v2766_v43 = vsel %vm2749_vm12, %v2701_v42, %v2150_v31  ;;  %v2702_v37 = vsel %vm2684_vm11, %v2637_v10, %v1969_v48  ;;  %v792_v42 = vrot.slane %v401_v50, 1 }
 0x23d   :  { %1233 = vrot.lane.b32.xlu1 %v14344_v44, %s6937_s25  ;;  %1423 = vrot.lane.b32.xlu0 %v14345_v28, %s6938_s20  ;;  %v799_v28 = vrot.slane %v369_v20, 2 }
 0x23e   :  { %6765 = vmatprep.mubr.msk.f32.mxu0 %vm2819_vm13, %v2766_v43  ;;  %v793_v16 = vsel %vm479_vm3, %v790_v0, %v792_v42 }
 0x23f   :  { %v1406_v49 = vpop.permute.xlu1 %1405  ;;  %v1596_v23 = vpop.permute.xlu0 %1595  ;;  %v801_v29 = vsel %vm632_vm4, %v799_v28, %v800_v7  ;;  %v14364_v28 = vld [vmem:[#allocation10_spill] sm:$0xff] }
 0x240   :  { %v2573_v59 = vsel %vm2554_vm9, %v2508_v18, %v1596_v23  ;;  %v2444_v23 = vsel %vm2424_vm7, %v2381_v5, %v9001_v34  ;;  %v14361_v18 = vld [vmem:[#allocation143_spill] sm:$0xff] }
 0x241   :  { %1988 = vrot.lane.b32.xlu1 %v14348_v14, %s6941_s12  ;;  %2169 = vrot.lane.b32.xlu0 %v14349_v39, %s6942_s1  ;;  %v2509_v13 = vsel %vm2489_vm8, %v2444_v23, %v1406_v49  ;;  %v14368_v23 = vld [vmem:[#allocation49_spill] sm:$0xff] }
 0x243   :  { %v2152_v51 = vpop.permute.xlu1 %2151  ;;  %v1598_v63 = vpop.permute.xlu0 %1597 }
 0x244   :  { %v2767_v40 = vsel %vm2749_vm12, %v2702_v37, %v2152_v51  ;;  %v2574_v53 = vsel %vm2554_vm9, %v2509_v13, %v1598_v63  ;;  %v14369_v13 = vld [vmem:[#allocation52_spill] sm:$0xff] }
 0x245   :  { %1425 = vrot.lane.b32.xlu1 %v14348_v14, %s6938_s20  ;;  %1615 = vrot.lane.b32.xlu0 %v14349_v39, %s6939_s21  ;;  %v802_v14 = vrot.slane %v401_v50, 2 }
 0x246   :  { %6766 = vmatmul.mubr.msk.f32.gmra.mxu0 %vm2819_vm13, %v2767_v40  ;;  %v14355_v40 = vld [vmem:[#allocation142_spill] sm:$0xff] }
 0x247   :  { %v1788_v17 = vpop.permute.xlu1 %1787  ;;  %v9043_v32 = vpop.permute.xlu0 %1215  ;;  %v803_v34 = vsel %vm632_vm4, %v800_v7, %v802_v14  ;;  %v14370_v14 = vld [vmem:[#allocation144_spill] sm:$0xff] }
 0x248   :  { %v2638_v19 = vsel %vm2619_vm10, %v2573_v59, %v1788_v17  ;;  %v2320_v17 = vsel %vm2300_vm6, %v7279_v41, %v14355_v40  ;;  %v14359_v41 = vld [vmem:[#allocation5_spill] sm:$0xff]  ;;  %v14362_v59 = vld [vmem:[#allocation54_spill] sm:$0xff] }
 0x249   :  { %2171 = vrot.lane.b32.xlu1 %v14350_v21, %s6942_s1  ;;  %1617 = vrot.lane.b32.xlu0 %v14350_v21, %s6939_s21  ;;  %v14358_v21 = vld [vmem:[#allocation204_spill] sm:$0xff] }
 0x24a   :  { %v2382_v25 = vsel %vm2362_vm0, %v2320_v17, %v14358_v21 }
 0x24b   :  { %v1790_v1 = vpop.permute.xlu1 %1789  ;;  %v1971_v47 = vpop.permute.xlu0 %1970  ;;  %v2445_v0 = vsel %vm2424_vm7, %v2382_v25, %v9043_v32 }
 0x24c   :  { %v2703_v6 = vsel %vm2684_vm11, %v2638_v19, %v1971_v47  ;;  %v2639_v60 = vsel %vm2619_vm10, %v2574_v53, %v1790_v1  ;;  %v14363_v19 = vld [vmem:[#allocation125_spill] sm:$0xff] }
 0x24d   :  { %1807 = vrot.lane.b32.xlu1 %v369_v20, %s6940_s27  ;;  %1235 = vrot.lane.b32.xlu0 %v369_v20, %s6937_s25  ;;  %v14356_v20 = vmov 0.0  }
 0x24f   :  { %v9060_v38 = vpop.permute.xlu1 %1217  ;;  %v1408_v35 = vpop.permute.xlu0 %1407 }
 0x250   :  { %v2510_v45 = vsel %vm2489_vm8, %v2445_v0, %v1408_v35  ;;  %v2321_v35 = vsel %vm2300_vm6, %v14309_v55, %v14361_v18  ;;  %v14374_v0 = vld [vmem:[#allocation145_spill] sm:$0xff] }
 0x251   :  { %1809 = vrot.lane.b32.xlu1 %v211_v27, %s6940_s27  ;;  %1990 = vrot.lane.b32.xlu0 %v791_v3, %s6941_s12  ;;  %v2383_v7 = vsel %vm2362_vm0, %v2321_v35, %v14364_v28  ;;  %v14378_v28 = vld [vmem:[#allocation57_spill] sm:$0xff] }
 0x252   :  { %v2446_v42 = vsel %vm2424_vm7, %v2383_v7, %v9060_v38 }
 0x253   :  { %v1973_v48 = vpop.permute.xlu1 %1972  ;;  %v2154_v31 = vpop.permute.xlu0 %2153 }
 0x254   :  { %v2768_v43 = vsel %vm2749_vm12, %v2703_v6, %v2154_v31  ;;  %v2704_v39 = vsel %vm2684_vm11, %v2639_v60, %v1973_v48 }
 0x255   :  { %1237 = vrot.lane.b32.xlu1 %v211_v27, %s6937_s25  ;;  %1427 = vrot.lane.b32.xlu0 %v791_v3, %s6938_s20  ;;  %v14357_v27 = vld [vmem:[#allocation46_spill] sm:$0xff] }
 0x256   :  { %6768 = vmatprep.mubr.msk.f32.mxu0 %vm2819_vm13, %v2768_v43  ;;  %v14365_v43 = vld [vmem:[#allocation55_spill] sm:$0xff] }
 0x257   :  { %v1410_v52 = vpop.permute.xlu1 %1409  ;;  %v1600_v33 = vpop.permute.xlu0 %1599 }
 0x258   :  { %v2575_v22 = vsel %vm2554_vm9, %v2510_v45, %v1600_v33  ;;  %v2511_v31 = vsel %vm2489_vm8, %v2446_v42, %v1410_v52  ;;  %v14375_v45 = vld [vmem:[#allocation164_spill] sm:$0xff] }
 0x259   :  { %1992 = vrot.lane.b32.xlu1 %v793_v16, %s6941_s12  ;;  %2173 = vrot.lane.b32.xlu0 %v801_v29, %s6942_s1 }
 0x25b   :  { %v2156_v10 = vpop.permute.xlu1 %2155  ;;  %v1602_v37 = vpop.permute.xlu0 %1601 }
 0x25c   :  { %v2769_v51 = vsel %vm2749_vm12, %v2704_v39, %v2156_v10  ;;  %v2576_v55 = vsel %vm2554_vm9, %v2511_v31, %v1602_v37  ;;  %v2322_v39 = vsel %vm2300_vm6, %v7295_v58, %v14370_v14  ;;  %v14371_v10 = vld [vmem:[#allocation59_spill] sm:$0xff]  ;;  %v14372_v37 = vld [vmem:[#allocation205_spill] sm:$0xff]  ;;  %v14373_v58 = vld [vmem:[#allocation62_spill] sm:$0xff] }
 0x25d   :  { %1429 = vrot.lane.b32.xlu1 %v793_v16, %s6938_s20  ;;  %1619 = vrot.lane.b32.xlu0 %v801_v29, %s6939_s21  ;;  %v14367_v29 = vld [vmem:[#allocation163_spill] sm:$0xff] }
 0x25e   :  { %6769 = vmatmul.mubr.msk.f32.gmra.mxu0 %vm2819_vm13, %v2769_v51  ;;  %v2384_v51 = vsel %vm2362_vm0, %v2322_v39, %v14372_v37 }
 0x25f   :  { %v1792_v49 = vpop.permute.xlu1 %1791  ;;  %v1220_v63 = vpop.permute.xlu0 %1219 }
 0x260   :  { %v2640_v12 = vsel %vm2619_vm10, %v2575_v22, %v1792_v49  ;;  %v14376_v22 = vld [vmem:[#allocation206_spill] sm:$0xff] }
 0x261   :  { %2175 = vrot.lane.b32.xlu1 %v803_v34, %s6942_s1  ;;  %1621 = vrot.lane.b32.xlu0 %v803_v34, %s6939_s21  ;;  %v2447_v34 = vsel %vm2424_vm7, %v2384_v51, %v1220_v63  ;;  %v14385_v51 = vld [vmem:[#allocation166_spill] sm:$0xff] }
 0x263   :  { %v1794_v11 = vpop.permute.xlu1 %1793  ;;  %v1975_v4 = vpop.permute.xlu0 %1974 }
 0x264   :  { %v2705_v3 = vsel %vm2684_vm11, %v2640_v12, %v1975_v4  ;;  %v2641_v2 = vsel %vm2619_vm10, %v2576_v55, %v1794_v11  ;;  %v14380_v55 = vld [vmem:[#allocation146_spill] sm:$0xff] }
 0x265   :  { %1811 = vrot.lane.b32.xlu1 %v14356_v20, %s6940_s27  ;;  %1239 = vrot.lane.b32.xlu0 %v14357_v27, %s6937_s25 }
 0x267   :  { %v1222_v1 = vpop.permute.xlu1 %1221  ;;  %v1412_v47 = vpop.permute.xlu0 %1411 }
 0x268   :  { %v2512_v4 = vsel %vm2489_vm8, %v2447_v34, %v1412_v47  ;;  %v2323_v47 = vsel %vm2300_vm6, %v14314_v30, %v14374_v0  ;;  %v14377_v30 = vld [vmem:[#allocation58_spill] sm:$0xff]  ;;  %v14386_v34 = vld [vmem:[#allocation11_spill] sm:$0xff] }
 0x269   :  { %1994 = vrot.lane.b32.xlu1 %v14359_v41, %s6941_s12  ;;  %1241 = vrot.lane.b32.xlu0 %v14360_v62, %s6937_s25  ;;  %v2385_v41 = vsel %vm2362_vm0, %v2323_v47, %v14376_v22  ;;  %v14388_v47 = vld [vmem:[#allocation61_spill] sm:$0xff] }
 0x26a   :  { %v2448_v12 = vsel %vm2424_vm7, %v2385_v41, %v1222_v1  ;;  %v14389_v41 = vld [vmem:[#allocation60_spill] sm:$0xff] }
 0x26b   :  { %v1977_v15 = vpop.permute.xlu1 %1976  ;;  %v2158_v50 = vpop.permute.xlu0 %2157 }
 0x26c   :  { %v2770_v32 = vsel %vm2749_vm12, %v2705_v3, %v2158_v50  ;;  %v2706_v54 = vsel %vm2684_vm11, %v2641_v2, %v1977_v15  ;;  %v14382_v2 = vld [vmem:[#allocation207_spill] sm:$0xff] }
 0x26d   :  { %1431 = vrot.lane.b32.xlu1 %v14362_v59, %s6938_s20  ;;  %2177 = vrot.lane.b32.xlu0 %v14363_v19, %s6942_s1 }
 0x26e   :  { %6771 = vmatprep.mubr.msk.f32.mxu0 %vm2819_vm13, %v2770_v32 }
 0x26f   :  { %v1414_v6 = vpop.permute.xlu1 %1413  ;;  %v1604_v48 = vpop.permute.xlu0 %1603 }
 0x270   :  { %v2577_v40 = vsel %vm2554_vm9, %v2512_v4, %v1604_v48  ;;  %v2513_v50 = vsel %vm2489_vm8, %v2448_v12, %v1414_v6  ;;  %v14379_v6 = vld [vmem:[#allocation56_spill] sm:$0xff] }
 0x271   :  { %1433 = vrot.lane.b32.xlu1 %v14365_v43, %s6938_s20  ;;  %1623 = vrot.lane.b32.xlu0 %v14366_v26, %s6939_s21  ;;  %v2324_v43 = vsel %vm2300_vm6, %v7322_v36, %v14380_v55  ;;  %v14381_v26 = vld [vmem:[#allocation64_spill] sm:$0xff]  ;;  %v14383_v36 = vld [vmem:[#allocation65_spill] sm:$0xff] }
 0x273   :  { %v2160_v5 = vpop.permute.xlu1 %2159  ;;  %v1606_v16 = vpop.permute.xlu0 %1605 }
 0x274   :  { %v2771_v38 = vsel %vm2749_vm12, %v2706_v54, %v2160_v5  ;;  %v2578_v32 = vsel %vm2554_vm9, %v2513_v50, %v1606_v16  ;;  %v2386_v54 = vsel %vm2362_vm0, %v2324_v43, %v14382_v2 }
 0x275   :  { %1625 = vrot.lane.b32.xlu1 %v14367_v29, %s6939_s21  ;;  %1813 = vrot.lane.b32.xlu0 %v14368_v23, %s6940_s27 }
 0x276   :  { %6772 = vmatmul.mubr.msk.f32.gmra.mxu0 %vm2819_vm13, %v2771_v38 }
 0x277   :  { %v1796_v52 = vpop.permute.xlu1 %1795  ;;  %v1224_v33 = vpop.permute.xlu0 %1223 }
 0x278   :  { %v2642_v17 = vsel %vm2619_vm10, %v2577_v40, %v1796_v52  ;;  %v2449_v5 = vsel %vm2424_vm7, %v2386_v54, %v1224_v33  ;;  %v14395_v54 = vld [vmem:[#allocation169_spill] sm:$0xff] }
 0x279   :  { %1243 = vrot.lane.b32.xlu1 %v14368_v23, %s6937_s25  ;;  %1815 = vrot.lane.b32.xlu0 %v14369_v13, %s6940_s27 }
 0x27b   :  { %v1798_v53 = vpop.permute.xlu1 %1797  ;;  %v1979_v60 = vpop.permute.xlu0 %1978 }
 0x27c   :  { %v2707_v20 = vsel %vm2684_vm11, %v2642_v17, %v1979_v60  ;;  %v2643_v18 = vsel %vm2619_vm10, %v2578_v32, %v1798_v53  ;;  %v14391_v32 = vld [vmem:[#allocation69_spill] sm:$0xff] }
 0x27d   :  { %1996 = vrot.lane.b32.xlu1 %v14371_v10, %s6941_s12  ;;  %1245 = vrot.lane.b32.xlu0 %v14369_v13, %s6937_s25 }
 0x27f   :  { %v1226_v49 = vpop.permute.xlu1 %1225  ;;  %v1416_v11 = vpop.permute.xlu0 %1415 }
 0x280   :  { %v2514_v29 = vsel %vm2489_vm8, %v2449_v5, %v1416_v11  ;;  %v14396_v5 = vld [vmem:[#allocation209_spill] sm:$0xff] }
 0x281   :  { %1435 = vrot.lane.b32.xlu1 %v14371_v10, %s6938_s20  ;;  %1998 = vrot.lane.b32.xlu0 %v14373_v58, %s6941_s12  ;;  %v14384_v10 = vld [vmem:[#allocation147_spill] sm:$0xff] }
 0x282   :  { %v2325_v37 = vsel %vm2300_vm6, %v14319_v61, %v14384_v10  ;;  %v14387_v61 = vld [vmem:[#allocation63_spill] sm:$0xff] }
 0x283   :  { %v1981_v21 = vpop.permute.xlu1 %1980  ;;  %v2162_v25 = vpop.permute.xlu0 %2161  ;;  %v2387_v11 = vsel %vm2362_vm0, %v2325_v37, %v14386_v34  ;;  %v14398_v37 = vld [vmem:[#allocation66_spill] sm:$0xff] }
 0x284   :  { %v2772_v63 = vsel %vm2749_vm12, %v2707_v20, %v2162_v25  ;;  %v2708_v35 = vsel %vm2684_vm11, %v2643_v18, %v1981_v21  ;;  %v2450_v4 = vsel %vm2424_vm7, %v2387_v11, %v1226_v49  ;;  %v14399_v11 = vld [vmem:[#allocation67_spill] sm:$0xff] }
 0x285   :  { %2179 = vrot.lane.b32.xlu1 %v14375_v45, %s6942_s1  ;;  %1437 = vrot.lane.b32.xlu0 %v14373_v58, %s6938_s20 }
 0x286   :  { %6774 = vmatprep.mubr.msk.f32.mxu0 %vm2819_vm13, %v2772_v63 }
 0x287   :  { %v1418_v3 = vpop.permute.xlu1 %1417  ;;  %v1608_v15 = vpop.permute.xlu0 %1607 }
 0x288   :  { %v2579_v52 = vsel %vm2554_vm9, %v2514_v29, %v1608_v15  ;;  %v2515_v17 = vsel %vm2489_vm8, %v2450_v4, %v1418_v3  ;;  %v14390_v15 = vld [vmem:[#allocation148_spill] sm:$0xff] }
 0x289   :  { %1627 = vrot.lane.b32.xlu1 %v14375_v45, %s6939_s21  ;;  %2181 = vrot.lane.b32.xlu0 %v14377_v30, %s6942_s1  ;;  %v2326_v50 = vsel %vm2300_vm6, %v7348_v8, %v14390_v15  ;;  %v14393_v8 = vld [vmem:[#allocation73_spill] sm:$0xff] }
 0x28b   :  { %v2164_v59 = vpop.permute.xlu1 %2163  ;;  %v1610_v19 = vpop.permute.xlu0 %1609 }
 0x28c   :  { %v2773_v1 = vsel %vm2749_vm12, %v2708_v35, %v2164_v59  ;;  %v2580_v20 = vsel %vm2554_vm9, %v2515_v17, %v1610_v19 }
 0x28d   :  { %1629 = vrot.lane.b32.xlu1 %v14377_v30, %s6939_s21  ;;  %1817 = vrot.lane.b32.xlu0 %v14378_v28, %s6940_s27  ;;  %v14392_v30 = vld [vmem:[#allocation208_spill] sm:$0xff] }
 0x28e   :  { %6775 = vmatmul.mubr.msk.f32.gmra.mxu0 %vm2819_vm13, %v2773_v1  ;;  %v2388_v18 = vsel %vm2362_vm0, %v2326_v50, %v14392_v30 }
 0x28f   :  { %v1800_v7 = vpop.permute.xlu1 %1799  ;;  %v1228_v42 = vpop.permute.xlu0 %1227 }
 0x290   :  { %v2644_v53 = vsel %vm2619_vm10, %v2579_v52, %v1800_v7  ;;  %v2451_v35 = vsel %vm2424_vm7, %v2388_v18, %v1228_v42  ;;  %v14405_v18 = vld [vmem:[#allocation172_spill] sm:$0xff] }
 0x291   :  { %1247 = vrot.lane.b32.xlu1 %v14378_v28, %s6937_s25  ;;  %1819 = vrot.lane.b32.xlu0 %v14379_v6, %s6940_s27 }
 0x293   :  { %v1802_v48 = vpop.permute.xlu1 %1801  ;;  %v1983_v31 = vpop.permute.xlu0 %1982 }
 0x294   :  { %v2709_v60 = vsel %vm2684_vm11, %v2644_v53, %v1983_v31  ;;  %v2645_v21 = vsel %vm2619_vm10, %v2580_v20, %v1802_v48  ;;  %v14401_v20 = vld [vmem:[#allocation74_spill] sm:$0xff] }
 0x295   :  { %2000 = vrot.lane.b32.xlu1 %v14381_v26, %s6941_s12  ;;  %1249 = vrot.lane.b32.xlu0 %v14379_v6, %s6937_s25 }
 0x297   :  { %v1230_v16 = vpop.permute.xlu1 %1229  ;;  %v1420_v38 = vpop.permute.xlu0 %1419 }
 0x298   :  { %v2516_v1 = vsel %vm2489_vm8, %v2451_v35, %v1420_v38  ;;  %v14406_v35 = vld [vmem:[#allocation211_spill] sm:$0xff] }
 0x299   :  { %1439 = vrot.lane.b32.xlu1 %v14381_v26, %s6938_s20  ;;  %2002 = vrot.lane.b32.xlu0 %v14383_v36, %s6941_s12  ;;  %v14394_v26 = vld [vmem:[#allocation149_spill] sm:$0xff] }
 0x29a   :  { %v2327_v2 = vsel %vm2300_vm6, %v14324_v9, %v14394_v26  ;;  %v14397_v9 = vld [vmem:[#allocation68_spill] sm:$0xff] }
 0x29b   :  { %v1985_v14 = vpop.permute.xlu1 %1984  ;;  %v2166_v39 = vpop.permute.xlu0 %2165  ;;  %v2389_v38 = vsel %vm2362_vm0, %v2327_v2, %v14396_v5  ;;  %v14408_v2 = vld [vmem:[#allocation71_spill] sm:$0xff] }
 0x29c   :  { %v2774_v33 = vsel %vm2749_vm12, %v2709_v60, %v2166_v39  ;;  %v2710_v25 = vsel %vm2684_vm11, %v2645_v21, %v1985_v14  ;;  %v2452_v29 = vsel %vm2424_vm7, %v2389_v38, %v1230_v16  ;;  %v14409_v38 = vld [vmem:[#allocation155_spill] sm:$0xff] }
 0x29d   :  { %2183 = vrot.lane.b32.xlu1 %v14385_v51, %s6942_s1  ;;  %1441 = vrot.lane.b32.xlu0 %v14383_v36, %s6938_s20 }
 0x29e   :  { %6777 = vmatprep.mubr.msk.f32.mxu0 %vm2819_vm13, %v2774_v33 }
 0x29f   :  { %v1422_v40 = vpop.permute.xlu1 %1421  ;;  %v1612_v58 = vpop.permute.xlu0 %1611 }
 0x2a0   :  { %v2581_v7 = vsel %vm2554_vm9, %v2516_v1, %v1612_v58  ;;  %v2517_v53 = vsel %vm2489_vm8, %v2452_v29, %v1422_v40  ;;  %v14400_v58 = vld [vmem:[#allocation151_spill] sm:$0xff]  ;;  %v2330_v29 = vsel %vm2300_vm6, %v14342_v56, %v14409_v38 }
 0x2a1   :  { %1631 = vrot.lane.b32.xlu1 %v14385_v51, %s6939_s21  ;;  %2185 = vrot.lane.b32.xlu0 %v14387_v61, %s6942_s1  ;;  %v2328_v17 = vsel %vm2300_vm6, %v14332_v24, %v14400_v58  ;;  %v14403_v24 = vld [vmem:[#allocation75_spill] sm:$0xff] }
 0x2a2   :  { %v14414_v58 = vld [vmem:[#allocation79_spill] sm:$0xff] }
 0x2a3   :  { %v2168_v63 = vpop.permute.xlu1 %2167  ;;  %v1614_v0 = vpop.permute.xlu0 %1613 }
 0x2a4   :  { %v2775_v49 = vsel %vm2749_vm12, %v2710_v25, %v2168_v63  ;;  %v2582_v60 = vsel %vm2554_vm9, %v2517_v53, %v1614_v0  ;;  %v14411_v53 = vld [vmem:[#allocation70_spill] sm:$0xff] }
 0x2a5   :  { %1633 = vrot.lane.b32.xlu1 %v14387_v61, %s6939_s21  ;;  %1821 = vrot.lane.b32.xlu0 %v14388_v47, %s6940_s27  ;;  %v14402_v61 = vld [vmem:[#allocation210_spill] sm:$0xff] }
 0x2a6   :  { %6778 = vmatmul.mubr.msk.f32.gmra.mxu0 %vm2819_vm13, %v2775_v49  ;;  %v2390_v21 = vsel %vm2362_vm0, %v2328_v17, %v14402_v61 }
 0x2a7   :  { %v1804_v45 = vpop.permute.xlu1 %1803  ;;  %v1232_v22 = vpop.permute.xlu0 %1231 }
 0x2a8   :  { %v2646_v48 = vsel %vm2619_vm10, %v2581_v7, %v1804_v45  ;;  %v2453_v25 = vsel %vm2424_vm7, %v2390_v21, %v1232_v22 }
 0x2a9   :  { %1251 = vrot.lane.b32.xlu1 %v14388_v47, %s6937_s25  ;;  %1823 = vrot.lane.b32.xlu0 %v14389_v41, %s6940_s27 }
 0x2ab   :  { %v1806_v12 = vpop.permute.xlu1 %1805  ;;  %v1987_v3 = vpop.permute.xlu0 %1986 }
 0x2ac   :  { %v2711_v31 = vsel %vm2684_vm11, %v2646_v48, %v1987_v3  ;;  %v2647_v14 = vsel %vm2619_vm10, %v2582_v60, %v1806_v12  ;;  %v14412_v60 = vld [vmem:[#allocation212_spill] sm:$0xff] }
 0x2ad   :  { %2004 = vrot.lane.b32.xlu1 %v14391_v32, %s6941_s12  ;;  %1253 = vrot.lane.b32.xlu0 %v14389_v41, %s6937_s25 }
 0x2af   :  { %v1234_v59 = vpop.permute.xlu1 %1233  ;;  %v1424_v19 = vpop.permute.xlu0 %1423 }
 0x2b0   :  { %v2518_v49 = vsel %vm2489_vm8, %v2453_v25, %v1424_v19 }
 0x2b1   :  { %1443 = vrot.lane.b32.xlu1 %v14391_v32, %s6938_s20  ;;  %2006 = vrot.lane.b32.xlu0 %v14393_v8, %s6941_s12  ;;  %v14404_v32 = vld [vmem:[#allocation152_spill] sm:$0xff] }
 0x2b2   :  { %v2329_v30 = vsel %vm2300_vm6, %v14334_v46, %v14404_v32  ;;  %v14407_v46 = vld [vmem:[#allocation175_spill] sm:$0xff] }
 0x2b3   :  { %v1989_v55 = vpop.permute.xlu1 %1988  ;;  %v2170_v43 = vpop.permute.xlu0 %2169  ;;  %v2391_v19 = vsel %vm2362_vm0, %v2329_v30, %v14406_v35  ;;  %v14418_v30 = vld [vmem:[#allocation76_spill] sm:$0xff] }
 0x2b4   :  { %v2776_v42 = vsel %vm2749_vm12, %v2711_v31, %v2170_v43  ;;  %v2712_v39 = vsel %vm2684_vm11, %v2647_v14, %v1989_v55  ;;  %v2454_v1 = vsel %vm2424_vm7, %v2391_v19, %v1234_v59  ;;  %v14413_v14 = vld [vmem:[#allocation213_spill] sm:$0xff] }
 0x2b5   :  { %2187 = vrot.lane.b32.xlu1 %v14395_v54, %s6942_s1  ;;  %1445 = vrot.lane.b32.xlu0 %v14393_v8, %s6938_s20  ;;  %v14419_v19 = vld [vmem:[#allocation77_spill] sm:$0xff] }
 0x2b6   :  { %6780 = vmatprep.mubr.msk.f32.mxu0 %vm2819_vm13, %v2776_v42 }
 0x2b7   :  { %v1426_v52 = vpop.permute.xlu1 %1425  ;;  %v1616_v36 = vpop.permute.xlu0 %1615 }
 0x2b8   :  { %v2583_v45 = vsel %vm2554_vm9, %v2518_v49, %v1616_v36  ;;  %v2519_v48 = vsel %vm2489_vm8, %v2454_v1, %v1426_v52  ;;  %v14410_v52 = vld [vmem:[#allocation156_spill] sm:$0xff] }
 0x2b9   :  { %1635 = vrot.lane.b32.xlu1 %v14395_v54, %s6939_s21  ;;  %2189 = vrot.lane.b32.xlu0 %v14397_v9, %s6942_s1  ;;  %v2331_v36 = vsel %vm2300_vm6, %v14344_v44, %v14410_v52  ;;  %v14415_v49 = vld [vmem:[#allocation80_spill] sm:$0xff]  ;;  %v14421_v52 = vld [vmem:[#allocation87_spill] sm:$0xff] }
 0x2bb   :  { %v2172_v33 = vpop.permute.xlu1 %2171  ;;  %v1618_v10 = vpop.permute.xlu0 %1617 }
 0x2bc   :  { %v2777_v16 = vsel %vm2749_vm12, %v2712_v39, %v2172_v33  ;;  %v2584_v31 = vsel %vm2554_vm9, %v2519_v48, %v1618_v10  ;;  %v2393_v39 = vsel %vm2362_vm0, %v2331_v36, %v14413_v14 }
 0x2bd   :  { %1637 = vrot.lane.b32.xlu1 %v14397_v9, %s6939_s21  ;;  %1825 = vrot.lane.b32.xlu0 %v14398_v37, %s6940_s27  ;;  %v2392_v9 = vsel %vm2362_vm0, %v2330_v29, %v14412_v60 }
 0x2be   :  { %6781 = vmatmul.mubr.msk.f32.gmra.mxu0 %vm2819_vm13, %v2777_v16 }
 0x2bf   :  { %v1808_v51 = vpop.permute.xlu1 %1807  ;;  %v1236_v34 = vpop.permute.xlu0 %1235 }
 0x2c0   :  { %v2648_v12 = vsel %vm2619_vm10, %v2583_v45, %v1808_v51  ;;  %v2455_v33 = vsel %vm2424_vm7, %v2392_v9, %v1236_v34 }
 0x2c1   :  { %1255 = vrot.lane.b32.xlu1 %v14398_v37, %s6937_s25  ;;  %1827 = vrot.lane.b32.xlu0 %v14399_v11, %s6940_s27 }
 0x2c3   :  { %v1810_v4 = vpop.permute.xlu1 %1809  ;;  %v1991_v40 = vpop.permute.xlu0 %1990 }
 0x2c4   :  { %v2713_v3 = vsel %vm2684_vm11, %v2648_v12, %v1991_v40  ;;  %v2649_v55 = vsel %vm2619_vm10, %v2584_v31, %v1810_v4  ;;  %v14416_v12 = vld [vmem:[#allocation176_spill] sm:$0xff] }
 0x2c5   :  { %2008 = vrot.lane.b32.xlu1 %v14401_v20, %s6941_s12  ;;  %1257 = vrot.lane.b32.xlu0 %v14399_v11, %s6937_s25 }
 0x2c7   :  { %v1238_v63 = vpop.permute.xlu1 %1237  ;;  %v1428_v0 = vpop.permute.xlu0 %1427 }
 0x2c8   :  { %v2456_v56 = vsel %vm2424_vm7, %v2393_v39, %v1238_v63  ;;  %v2520_v44 = vsel %vm2489_vm8, %v2455_v33, %v1428_v0  ;;  %v14422_v39 = vld [vmem:[#allocation178_spill] sm:$0xff] }
 0x2c9   :  { %1447 = vrot.lane.b32.xlu1 %v14401_v20, %s6938_s20  ;;  %2010 = vrot.lane.b32.xlu0 %v14403_v24, %s6941_s12 }
 0x2cb   :  { %v1993_v15 = vpop.permute.xlu1 %1992  ;;  %v2174_v50 = vpop.permute.xlu0 %2173 }
 0x2cc   :  { %v2778_v22 = vsel %vm2749_vm12, %v2713_v3, %v2174_v50  ;;  %v2714_v43 = vsel %vm2684_vm11, %v2649_v55, %v1993_v15  ;;  %v14417_v50 = vld [vmem:[#allocation78_spill] sm:$0xff] }
 0x2cd   :  { %2191 = vrot.lane.b32.xlu1 %v14405_v18, %s6942_s1  ;;  %1449 = vrot.lane.b32.xlu0 %v14403_v24, %s6938_s20 }
 0x2ce   :  { %6783 = vmatprep.mubr.msk.f32.mxu0 %vm2819_vm13, %v2778_v22 }
 0x2cf   :  { %v1430_v7 = vpop.permute.xlu1 %1429  ;;  %v1620_v8 = vpop.permute.xlu0 %1619 }
 0x2d0   :  { %v2521_v51 = vsel %vm2489_vm8, %v2456_v56, %v1430_v7  ;;  %v2585_v4 = vsel %vm2554_vm9, %v2520_v44, %v1620_v8 }
 0x2d1   :  { %1639 = vrot.lane.b32.xlu1 %v14405_v18, %s6939_s21  ;;  %2193 = vrot.lane.b32.xlu0 %v14407_v46, %s6942_s1 }
 0x2d3   :  { %v2176_v42 = vpop.permute.xlu1 %2175  ;;  %v1622_v26 = vpop.permute.xlu0 %1621 }
 0x2d4   :  { %v2779_v59 = vsel %vm2749_vm12, %v2714_v43, %v2176_v42  ;;  %v2586_v40 = vsel %vm2554_vm9, %v2521_v51, %v1622_v26 }
 0x2d5   :  { %1641 = vrot.lane.b32.xlu1 %v14407_v46, %s6939_s21  ;;  %1829 = vrot.lane.b32.xlu0 %v14408_v2, %s6940_s27  ;;  %v14420_v46 = vld [vmem:[#allocation86_spill] sm:$0xff] }
 0x2d6   :  { %6784 = vmatmul.mubr.msk.f32.gmra.mxu0 %vm2819_vm13, %v2779_v59 }
 0x2d7   :  { %v9333_v54 = vpop.permute.xlu1 %1811  ;;  %v1240_v5 = vpop.permute.xlu0 %1239 }
 0x2d8   :  { %v2650_v34 = vsel %vm2619_vm10, %v2585_v4, %v9333_v54  ;;  %v2651_v17 = vsel %vm2619_vm10, %v2586_v40, %v9333_v54  ;;  %v2457_v1 = vsel %vm2424_vm7, %v8617_v57, %v1240_v5  ;;  %v14424_v4 = vld [vmem:[#allocation81_spill] sm:$0xff] }
 0x2d9   :  { %1259 = vrot.lane.b32.xlu1 %v14408_v2, %s6937_s25  ;;  %1831 = vrot.lane.b32.xlu0 %v14411_v53, %s6940_s27 }
 0x2db   :  { %v9351_v10 = vpop.permute.xlu1 %1994  ;;  %v1242_v16 = vpop.permute.xlu0 %1241 }
 0x2dc   :  { %v2715_v21 = vsel %vm2684_vm11, %v2650_v34, %v9351_v10  ;;  %v2716_v25 = vsel %vm2684_vm11, %v2651_v17, %v9351_v10  ;;  %v2458_v43 = vsel %vm2424_vm7, %v8617_v57, %v1242_v16  ;;  %v14423_v16 = vld [vmem:[#allocation83_spill] sm:$0xff]  ;;  %v14425_v34 = vld [vmem:[#allocation158_spill] sm:$0xff] }
 0x2dd   :  { %2012 = vrot.lane.b32.xlu1 %v14414_v58, %s6941_s12  ;;  %1261 = vrot.lane.b32.xlu0 %v14411_v53, %s6937_s25  ;;  %v2332_v17 = vsel %vm2300_vm6, %v14357_v27, %v14425_v34 }
 0x2df   :  { %v1432_v20 = vpop.permute.xlu1 %1431  ;;  %v9365_v61 = vpop.permute.xlu0 %2177 }
 0x2e0   :  { %v2780_v63 = vsel %vm2749_vm12, %v2715_v21, %v9365_v61  ;;  %v2781_v0 = vsel %vm2749_vm12, %v2716_v25, %v9365_v61  ;;  %v2522_v48 = vsel %vm2489_vm8, %v2457_v1, %v1432_v20  ;;  %v14426_v20 = vld [vmem:[#allocation82_spill] sm:$0xff] }
 0x2e1   :  { %1451 = vrot.lane.b32.xlu1 %v14414_v58, %s6938_s20  ;;  %2014 = vrot.lane.b32.xlu0 %v14415_v49, %s6941_s12  ;;  %v14427_v21 = vld [vmem:[#allocation214_spill] sm:$0xff] }
 0x2e2   :  { %6786 = vmatprep.mubr.msk.f32.mxu0 %vm2819_vm13, %v2780_v63  ;;  %v2394_v25 = vsel %vm2362_vm0, %v2332_v17, %v14427_v21  ;;  %v14438_v17 = vld [vmem:[#allocation162_spill] sm:$0xff] }
 0x2e3   :  { %6787 = vmatmul.mubr.msk.f32.gmra.mxu0 %vm2819_vm13, %v2781_v0  ;;  %v1434_v45 = vpop.permute.xlu1 %1433  ;;  %v1624_v24 = vpop.permute.xlu0 %1623  ;;  %v2335_v21 = vsel %vm2300_vm6, %v14369_v13, %v14438_v17 }
 0x2e4   :  { %v2587_v31 = vsel %vm2554_vm9, %v2522_v48, %v1624_v24  ;;  %v2523_v5 = vsel %vm2489_vm8, %v2458_v43, %v1434_v45  ;;  %v14428_v24 = vld [vmem:[#allocation159_spill] sm:$0xff] }
 0x2e5   :  { %2195 = vrot.lane.b32.xlu1 %v14416_v12, %s6942_s1  ;;  %1453 = vrot.lane.b32.xlu0 %v14415_v49, %s6938_s20 }
 0x2e7   :  { %v1626_v3 = vpop.permute.xlu1 %1625  ;;  %v1814_v15 = vpop.permute.xlu0 %1813 }
 0x2e8   :  { %v2652_v55 = vsel %vm2619_vm10, %v2587_v31, %v1814_v15  ;;  %v2588_v29 = vsel %vm2554_vm9, %v2523_v5, %v1626_v3  ;;  %v14429_v3 = vld [vmem:[#allocation89_spill] sm:$0xff]  ;;  %v14430_v15 = vld [vmem:[#allocation12_spill] sm:$0xff]  ;;  %v14431_v31 = vld [vmem:[#allocation90_spill] sm:$0xff] }
 0x2e9   :  { %1643 = vrot.lane.b32.xlu1 %v14416_v12, %s6939_s21  ;;  %2197 = vrot.lane.b32.xlu0 %v14417_v50, %s6942_s1  ;;  %v2333_v12 = vsel %vm2300_vm6, %v14360_v62, %v14428_v24 }
 0x2eb   :  { %v1244_v22 = vpop.permute.xlu1 %1243  ;;  %v1816_v32 = vpop.permute.xlu0 %1815 }
 0x2ec   :  { %v2653_v36 = vsel %vm2619_vm10, %v2588_v29, %v1816_v32  ;;  %v2459_v63 = vsel %vm2424_vm7, %v2394_v25, %v1244_v22  ;;  %v14439_v25 = vld [vmem:[#allocation94_spill] sm:$0xff] }
 0x2ed   :  { %1645 = vrot.lane.b32.xlu1 %v14417_v50, %s6939_s21  ;;  %1833 = vrot.lane.b32.xlu0 %v14418_v30, %s6940_s27  ;;  %v2395_v50 = vsel %vm2362_vm0, %v2333_v12, %v14430_v15  ;;  %v14441_v15 = vld [vmem:[#allocation95_spill] sm:$0xff] }
 0x2ef   :  { %v1997_v18 = vpop.permute.xlu1 %1996  ;;  %v1246_v35 = vpop.permute.xlu0 %1245 }
 0x2f0   :  { %v2717_v42 = vsel %vm2684_vm11, %v2652_v55, %v1997_v18  ;;  %v2460_v32 = vsel %vm2424_vm7, %v2395_v50, %v1246_v35 }
 0x2f1   :  { %1263 = vrot.lane.b32.xlu1 %v14418_v30, %s6937_s25  ;;  %1835 = vrot.lane.b32.xlu0 %v14419_v19, %s6940_s27 }
 0x2f3   :  { %v1436_v7 = vpop.permute.xlu1 %1435  ;;  %v1999_v8 = vpop.permute.xlu0 %1998 }
 0x2f4   :  { %v2718_v57 = vsel %vm2684_vm11, %v2653_v36, %v1999_v8  ;;  %v2524_v45 = vsel %vm2489_vm8, %v2459_v63, %v1436_v7  ;;  %v14434_v36 = vld [vmem:[#allocation85_spill] sm:$0xff]  ;;  %v14440_v63 = vld [vmem:[#allocation216_spill] sm:$0xff] }
 0x2f5   :  { %2016 = vrot.lane.b32.xlu1 %v14420_v46, %s6941_s12  ;;  %1265 = vrot.lane.b32.xlu0 %v14419_v19, %s6937_s25 }
 0x2f7   :  { %v2180_v26 = vpop.permute.xlu1 %2179  ;;  %v1438_v59 = vpop.permute.xlu0 %1437 }
 0x2f8   :  { %v2782_v38 = vsel %vm2749_vm12, %v2717_v42, %v2180_v26  ;;  %v2525_v62 = vsel %vm2489_vm8, %v2460_v32, %v1438_v59  ;;  %v14432_v26 = vld [vmem:[#allocation181_spill] sm:$0xff] }
 0x2f9   :  { %1455 = vrot.lane.b32.xlu1 %v14420_v46, %s6938_s20  ;;  %2018 = vrot.lane.b32.xlu0 %v14421_v52, %s6941_s12 }
 0x2fa   :  { %6789 = vmatprep.mubr.msk.f32.mxu0 %vm2819_vm13, %v2782_v38  ;;  %v14433_v38 = vld [vmem:[#allocation88_spill] sm:$0xff] }
 0x2fb   :  { %v1628_v60 = vpop.permute.xlu1 %1627  ;;  %v2182_v9 = vpop.permute.xlu0 %2181 }
 0x2fc   :  { %v2783_v14 = vsel %vm2749_vm12, %v2718_v57, %v2182_v9  ;;  %v2589_v27 = vsel %vm2554_vm9, %v2524_v45, %v1628_v60  ;;  %v14435_v9 = vld [vmem:[#allocation161_spill] sm:$0xff] }
 0x2fd   :  { %2199 = vrot.lane.b32.xlu1 %v14422_v39, %s6942_s1  ;;  %1457 = vrot.lane.b32.xlu0 %v14421_v52, %s6938_s20 }
 0x2fe   :  { %6790 = vmatmul.mubr.msk.f32.gmra.mxu0 %vm2819_vm13, %v2783_v14  ;;  %v2334_v14 = vsel %vm2300_vm6, %v14368_v23, %v14435_v9 }
 0x2ff   :  { %v1630_v33 = vpop.permute.xlu1 %1629  ;;  %v1818_v56 = vpop.permute.xlu0 %1817 }
 0x300   :  { %v2654_v22 = vsel %vm2619_vm10, %v2589_v27, %v1818_v56  ;;  %v2590_v48 = vsel %vm2554_vm9, %v2525_v62, %v1630_v33  ;;  %v14437_v33 = vld [vmem:[#allocation215_spill] sm:$0xff] }
 0x301   :  { %1647 = vrot.lane.b32.xlu1 %v14422_v39, %s6939_s21  ;;  %2201 = vrot.lane.b32.xlu0 %v14423_v16, %s6942_s1  ;;  %v14436_v39 = vld [vmem:[#allocation84_spill] sm:$0xff]  ;;  %v2396_v56 = vsel %vm2362_vm0, %v2334_v14, %v14437_v33  ;;  %v14448_v14 = vld [vmem:[#allocation165_spill] sm:$0xff] }
 0x302   :  { %v2337_v33 = vsel %vm2300_vm6, %v14379_v6, %v14448_v14 }
 0x303   :  { %v1248_v44 = vpop.permute.xlu1 %1247  ;;  %v1820_v51 = vpop.permute.xlu0 %1819 }
 0x304   :  { %v2655_v46 = vsel %vm2619_vm10, %v2590_v48, %v1820_v51 }
 0x305   :  { %1649 = vrot.lane.b32.xlu1 %v14423_v16, %s6939_s21  ;;  %1837 = vrot.lane.b32.xlu0 %v14424_v4, %s6940_s27  ;;  %v2461_v16 = vsel %vm2424_vm7, %v2396_v56, %v1248_v44  ;;  %v14449_v56 = vld [vmem:[#allocation99_spill] sm:$0xff] }
 0x307   :  { %v2001_v40 = vpop.permute.xlu1 %2000  ;;  %v1250_v58 = vpop.permute.xlu0 %1249 }
 0x308   :  { %v2719_v18 = vsel %vm2684_vm11, %v2654_v22, %v2001_v40 }
 0x309   :  { %1267 = vrot.lane.b32.xlu1 %v14424_v4, %s6937_s25  ;;  %1839 = vrot.lane.b32.xlu0 %v14426_v20, %s6940_s27 }
 0x30b   :  { %v1440_v0 = vpop.permute.xlu1 %1439  ;;  %v2003_v49 = vpop.permute.xlu0 %2002 }
 0x30c   :  { %v2720_v35 = vsel %vm2684_vm11, %v2655_v46, %v2003_v49  ;;  %v2526_v34 = vsel %vm2489_vm8, %v2461_v16, %v1440_v0  ;;  %v2397_v49 = vsel %vm2362_vm0, %v2335_v21, %v14440_v63  ;;  %v14444_v46 = vld [vmem:[#allocation91_spill] sm:$0xff]  ;;  %v14450_v16 = vld [vmem:[#allocation13_spill] sm:$0xff]  ;;  %v14451_v63 = vld [vmem:[#allocation100_spill] sm:$0xff] }
 0x30d   :  { %2020 = vrot.lane.b32.xlu1 %v14429_v3, %s6941_s12  ;;  %1269 = vrot.lane.b32.xlu0 %v14426_v20, %s6937_s25  ;;  %v2462_v45 = vsel %vm2424_vm7, %v2397_v49, %v1250_v58 }
 0x30f   :  { %v2184_v1 = vpop.permute.xlu1 %2183  ;;  %v1442_v7 = vpop.permute.xlu0 %1441 }
 0x310   :  { %v2784_v8 = vsel %vm2749_vm12, %v2719_v18, %v2184_v1  ;;  %v2527_v13 = vsel %vm2489_vm8, %v2462_v45, %v1442_v7  ;;  %v14442_v1 = vld [vmem:[#allocation184_spill] sm:$0xff] }
 0x311   :  { %1459 = vrot.lane.b32.xlu1 %v14429_v3, %s6938_s20  ;;  %2022 = vrot.lane.b32.xlu0 %v14431_v31, %s6941_s12 }
 0x312   :  { %6792 = vmatprep.mubr.msk.f32.mxu0 %vm2819_vm13, %v2784_v8  ;;  %v14443_v8 = vld [vmem:[#allocation187_spill] sm:$0xff] }
 0x313   :  { %v1632_v55 = vpop.permute.xlu1 %1631  ;;  %v2186_v43 = vpop.permute.xlu0 %2185 }
 0x314   :  { %v2785_v42 = vsel %vm2749_vm12, %v2720_v35, %v2186_v43  ;;  %v2591_v23 = vsel %vm2554_vm9, %v2526_v34, %v1632_v55  ;;  %v14445_v43 = vld [vmem:[#allocation53_spill] sm:$0xff] }
 0x315   :  { %2203 = vrot.lane.b32.xlu1 %v14432_v26, %s6942_s1  ;;  %1461 = vrot.lane.b32.xlu0 %v14431_v31, %s6938_s20 }
 0x316   :  { %6793 = vmatmul.mubr.msk.f32.gmra.mxu0 %vm2819_vm13, %v2785_v42  ;;  %v2336_v42 = vsel %vm2300_vm6, %v14378_v28, %v14445_v43 }
 0x317   :  { %v1634_v59 = vpop.permute.xlu1 %1633  ;;  %v1822_v5 = vpop.permute.xlu0 %1821 }
 0x318   :  { %v2656_v44 = vsel %vm2619_vm10, %v2591_v23, %v1822_v5  ;;  %v2592_v3 = vsel %vm2554_vm9, %v2527_v13, %v1634_v59  ;;  %v14447_v59 = vld [vmem:[#allocation217_spill] sm:$0xff] }
 0x319   :  { %1651 = vrot.lane.b32.xlu1 %v14432_v26, %s6939_s21  ;;  %2205 = vrot.lane.b32.xlu0 %v14433_v38, %s6942_s1  ;;  %v14446_v26 = vld [vmem:[#allocation92_spill] sm:$0xff]  ;;  %v2398_v5 = vsel %vm2362_vm0, %v2336_v42, %v14447_v59 }
 0x31a   :  { %v14458_v42 = vld [vmem:[#allocation168_spill] sm:$0xff] }
 0x31b   :  { %v1252_v29 = vpop.permute.xlu1 %1251  ;;  %v1824_v52 = vpop.permute.xlu0 %1823  ;;  %v2339_v59 = vsel %vm2300_vm6, %v14389_v41, %v14458_v42 }
 0x31c   :  { %v2657_v50 = vsel %vm2619_vm10, %v2592_v3, %v1824_v52 }
 0x31d   :  { %1653 = vrot.lane.b32.xlu1 %v14433_v38, %s6939_s21  ;;  %1841 = vrot.lane.b32.xlu0 %v14434_v36, %s6940_s27  ;;  %v2463_v38 = vsel %vm2424_vm7, %v2398_v5, %v1252_v29  ;;  %v14459_v5 = vld [vmem:[#allocation104_spill] sm:$0xff] }
 0x31f   :  { %v2005_v57 = vpop.permute.xlu1 %2004  ;;  %v1254_v60 = vpop.permute.xlu0 %1253 }
 0x320   :  { %v2721_v0 = vsel %vm2684_vm11, %v2656_v44, %v2005_v57 }
 0x321   :  { %1271 = vrot.lane.b32.xlu1 %v14434_v36, %s6937_s25  ;;  %1843 = vrot.lane.b32.xlu0 %v14436_v39, %s6940_s27 }
 0x323   :  { %v1444_v51 = vpop.permute.xlu1 %1443  ;;  %v2007_v40 = vpop.permute.xlu0 %2006 }
 0x324   :  { %v2722_v58 = vsel %vm2684_vm11, %v2657_v50, %v2007_v40  ;;  %v2528_v9 = vsel %vm2489_vm8, %v2463_v38, %v1444_v51  ;;  %v2399_v40 = vsel %vm2362_vm0, %v2337_v33, %v14450_v16  ;;  %v14454_v50 = vld [vmem:[#allocation97_spill] sm:$0xff]  ;;  %v14460_v38 = vld [vmem:[#allocation219_spill] sm:$0xff] }
 0x325   :  { %2024 = vrot.lane.b32.xlu1 %v14439_v25, %s6941_s12  ;;  %1273 = vrot.lane.b32.xlu0 %v14436_v39, %s6937_s25  ;;  %v2464_v34 = vsel %vm2424_vm7, %v2399_v40, %v1254_v60  ;;  %v14461_v16 = vld [vmem:[#allocation105_spill] sm:$0xff] }
 0x327   :  { %v2188_v24 = vpop.permute.xlu1 %2187  ;;  %v1446_v12 = vpop.permute.xlu0 %1445 }
 0x328   :  { %v2786_v27 = vsel %vm2749_vm12, %v2721_v0, %v2188_v24  ;;  %v2529_v6 = vsel %vm2489_vm8, %v2464_v34, %v1446_v12  ;;  %v14452_v24 = vld [vmem:[#allocation188_spill] sm:$0xff] }
 0x329   :  { %1463 = vrot.lane.b32.xlu1 %v14439_v25, %s6938_s20  ;;  %2026 = vrot.lane.b32.xlu0 %v14441_v15, %s6941_s12 }
 0x32a   :  { %6795 = vmatprep.mubr.msk.f32.mxu0 %vm2819_vm13, %v2786_v27  ;;  %v14453_v27 = vld [vmem:[#allocation98_spill] sm:$0xff] }
 0x32b   :  { %v1636_v22 = vpop.permute.xlu1 %1635  ;;  %v2190_v32 = vpop.permute.xlu0 %2189 }
 0x32c   :  { %v2787_v18 = vsel %vm2749_vm12, %v2722_v58, %v2190_v32  ;;  %v2593_v28 = vsel %vm2554_vm9, %v2528_v9, %v1636_v22  ;;  %v14455_v32 = vld [vmem:[#allocation167_spill] sm:$0xff] }
 0x32d   :  { %2207 = vrot.lane.b32.xlu1 %v14442_v1, %s6942_s1  ;;  %1465 = vrot.lane.b32.xlu0 %v14441_v15, %s6938_s20 }
 0x32e   :  { %6796 = vmatmul.mubr.msk.f32.gmra.mxu0 %vm2819_vm13, %v2787_v18  ;;  %v2338_v18 = vsel %vm2300_vm6, %v14388_v47, %v14455_v32 }
 0x32f   :  { %v1638_v7 = vpop.permute.xlu1 %1637  ;;  %v1826_v62 = vpop.permute.xlu0 %1825 }
 0x330   :  { %v2658_v29 = vsel %vm2619_vm10, %v2593_v28, %v1826_v62  ;;  %v2594_v25 = vsel %vm2554_vm9, %v2529_v6, %v1638_v7  ;;  %v14457_v7 = vld [vmem:[#allocation218_spill] sm:$0xff] }
 0x331   :  { %1655 = vrot.lane.b32.xlu1 %v14442_v1, %s6939_s21  ;;  %2209 = vrot.lane.b32.xlu0 %v14443_v8, %s6942_s1  ;;  %v14456_v1 = vld [vmem:[#allocation96_spill] sm:$0xff]  ;;  %v2400_v62 = vsel %vm2362_vm0, %v2338_v18, %v14457_v7  ;;  %v14468_v18 = vld [vmem:[#allocation171_spill] sm:$0xff] }
 0x332   :  { %v2341_v7 = vsel %vm2300_vm6, %v14399_v11, %v14468_v18 }
 0x333   :  { %v1256_v48 = vpop.permute.xlu1 %1255  ;;  %v1828_v31 = vpop.permute.xlu0 %1827 }
 0x334   :  { %v2659_v49 = vsel %vm2619_vm10, %v2594_v25, %v1828_v31 }
 0x335   :  { %1657 = vrot.lane.b32.xlu1 %v14443_v8, %s6939_s21  ;;  %1845 = vrot.lane.b32.xlu0 %v14444_v46, %s6940_s27  ;;  %v2465_v8 = vsel %vm2424_vm7, %v2400_v62, %v1256_v48  ;;  %v14469_v62 = vld [vmem:[#allocation109_spill] sm:$0xff] }
 0x337   :  { %v2009_v35 = vpop.permute.xlu1 %2008  ;;  %v1258_v55 = vpop.permute.xlu0 %1257 }
 0x338   :  { %v2723_v51 = vsel %vm2684_vm11, %v2658_v29, %v2009_v35 }
 0x339   :  { %1275 = vrot.lane.b32.xlu1 %v14444_v46, %s6937_s25  ;;  %1847 = vrot.lane.b32.xlu0 %v14446_v26, %s6940_s27 }
 0x33b   :  { %v1448_v52 = vpop.permute.xlu1 %1447  ;;  %v2011_v57 = vpop.permute.xlu0 %2010 }
 0x33c   :  { %v2724_v60 = vsel %vm2684_vm11, %v2659_v49, %v2011_v57  ;;  %v2530_v43 = vsel %vm2489_vm8, %v2465_v8, %v1448_v52  ;;  %v2401_v57 = vsel %vm2362_vm0, %v2339_v59, %v14460_v38  ;;  %v14464_v49 = vld [vmem:[#allocation102_spill] sm:$0xff]  ;;  %v14470_v8 = vld [vmem:[#allocation221_spill] sm:$0xff] }
 0x33d   :  { %2028 = vrot.lane.b32.xlu1 %v14449_v56, %s6941_s12  ;;  %1277 = vrot.lane.b32.xlu0 %v14446_v26, %s6937_s25  ;;  %v2466_v9 = vsel %vm2424_vm7, %v2401_v57, %v1258_v55  ;;  %v14471_v38 = vld [vmem:[#allocation110_spill] sm:$0xff] }
 0x33f   :  { %v2192_v17 = vpop.permute.xlu1 %2191  ;;  %v1450_v21 = vpop.permute.xlu0 %1449 }
 0x340   :  { %v2788_v23 = vsel %vm2749_vm12, %v2723_v51, %v2192_v17  ;;  %v2531_v41 = vsel %vm2489_vm8, %v2466_v9, %v1450_v21  ;;  %v14462_v17 = vld [vmem:[#allocation190_spill] sm:$0xff] }
 0x341   :  { %1467 = vrot.lane.b32.xlu1 %v14449_v56, %s6938_s20  ;;  %2030 = vrot.lane.b32.xlu0 %v14451_v63, %s6941_s12 }
 0x342   :  { %6798 = vmatprep.mubr.msk.f32.mxu0 %vm2819_vm13, %v2788_v23  ;;  %v14463_v23 = vld [vmem:[#allocation103_spill] sm:$0xff] }
 0x343   :  { %v1640_v44 = vpop.permute.xlu1 %1639  ;;  %v2194_v45 = vpop.permute.xlu0 %2193 }
 0x344   :  { %v2789_v0 = vsel %vm2749_vm12, %v2724_v60, %v2194_v45  ;;  %v2595_v47 = vsel %vm2554_vm9, %v2530_v43, %v1640_v44  ;;  %v14465_v45 = vld [vmem:[#allocation170_spill] sm:$0xff] }
 0x345   :  { %2211 = vrot.lane.b32.xlu1 %v14452_v24, %s6942_s1  ;;  %1469 = vrot.lane.b32.xlu0 %v14451_v63, %s6938_s20 }
 0x346   :  { %6799 = vmatmul.mubr.msk.f32.gmra.mxu0 %vm2819_vm13, %v2789_v0  ;;  %v2340_v0 = vsel %vm2300_vm6, %v14398_v37, %v14465_v45 }
 0x347   :  { %v1642_v12 = vpop.permute.xlu1 %1641  ;;  %v1830_v13 = vpop.permute.xlu0 %1829 }
 0x348   :  { %v2660_v48 = vsel %vm2619_vm10, %v2595_v47, %v1830_v13  ;;  %v2596_v56 = vsel %vm2554_vm9, %v2531_v41, %v1642_v12  ;;  %v14467_v12 = vld [vmem:[#allocation220_spill] sm:$0xff] }
 0x349   :  { %1659 = vrot.lane.b32.xlu1 %v14452_v24, %s6939_s21  ;;  %2213 = vrot.lane.b32.xlu0 %v14453_v27, %s6942_s1  ;;  %v14466_v24 = vld [vmem:[#allocation101_spill] sm:$0xff]  ;;  %v2402_v13 = vsel %vm2362_vm0, %v2340_v0, %v14467_v12  ;;  %v14478_v0 = vld [vmem:[#allocation174_spill] sm:$0xff] }
 0x34a   :  { %v2343_v12 = vsel %vm2300_vm6, %v14411_v53, %v14478_v0 }
 0x34b   :  { %v1260_v3 = vpop.permute.xlu1 %1259  ;;  %v1832_v15 = vpop.permute.xlu0 %1831 }
 0x34c   :  { %v2661_v40 = vsel %vm2619_vm10, %v2596_v56, %v1832_v15 }
 0x34d   :  { %1661 = vrot.lane.b32.xlu1 %v14453_v27, %s6939_s21  ;;  %1849 = vrot.lane.b32.xlu0 %v14454_v50, %s6940_s27  ;;  %v2467_v27 = vsel %vm2424_vm7, %v2402_v13, %v1260_v3  ;;  %v14479_v13 = vld [vmem:[#allocation114_spill] sm:$0xff] }
 0x34f   :  { %v2013_v58 = vpop.permute.xlu1 %2012  ;;  %v1262_v22 = vpop.permute.xlu0 %1261 }
 0x350   :  { %v2725_v52 = vsel %vm2684_vm11, %v2660_v48, %v2013_v58 }
 0x351   :  { %1279 = vrot.lane.b32.xlu1 %v14454_v50, %s6937_s25  ;;  %1851 = vrot.lane.b32.xlu0 %v14456_v1, %s6940_s27 }
 0x353   :  { %v1452_v31 = vpop.permute.xlu1 %1451  ;;  %v2015_v35 = vpop.permute.xlu0 %2014 }
 0x354   :  { %v2726_v55 = vsel %vm2684_vm11, %v2661_v40, %v2015_v35  ;;  %v2532_v32 = vsel %vm2489_vm8, %v2467_v27, %v1452_v31  ;;  %v2403_v35 = vsel %vm2362_vm0, %v2341_v7, %v14470_v8  ;;  %v14474_v40 = vld [vmem:[#allocation106_spill] sm:$0xff]  ;;  %v14480_v27 = vld [vmem:[#allocation223_spill] sm:$0xff] }
 0x355   :  { %2032 = vrot.lane.b32.xlu1 %v14459_v5, %s6941_s12  ;;  %1281 = vrot.lane.b32.xlu0 %v14456_v1, %s6937_s25  ;;  %v2468_v43 = vsel %vm2424_vm7, %v2403_v35, %v1262_v22  ;;  %v14481_v8 = vld [vmem:[#allocation115_spill] sm:$0xff] }
 0x357   :  { %v2196_v14 = vpop.permute.xlu1 %2195  ;;  %v1454_v33 = vpop.permute.xlu0 %1453 }
 0x358   :  { %v2790_v28 = vsel %vm2749_vm12, %v2725_v52, %v2196_v14  ;;  %v2533_v11 = vsel %vm2489_vm8, %v2468_v43, %v1454_v33  ;;  %v14472_v14 = vld [vmem:[#allocation193_spill] sm:$0xff] }
 0x359   :  { %1471 = vrot.lane.b32.xlu1 %v14459_v5, %s6938_s20  ;;  %2034 = vrot.lane.b32.xlu0 %v14461_v16, %s6941_s12 }
 0x35a   :  { %6801 = vmatprep.mubr.msk.f32.mxu0 %vm2819_vm13, %v2790_v28  ;;  %v14473_v28 = vld [vmem:[#allocation196_spill] sm:$0xff] }
 0x35b   :  { %v1644_v29 = vpop.permute.xlu1 %1643  ;;  %v2198_v34 = vpop.permute.xlu0 %2197 }
 0x35c   :  { %v2791_v51 = vsel %vm2749_vm12, %v2726_v55, %v2198_v34  ;;  %v2597_v37 = vsel %vm2554_vm9, %v2532_v32, %v1644_v29  ;;  %v14475_v34 = vld [vmem:[#allocation173_spill] sm:$0xff] }
 0x35d   :  { %2215 = vrot.lane.b32.xlu1 %v14462_v17, %s6942_s1  ;;  %1473 = vrot.lane.b32.xlu0 %v14461_v16, %s6938_s20 }
 0x35e   :  { %6802 = vmatmul.mubr.msk.f32.gmra.mxu0 %vm2819_vm13, %v2791_v51  ;;  %v2342_v51 = vsel %vm2300_vm6, %v14408_v2, %v14475_v34 }
 0x35f   :  { %v1646_v21 = vpop.permute.xlu1 %1645  ;;  %v1834_v6 = vpop.permute.xlu0 %1833 }
 0x360   :  { %v2662_v3 = vsel %vm2619_vm10, %v2597_v37, %v1834_v6  ;;  %v2598_v5 = vsel %vm2554_vm9, %v2533_v11, %v1646_v21  ;;  %v14477_v21 = vld [vmem:[#allocation222_spill] sm:$0xff]  ;;  %v14483_v11 = vld [vmem:[#allocation197_spill] sm:$0xff] }
 0x361   :  { %1663 = vrot.lane.b32.xlu1 %v14462_v17, %s6939_s21  ;;  %2217 = vrot.lane.b32.xlu0 %v14463_v23, %s6942_s1  ;;  %v14476_v17 = vld [vmem:[#allocation107_spill] sm:$0xff]  ;;  %v2404_v6 = vsel %vm2362_vm0, %v2342_v51, %v14477_v21 }
 0x363   :  { %v1264_v25 = vpop.permute.xlu1 %1263  ;;  %v1836_v63 = vpop.permute.xlu0 %1835 }
 0x364   :  { %v2663_v57 = vsel %vm2619_vm10, %v2598_v5, %v1836_v63 }
 0x365   :  { %1665 = vrot.lane.b32.xlu1 %v14463_v23, %s6939_s21  ;;  %1853 = vrot.lane.b32.xlu0 %v14464_v49, %s6940_s27  ;;  %v2469_v23 = vsel %vm2424_vm7, %v2404_v6, %v1264_v25 }
 0x367   :  { %v2017_v60 = vpop.permute.xlu1 %2016  ;;  %v1266_v44 = vpop.permute.xlu0 %1265 }
 0x368   :  { %v2727_v31 = vsel %vm2684_vm11, %v2662_v3, %v2017_v60 }
 0x369   :  { %1283 = vrot.lane.b32.xlu1 %v14464_v49, %s6937_s25  ;;  %1855 = vrot.lane.b32.xlu0 %v14466_v24, %s6940_s27 }
 0x36b   :  { %v1456_v15 = vpop.permute.xlu1 %1455  ;;  %v2019_v58 = vpop.permute.xlu0 %2018 }
 0x36c   :  { %v2728_v22 = vsel %vm2684_vm11, %v2663_v57, %v2019_v58  ;;  %v2534_v45 = vsel %vm2489_vm8, %v2469_v23, %v1456_v15  ;;  %v2405_v58 = vsel %vm2362_vm0, %v2343_v12, %v14480_v27  ;;  %v14488_v23 = vld [vmem:[#allocation111_spill] sm:$0xff] }
 0x36d   :  { %2036 = vrot.lane.b32.xlu1 %v14469_v62, %s6941_s12  ;;  %1285 = vrot.lane.b32.xlu0 %v14466_v24, %s6937_s25  ;;  %v2470_v32 = vsel %vm2424_vm7, %v2405_v58, %v1266_v44  ;;  %v14482_v44 = vld [vmem:[#allocation108_spill] sm:$0xff]  ;;  %v776_v12 = vrot.slane %v14488_v23, 2 }
 0x36e   :  { %v773_v3 = vrot.slane %v14482_v44, 2 }
 0x36f   :  { %v2200_v42 = vpop.permute.xlu1 %2199  ;;  %v1458_v59 = vpop.permute.xlu0 %1457 }
 0x370   :  { %v2792_v47 = vsel %vm2749_vm12, %v2727_v31, %v2200_v42  ;;  %v2535_v53 = vsel %vm2489_vm8, %v2470_v32, %v1458_v59 }
 0x371   :  { %1475 = vrot.lane.b32.xlu1 %v14469_v62, %s6938_s20  ;;  %2038 = vrot.lane.b32.xlu0 %v14471_v38, %s6941_s12 }
 0x372   :  { %6804 = vmatprep.mubr.msk.f32.mxu0 %vm2819_vm13, %v2792_v47  ;;  %v14484_v47 = vrot.slane %v14476_v17, 2 }
 0x373   :  { %v1648_v48 = vpop.permute.xlu1 %1647  ;;  %v2202_v9 = vpop.permute.xlu0 %2201 }
 0x374   :  { %v2793_v52 = vsel %vm2749_vm12, %v2728_v22, %v2202_v9  ;;  %v2599_v2 = vsel %vm2554_vm9, %v2534_v45, %v1648_v48  ;;  %v774_v5 = vsel %vm632_vm4, %v14484_v47, %v773_v3  ;;  %v14485_v9 = vld [vmem:[#allocation112_spill] sm:$0xff] }
 0x375   :  { %2219 = vrot.lane.b32.xlu1 %v14472_v14, %s6942_s1  ;;  %1477 = vrot.lane.b32.xlu0 %v14471_v38, %s6938_s20 }
 0x376   :  { %6805 = vmatmul.mubr.msk.f32.gmra.mxu0 %vm2819_vm13, %v2793_v52 }
 0x377   :  { %v1650_v33 = vpop.permute.xlu1 %1649  ;;  %v1838_v41 = vpop.permute.xlu0 %1837 }
 0x378   :  { %v2664_v25 = vsel %vm2619_vm10, %v2599_v2, %v1838_v41  ;;  %v2600_v62 = vsel %vm2554_vm9, %v2535_v53, %v1650_v33  ;;  %v14486_v33 = vld [vmem:[#allocation72_spill] sm:$0xff]  ;;  %v14491_v2 = vld [vmem:[#allocation14_spill] sm:$0xff] }
 0x379   :  { %1667 = vrot.lane.b32.xlu1 %v14472_v14, %s6939_s21  ;;  %2221 = vrot.lane.b32.xlu0 %v14473_v28, %s6942_s1  ;;  %v2344_v41 = vsel %vm2300_vm6, %v14418_v30, %v14486_v33  ;;  %v14489_v30 = vld [vmem:[#allocation119_spill] sm:$0xff] }
 0x37b   :  { %v1268_v56 = vpop.permute.xlu1 %1267  ;;  %v1840_v16 = vpop.permute.xlu0 %1839 }
 0x37c   :  { %v2665_v35 = vsel %vm2619_vm10, %v2600_v62, %v1840_v16 }
 0x37d   :  { %1669 = vrot.lane.b32.xlu1 %v14473_v28, %s6939_s21  ;;  %1857 = vrot.lane.b32.xlu0 %v14474_v40, %s6940_s27  ;;  %v14487_v28 = vld [vmem:[#allocation224_spill] sm:$0xff] }
 0x37e   :  { %v2406_v16 = vsel %vm2362_vm0, %v2344_v41, %v14487_v28 }
 0x37f   :  { %v2021_v55 = vpop.permute.xlu1 %2020  ;;  %v9673_v29 = vpop.permute.xlu0 %1269 }
 0x380   :  { %v2729_v15 = vsel %vm2684_vm11, %v2664_v25, %v2021_v55  ;;  %v2471_v55 = vsel %vm2424_vm7, %v2406_v16, %v1268_v56  ;;  %v775_v56 = vrot.slane %v14485_v9, 2 }
 0x381   :  { %1287 = vrot.lane.b32.xlu1 %v14474_v40, %s6937_s25  ;;  %1859 = vrot.lane.b32.xlu0 %v14476_v17, %s6940_s27 }
 0x383   :  { %v1460_v63 = vpop.permute.xlu1 %1459  ;;  %v2023_v60 = vpop.permute.xlu0 %2022 }
 0x384   :  { %v2730_v43 = vsel %vm2684_vm11, %v2665_v35, %v2023_v60  ;;  %v2536_v21 = vsel %vm2489_vm8, %v2471_v55, %v1460_v63  ;;  %v14490_v60 = vld [vmem:[#allocation177_spill] sm:$0xff] }
 0x385   :  { %2040 = vrot.lane.b32.xlu1 %v14479_v13, %s6941_s12  ;;  %1289 = vrot.lane.b32.xlu0 %v14476_v17, %s6937_s25  ;;  %v2345_v45 = vsel %vm2300_vm6, %v14419_v19, %v14490_v60  ;;  %v14493_v35 = vld [vmem:[#allocation113_spill] sm:$0xff] }
 0x386   :  { %v2407_v63 = vsel %vm2362_vm0, %v2345_v45, %v14491_v2  ;;  %v778_v44 = vrot.slane %v14493_v35, 2  ;;  %v98_v35 = vld [vmem:[%s13644_s0 + $0x1f8] sm:$0xff] }
 0x387   :  { %v2204_v18 = vpop.permute.xlu1 %2203  ;;  %v1462_v7 = vpop.permute.xlu0 %1461  ;;  %v2472_v25 = vsel %vm2424_vm7, %v2407_v63, %v9673_v29 }
 0x388   :  { %v2794_v37 = vsel %vm2749_vm12, %v2729_v15, %v2204_v18  ;;  %v2537_v19 = vsel %vm2489_vm8, %v2472_v25, %v1462_v7  ;;  %v777_v18 = vsel %vm632_vm4, %v775_v56, %v776_v12 }
 0x389   :  { %1479 = vrot.lane.b32.xlu1 %v14479_v13, %s6938_s20  ;;  %2042 = vrot.lane.b32.xlu0 %v14481_v8, %s6941_s12 }
 0x38a   :  { %6807 = vmatprep.mubr.msk.f32.mxu0 %vm2819_vm13, %v2794_v37 }
 0x38b   :  { %v1652_v31 = vpop.permute.xlu1 %1651  ;;  %v2206_v42 = vpop.permute.xlu0 %2205 }
 0x38c   :  { %v2795_v59 = vsel %vm2749_vm12, %v2730_v43, %v2206_v42  ;;  %v2601_v6 = vsel %vm2554_vm9, %v2536_v21, %v1652_v31  ;;  %v779_v31 = vsel %vm632_vm4, %v776_v12, %v778_v44  ;;  %v14499_v12 = vld [vmem:[#allocation116_spill] sm:$0xff] }
 0x38d   :  { %2223 = vrot.lane.b32.xlu1 %v14483_v11, %s6942_s1  ;;  %1481 = vrot.lane.b32.xlu0 %v14481_v8, %s6938_s20  ;;  %v14492_v8 = vld [vmem:[#allocation120_spill] sm:$0xff] }
 0x38e   :  { %6808 = vmatmul.mubr.msk.f32.gmra.mxu0 %vm2819_vm13, %v2795_v59 }
 0x38f   :  { %v1654_v38 = vpop.permute.xlu1 %1653  ;;  %v1842_v57 = vpop.permute.xlu0 %1841 }
 0x390   :  { %v2666_v0 = vsel %vm2619_vm10, %v2601_v6, %v1842_v57  ;;  %v2602_v15 = vsel %vm2554_vm9, %v2537_v19, %v1654_v38  ;;  %v14495_v57 = vld [vmem:[#allocation117_spill] sm:$0xff]  ;;  %v14498_v6 = vld [vmem:[#allocation226_spill] sm:$0xff] }
 0x391   :  { %1671 = vrot.lane.b32.xlu1 %v14483_v11, %s6939_s21  ;;  %2225 = vrot.lane.b32.xlu0 %v774_v5, %s6942_s1  ;;  %v780_v63 = vrot.slane %v14495_v57, 2 }
 0x393   :  { %v1272_v22 = vpop.permute.xlu1 %1271  ;;  %v1844_v48 = vpop.permute.xlu0 %1843 }
 0x394   :  { %v2667_v53 = vsel %vm2619_vm10, %v2602_v15, %v1844_v48  ;;  %v14496_v48 = vld [vmem:[#allocation225_spill] sm:$0xff] }
 0x395   :  { %1673 = vrot.lane.b32.xlu1 %v774_v5, %s6939_s21  ;;  %1861 = vrot.lane.b32.xlu0 %v14485_v9, %s6940_s27 }
 0x397   :  { %v2025_v52 = vpop.permute.xlu1 %2024  ;;  %v9725_v14 = vpop.permute.xlu0 %1273 }
 0x398   :  { %v2731_v13 = vsel %vm2684_vm11, %v2666_v0, %v2025_v52 }
 0x399   :  { %1104 = vrot.lane.b32.xlu1 %v774_v5, %s6936_s19  ;;  %1291 = vrot.lane.b32.xlu0 %v14485_v9, %s6937_s25  ;;  %v14494_v5 = vld [vmem:[#allocation179_spill] sm:$0xff] }
 0x39a   :  { %v2346_v38 = vsel %vm2300_vm6, %v14424_v4, %v14494_v5  ;;  %v14497_v4 = vld [vmem:[#allocation180_spill] sm:$0xff] }
 0x39b   :  { %v1464_v34 = vpop.permute.xlu1 %1463  ;;  %v2027_v51 = vpop.permute.xlu0 %2026  ;;  %v2408_v52 = vsel %vm2362_vm0, %v2346_v38, %v14496_v48  ;;  %v14504_v38 = vld [vmem:[#allocation227_spill] sm:$0xff] }
 0x39c   :  { %v2732_v29 = vsel %vm2684_vm11, %v2667_v53, %v2027_v51  ;;  %v2473_v33 = vsel %vm2424_vm7, %v2408_v52, %v1272_v22  ;;  %v2347_v51 = vsel %vm2300_vm6, %v14426_v20, %v14497_v4  ;;  %v14500_v20 = vld [vmem:[#allocation121_spill] sm:$0xff]  ;;  %v14501_v53 = vld [vmem:[#allocation122_spill] sm:$0xff] }
 0x39d   :  { %1863 = vrot.lane.b32.xlu1 %v14488_v23, %s6940_s27  ;;  %2044 = vrot.lane.b32.xlu0 %v14489_v30, %s6941_s12  ;;  %v2538_v28 = vsel %vm2489_vm8, %v2473_v33, %v1464_v34  ;;  %v2409_v22 = vsel %vm2362_vm0, %v2347_v51, %v14498_v6  ;;  %v14505_v51 = vld [vmem:[#allocation183_spill] sm:$0xff] }
 0x39e   :  { %v2474_v60 = vsel %vm2424_vm7, %v2409_v22, %v9725_v14 }
 0x39f   :  { %v2208_v27 = vpop.permute.xlu1 %2207  ;;  %v1466_v58 = vpop.permute.xlu0 %1465 }
 0x3a0   :  { %v2796_v32 = vsel %vm2749_vm12, %v2731_v13, %v2208_v27  ;;  %v2539_v56 = vsel %vm2489_vm8, %v2474_v60, %v1466_v58  ;;  %v781_v13 = vrot.slane %v14499_v12, 2 }
 0x3a1   :  { %1293 = vrot.lane.b32.xlu1 %v14488_v23, %s6937_s25  ;;  %1483 = vrot.lane.b32.xlu0 %v14489_v30, %s6938_s20 }
 0x3a2   :  { %6810 = vmatprep.mubr.msk.f32.mxu0 %vm2819_vm13, %v2796_v32  ;;  %v782_v19 = vsel %vm632_vm4, %v780_v63, %v781_v13 }
 0x3a3   :  { %v1656_v37 = vpop.permute.xlu1 %1655  ;;  %v2210_v62 = vpop.permute.xlu0 %2209 }
 0x3a4   :  { %v2797_v7 = vsel %vm2749_vm12, %v2732_v29, %v2210_v62  ;;  %v2603_v55 = vsel %vm2554_vm9, %v2538_v28, %v1656_v37  ;;  %v14502_v37 = vld [vmem:[#allocation118_spill] sm:$0xff] }
 0x3a5   :  { %2046 = vrot.lane.b32.xlu1 %v14492_v8, %s6941_s12  ;;  %2227 = vrot.lane.b32.xlu0 %v777_v18, %s6942_s1  ;;  %v783_v29 = vrot.slane %v14502_v37, 2 }
 0x3a6   :  { %6811 = vmatmul.mubr.msk.f32.gmra.mxu0 %vm2819_vm13, %v2797_v7  ;;  %v97_v7 = vld [vmem:[%s13644_s0 + $0x1f0] sm:$0xff] }
 0x3a7   :  { %v1658_v3 = vpop.permute.xlu1 %1657  ;;  %v1846_v43 = vpop.permute.xlu0 %1845  ;;  %v784_v44 = vsel %vm632_vm4, %v781_v13, %v783_v29 }
 0x3a8   :  { %v2668_v21 = vsel %vm2619_vm10, %v2603_v55, %v1846_v43  ;;  %v2604_v2 = vsel %vm2554_vm9, %v2539_v56, %v1658_v3  ;;  %v257_v3 = vrot.slane %v97_v7, 7 }
 0x3a9   :  { %1485 = vrot.lane.b32.xlu1 %v14492_v8, %s6938_s20  ;;  %1675 = vrot.lane.b32.xlu0 %v777_v18, %s6939_s21 }
 0x3aa   :  { %v385_v52 = vsel %vm163_vm2, 0.0, %v257_v3 }
 0x3ab   :  { %v9774_v42 = vpop.permute.xlu1 %1275  ;;  %v1848_v59 = vpop.permute.xlu0 %1847  ;;  %v794_v22 = vrot.slane %v385_v52, 1 }
 0x3ac   :  { %v2669_v14 = vsel %vm2619_vm10, %v2604_v2, %v1848_v59 }
 0x3ad   :  { %2229 = vrot.lane.b32.xlu1 %v779_v31, %s6942_s1  ;;  %1106 = vrot.lane.b32.xlu0 %v777_v18, %s6936_s19 }
 0x3af   :  { %v2029_v11 = vpop.permute.xlu1 %2028  ;;  %v9778_v47 = vpop.permute.xlu0 %1277 }
 0x3b0   :  { %v2733_v30 = vsel %vm2684_vm11, %v2668_v21, %v2029_v11  ;;  %v14503_v11 = vld [vmem:[#allocation182_spill] sm:$0xff]  ;;  %v2349_v21 = vsel %vm2300_vm6, %v14436_v39, %v14505_v51 }
 0x3b1   :  { %1677 = vrot.lane.b32.xlu1 %v779_v31, %s6939_s21  ;;  %1865 = vrot.lane.b32.xlu0 %v14495_v57, %s6940_s27  ;;  %v2348_v5 = vsel %vm2300_vm6, %v14434_v36, %v14503_v11 }
 0x3b2   :  { %v2410_v48 = vsel %vm2362_vm0, %v2348_v5, %v14504_v38 }
 0x3b3   :  { %v1468_v41 = vpop.permute.xlu1 %1467  ;;  %v2031_v16 = vpop.permute.xlu0 %2030  ;;  %v2475_v33 = vsel %vm2424_vm7, %v2410_v48, %v9774_v42 }
 0x3b4   :  { %v2734_v25 = vsel %vm2684_vm11, %v2669_v14, %v2031_v16  ;;  %v2540_v55 = vsel %vm2489_vm8, %v2475_v33, %v1468_v41 }
 0x3b5   :  { %1108 = vrot.lane.b32.xlu1 %v779_v31, %s6936_s19  ;;  %1295 = vrot.lane.b32.xlu0 %v14495_v57, %s6937_s25  ;;  %v258_v31 = vrot.slane %v98_v35, 7 }
 0x3b7   :  { %v2212_v34 = vpop.permute.xlu1 %2211  ;;  %v1470_v45 = vpop.permute.xlu0 %1469  ;;  %v259_v16 = vsel %vm163_vm2, %v257_v3, %v258_v31  ;;  %v14507_v3 = vld [vmem:[#allocation185_spill] sm:$0xff] }
 0x3b8   :  { %v2798_v0 = vsel %vm2749_vm12, %v2733_v30, %v2212_v34  ;;  %v795_v42 = vrot.slane %v259_v16, 1  ;;  %v14506_v30 = vld [vmem:[#allocation15_spill] sm:$0xff] }
 0x3b9   :  { %1867 = vrot.lane.b32.xlu1 %v14499_v12, %s6940_s27  ;;  %2048 = vrot.lane.b32.xlu0 %v14500_v20, %s6941_s12  ;;  %v2411_v34 = vsel %vm2362_vm0, %v2349_v21, %v14506_v30 }
 0x3ba   :  { %6813 = vmatprep.mubr.msk.f32.mxu1 %vm2819_vm13, %v2798_v0  ;;  %v2476_v0 = vsel %vm2424_vm7, %v2411_v34, %v9778_v47  ;;  %v796_v63 = vsel %vm479_vm3, %v794_v22, %v795_v42  ;;  %v417_v47 = vsel %vm163_vm2, %v258_v31, 0.0  ;;  %v14508_v31 = vld [vmem:[#allocation228_spill] sm:$0xff] }
 0x3bb   :  { %v1660_v27 = vpop.permute.xlu1 %1659  ;;  %v2214_v58 = vpop.permute.xlu0 %2213  ;;  %v2541_v2 = vsel %vm2489_vm8, %v2476_v0, %v1470_v45 }
 0x3bc   :  { %v2799_v32 = vsel %vm2749_vm12, %v2734_v25, %v2214_v58  ;;  %v2605_v36 = vsel %vm2554_vm9, %v2540_v55, %v1660_v27  ;;  %v804_v58 = vrot.slane %v385_v52, 2 }
 0x3bd   :  { %1297 = vrot.lane.b32.xlu1 %v14499_v12, %s6937_s25  ;;  %1487 = vrot.lane.b32.xlu0 %v14500_v20, %s6938_s20 }
 0x3be   :  { %6814 = vmatmul.mubr.msk.f32.vlgmr.msra.gmra.mxu1 %vm2819_vm13, %v2799_v32  ;;  %v805_v32 = vrot.slane %v259_v16, 2 }
 0x3bf   :  { %v1662_v15 = vpop.permute.xlu1 %1661  ;;  %v1850_v18 = vpop.permute.xlu0 %1849 }
 0x3c0   :  { %v2670_v6 = vsel %vm2619_vm10, %v2605_v36, %v1850_v18  ;;  %v2606_v39 = vsel %vm2554_vm9, %v2541_v2, %v1662_v15  ;;  %v806_v37 = vsel %vm632_vm4, %v804_v58, %v805_v32  ;;  %v14510_v36 = vld [vmem:[#allocation229_spill] sm:$0xff] }
 0x3c1   :  { %2050 = vrot.lane.b32.xlu1 %v14501_v53, %s6941_s12  ;;  %2231 = vrot.lane.b32.xlu0 %v782_v19, %s6942_s1 }
 0x3c3   :  { %v9826_v62 = vpop.permute.xlu1 %1279  ;;  %v1852_v8 = vpop.permute.xlu0 %1851 }
 0x3c4   :  { %v2671_v13 = vsel %vm2619_vm10, %v2606_v39, %v1852_v8  ;;  %v807_v8 = vrot.slane %v417_v47, 2 }
 0x3c5   :  { %1489 = vrot.lane.b32.xlu1 %v14501_v53, %s6938_s20  ;;  %1679 = vrot.lane.b32.xlu0 %v782_v19, %s6939_s21 }
 0x3c6   :  { %v808_v5 = vsel %vm632_vm4, %v805_v32, %v807_v8 }
 0x3c7   :  { %v2033_v43 = vpop.permute.xlu1 %2032  ;;  %v9838_v59 = vpop.permute.xlu0 %1281 }
 0x3c8   :  { %v2735_v41 = vsel %vm2684_vm11, %v2670_v6, %v2033_v43  ;;  %v2350_v43 = vsel %vm2300_vm6, %v14444_v46, %v14507_v3  ;;  %v14509_v46 = vld [vmem:[#allocation186_spill] sm:$0xff] }
 0x3c9   :  { %2233 = vrot.lane.b32.xlu1 %v784_v44, %s6942_s1  ;;  %1110 = vrot.lane.b32.xlu0 %v782_v19, %s6936_s19  ;;  %v797_v19 = vrot.slane %v417_v47, 1  ;;  %v2412_v11 = vsel %vm2362_vm0, %v2350_v43, %v14508_v31  ;;  %v2351_v55 = vsel %vm2300_vm6, %v14446_v26, %v14509_v46  ;;  %v14512_v47 = vld [vmem:[#allocation230_spill] sm:$0xff] }
 0x3ca   :  { %v2477_v38 = vsel %vm2424_vm7, %v2412_v11, %v9826_v62  ;;  %v2413_v51 = vsel %vm2362_vm0, %v2351_v55, %v14510_v36 }
 0x3cb   :  { %v1472_v28 = vpop.permute.xlu1 %1471  ;;  %v2035_v4 = vpop.permute.xlu0 %2034  ;;  %v798_v53 = vsel %vm479_vm3, %v795_v42, %v797_v19  ;;  %vm5633_vm3 = vcmask 588800  }
 0x3cc   :  { %v2736_v27 = vsel %vm2684_vm11, %v2671_v13, %v2035_v4  ;;  %v14511_v13 = vld [vmem:[#allocation93_spill] sm:$0xff] }
 0x3cd   :  { %1681 = vrot.lane.b32.xlu1 %v784_v44, %s6939_s21  ;;  %1869 = vrot.lane.b32.xlu0 %v385_v52, %s6940_s27 }
 0x3cf   :  { %v2216_v60 = vpop.permute.xlu1 %2215  ;;  %v1474_v20 = vpop.permute.xlu0 %1473 }
 0x3d0   :  { %v2800_v56 = vsel %vm2749_vm12, %v2735_v41, %v2216_v60 }
 0x3d1   :  { %1112 = vrot.lane.b32.xlu1 %v784_v44, %s6936_s19  ;;  %1299 = vrot.lane.b32.xlu0 %v385_v52, %s6937_s25  ;;  %v2542_v52 = vsel %vm2489_vm8, %v2477_v38, %v1472_v28  ;;  %v2478_v28 = vsel %vm2424_vm7, %v2413_v51, %v9838_v59  ;;  %v14516_v51 = vld [vmem:[#allocation232_spill] sm:$0xff] }
 0x3d2   :  { %6816 = vmatprep.mubr.msk.f32.mxu1 %vm2819_vm13, %v2800_v56  ;;  %v2543_v42 = vsel %vm2489_vm8, %v2478_v28, %v1474_v20 }
 0x3d3   :  { %v1664_v14 = vpop.permute.xlu1 %1663  ;;  %v2218_v25 = vpop.permute.xlu0 %2217 }
 0x3d4   :  { %v2801_v45 = vsel %vm2749_vm12, %v2736_v27, %v2218_v25 }
 0x3d5   :  { %1871 = vrot.lane.b32.xlu1 %v259_v16, %s6940_s27  ;;  %2052 = vrot.lane.b32.xlu0 %v796_v63, %s6941_s12 }
 0x3d6   :  { %6817 = vmatmul.mubr.msk.f32.gmra.mxu1 %vm2819_vm13, %v2801_v45 }
 0x3d7   :  { %v1666_v15 = vpop.permute.xlu1 %1665  ;;  %v1854_v18 = vpop.permute.xlu0 %1853 }
 0x3d8   :  { %v2608_v26 = vsel %vm2554_vm9, %v2543_v42, %v1666_v15  ;;  %v14513_v15 = vld [vmem:[#allocation189_spill] sm:$0xff] }
 0x3d9   :  { %1301 = vrot.lane.b32.xlu1 %v259_v16, %s6937_s25  ;;  %1491 = vrot.lane.b32.xlu0 %v796_v63, %s6938_s20  ;;  %v2607_v16 = vsel %vm2554_vm9, %v2542_v52, %v1664_v14  ;;  %v2352_v14 = vsel %vm2300_vm6, %v14454_v50, %v14511_v13 }
 0x3da   :  { %v2672_v4 = vsel %vm2619_vm10, %v2607_v16, %v1854_v18  ;;  %v2414_v27 = vsel %vm2362_vm0, %v2352_v14, %v14512_v47  ;;  %v2353_v18 = vsel %vm2300_vm6, %v14456_v1, %v14513_v15 }
 0x3db   :  { %v1284_v29 = vpop.permute.xlu1 %1283  ;;  %v1856_v7 = vpop.permute.xlu0 %1855 }
 0x3dc   :  { %v2673_v30 = vsel %vm2619_vm10, %v2608_v26, %v1856_v7  ;;  %v2479_v25 = vsel %vm2424_vm7, %v2414_v27, %v1284_v29 }
 0x3dd   :  { %2054 = vrot.lane.b32.xlu1 %v798_v53, %s6941_s12  ;;  %2235 = vrot.lane.b32.xlu0 %v806_v37, %s6942_s1 }
 0x3df   :  { %v2037_v35 = vpop.permute.xlu1 %2036  ;;  %v1286_v44 = vpop.permute.xlu0 %1285 }
 0x3e0   :  { %v2737_v62 = vsel %vm2684_vm11, %v2672_v4, %v2037_v35  ;;  %v14515_v4 = vld [vmem:[#allocation191_spill] sm:$0xff] }
 0x3e1   :  { %1493 = vrot.lane.b32.xlu1 %v798_v53, %s6938_s20  ;;  %1683 = vrot.lane.b32.xlu0 %v806_v37, %s6939_s21  ;;  %v14514_v37 = vld [vmem:[#allocation231_spill] sm:$0xff]  ;;  %v2354_v36 = vsel %vm2300_vm6, %v14464_v49, %v14515_v4 }
 0x3e2   :  { %v2415_v50 = vsel %vm2362_vm0, %v2353_v18, %v14514_v37 }
 0x3e3   :  { %v1476_v48 = vpop.permute.xlu1 %1475  ;;  %v2039_v33 = vpop.permute.xlu0 %2038  ;;  %v2480_v29 = vsel %vm2424_vm7, %v2415_v50, %v1286_v44  ;;  %v14520_v50 = vld [vmem:[#allocation234_spill] sm:$0xff] }
 0x3e4   :  { %v2738_v41 = vsel %vm2684_vm11, %v2673_v30, %v2039_v33  ;;  %v2544_v58 = vsel %vm2489_vm8, %v2479_v25, %v1476_v48 }
 0x3e5   :  { %2237 = vrot.lane.b32.xlu1 %v808_v5, %s6942_s1  ;;  %1685 = vrot.lane.b32.xlu0 %v808_v5, %s6939_s21 }
 0x3e7   :  { %v2220_v21 = vpop.permute.xlu1 %2219  ;;  %v1478_v22 = vpop.permute.xlu0 %1477 }
 0x3e8   :  { %v2802_v6 = vsel %vm2749_vm12, %v2737_v62, %v2220_v21  ;;  %v2545_v43 = vsel %vm2489_vm8, %v2480_v29, %v1478_v22  ;;  %v2416_v62 = vsel %vm2362_vm0, %v2354_v36, %v14516_v51 }
 0x3e9   :  { %6819 = vmatprep.mubr.msk.f32.mxu1 %vm2819_vm13, %v2802_v6 }
 0x3eb   :  { %v1668_v34 = vpop.permute.xlu1 %1667  ;;  %v2222_v60 = vpop.permute.xlu0 %2221 }
 0x3ec   :  { %v2803_v0 = vsel %vm2749_vm12, %v2738_v41, %v2222_v60  ;;  %v2609_v19 = vsel %vm2554_vm9, %v2544_v58, %v1668_v34  ;;  %v14517_v60 = vld [vmem:[#allocation192_spill] sm:$0xff] }
 0x3ed   :  { %6820 = vmatmul.mubr.msk.f32.gmra.mxu1 %vm2819_vm13, %v2803_v0  ;;  %v2355_v49 = vsel %vm2300_vm6, %v14466_v24, %v14517_v60 }
 0x3ef   :  { %v1670_v59 = vpop.permute.xlu1 %1669  ;;  %v1858_v56 = vpop.permute.xlu0 %1857 }
 0x3f0   :  { %v2674_v53 = vsel %vm2619_vm10, %v2609_v19, %v1858_v56  ;;  %v2610_v31 = vsel %vm2554_vm9, %v2545_v43, %v1670_v59  ;;  %v14518_v59 = vld [vmem:[#allocation233_spill] sm:$0xff] }
 0x3f1   :  { %v2417_v56 = vsel %vm2362_vm0, %v2355_v49, %v14518_v59 }
 0x3f3   :  { %v1288_v2 = vpop.permute.xlu1 %1287  ;;  %v1860_v39 = vpop.permute.xlu0 %1859 }
 0x3f4   :  { %v2675_v1 = vsel %vm2619_vm10, %v2610_v31, %v1860_v39  ;;  %v2481_v28 = vsel %vm2424_vm7, %v2416_v62, %v1288_v2 }
 0x3f7   :  { %v2041_v63 = vpop.permute.xlu1 %2040  ;;  %v1290_v20 = vpop.permute.xlu0 %1289 }
 0x3f8   :  { %v2739_v7 = vsel %vm2684_vm11, %v2674_v53, %v2041_v63  ;;  %v2482_v2 = vsel %vm2424_vm7, %v2417_v56, %v1290_v20  ;;  %v14519_v53 = vld [vmem:[#allocation194_spill] sm:$0xff] }
 0x3f9   :  { %v2356_v37 = vsel %vm2300_vm6, %v14474_v40, %v14519_v53  ;;  %v14525_v53 = vld [vmem:[#allocation201_spill] sm:$0xff] }
 0x3fb   :  { %v1480_v45 = vpop.permute.xlu1 %1479  ;;  %v2043_v32 = vpop.permute.xlu0 %2042 }
 0x3fc   :  { %v2740_v5 = vsel %vm2684_vm11, %v2675_v1, %v2043_v32  ;;  %v2546_v22 = vsel %vm2489_vm8, %v2481_v28, %v1480_v45 }
 0x3ff   :  { %v2224_v8 = vpop.permute.xlu1 %2223  ;;  %v1482_v3 = vpop.permute.xlu0 %1481 }
 0x400   :  { %v2804_v35 = vsel %vm2749_vm12, %v2739_v7, %v2224_v8  ;;  %v2547_v63 = vsel %vm2489_vm8, %v2482_v2, %v1482_v3  ;;  %v2418_v7 = vsel %vm2362_vm0, %v2356_v37, %v14520_v50 }
 0x401   :  { %6822 = vmatprep.mubr.msk.f32.mxu1 %vm2819_vm13, %v2804_v35 }
 0x403   :  { %v1672_v11 = vpop.permute.xlu1 %1671  ;;  %v2226_v38 = vpop.permute.xlu0 %2225 }
 0x404   :  { %v2805_v48 = vsel %vm2749_vm12, %v2740_v5, %v2226_v38  ;;  %v2611_v42 = vsel %vm2554_vm9, %v2546_v22, %v1672_v11  ;;  %v14521_v38 = vld [vmem:[#allocation195_spill] sm:$0xff] }
 0x405   :  { %6823 = vmatmul.mubr.msk.f32.gmra.mxu1 %vm2819_vm13, %v2805_v48  ;;  %v2357_v40 = vsel %vm2300_vm6, %v14476_v17, %v14521_v38 }
 0x407   :  { %v1674_v44 = vpop.permute.xlu1 %1673  ;;  %v1862_v52 = vpop.permute.xlu0 %1861 }
 0x408   :  { %v2676_v26 = vsel %vm2619_vm10, %v2611_v42, %v1862_v52  ;;  %v2612_v14 = vsel %vm2554_vm9, %v2547_v63, %v1674_v44 }
 0x40b   :  { %v1105_v33 = vpop.permute.xlu1 %1104  ;;  %v1292_v16 = vpop.permute.xlu0 %1291 }
 0x40c   :  { %v2483_v29 = vsel %vm2424_vm7, %v2418_v7, %v1292_v16  ;;  %v2419_v44 = vsel %vm2362_vm0, %v2357_v40, %v1105_v33 }
 0x40f   :  { %v1864_v46 = vpop.permute.xlu1 %1863  ;;  %v2045_v55 = vpop.permute.xlu0 %2044 }
 0x410   :  { %v2741_v34 = vsel %vm2684_vm11, %v2676_v26, %v2045_v55  ;;  %v2677_v47 = vsel %vm2619_vm10, %v2612_v14, %v1864_v46  ;;  %v14523_v14 = vld [vmem:[#allocation199_spill] sm:$0xff] }
 0x413   :  { %v1294_v21 = vpop.permute.xlu1 %1293  ;;  %v1484_v6 = vpop.permute.xlu0 %1483 }
 0x414   :  { %v2548_v3 = vsel %vm2489_vm8, %v2483_v29, %v1484_v6  ;;  %v2484_v52 = vsel %vm2424_vm7, %v2419_v44, %v1294_v21  ;;  %v10036_v44 = vpop.f32.mrf.mxu0 }
 0x417   :  { %v2047_v30 = vpop.permute.xlu1 %2046  ;;  %v2228_v41 = vpop.permute.xlu0 %2227 }
 0x418   :  { %v2806_v0 = vsel %vm2749_vm12, %v2741_v34, %v2228_v41  ;;  %v2742_v27 = vsel %vm2684_vm11, %v2677_v47, %v2047_v30  ;;  %v14522_v30 = vld [vmem:[#allocation198_spill] sm:$0xff]  ;;  %v14524_v47 = vld [vmem:[#allocation200_spill] sm:$0xff] }
 0x419   :  { %6825 = vmatprep.mubr.msk.f32.mxu1 %vm2819_vm13, %v2806_v0  ;;  %v2358_v34 = vsel %vm2300_vm6, %v14485_v9, %v14522_v30  ;;  %v2359_v9 = vsel %vm2300_vm6, %v14488_v23, %v14523_v14 }
 0x41b   :  { %v1486_v39 = vpop.permute.xlu1 %1485  ;;  %v1676_v13 = vpop.permute.xlu0 %1675 }
 0x41c   :  { %v2613_v43 = vsel %vm2554_vm9, %v2548_v3, %v1676_v13  ;;  %v2549_v46 = vsel %vm2489_vm8, %v2484_v52, %v1486_v39  ;;  %v10038_v52 = vpop.f32.mrf.mxu0 }
 0x41f   :  { %v2230_v24 = vpop.permute.xlu1 %2229  ;;  %v1107_v45 = vpop.permute.xlu0 %1106 }
 0x420   :  { %v2807_v25 = vsel %vm2749_vm12, %v2742_v27, %v2230_v24  ;;  %v2420_v41 = vsel %vm2362_vm0, %v2358_v34, %v1107_v45  ;;  %v2360_v27 = vsel %vm2300_vm6, %v14495_v57, %v14524_v47  ;;  %v2361_v57 = vsel %vm2300_vm6, %v14499_v12, %v14525_v53 }
 0x421   :  { %6826 = vmatmul.mubr.msk.f32.gmra.mxu1 %vm2819_vm13, %v2807_v25 }
 0x423   :  { %v1678_v58 = vpop.permute.xlu1 %1677  ;;  %v1866_v32 = vpop.permute.xlu0 %1865 }
 0x424   :  { %v2678_v31 = vsel %vm2619_vm10, %v2613_v43, %v1866_v32  ;;  %v2614_v4 = vsel %vm2554_vm9, %v2549_v46, %v1678_v58 }
 0x427   :  { %v1109_v19 = vpop.permute.xlu1 %1108  ;;  %v1296_v20 = vpop.permute.xlu0 %1295 }
 0x428   :  { %v2485_v49 = vsel %vm2424_vm7, %v2420_v41, %v1296_v20  ;;  %v2421_v25 = vsel %vm2362_vm0, %v2359_v9, %v1109_v19 }
 0x42b   :  { %v1868_v15 = vpop.permute.xlu1 %1867  ;;  %v2049_v18 = vpop.permute.xlu0 %2048 }
 0x42c   :  { %v2743_v11 = vsel %vm2684_vm11, %v2678_v31, %v2049_v18  ;;  %v2679_v36 = vsel %vm2619_vm10, %v2614_v4, %v1868_v15 }
 0x42f   :  { %v1298_v8 = vpop.permute.xlu1 %1297  ;;  %v1488_v35 = vpop.permute.xlu0 %1487 }
 0x430   :  { %v2550_v59 = vsel %vm2489_vm8, %v2485_v49, %v1488_v35  ;;  %v2486_v58 = vsel %vm2424_vm7, %v2421_v25, %v1298_v8 }
 0x433   :  { %v2051_v1 = vpop.permute.xlu1 %2050  ;;  %v2232_v5 = vpop.permute.xlu0 %2231 }
 0x434   :  { %v2808_v48 = vsel %vm2749_vm12, %v2743_v11, %v2232_v5  ;;  %v2744_v51 = vsel %vm2684_vm11, %v2679_v36, %v2051_v1 }
 0x435   :  { %6828 = vmatprep.mubr.msk.f32.mxu1 %vm2819_vm13, %v2808_v48 }
 0x437   :  { %v1490_v16 = vpop.permute.xlu1 %1489  ;;  %v1680_v55 = vpop.permute.xlu0 %1679 }
 0x438   :  { %v2615_v56 = vsel %vm2554_vm9, %v2550_v59, %v1680_v55  ;;  %v2551_v15 = vsel %vm2489_vm8, %v2486_v58, %v1490_v16  ;;  %v10040_v16 = vpop.f32.mrf.mxu0 }
 0x43a   :  { %v10042_v46 = vpop.f32.mrf.mxu0 }
 0x43b   :  { %v2234_v62 = vpop.permute.xlu1 %2233  ;;  %v1111_v28 = vpop.permute.xlu0 %1110 }
 0x43c   :  { %v2809_v17 = vsel %vm2749_vm12, %v2744_v51, %v2234_v62  ;;  %v2422_v45 = vsel %vm2362_vm0, %v2360_v27, %v1111_v28  ;;  %v10046_v55 = vpop.f32.mrf.mxu0 }
 0x43d   :  { %6829 = vmatmul.mubr.msk.f32.gmra.mxu1 %vm2819_vm13, %v2809_v17  ;;  %v3408_v17 = vsel %vm2362_vm0, %v10040_v16, 0.0 }
 0x43e   :  { %v10052_v51 = vpop.f32.mrf.mxu0 }
 0x43f   :  { %v1682_v33 = vpop.permute.xlu1 %1681  ;;  %v1870_v6 = vpop.permute.xlu0 %1869  ;;  %v3410_v28 = vsel %vm2362_vm0, %v10052_v51, 0.0 }
 0x440   :  { %v2680_v2 = vsel %vm2619_vm10, %v2615_v56, %v1870_v6  ;;  %v2616_v19 = vsel %vm2554_vm9, %v2551_v15, %v1682_v33  ;;  %v10054_v62 = vpop.f32.mrf.mxu0 }
 0x441   :  { %v3416_v49 = vsel %vm2362_vm0, %v10054_v62, 0.0 }
 0x443   :  { %v1113_v22 = vpop.permute.xlu1 %1112  ;;  %v1300_v21 = vpop.permute.xlu0 %1299 }
 0x444   :  { %v2487_v32 = vsel %vm2424_vm7, %v2422_v45, %v1300_v21  ;;  %v2423_v50 = vsel %vm2362_vm0, %v2361_v57, %v1113_v22  ;;  %v10060_v22 = vpop.f32.mrf.mxu0 }
 0x446   :  { %v10062_v21 = vpop.f32.mrf.mxu0 }
 0x447   :  { %v1872_v42 = vpop.permute.xlu1 %1871  ;;  %v2053_v26 = vpop.permute.xlu0 %2052 }
 0x448   :  { %v2745_v63 = vsel %vm2684_vm11, %v2680_v2, %v2053_v26  ;;  %v2681_v7 = vsel %vm2619_vm10, %v2616_v19, %v1872_v42  ;;  %v3412_v42 = vsel %vm2362_vm0, %v10046_v55, 0.0  ;;  %v3414_v26 = vsel %vm2362_vm0, %v10060_v22, 0.0  ;;  %v10068_v41 = vpop.f32.mrf.mxu0 }
 0x44b   :  { %v1302_v60 = vpop.permute.xlu1 %1301  ;;  %v1492_v0 = vpop.permute.xlu0 %1491 }
 0x44c   :  { %v2552_v23 = vsel %vm2489_vm8, %v2487_v32, %v1492_v0  ;;  %v2488_v29 = vsel %vm2424_vm7, %v2423_v50, %v1302_v60  ;;  %v10070_v60 = vpop.f32.mrf.mxu0  ;;  %v3418_v0 = vsel %vm2362_vm0, %v10068_v41, 0.0 }
 0x44e   :  { %v10076_v2 = vpop.f32.mrf.mxu0 }
 0x44f   :  { %v2055_v39 = vpop.permute.xlu1 %2054  ;;  %v2236_v13 = vpop.permute.xlu0 %2235 }
 0x450   :  { %v2810_v24 = vsel %vm2749_vm12, %v2745_v63, %v2236_v13  ;;  %v2746_v35 = vsel %vm2684_vm11, %v2681_v7, %v2055_v39  ;;  %v10078_v39 = vpop.f32.mrf.mxu0  ;;  %v3420_v63 = vsel %vm2362_vm0, %v10062_v21, 0.0  ;;  %v3422_v13 = vsel %vm2362_vm0, %v10076_v2, 0.0 }
 0x451   :  { %6831 = vmatprep.mubr.msk.f32.mxu1 %vm2819_vm13, %v2810_v24  ;;  %v3424_v24 = vsel %vm2362_vm0, %v10070_v60, 0.0  ;;  %v3428_v15 = vsel %vm2362_vm0, %v10078_v39, 0.0 }
 0x452   :  { %v10084_v47 = vpop.f32.mrf.mxu0 }
 0x453   :  { %v1494_v20 = vpop.permute.xlu1 %1493  ;;  %v1684_v18 = vpop.permute.xlu0 %1683  ;;  %v3426_v25 = vsel %vm2362_vm0, %v10084_v47, 0.0 }
 0x454   :  { %v2617_v37 = vsel %vm2554_vm9, %v2552_v23, %v1684_v18  ;;  %v2553_v12 = vsel %vm2489_vm8, %v2488_v29, %v1494_v20  ;;  %v10086_v27 = vpop.f32.mrf.mxu0 }
 0x455   :  { %v2682_v8 = vsel %vm2619_vm10, %v2617_v37, %v9333_v54  ;;  %v3432_v37 = vsel %vm2362_vm0, %v10086_v27, 0.0 }
 0x456   :  { %v2747_v43 = vsel %vm2684_vm11, %v2682_v8, %v9351_v10  ;;  %v10092_v32 = vpop.f32.mrf.mxu0 }
 0x457   :  { %v2238_v3 = vpop.permute.xlu1 %2237  ;;  %v1686_v1 = vpop.permute.xlu0 %1685  ;;  %v2812_v5 = vsel %vm2749_vm12, %v2747_v43, %v9365_v61  ;;  %v3430_v23 = vsel %vm2362_vm0, %v10092_v32, 0.0 }
 0x458   :  { %v2811_v31 = vsel %vm2749_vm12, %v2746_v35, %v2238_v3  ;;  %v2618_v11 = vsel %vm2554_vm9, %v2553_v12, %v1686_v1  ;;  %v10094_v20 = vpop.f32.mrf.mxu0 }
 0x459   :  { %6832 = vmatmul.mubr.msk.f32.gmra.mxu1 %vm2819_vm13, %v2811_v31  ;;  %v2683_v38 = vsel %vm2619_vm10, %v2618_v11, %v9333_v54  ;;  %v3403_v54 = vsel %vm2362_vm0, %v10038_v52, 0.0  ;;  %v3436_v3 = vsel %vm2362_vm0, %v10094_v20, 0.0 }
 0x45a   :  { %6834 = vmatprep.mubr.msk.f32.mxu1 %vm2819_vm13, %v2812_v5  ;;  %v2748_v40 = vsel %vm2684_vm11, %v2683_v38, %v9351_v10  ;;  %v3404_v10 = vsel %vm2362_vm0, %v10036_v44, 0.0  ;;  %v10100_v57 = vpop.f32.mrf.mxu0 }
 0x45b   :  { %v2813_v48 = vsel %vm2749_vm12, %v2748_v40, %v9365_v61  ;;  %v3406_v61 = vsel %vm2362_vm0, %v10042_v46, 0.0  ;;  %v3405_v4 = vadd.f32 %v3404_v10, %v3403_v54  ;;  %v3434_v50 = vsel %vm2362_vm0, %v10100_v57, 0.0 }
 0x45c   :  { %v10102_v19 = vpop.f32.mrf.mxu0 }
 0x45d   :  { %6835 = vmatmul.mubr.msk.f32.gmra.mxu1 %vm2819_vm13, %v2813_v48  ;;  %v3407_v36 = vadd.f32 %v3406_v61, %v3405_v4  ;;  %v3440_v5 = vsel %vm2362_vm0, %v10102_v19, 0.0 }
 0x45e   :  { %v10108_v29 = vpop.f32.mrf.mxu0 }
 0x45f   :  { %v3409_v33 = vadd.f32 %v3408_v17, %v3407_v36  ;;  %v3438_v43 = vsel %vm2362_vm0, %v10108_v29, 0.0 }
 0x460   :  { %v10110_v35 = vpop.f32.mrf.mxu0 }
 0x461   :  { %v3411_v6 = vadd.f32 %v3410_v28, %v3409_v33  ;;  %v3444_v61 = vsel %vm2362_vm0, %v10110_v35, 0.0 }
 0x462   :  { %v10116_v1 = vpop.f32.mrf.mxu0 }
 0x463   :  { %v3413_v30 = vadd.f32 %v3412_v42, %v3411_v6  ;;  %v3442_v38 = vsel %vm2362_vm0, %v10116_v1, 0.0 }
 0x464   :  { %v10118_v11 = vpop.f32.mrf.mxu0 }
 0x465   :  { %v3415_v34 = vadd.f32 %v3414_v26, %v3413_v30  ;;  %v3448_v6 = vsel %vm2362_vm0, %v10118_v11, 0.0 }
 0x466   :  { %v10124_v54 = vpop.f32.mrf.mxu0 }
 0x467   :  { %v3417_v59 = vadd.f32 %v3416_v49, %v3415_v34  ;;  %v3446_v4 = vsel %vm2362_vm0, %v10124_v54, 0.0 }
 0x468   :  { %v10126_v10 = vpop.f32.mrf.mxu0 }
 0x469   :  { %v3419_v56 = vadd.f32 %v3418_v0, %v3417_v59  ;;  %v3452_v0 = vsel %vm2362_vm0, %v10126_v10, 0.0 }
 0x46a   :  { %v10132_v28 = vpop.f32.mrf.mxu0 }
 0x46b   :  { %v3421_v14 = vadd.f32 %v3420_v63, %v3419_v56  ;;  %v3450_v42 = vsel %vm2362_vm0, %v10132_v28, 0.0 }
 0x46c   :  { %v10134_v33 = vpop.f32.mrf.mxu0 }
 0x46d   :  { %v3423_v9 = vadd.f32 %v3422_v13, %v3421_v14 }
 0x46e   :  { %v10140_v34 = vpop.f32.mrf.mxu0 }
 0x46f   :  { %v3425_v45 = vadd.f32 %v3424_v24, %v3423_v9  ;;  %v3454_v59 = vsel %vm2362_vm0, %v10140_v34, 0.0  ;;  %v3456_v9 = vsel %vm2362_vm0, %v10134_v33, 0.0 }
 0x470   :  { %v10142_v49 = vpop.f32.mrf.mxu0 }
 0x471   :  { %v3427_v58 = vadd.f32 %v3426_v25, %v3425_v45 }
 0x472   :  { %v10148_v13 = vpop.f32.mrf.mxu0 }
 0x473   :  { %v3429_v18 = vadd.f32 %v3428_v15, %v3427_v58  ;;  %v3458_v24 = vsel %vm2362_vm0, %v10148_v13, 0.0 }
 0x474   :  { %v10150_v14 = vpop.f32.mrf.mxu0 }
 0x475   :  { %v3431_v53 = vadd.f32 %v3430_v23, %v3429_v18  ;;  %v3460_v23 = vsel %vm2362_vm0, %v10142_v49, 0.0 }
 0x476   :  { %v10156_v58 = vpop.f32.mrf.mxu0 }
 0x477   :  { %v3433_v7 = vadd.f32 %v3432_v37, %v3431_v53  ;;  %v3462_v18 = vsel %vm2362_vm0, %v10156_v58, 0.0 }
 0x478   :  { %v10158_v15 = vpop.f32.mrf.mxu0 }
 0x479   :  { %v3435_v8 = vadd.f32 %v3434_v50, %v3433_v7 }
 0x47a   :  { %v10164_v50 = vpop.f32.mrf.mxu0 }
 0x47b   :  { %v3437_v12 = vadd.f32 %v3436_v3, %v3435_v8  ;;  %v3464_v8 = vsel %vm2362_vm0, %v10150_v14, 0.0  ;;  %v3466_v3 = vsel %vm2362_vm0, %v10164_v50, 0.0 }
 0x47c   :  { %v10166_v7 = vpop.f32.mrf.mxu0 }
 0x47d   :  { %v3439_v31 = vadd.f32 %v3438_v43, %v3437_v12 }
 0x47f   :  { %v3441_v40 = vadd.f32 %v3440_v5, %v3439_v31  ;;  %v10172_v31 = vpop.f32.mrf.mxu0 }
 0x481   :  { %v3443_v48 = vadd.f32 %v3442_v38, %v3441_v40  ;;  %v10174_v5 = vpop.f32.mrf.mxu0  ;;  %v3468_v38 = vsel %vm2362_vm0, %v10158_v15, 0.0  ;;  %v3470_v40 = vsel %vm2362_vm0, %v10172_v31, 0.0 }
 0x483   :  { %v3445_v36 = vadd.f32 %v3444_v61, %v3443_v48 }
 0x485   :  { %v3447_v17 = vadd.f32 %v3446_v4, %v3445_v36  ;;  %v10180_v4 = vpop.f32.mrf.mxu0 }
 0x487   :  { %v3449_v26 = vadd.f32 %v3448_v6, %v3447_v17  ;;  %v10182_v36 = vpop.f32.mrf.mxu0  ;;  %v3472_v17 = vsel %vm2362_vm0, %v10166_v7, 0.0  ;;  %v3474_v6 = vsel %vm2362_vm0, %v10180_v4, 0.0 }
 0x489   :  { %v3451_v30 = vadd.f32 %v3450_v42, %v3449_v26 }
 0x48b   :  { %v3453_v56 = vadd.f32 %v3452_v0, %v3451_v30  ;;  %v10188_v30 = vpop.f32.mrf.mxu0 }
 0x48d   :  { %v3455_v63 = vadd.f32 %v3454_v59, %v3453_v56  ;;  %v10190_v0 = vpop.f32.mrf.mxu0  ;;  %v3476_v59 = vsel %vm2362_vm0, %v10174_v5, 0.0  ;;  %v3478_v56 = vsel %vm2362_vm0, %v10188_v30, 0.0 }
 0x48f   :  { %v3457_v25 = vadd.f32 %v3456_v9, %v3455_v63 }
 0x491   :  { %v3459_v45 = vadd.f32 %v3458_v24, %v3457_v25  ;;  %v10196_v24 = vpop.f32.mrf.mxu0 }
 0x493   :  { %v3461_v53 = vadd.f32 %v3460_v23, %v3459_v45  ;;  %v10198_v25 = vpop.f32.mrf.mxu0  ;;  %v3480_v45 = vsel %vm2362_vm0, %v10182_v36, 0.0  ;;  %v3482_v23 = vsel %vm2362_vm0, %v10196_v24, 0.0 }
 0x495   :  { %v3463_v37 = vadd.f32 %v3462_v18, %v3461_v53 }
 0x497   :  { %v3465_v43 = vadd.f32 %v3464_v8, %v3463_v37  ;;  %v10204_v37 = vpop.f32.mrf.mxu0 }
 0x499   :  { %v3467_v12 = vadd.f32 %v3466_v3, %v3465_v43  ;;  %v10206_v8 = vpop.f32.mrf.mxu0  ;;  %v3484_v3 = vsel %vm2362_vm0, %v10190_v0, 0.0  ;;  %v3486_v43 = vsel %vm2362_vm0, %v10204_v37, 0.0 }
 0x49a   :  { %14526 = vst [vmem:[#allocation17_spill] sm:$0xff] %v10206_v8 }
 0x49b   :  { %v3469_v48 = vadd.f32 %v3468_v38, %v3467_v12 }
 0x49d   :  { %v3471_v61 = vadd.f32 %v3470_v40, %v3469_v48  ;;  %v10212_v40 = vpop.f32.mrf.mxu0 }
 0x49f   :  { %v3473_v42 = vadd.f32 %v3472_v17, %v3471_v61  ;;  %v10214_v48 = vpop.f32.mrf.mxu0  ;;  %v3488_v61 = vsel %vm2362_vm0, %v10198_v25, 0.0  ;;  %v3490_v17 = vsel %vm2362_vm0, %v10212_v40, 0.0 }
 0x4a0   :  { %14527 = vst [vmem:[#allocation18_spill] sm:$0xff] %v10214_v48 }
 0x4a1   :  { %v3475_v26 = vadd.f32 %v3474_v6, %v3473_v42 }
 0x4a3   :  { %v3477_v63 = vadd.f32 %v3476_v59, %v3475_v26  ;;  %v10220_v26 = vpop.f32.mrf.mxu0  ;;  %v10222_v59 = vpop.f32.mrf.mxu1 }
 0x4a4   :  { %14528 = vst [vmem:[#allocation20_spill] sm:$0xff] %v10220_v26  ;;  %14529 = vst [vmem:[#allocation21_spill] sm:$0xff] %v10222_v59 }
 0x4a5   :  { %v3479_v9 = vadd.f32 %v3478_v56, %v3477_v63  ;;  %v3492_v56 = vsel %vm2362_vm0, %v10206_v8, 0.0  ;;  %v3494_v63 = vsel %vm2362_vm0, %v10220_v26, 0.0 }
 0x4a7   :  { %v3481_v18 = vadd.f32 %v3480_v45, %v3479_v9 }
 0x4a9   :  { %v3483_v53 = vadd.f32 %v3482_v23, %v3481_v18  ;;  %v10228_v23 = vpop.f32.mrf.mxu1 }
 0x4aa   :  { %14530 = vst [vmem:[#allocation124_spill] sm:$0xff] %v10228_v23 }
 0x4ab   :  { %v3485_v12 = vadd.f32 %v3484_v3, %v3483_v53  ;;  %v10230_v18 = vpop.f32.mrf.mxu1  ;;  %v3496_v53 = vsel %vm2362_vm0, %v10214_v48, 0.0  ;;  %v3498_v3 = vsel %vm2362_vm0, %v10228_v23, 0.0 }
 0x4ac   :  { %14531 = vst [vmem:[#allocation19_spill] sm:$0xff] %v10230_v18 }
 0x4ad   :  { %v3487_v38 = vadd.f32 %v3486_v43, %v3485_v12 }
 0x4af   :  { %v3489_v6 = vadd.f32 %v3488_v61, %v3487_v38  ;;  %v10236_v38 = vpop.f32.mrf.mxu1 }
 0x4b0   :  { %14532 = vst [vmem:[#allocation23_spill] sm:$0xff] %v10236_v38 }
 0x4b1   :  { %v3491_v42 = vadd.f32 %v3490_v17, %v3489_v6  ;;  %v10238_v61 = vpop.f32.mrf.mxu1  ;;  %v3500_v17 = vsel %vm2362_vm0, %v10222_v59, 0.0  ;;  %v3502_v6 = vsel %vm2362_vm0, %v10236_v38, 0.0 }
 0x4b2   :  { %14533 = vst [vmem:[#allocation123_spill] sm:$0xff] %v10238_v61 }
 0x4b3   :  { %v3493_v9 = vadd.f32 %v3492_v56, %v3491_v42 }
 0x4b5   :  { %v3495_v45 = vadd.f32 %v3494_v63, %v3493_v9  ;;  %v10244_v63 = vpop.f32.mrf.mxu1 }
 0x4b6   :  { %14534 = vst [vmem:[#allocation24_spill] sm:$0xff] %v10244_v63 }
 0x4b7   :  { %v3497_v43 = vadd.f32 %v3496_v53, %v3495_v45  ;;  %v3504_v45 = vsel %vm2362_vm0, %v10230_v18, 0.0  ;;  %v3506_v53 = vsel %vm2362_vm0, %v10244_v63, 0.0 }
 0x4b9   :  { %v3499_v12 = vadd.f32 %v3498_v3, %v3497_v43 }
 0x4bb   :  { %v3501_v42 = vadd.f32 %v3500_v17, %v3499_v12  ;;  %v3508_v12 = vsel %vm2362_vm0, %v10238_v61, 0.0 }
 0x4bd   :  { %v3503_v56 = vadd.f32 %v3502_v6, %v3501_v42 }
 0x4bf   :  { %v3505_v3 = vadd.f32 %v3504_v45, %v3503_v56 }
 0x4c1   :  { %v3507_v43 = vadd.f32 %v3506_v53, %v3505_v3 }
 0x4c3   :  { %v3509_v6 = vadd.f32 %v3508_v12, %v3507_v43 }
 0x4c5   :  { %v10246_v9 = vpop.f32.mrf.mxu1 }
 0x4c6   :  { %14535 = vst [vmem:[#allocation126_spill] sm:$0xff] %v10246_v9  ;;  %v3512_v56 = vsel %vm2362_vm0, %v10246_v9, 0.0 }
 0x4c7   :  { %v10252_v23 = vpop.f32.mrf.mxu1 }
 0x4c8   :  { %14536 = vst [vmem:[#allocation22_spill] sm:$0xff] %v10252_v23  ;;  %v3510_v17 = vsel %vm2362_vm0, %v10252_v23, 0.0 }
 0x4c9   :  { %v3511_v42 = vadd.f32 %v3510_v17, %v3509_v6 }
 0x4cb   :  { %v3513_v53 = vadd.f32 %v3512_v56, %v3511_v42 }
 0x4e1   :  { %v10254_v59 = vpop.f32.mrf.mxu1 }
 0x4e2   :  { %14537 = vst [vmem:[#allocation26_spill] sm:$0xff] %v10254_v59  ;;  %v3516_v61 = vsel %vm2362_vm0, %v10254_v59, 0.0 }
 0x4e3   :  { %v10260_v38 = vpop.f32.mrf.mxu1 }
 0x4e4   :  { %14538 = vst [vmem:[#allocation127_spill] sm:$0xff] %v10260_v38  ;;  %v3514_v45 = vsel %vm2362_vm0, %v10260_v38, 0.0 }
 0x4e5   :  { %v3515_v3 = vadd.f32 %v3514_v45, %v3513_v53 }
 0x4e7   :  { %v3517_v12 = vadd.f32 %v3516_v61, %v3515_v3 }
 0x4fd   :  { %v10262_v18 = vpop.f32.mrf.mxu1 }
 0x4fe   :  { %14539 = vst [vmem:[#allocation27_spill] sm:$0xff] %v10262_v18  ;;  %v3520_v23 = vsel %vm2362_vm0, %v10262_v18, 0.0 }
 0x4ff   :  { %v10268_v63 = vpop.f32.mrf.mxu1 }
 0x500   :  { %14540 = vst [vmem:[#allocation128_spill] sm:$0xff] %v10268_v63  ;;  %v3518_v43 = vsel %vm2362_vm0, %v10268_v63, 0.0 }
 0x501   :  { %v3519_v17 = vadd.f32 %v3518_v43, %v3517_v12 }
 0x503   :  { %v3521_v48 = vadd.f32 %v3520_v23, %v3519_v17 }
 0x519   :  { %v6833_v6 = vpop.f32.mrf.mxu1 }
 0x51a   :  { %v3524_v45 = vsel %vm2362_vm0, %v6833_v6, 0.0 }
 0x51b   :  { %v3382_v9 = vpop.f32.mrf.mxu1 }
 0x51c   :  { %v3522_v38 = vsel %vm2362_vm0, %v3382_v9, 0.0 }
 0x51d   :  { %v3523_v42 = vadd.f32 %v3522_v38, %v3521_v48  ;;  %v6836_v56 = vpop.f32.mrf.mxu1 }
 0x51e   :  { %v3528_v3 = vsel %vm2362_vm0, %v6836_v56, 0.0 }
 0x51f   :  { %v10278_v53 = vpop.f32.mrf.mxu1  ;;  %v3525_v59 = vadd.f32 %v3524_v45, %v3523_v42 }
 0x520   :  { %v3526_v63 = vsel %vm2362_vm0, %v10278_v53, 0.0 }
 0x521   :  { %v3527_v61 = vadd.f32 %v3526_v63, %v3525_v59 }
 0x523   :  { %v3529_v43 = vadd.f32 %v3528_v3, %v3527_v61 }
 0x525   :  { %v3530_v12 = vrot.slane %v3529_v43, 4 }
 0x527   :  { %v3531_v18 = vadd.f32 %v3530_v12, %v3529_v43 }
 0x529   :  { %v3532_v26 = vrot.slane %v3531_v18, 2 }
 0x52b   :  { %v3533_v23 = vadd.f32 %v3532_v26, %v3531_v18 }
 0x52d   :  { %v3534_v17 = vrot.slane %v3533_v23, 1 }
 0x52f   :  { %v3535_v8 = vadd.f32 %v3534_v17, %v3533_v23 }
 0x531   :  { %v10283_v48 = vmul.f32 0.001953125, %v3535_v8 }
 0x533   :  { %v10286_v38 = vsub.f32 %v3382_v9, %v10283_v48  ;;  %v10289_v42 = vsub.f32 %v6833_v6, %v10283_v48  ;;  %v10292_v45 = vsub.f32 %v6836_v56, %v10283_v48  ;;  %v10296_v59 = vsub.f32 %v10038_v52, %v10283_v48 }
 0x534   :  { %v10300_v26 = vsub.f32 %v10036_v44, %v10283_v48  ;;  %v10304_v8 = vsub.f32 %v10042_v46, %v10283_v48  ;;  %v10308_v18 = vsub.f32 %v10040_v16, %v10283_v48  ;;  %v10316_v52 = vsub.f32 %v10052_v51, %v10283_v48 }
 0x535   :  { %14541 = vst [vmem:[#allocation25_spill] sm:$0xff] %v10286_v38  ;;  %14542 = vst [vmem:[#allocation30_spill] sm:$0xff] %v10289_v42  ;;  %v3602_v63 = vmul.f32 %v10296_v59, %v10296_v59  ;;  %v10322_v46 = vsub.f32 %v10046_v55, %v10283_v48  ;;  %v10330_v3 = vsub.f32 %v10060_v22, %v10283_v48 }
 0x536   :  { %v3603_v9 = vmul.f32 %v10300_v26, %v10300_v26  ;;  %v3604_v44 = vmul.f32 %v10304_v8, %v10304_v8  ;;  %v3605_v16 = vmul.f32 %v10308_v18, %v10308_v18  ;;  %v3606_v51 = vmul.f32 %v10316_v52, %v10316_v52 }
 0x537   :  { %v3666_v6 = vsel %vm2362_vm0, %v3602_v63, 0.0  ;;  %v10337_v55 = vsub.f32 %v10054_v62, %v10283_v48  ;;  %v3607_v23 = vmul.f32 %v10322_v46, %v10322_v46  ;;  %v10344_v22 = vsub.f32 %v10068_v41, %v10283_v48 }
 0x538   :  { %v3667_v56 = vsel %vm2362_vm0, %v3603_v9, 0.0  ;;  %v3669_v43 = vsel %vm2362_vm0, %v3604_v44, 0.0  ;;  %v3671_v17 = vsel %vm2362_vm0, %v3605_v16, 0.0  ;;  %v3608_v9 = vmul.f32 %v10330_v3, %v10330_v3 }
 0x539   :  { %v3668_v61 = vadd.f32 %v3667_v56, %v3666_v6  ;;  %v3673_v44 = vsel %vm2362_vm0, %v3606_v51, 0.0  ;;  %v10351_v62 = vsub.f32 %v10062_v21, %v10283_v48  ;;  %v3609_v56 = vmul.f32 %v10337_v55, %v10337_v55 }
 0x53a   :  { %v3675_v16 = vsel %vm2362_vm0, %v3607_v23, 0.0  ;;  %v10358_v41 = vsub.f32 %v10076_v2, %v10283_v48  ;;  %v3677_v51 = vsel %vm2362_vm0, %v3608_v9, 0.0  ;;  %v10365_v21 = vsub.f32 %v10070_v60, %v10283_v48 }
 0x53b   :  { %v3670_v12 = vadd.f32 %v3669_v43, %v3668_v61  ;;  %v3610_v43 = vmul.f32 %v10344_v22, %v10344_v22  ;;  %v3679_v23 = vsel %vm2362_vm0, %v3609_v56, 0.0  ;;  %v10372_v2 = vsub.f32 %v10084_v47, %v10283_v48 }
 0x53c   :  { %v10379_v60 = vsub.f32 %v10078_v39, %v10283_v48  ;;  %v10386_v47 = vsub.f32 %v10092_v32, %v10283_v48  ;;  %v10393_v39 = vsub.f32 %v10086_v27, %v10283_v48  ;;  %v10400_v32 = vsub.f32 %v10100_v57, %v10283_v48 }
 0x53d   :  { %v3672_v63 = vadd.f32 %v3671_v17, %v3670_v12  ;;  %v3611_v17 = vmul.f32 %v10351_v62, %v10351_v62  ;;  %v3681_v9 = vsel %vm2362_vm0, %v3610_v43, 0.0  ;;  %v10407_v27 = vsub.f32 %v10094_v20, %v10283_v48 }
 0x53e   :  { %v10414_v57 = vsub.f32 %v10108_v29, %v10283_v48  ;;  %v10421_v20 = vsub.f32 %v10102_v19, %v10283_v48  ;;  %v10428_v29 = vsub.f32 %v10116_v1, %v10283_v48  ;;  %v10435_v19 = vsub.f32 %v10110_v35, %v10283_v48 }
 0x53f   :  { %v3674_v6 = vadd.f32 %v3673_v44, %v3672_v63  ;;  %v3612_v44 = vmul.f32 %v10358_v41, %v10358_v41  ;;  %v3683_v56 = vsel %vm2362_vm0, %v3611_v17, 0.0  ;;  %v10442_v1 = vsub.f32 %v10124_v54, %v10283_v48 }
 0x540   :  { %v10449_v35 = vsub.f32 %v10118_v11, %v10283_v48  ;;  %v10456_v54 = vsub.f32 %v10132_v28, %v10283_v48  ;;  %v10463_v11 = vsub.f32 %v10126_v10, %v10283_v48  ;;  %v10470_v28 = vsub.f32 %v10140_v34, %v10283_v48 }
 0x541   :  { %v3676_v61 = vadd.f32 %v3675_v16, %v3674_v6  ;;  %v3613_v16 = vmul.f32 %v10365_v21, %v10365_v21  ;;  %v3685_v43 = vsel %vm2362_vm0, %v3612_v44, 0.0  ;;  %v10477_v10 = vsub.f32 %v10134_v33, %v10283_v48 }
 0x542   :  { %v10484_v34 = vsub.f32 %v10148_v13, %v10283_v48  ;;  %v10491_v33 = vsub.f32 %v10142_v49, %v10283_v48 }
 0x543   :  { %v3678_v12 = vadd.f32 %v3677_v51, %v3676_v61  ;;  %v3614_v51 = vmul.f32 %v10372_v2, %v10372_v2  ;;  %v3687_v17 = vsel %vm2362_vm0, %v3613_v16, 0.0 }
 0x545   :  { %v3680_v63 = vadd.f32 %v3679_v23, %v3678_v12  ;;  %v3615_v23 = vmul.f32 %v10379_v60, %v10379_v60  ;;  %v3689_v44 = vsel %vm2362_vm0, %v3614_v51, 0.0 }
 0x547   :  { %v3682_v6 = vadd.f32 %v3681_v9, %v3680_v63  ;;  %v3616_v9 = vmul.f32 %v10386_v47, %v10386_v47  ;;  %v3691_v16 = vsel %vm2362_vm0, %v3615_v23, 0.0 }
 0x549   :  { %v3684_v61 = vadd.f32 %v3683_v56, %v3682_v6  ;;  %v3617_v56 = vmul.f32 %v10393_v39, %v10393_v39  ;;  %v3693_v51 = vsel %vm2362_vm0, %v3616_v9, 0.0 }
 0x54b   :  { %v3686_v12 = vadd.f32 %v3685_v43, %v3684_v61  ;;  %v3618_v43 = vmul.f32 %v10400_v32, %v10400_v32  ;;  %v3695_v23 = vsel %vm2362_vm0, %v3617_v56, 0.0 }
 0x54d   :  { %v3688_v63 = vadd.f32 %v3687_v17, %v3686_v12  ;;  %v3619_v17 = vmul.f32 %v10407_v27, %v10407_v27  ;;  %v3697_v9 = vsel %vm2362_vm0, %v3618_v43, 0.0 }
 0x54f   :  { %v3690_v6 = vadd.f32 %v3689_v44, %v3688_v63  ;;  %v3620_v44 = vmul.f32 %v10414_v57, %v10414_v57  ;;  %v3699_v56 = vsel %vm2362_vm0, %v3619_v17, 0.0 }
 0x551   :  { %v3692_v61 = vadd.f32 %v3691_v16, %v3690_v6  ;;  %v3621_v16 = vmul.f32 %v10421_v20, %v10421_v20  ;;  %v3701_v43 = vsel %vm2362_vm0, %v3620_v44, 0.0 }
 0x553   :  { %v3694_v12 = vadd.f32 %v3693_v51, %v3692_v61  ;;  %v3622_v51 = vmul.f32 %v10428_v29, %v10428_v29  ;;  %v3703_v17 = vsel %vm2362_vm0, %v3621_v16, 0.0 }
 0x555   :  { %v3696_v63 = vadd.f32 %v3695_v23, %v3694_v12  ;;  %v3623_v23 = vmul.f32 %v10435_v19, %v10435_v19  ;;  %v3705_v44 = vsel %vm2362_vm0, %v3622_v51, 0.0 }
 0x557   :  { %v3698_v6 = vadd.f32 %v3697_v9, %v3696_v63  ;;  %v3624_v9 = vmul.f32 %v10442_v1, %v10442_v1  ;;  %v3707_v16 = vsel %vm2362_vm0, %v3623_v23, 0.0 }
 0x559   :  { %v3700_v61 = vadd.f32 %v3699_v56, %v3698_v6  ;;  %v3625_v56 = vmul.f32 %v10449_v35, %v10449_v35  ;;  %v3709_v51 = vsel %vm2362_vm0, %v3624_v9, 0.0 }
 0x55b   :  { %v3702_v12 = vadd.f32 %v3701_v43, %v3700_v61  ;;  %v3626_v43 = vmul.f32 %v10456_v54, %v10456_v54  ;;  %v3711_v23 = vsel %vm2362_vm0, %v3625_v56, 0.0  ;;  %v3629_v56 = vmul.f32 %v10477_v10, %v10477_v10 }
 0x55d   :  { %v3704_v63 = vadd.f32 %v3703_v17, %v3702_v12  ;;  %v3627_v17 = vmul.f32 %v10463_v11, %v10463_v11  ;;  %v3713_v9 = vsel %vm2362_vm0, %v3626_v43, 0.0  ;;  %v10500_v43 = vsub.f32 %v10156_v58, %v10283_v48 }
 0x55e   :  { %v10514_v58 = vsub.f32 %v10164_v50, %v10283_v48 }
 0x55f   :  { %v3706_v6 = vadd.f32 %v3705_v44, %v3704_v63  ;;  %v3628_v44 = vmul.f32 %v10470_v28, %v10470_v28 }
 0x561   :  { %v3708_v61 = vadd.f32 %v3707_v16, %v3706_v6  ;;  %v4499_v16 = vld [vmem:[#allocation2] sm:$0xff]  ;;  %v3717_v49 = vsel %vm2362_vm0, %v3628_v44, 0.0 }
 0x562   :  { %4547 = vst.msk [vmem:[#allocation3] sm:$0xff] %vm2362_vm0, %v4499_v16  ;;  %v3632_v16 = vmul.f32 %v10500_v43, %v10500_v43 }
 0x563   :  { %v3710_v12 = vadd.f32 %v3709_v51, %v3708_v61  ;;  %v4500_v61 = vld [vmem:[#allocation2 + $0x8] sm:$0xff]  ;;  %v3715_v51 = vsel %vm2362_vm0, %v3627_v17, 0.0  ;;  %v3631_v17 = vmul.f32 %v10491_v33, %v10491_v33 }
 0x564   :  { %4548 = vst.msk [vmem:[#allocation3 + $0x8] sm:$0xff] %vm2362_vm0, %v4500_v61 }
 0x565   :  { %v3712_v63 = vadd.f32 %v3711_v23, %v3710_v12  ;;  %v3630_v12 = vmul.f32 %v10484_v34, %v10484_v34 }
 0x567   :  { %v3714_v6 = vadd.f32 %v3713_v9, %v3712_v63  ;;  %v10507_v63 = vsub.f32 %v10150_v14, %v10283_v48  ;;  %v3719_v9 = vsel %vm2362_vm0, %v3629_v56, 0.0  ;;  %v3721_v44 = vsel %vm2362_vm0, %v3630_v12, 0.0 }
 0x568   :  { %v10521_v14 = vsub.f32 %v10158_v15, %v10283_v48  ;;  %v3723_v56 = vsel %vm2362_vm0, %v3631_v17, 0.0  ;;  %v3634_v12 = vmul.f32 %v10514_v58, %v10514_v58  ;;  %v10536_v15 = vsub.f32 %v10166_v7, %v10283_v48 }
 0x569   :  { %v3716_v13 = vadd.f32 %v3715_v51, %v3714_v6  ;;  %v10550_v7 = vsub.f32 %v10174_v5, %v10283_v48  ;;  %v10565_v5 = vsub.f32 %v10182_v36, %v10283_v48  ;;  %v10579_v36 = vsub.f32 %v10190_v0, %v10283_v48 }
 0x56a   :  { %v3635_v17 = vmul.f32 %v10521_v14, %v10521_v14  ;;  %v10594_v0 = vsub.f32 %v10198_v25, %v10283_v48 }
 0x56b   :  { %v3718_v23 = vadd.f32 %v3717_v49, %v3716_v13  ;;  %v4627_v51 = vld [vmem:[#allocation3 + $0x1] ss:$2 sm:$0xff]  ;;  %v3633_v13 = vmul.f32 %v10507_v63, %v10507_v63  ;;  %v10529_v49 = vsub.f32 %v10172_v31, %v10283_v48  ;;  %v10543_v31 = vsub.f32 %v10180_v4, %v10283_v48 }
 0x56c   :  { %4996 = vrot.lane.b32.xlu1 %v4627_v51, %s6936_s19  ;;  %14544 = vst [vmem:[#allocation31_spill] sm:$0xff] %v10594_v0 }
 0x56d   :  { %v3720_v6 = vadd.f32 %v3719_v9, %v3718_v23  ;;  %v3725_v23 = vsel %vm2362_vm0, %v3632_v16, 0.0  ;;  %v3729_v16 = vsel %vm2362_vm0, %v3634_v12, 0.0  ;;  %v3638_v12 = vmul.f32 %v10543_v31, %v10543_v31 }
 0x56f   :  { %v3722_v61 = vadd.f32 %v3721_v44, %v3720_v6  ;;  %v3727_v6 = vsel %vm2362_vm0, %v3633_v13, 0.0  ;;  %v3731_v13 = vsel %vm2362_vm0, %v3635_v17, 0.0  ;;  %v3639_v17 = vmul.f32 %v10550_v7, %v10550_v7 }
 0x571   :  { %v3724_v50 = vadd.f32 %v3723_v56, %v3722_v61  ;;  %v3636_v61 = vmul.f32 %v10529_v49, %v10529_v49  ;;  %v4501_v56 = vld [vmem:[#allocation2 + $0x10] sm:$0x3] }
 0x572   :  { %4549 = vst.msk [vmem:[#allocation3 + $0x10] sm:$0x3] %vm4392_vm1, %v4501_v56 }
 0x573   :  { %v3726_v9 = vadd.f32 %v3725_v23, %v3724_v50  ;;  %v3637_v50 = vmul.f32 %v10536_v15, %v10536_v15  ;;  %v10558_v23 = vsub.f32 %v10188_v30, %v10283_v48  ;;  %v10572_v30 = vsub.f32 %v10196_v24, %v10283_v48 }
 0x575   :  { %v3728_v44 = vadd.f32 %v3727_v6, %v3726_v9  ;;  %v3733_v9 = vsel %vm2362_vm0, %v3636_v61, 0.0  ;;  %v3737_v61 = vsel %vm2362_vm0, %v3638_v12, 0.0  ;;  %v3642_v12 = vmul.f32 %v10572_v30, %v10572_v30 }
 0x577   :  { %v3730_v51 = vadd.f32 %v3729_v16, %v3728_v44  ;;  %v3735_v44 = vsel %vm2362_vm0, %v3637_v50, 0.0  ;;  %v3739_v50 = vsel %vm2362_vm0, %v3639_v17, 0.0  ;;  %v3643_v17 = vmul.f32 %v10579_v36, %v10579_v36 }
 0x579   :  { %v3732_v4 = vadd.f32 %v3731_v13, %v3730_v51  ;;  %v3640_v51 = vmul.f32 %v10558_v23, %v10558_v23  ;;  %v4659_v13 = vld [vmem:[#allocation3 + $0x2] ss:$2 sm:$0xff] }
 0x57a   :  { %5060 = vrot.lane.b32.xlu1 %v4659_v13, %s6938_s20 }
 0x57b   :  { %v3734_v6 = vadd.f32 %v3733_v9, %v3732_v4  ;;  %v3641_v4 = vmul.f32 %v10565_v5, %v10565_v5  ;;  %v10587_v9 = vsub.f32 %v10204_v37, %v10283_v48  ;;  %v10601_v37 = vsub.f32 %v10212_v40, %v10283_v48 }
 0x57d   :  { %v3736_v16 = vadd.f32 %v3735_v44, %v3734_v6  ;;  %14543 = vst [vmem:[#allocation129_spill] sm:$0xff] %v10587_v9  ;;  %v3741_v6 = vsel %vm2362_vm0, %v3640_v51, 0.0  ;;  %14545 = vst [vmem:[#allocation130_spill] sm:$0xff] %v10601_v37  ;;  %v3745_v51 = vsel %vm2362_vm0, %v3642_v12, 0.0 }
 0x57f   :  { %v3738_v56 = vadd.f32 %v3737_v61, %v3736_v16  ;;  %v3743_v16 = vsel %vm2362_vm0, %v3641_v4, 0.0  ;;  %v3747_v4 = vsel %vm2362_vm0, %v3643_v17, 0.0 }
 0x581   :  { %v3740_v24 = vadd.f32 %v3739_v50, %v3738_v56  ;;  %v3644_v56 = vmul.f32 %v10587_v9, %v10587_v9  ;;  %v14546_v50 = vld [vmem:[#allocation17_spill] sm:$0xff] }
 0x582   :  { %v10608_v25 = vsub.f32 %v14546_v50, %v10283_v48 }
 0x583   :  { %v3742_v44 = vadd.f32 %v3741_v6, %v3740_v24  ;;  %v3645_v24 = vmul.f32 %v10594_v0, %v10594_v0  ;;  %v3749_v12 = vsel %vm2362_vm0, %v3644_v56, 0.0 }
 0x584   :  { %14547 = vst [vmem:[#allocation28_spill] sm:$0xff] %v10608_v25  ;;  %v3647_v0 = vmul.f32 %v10608_v25, %v10608_v25 }
 0x585   :  { %v3744_v61 = vadd.f32 %v3743_v16, %v3742_v44  ;;  %v14548_v44 = vld [vmem:[#allocation20_spill] sm:$0xff]  ;;  %v3646_v16 = vmul.f32 %v10601_v37, %v10601_v37  ;;  %v3751_v17 = vsel %vm2362_vm0, %v3645_v24, 0.0 }
 0x586   :  { %v10615_v40 = vsub.f32 %v14548_v44, %v10283_v48  ;;  %v3755_v24 = vsel %vm2362_vm0, %v3647_v0, 0.0 }
 0x587   :  { %v3746_v13 = vadd.f32 %v3745_v51, %v3744_v61  ;;  %v14550_v51 = vld [vmem:[#allocation18_spill] sm:$0xff]  ;;  %v3753_v56 = vsel %vm2362_vm0, %v3646_v16, 0.0 }
 0x588   :  { %14549 = vst [vmem:[#allocation32_spill] sm:$0xff] %v10615_v40  ;;  %v10622_v50 = vsub.f32 %v14550_v51, %v10283_v48  ;;  %v3648_v37 = vmul.f32 %v10615_v40, %v10615_v40 }
 0x589   :  { %v3748_v6 = vadd.f32 %v3747_v4, %v3746_v13  ;;  %v14552_v4 = vld [vmem:[#allocation124_spill] sm:$0xff] }
 0x58a   :  { %14551 = vst [vmem:[#allocation131_spill] sm:$0xff] %v10622_v50  ;;  %v10629_v44 = vsub.f32 %v14552_v4, %v10283_v48  ;;  %v3649_v25 = vmul.f32 %v10622_v50, %v10622_v50  ;;  %v3757_v16 = vsel %vm2362_vm0, %v3648_v37, 0.0 }
 0x58b   :  { %v3750_v61 = vadd.f32 %v3749_v12, %v3748_v6  ;;  %v14554_v12 = vld [vmem:[#allocation21_spill] sm:$0xff] }
 0x58c   :  { %14553 = vst [vmem:[#allocation33_spill] sm:$0xff] %v10629_v44  ;;  %v10636_v51 = vsub.f32 %v14554_v12, %v10283_v48  ;;  %v3650_v40 = vmul.f32 %v10629_v44, %v10629_v44  ;;  %v3759_v0 = vsel %vm2362_vm0, %v3649_v25, 0.0 }
 0x58d   :  { %v3752_v13 = vadd.f32 %v3751_v17, %v3750_v61  ;;  %v14556_v17 = vld [vmem:[#allocation23_spill] sm:$0xff] }
 0x58e   :  { %14555 = vst [vmem:[#allocation132_spill] sm:$0xff] %v10636_v51  ;;  %v10643_v4 = vsub.f32 %v14556_v17, %v10283_v48  ;;  %v3651_v50 = vmul.f32 %v10636_v51, %v10636_v51  ;;  %v3761_v37 = vsel %vm2362_vm0, %v3650_v40, 0.0 }
 0x58f   :  { %v3754_v6 = vadd.f32 %v3753_v56, %v3752_v13  ;;  %v14558_v56 = vld [vmem:[#allocation19_spill] sm:$0xff] }
 0x590   :  { %14557 = vst [vmem:[#allocation29_spill] sm:$0xff] %v10643_v4  ;;  %v10650_v12 = vsub.f32 %v14558_v56, %v10283_v48  ;;  %v3652_v44 = vmul.f32 %v10643_v4, %v10643_v4  ;;  %v3763_v25 = vsel %vm2362_vm0, %v3651_v50, 0.0 }
 0x591   :  { %v3756_v61 = vadd.f32 %v3755_v24, %v3754_v6  ;;  %v14560_v24 = vld [vmem:[#allocation24_spill] sm:$0xff] }
 0x592   :  { %14559 = vst [vmem:[#allocation35_spill] sm:$0xff] %v10650_v12  ;;  %v10657_v17 = vsub.f32 %v14560_v24, %v10283_v48  ;;  %v3653_v51 = vmul.f32 %v10650_v12, %v10650_v12  ;;  %v3765_v40 = vsel %vm2362_vm0, %v3652_v44, 0.0 }
 0x593   :  { %v3758_v13 = vadd.f32 %v3757_v16, %v3756_v61  ;;  %v14562_v16 = vld [vmem:[#allocation123_spill] sm:$0xff] }
 0x594   :  { %14561 = vst [vmem:[#allocation133_spill] sm:$0xff] %v10657_v17  ;;  %v10664_v56 = vsub.f32 %v14562_v16, %v10283_v48  ;;  %v3654_v4 = vmul.f32 %v10657_v17, %v10657_v17  ;;  %v3767_v50 = vsel %vm2362_vm0, %v3653_v51, 0.0 }
 0x595   :  { %v3760_v6 = vadd.f32 %v3759_v0, %v3758_v13  ;;  %v14564_v0 = vld [vmem:[#allocation22_spill] sm:$0xff] }
 0x596   :  { %14563 = vst [vmem:[#allocation36_spill] sm:$0xff] %v10664_v56  ;;  %v10671_v24 = vsub.f32 %v14564_v0, %v10283_v48  ;;  %v3655_v12 = vmul.f32 %v10664_v56, %v10664_v56  ;;  %v3769_v44 = vsel %vm2362_vm0, %v3654_v4, 0.0 }
 0x597   :  { %v3762_v61 = vadd.f32 %v3761_v37, %v3760_v6  ;;  %v14566_v37 = vld [vmem:[#allocation126_spill] sm:$0xff] }
 0x598   :  { %14565 = vst [vmem:[#allocation134_spill] sm:$0xff] %v10671_v24  ;;  %v10678_v16 = vsub.f32 %v14566_v37, %v10283_v48  ;;  %v3656_v17 = vmul.f32 %v10671_v24, %v10671_v24  ;;  %v3771_v51 = vsel %vm2362_vm0, %v3655_v12, 0.0 }
 0x599   :  { %v3764_v13 = vadd.f32 %v3763_v25, %v3762_v61  ;;  %v14568_v25 = vld [vmem:[#allocation127_spill] sm:$0xff] }
 0x59a   :  { %14567 = vst [vmem:[#allocation34_spill] sm:$0xff] %v10678_v16  ;;  %v10685_v0 = vsub.f32 %v14568_v25, %v10283_v48  ;;  %v3657_v56 = vmul.f32 %v10678_v16, %v10678_v16  ;;  %v3773_v4 = vsel %vm2362_vm0, %v3656_v17, 0.0 }
 0x59b   :  { %v3766_v6 = vadd.f32 %v3765_v40, %v3764_v13  ;;  %v14570_v40 = vld [vmem:[#allocation26_spill] sm:$0xff] }
 0x59c   :  { %14569 = vst [vmem:[#allocation39_spill] sm:$0xff] %v10685_v0  ;;  %v10692_v37 = vsub.f32 %v14570_v40, %v10283_v48  ;;  %v3658_v24 = vmul.f32 %v10685_v0, %v10685_v0  ;;  %v3775_v12 = vsel %vm2362_vm0, %v3657_v56, 0.0  ;;  %v4524_v0 = vld [vmem:[#allocation2 + $0x1b8] sm:$0xff] }
 0x59d   :  { %v3768_v61 = vadd.f32 %v3767_v50, %v3766_v6  ;;  %v14572_v50 = vld [vmem:[#allocation128_spill] sm:$0xff]  ;;  %4572 = vst.msk [vmem:[#allocation3 + $0xc8] sm:$0xff] %vm2362_vm0, %v4524_v0 }
 0x59e   :  { %14571 = vst [vmem:[#allocation135_spill] sm:$0xff] %v10692_v37  ;;  %v10699_v25 = vsub.f32 %v14572_v50, %v10283_v48  ;;  %v3659_v16 = vmul.f32 %v10692_v37, %v10692_v37  ;;  %v3777_v50 = vsel %vm2362_vm0, %v3658_v24, 0.0  ;;  %v3662_v37 = vmul.f32 %v10286_v38, %v10286_v38 }
 0x59f   :  { %v3770_v13 = vadd.f32 %v3769_v44, %v3768_v61  ;;  %v14574_v44 = vld [vmem:[#allocation27_spill] sm:$0xff] }
 0x5a0   :  { %14573 = vst [vmem:[#allocation40_spill] sm:$0xff] %v10699_v25  ;;  %v10706_v40 = vsub.f32 %v14574_v44, %v10283_v48  ;;  %v3600_v44 = vsub.f32 %v10278_v53, %v10283_v48 }
 0x5a1   :  { %v3772_v6 = vadd.f32 %v3771_v51, %v3770_v13  ;;  %v3660_v51 = vmul.f32 %v10699_v25, %v10699_v25 }
 0x5a2   :  { %14575 = vst [vmem:[#allocation150_spill] sm:$0xff] %v10706_v40  ;;  %v3661_v17 = vmul.f32 %v10706_v40, %v10706_v40  ;;  %v3785_v40 = vsel %vm2362_vm0, %v3662_v37, 0.0 }
 0x5a3   :  { %v3774_v61 = vadd.f32 %v3773_v4, %v3772_v6  ;;  %v3779_v6 = vsel %vm2362_vm0, %v3659_v16, 0.0  ;;  %v3781_v56 = vsel %vm2362_vm0, %v3660_v51, 0.0 }
 0x5a4   :  { %v3783_v24 = vsel %vm2362_vm0, %v3661_v17, 0.0 }
 0x5a5   :  { %v3776_v13 = vadd.f32 %v3775_v12, %v3774_v61  ;;  %v3663_v12 = vmul.f32 %v10289_v42, %v10289_v42 }
 0x5a7   :  { %v3778_v9 = vadd.f32 %v3777_v50, %v3776_v13  ;;  %v3664_v50 = vmul.f32 %v3600_v44, %v3600_v44  ;;  %v3787_v53 = vsel %vm2362_vm0, %v3663_v12, 0.0  ;;  %v4525_v12 = vld [vmem:[#allocation2 + $0x1c0] sm:$0x3] }
 0x5a8   :  { %4573 = vst.msk [vmem:[#allocation3 + $0xd0] sm:$0x3] %vm4392_vm1, %v4525_v12  ;;  %v14578_v12 = vld [vmem:[#allocation31_spill] sm:$0xff] }
 0x5a9   :  { %v3780_v4 = vadd.f32 %v3779_v6, %v3778_v9  ;;  %v3665_v9 = vmul.f32 %v10292_v45, %v10292_v45  ;;  %v3789_v6 = vsel %vm2362_vm0, %v3664_v50, 0.0 }
 0x5ab   :  { %v3782_v61 = vadd.f32 %v3781_v56, %v3780_v4  ;;  %v3791_v4 = vsel %vm2362_vm0, %v3665_v9, 0.0  ;;  %v10755_v9 = vld [vmem:[%s13647_s3] ss:$0 sm:$0xff]  ;;  %s6944_s3 = smov 48  }
 0x5ac   :  { %14576 = vst [vmem:[#allocation153_spill] sm:$0xff] %v10755_v9 }
 0x5ad   :  { %v3784_v13 = vadd.f32 %v3783_v24, %v3782_v61 }
 0x5af   :  { %v3786_v16 = vadd.f32 %v3785_v40, %v3784_v13  ;;  %v4523_v13 = vld [vmem:[#allocation2 + $0x1b0] sm:$0xff] }
 0x5b0   :  { %4571 = vst.msk [vmem:[#allocation3 + $0xc0] sm:$0xff] %vm2362_vm0, %v4523_v13  ;;  %v14577_v13 = vld [vmem:[#allocation129_spill] sm:$0xff] }
 0x5b1   :  { %v3788_v48 = vadd.f32 %v3787_v53, %v3786_v16 }
 0x5b3   :  { %v3790_v51 = vadd.f32 %v3789_v6, %v3788_v48 }
 0x5b5   :  { %v3792_v56 = vadd.f32 %v3791_v4, %v3790_v51 }
 0x5b7   :  { %v3793_v42 = vrot.slane %v3792_v56, 4 }
 0x5b9   :  { %v3794_v38 = vadd.f32 %v3793_v42, %v3792_v56 }
 0x5bb   :  { %v3795_v17 = vrot.slane %v3794_v38, 2 }
 0x5bd   :  { %v3796_v61 = vadd.f32 %v3795_v17, %v3794_v38  ;;  %v10739_v38 = vld [vmem:[%s13646_s2] ss:$0 sm:$0xff]  ;;  %s6943_s2 = smov 40  }
 0x5bf   :  { %v3797_v24 = vrot.slane %v3796_v61, 1 }
 0x5c1   :  { %v3798_v25 = vadd.f32 %v3797_v24, %v3796_v61 }
 0x5c3   :  { %v3799_v37 = vmul.f32 0.001953125, %v3798_v25 }
 0x5c5   :  { %v3800_v40 = vadd.f32 1e-05, %v3799_v37 }
 0x5c7   :  { %6928 = vrsqrt.f32 %v3800_v40 }
 0x5d4   :  { %v10734_v50 = vpop.eup %6928 }
 0x5d5   :  { %v3864_v42 = vmul.f32 %v10734_v50, %v3600_v44  ;;  %v3865_v25 = vmul.f32 %v10734_v50, %v10292_v45  ;;  %v10746_v16 = vmul.f32 %v10734_v50, %v10296_v59  ;;  %v10750_v0 = vmul.f32 %v10734_v50, %v10300_v26 }
 0x5d6   :  { %v10759_v53 = vmul.f32 %v10734_v50, %v10304_v8  ;;  %v10763_v45 = vmul.f32 %v10734_v50, %v10308_v18  ;;  %v10767_v59 = vmul.f32 %v10734_v50, %v10316_v52  ;;  %v10771_v26 = vmul.f32 %v10734_v50, %v10322_v46 }
 0x5d7   :  { %v3934_v44 = vmul.f32 %v10739_v38, %v3864_v42  ;;  %v3935_v48 = vmul.f32 %v10739_v38, %v3865_v25  ;;  %v10777_v8 = vmul.f32 %v10734_v50, %v10330_v3  ;;  %v10781_v18 = vmul.f32 %v10734_v50, %v10337_v55  ;;  %v14579_v42 = vld [vmem:[#allocation130_spill] sm:$0xff]  ;;  %v14580_v25 = vld [vmem:[#allocation28_spill] sm:$0xff] }
 0x5d8   :  { %v10785_v52 = vmul.f32 %v10734_v50, %v10344_v22  ;;  %v10789_v46 = vmul.f32 %v10734_v50, %v10351_v62  ;;  %v10793_v6 = vmul.f32 %v10734_v50, %v10358_v41  ;;  %v10797_v3 = vmul.f32 %v10734_v50, %v10365_v21 }
 0x5d9   :  { %v4004_v51 = vadd.f32 %v10755_v9, %v3934_v44  ;;  %v4005_v55 = vadd.f32 %v10755_v9, %v3935_v48  ;;  %v10803_v22 = vmul.f32 %v10734_v50, %v10372_v2  ;;  %v10807_v62 = vmul.f32 %v10734_v50, %v10379_v60  ;;  %v14581_v44 = vld [vmem:[#allocation32_spill] sm:$0xff]  ;;  %v14582_v48 = vld [vmem:[#allocation131_spill] sm:$0xff]  ;;  %v14595_v9 = vld [vmem:[#allocation34_spill] sm:$0xff] }
 0x5da   :  { %v10811_v41 = vmul.f32 %v10734_v50, %v10386_v47  ;;  %v10815_v21 = vmul.f32 %v10734_v50, %v10393_v39  ;;  %v10819_v4 = vmul.f32 %v10734_v50, %v10400_v32  ;;  %v10823_v2 = vmul.f32 %v10734_v50, %v10407_v27 }
 0x5db   :  { %v4068_v56 = vmax.f32 %v4004_v51, 0.0  ;;  %v4069_v17 = vmax.f32 %v4005_v55, 0.0  ;;  %v10827_v60 = vmul.f32 %v10734_v50, %v10414_v57  ;;  %v10831_v47 = vmul.f32 %v10734_v50, %v10421_v20  ;;  %v14583_v55 = vld [vmem:[#allocation33_spill] sm:$0xff] }
 0x5dc   :  { %v10835_v39 = vmul.f32 %v10734_v50, %v10428_v29  ;;  %v10839_v32 = vmul.f32 %v10734_v50, %v10435_v19  ;;  %v10843_v27 = vmul.f32 %v10734_v50, %v10442_v1  ;;  %v10847_v57 = vmul.f32 %v10734_v50, %v10449_v35 }
 0x5dd   :  { %v4227_v61 = vrot.slane %v4068_v56, 7  ;;  %v4228_v24 = vrot.slane %v4069_v17, 7  ;;  %v10851_v20 = vmul.f32 %v10734_v50, %v10456_v54  ;;  %v10855_v29 = vmul.f32 %v10734_v50, %v10463_v11  ;;  %v14584_v17 = vld [vmem:[#allocation132_spill] sm:$0xff] }
 0x5de   :  { %v10859_v19 = vmul.f32 %v10734_v50, %v10470_v28  ;;  %v10863_v1 = vmul.f32 %v10734_v50, %v10477_v10  ;;  %v10867_v35 = vmul.f32 %v10734_v50, %v10484_v34  ;;  %v10871_v54 = vmul.f32 %v10734_v50, %v10491_v33 }
 0x5df   :  { %v4229_v37 = vsel %vm163_vm2, %v4227_v61, %v4228_v24  ;;  %v4357_v11 = vsel %vm163_vm2, 0.0, %v4227_v61  ;;  %v10877_v28 = vmul.f32 %v10734_v50, %v10500_v43  ;;  %v10881_v10 = vmul.f32 %v10734_v50, %v10507_v63 }
 0x5e0   :  { %4493 = vst.msk [vmem:[#allocation2 + $0x330] sm:$0xff] %vm2362_vm0, %v4357_v11  ;;  %4494 = vst.msk [vmem:[#allocation2 + $0x338] sm:$0xff] %vm2362_vm0, %v4229_v37  ;;  %v10887_v34 = vmul.f32 %v10734_v50, %v10514_v58  ;;  %v10891_v33 = vmul.f32 %v10734_v50, %v10521_v14  ;;  %v10895_v43 = vmul.f32 %v10734_v50, %v10529_v49  ;;  %v14585_v37 = vld [vmem:[#allocation29_spill] sm:$0xff] }
 0x5e1   :  { %v10899_v63 = vmul.f32 %v10734_v50, %v10536_v15  ;;  %v10903_v40 = vmul.f32 %v10734_v50, %v10543_v31  ;;  %v10907_v58 = vmul.f32 %v10734_v50, %v10550_v7  ;;  %v10911_v14 = vmul.f32 %v10734_v50, %v10558_v23 }
 0x5e2   :  { %v10915_v49 = vmul.f32 %v10734_v50, %v10565_v5  ;;  %v10919_v15 = vmul.f32 %v10734_v50, %v10572_v30  ;;  %v10923_v31 = vmul.f32 %v10734_v50, %v10579_v36  ;;  %v10927_v7 = vmul.f32 %v10734_v50, %v14577_v13  ;;  %v14587_v13 = vld [vmem:[#allocation35_spill] sm:$0xff] }
 0x5e3   :  { %v10931_v23 = vmul.f32 %v10734_v50, %v14578_v12  ;;  %v10935_v5 = vmul.f32 %v10734_v50, %v14579_v42  ;;  %v10939_v30 = vmul.f32 %v10734_v50, %v14580_v25  ;;  %v10943_v36 = vmul.f32 %v10734_v50, %v14581_v44  ;;  %v14589_v42 = vld [vmem:[#allocation133_spill] sm:$0xff]  ;;  %v14591_v44 = vld [vmem:[#allocation36_spill] sm:$0xff] }
 0x5e4   :  { %v10947_v51 = vmul.f32 %v10734_v50, %v14582_v48  ;;  %v10951_v56 = vmul.f32 %v10734_v50, %v14583_v55  ;;  %v10955_v61 = vmul.f32 %v10734_v50, %v14584_v17  ;;  %v10959_v11 = vmul.f32 %v10734_v50, %v14585_v37  ;;  %v14593_v55 = vld [vmem:[#allocation134_spill] sm:$0xff] }
 0x5e5   :  { %v10963_v12 = vmul.f32 %v10734_v50, %v14587_v13  ;;  %v10967_v25 = vmul.f32 %v10734_v50, %v14589_v42  ;;  %v10971_v48 = vmul.f32 %v10734_v50, %v14591_v44  ;;  %v10975_v17 = vmul.f32 %v10734_v50, %v14593_v55 }
 0x5e6   :  { %14586 = vst [vmem:[#allocation136_spill] sm:$0xff] %v10959_v11  ;;  %v10979_v37 = vmul.f32 %v10734_v50, %v14595_v9  ;;  %v14597_v11 = vld [vmem:[#allocation39_spill] sm:$0xff] }
 0x5e7   :  { %14588 = vst [vmem:[#allocation16_spill] sm:$0xff] %v10963_v12  ;;  %14590 = vst [vmem:[#allocation38_spill] sm:$0xff] %v10967_v25  ;;  %v10983_v13 = vmul.f32 %v10734_v50, %v14597_v11  ;;  %v14599_v12 = vld [vmem:[#allocation135_spill] sm:$0xff]  ;;  %v14600_v25 = vld [vmem:[#allocation40_spill] sm:$0xff] }
 0x5e8   :  { %14592 = vst [vmem:[#allocation7_spill] sm:$0xff] %v10971_v48  ;;  %14594 = vst [vmem:[#allocation37_spill] sm:$0xff] %v10975_v17  ;;  %v10987_v42 = vmul.f32 %v10734_v50, %v14599_v12  ;;  %v10991_v44 = vmul.f32 %v10734_v50, %v14600_v25  ;;  %v14601_v48 = vld [vmem:[#allocation150_spill] sm:$0xff]  ;;  %v14602_v17 = vld [vmem:[#allocation25_spill] sm:$0xff]  ;;  %v11008_v12 = vmul.f32 %v10739_v38, %v10746_v16 }
 0x5e9   :  { %14596 = vst [vmem:[#allocation44_spill] sm:$0xff] %v10979_v37  ;;  %14598 = vst [vmem:[#allocation137_spill] sm:$0xff] %v10983_v13  ;;  %v10995_v55 = vmul.f32 %v10734_v50, %v14601_v48  ;;  %v10999_v9 = vmul.f32 %v10734_v50, %v14602_v17  ;;  %v14603_v37 = vld [vmem:[#allocation30_spill] sm:$0xff]  ;;  %v4389_v13 = vsel %vm163_vm2, %v4228_v24, 0.0  ;;  %v11012_v25 = vmul.f32 %v10739_v38, %v10750_v0 }
 0x5ea   :  { %v11003_v11 = vmul.f32 %v10734_v50, %v14603_v37  ;;  %v11016_v48 = vmul.f32 %v10739_v38, %v10759_v53  ;;  %v11020_v17 = vmul.f32 %v10739_v38, %v10763_v45  ;;  %v11024_v50 = vmul.f32 %v10739_v38, %v10767_v59  ;;  %4495 = vst.msk [vmem:[#allocation2 + $0x340] sm:$0x3] %vm4392_vm1, %v4389_v13 }
 0x5eb   :  { %v3877_v16 = vmul.f32 %v10739_v38, %v10771_v26  ;;  %v3878_v0 = vmul.f32 %v10739_v38, %v10777_v8  ;;  %v11033_v53 = vmul.f32 %v10739_v38, %v10781_v18  ;;  %v11037_v45 = vmul.f32 %v10739_v38, %v10785_v52 }
 0x5ec   :  { %v11041_v59 = vmul.f32 %v10739_v38, %v10789_v46  ;;  %v11045_v24 = vmul.f32 %v10739_v38, %v10793_v6  ;;  %v11049_v26 = vmul.f32 %v10739_v38, %v10797_v3  ;;  %v11053_v8 = vmul.f32 %v10739_v38, %v10803_v22 }
 0x5ed   :  { %v11057_v18 = vmul.f32 %v10739_v38, %v10807_v62  ;;  %v11061_v52 = vmul.f32 %v10739_v38, %v10811_v41  ;;  %v11065_v46 = vmul.f32 %v10739_v38, %v10815_v21  ;;  %v11069_v6 = vmul.f32 %v10739_v38, %v10819_v4 }
 0x5ee   :  { %v11073_v3 = vmul.f32 %v10739_v38, %v10823_v2  ;;  %v11077_v22 = vmul.f32 %v10739_v38, %v10827_v60  ;;  %v11081_v62 = vmul.f32 %v10739_v38, %v10831_v47  ;;  %v11085_v41 = vmul.f32 %v10739_v38, %v10835_v39  ;;  %v14609_v37 = vld [vmem:[#allocation16_spill] sm:$0xff]  ;;  %v14610_v13 = vld [vmem:[#allocation38_spill] sm:$0xff] }
 0x5ef   :  { %v11089_v21 = vmul.f32 %v10739_v38, %v10839_v32  ;;  %v11093_v4 = vmul.f32 %v10739_v38, %v10843_v27  ;;  %v11097_v2 = vmul.f32 %v10739_v38, %v10847_v57  ;;  %v11101_v60 = vmul.f32 %v10739_v38, %v10851_v20 }
 0x5f0   :  { %v11105_v47 = vmul.f32 %v10739_v38, %v10855_v29  ;;  %v11109_v39 = vmul.f32 %v10739_v38, %v10859_v19  ;;  %v11113_v32 = vmul.f32 %v10739_v38, %v10863_v1  ;;  %v11117_v27 = vmul.f32 %v10739_v38, %v10867_v35 }
 0x5f1   :  { %v11121_v57 = vmul.f32 %v10739_v38, %v10871_v54  ;;  %v11125_v20 = vmul.f32 %v10739_v38, %v10877_v28  ;;  %v11129_v29 = vmul.f32 %v10739_v38, %v10881_v10  ;;  %v11133_v19 = vmul.f32 %v10739_v38, %v10887_v34 }
 0x5f2   :  { %v11137_v1 = vmul.f32 %v10739_v38, %v10891_v33  ;;  %v11141_v35 = vmul.f32 %v10739_v38, %v10895_v43  ;;  %v11145_v54 = vmul.f32 %v10739_v38, %v10899_v63  ;;  %v11149_v28 = vmul.f32 %v10739_v38, %v10903_v40 }
 0x5f3   :  { %v11153_v10 = vmul.f32 %v10739_v38, %v10907_v58  ;;  %v11157_v34 = vmul.f32 %v10739_v38, %v10911_v14  ;;  %v11161_v33 = vmul.f32 %v10739_v38, %v10915_v49  ;;  %v11165_v43 = vmul.f32 %v10739_v38, %v10919_v15 }
 0x5f4   :  { %v11169_v63 = vmul.f32 %v10739_v38, %v10923_v31  ;;  %v11173_v40 = vmul.f32 %v10739_v38, %v10927_v7  ;;  %v11177_v58 = vmul.f32 %v10739_v38, %v10931_v23  ;;  %v11181_v14 = vmul.f32 %v10739_v38, %v10935_v5  ;;  %v14607_v5 = vld [vmem:[#allocation136_spill] sm:$0xff] }
 0x5f5   :  { %v11185_v49 = vmul.f32 %v10739_v38, %v10939_v30  ;;  %v11189_v15 = vmul.f32 %v10739_v38, %v10943_v36  ;;  %v11193_v31 = vmul.f32 %v10739_v38, %v10947_v51  ;;  %v11197_v7 = vmul.f32 %v10739_v38, %v10951_v56 }
 0x5f6   :  { %v11201_v23 = vmul.f32 %v10739_v38, %v10955_v61  ;;  %v11205_v30 = vmul.f32 %v10739_v38, %v14607_v5  ;;  %v11209_v36 = vmul.f32 %v10739_v38, %v14609_v37  ;;  %v11213_v51 = vmul.f32 %v10739_v38, %v14610_v13 }
 0x5f7   :  { %14604 = vst [vmem:[#allocation6_spill] sm:$0xff] %v11193_v31  ;;  %14605 = vst [vmem:[#allocation45_spill] sm:$0xff] %v11197_v7  ;;  %v14611_v31 = vld [vmem:[#allocation7_spill] sm:$0xff]  ;;  %v14612_v7 = vld [vmem:[#allocation37_spill] sm:$0xff]  ;;  %v11233_v13 = vmul.f32 %v10739_v38, %v10987_v42 }
 0x5f8   :  { %14606 = vst [vmem:[#allocation154_spill] sm:$0xff] %v11201_v23  ;;  %14608 = vst [vmem:[#allocation43_spill] sm:$0xff] %v11205_v30  ;;  %v11217_v56 = vmul.f32 %v10739_v38, %v14611_v31  ;;  %v11221_v61 = vmul.f32 %v10739_v38, %v14612_v7  ;;  %v14613_v23 = vld [vmem:[#allocation44_spill] sm:$0xff]  ;;  %v14614_v30 = vld [vmem:[#allocation137_spill] sm:$0xff]  ;;  %v11237_v31 = vmul.f32 %v10739_v38, %v10991_v44 }
 0x5f9   :  { %v11225_v5 = vmul.f32 %v10739_v38, %v14613_v23  ;;  %v11229_v37 = vmul.f32 %v10739_v38, %v14614_v30  ;;  %14616 = vst [vmem:[#allocation41_spill] sm:$0xff] %v11233_v13  ;;  %v11241_v7 = vmul.f32 %v10739_v38, %v10995_v55  ;;  %v11245_v23 = vmul.f32 %v10739_v38, %v10999_v9 }
 0x5fa   :  { %v11249_v30 = vmul.f32 %v10739_v38, %v11003_v11 }
 0x5fb   :  { %14615 = vst [vmem:[#allocation138_spill] sm:$0xff] %v11229_v37  ;;  %v14617_v37 = vld [vmem:[#allocation153_spill] sm:$0xff] }
 0x5fc   :  { %v3942_v42 = vadd.f32 %v14617_v37, %v11008_v12  ;;  %v3943_v13 = vadd.f32 %v14617_v37, %v11012_v25  ;;  %v11257_v44 = vadd.f32 %v14617_v37, %v11016_v48  ;;  %v11261_v55 = vadd.f32 %v14617_v37, %v11020_v17 }
 0x5fd   :  { %v11265_v9 = vadd.f32 %v14617_v37, %v11024_v50  ;;  %v11268_v38 = vadd.f32 %v14617_v37, %v3877_v16  ;;  %v11271_v11 = vadd.f32 %v14617_v37, %v3878_v0  ;;  %v11275_v48 = vadd.f32 %v14617_v37, %v11033_v53 }
 0x5fe   :  { %v4006_v12 = vmax.f32 %v3942_v42, 0.0  ;;  %v4007_v25 = vmax.f32 %v3943_v13, 0.0  ;;  %v11279_v17 = vadd.f32 %v14617_v37, %v11037_v45  ;;  %v11283_v50 = vadd.f32 %v14617_v37, %v11041_v59 }
 0x5ff   :  { %v11287_v16 = vadd.f32 %v14617_v37, %v11045_v24  ;;  %v11291_v0 = vadd.f32 %v14617_v37, %v11049_v26  ;;  %v11295_v53 = vadd.f32 %v14617_v37, %v11053_v8  ;;  %v11299_v45 = vadd.f32 %v14617_v37, %v11057_v18 }
 0x600   :  { %v4134_v13 = vrot.slane %v4006_v12, 7  ;;  %v4135_v42 = vrot.slane %v4007_v25, 7  ;;  %v11303_v59 = vadd.f32 %v14617_v37, %v11061_v52  ;;  %v11307_v24 = vadd.f32 %v14617_v37, %v11065_v46 }
 0x601   :  { %v11311_v26 = vadd.f32 %v14617_v37, %v11069_v6  ;;  %v11315_v8 = vadd.f32 %v14617_v37, %v11073_v3  ;;  %v11319_v18 = vadd.f32 %v14617_v37, %v11077_v22  ;;  %v11325_v46 = vadd.f32 %v14617_v37, %v11081_v62 }
 0x602   :  { %v4136_v12 = vsel %vm163_vm2, %v4134_v13, %v4135_v42  ;;  %v4326_v52 = vsel %vm163_vm2, 0.0, %v4134_v13  ;;  %v11329_v6 = vadd.f32 %v14617_v37, %v11085_v41  ;;  %v11335_v3 = vadd.f32 %v14617_v37, %v11089_v21  ;;  %v11413_v13 = vld [vmem:[#allocation3] ss:$2 sm:$0xff] }
 0x603   :  { %4394 = vst.msk [vmem:[#allocation2 + $0x18] sm:$0xff] %vm2362_vm0, %v4326_v52  ;;  %4395 = vst.msk [vmem:[#allocation2 + $0x20] sm:$0xff] %vm2362_vm0, %v4136_v12  ;;  %v11339_v22 = vadd.f32 %v14617_v37, %v11093_v4  ;;  %v11343_v62 = vadd.f32 %v14617_v37, %v11097_v2  ;;  %v11347_v41 = vadd.f32 %v14617_v37, %v11101_v60  ;;  %v14624_v12 = vld [vmem:[#allocation6_spill] sm:$0xff]  ;;  %v14626_v52 = vld [vmem:[#allocation45_spill] sm:$0xff] }
 0x604   :  { %v11351_v25 = vadd.f32 %v14617_v37, %v11105_v47  ;;  %v11355_v21 = vadd.f32 %v14617_v37, %v11109_v39  ;;  %v11359_v4 = vadd.f32 %v14617_v37, %v11113_v32  ;;  %v11363_v2 = vadd.f32 %v14617_v37, %v11117_v27  ;;  %14619 = vst [vmem:[#allocation42_spill] sm:$0xff] %v11413_v13 }
 0x605   :  { %v11367_v60 = vadd.f32 %v14617_v37, %v11121_v57  ;;  %v11371_v47 = vadd.f32 %v14617_v37, %v11125_v20  ;;  %v11375_v39 = vadd.f32 %v14617_v37, %v11129_v29  ;;  %v11379_v32 = vadd.f32 %v14617_v37, %v11133_v19 }
 0x606   :  { %v11383_v27 = vadd.f32 %v14617_v37, %v11137_v1  ;;  %v11387_v57 = vadd.f32 %v14617_v37, %v11141_v35  ;;  %v11391_v20 = vadd.f32 %v14617_v37, %v11145_v54  ;;  %v11395_v29 = vadd.f32 %v14617_v37, %v11149_v28 }
 0x607   :  { %v11399_v19 = vadd.f32 %v14617_v37, %v11153_v10  ;;  %v11403_v1 = vadd.f32 %v14617_v37, %v11157_v34  ;;  %v11407_v35 = vadd.f32 %v14617_v37, %v11161_v33  ;;  %v11411_v54 = vadd.f32 %v14617_v37, %v11165_v43 }
 0x608   :  { %14618 = vst [vmem:[#allocation8_spill] sm:$0xff] %v11395_v29  ;;  %v11417_v28 = vadd.f32 %v14617_v37, %v11169_v63  ;;  %v11421_v10 = vadd.f32 %v14617_v37, %v11173_v40  ;;  %v11425_v34 = vadd.f32 %v14617_v37, %v11177_v58  ;;  %v11429_v33 = vadd.f32 %v14617_v37, %v11181_v14  ;;  %v14628_v14 = vld [vmem:[#allocation154_spill] sm:$0xff] }
 0x609   :  { %v11433_v43 = vadd.f32 %v14617_v37, %v11185_v49  ;;  %v11437_v63 = vadd.f32 %v14617_v37, %v11189_v15  ;;  %v11441_v40 = vadd.f32 %v14617_v37, %v14624_v12  ;;  %v11445_v58 = vadd.f32 %v14617_v37, %v14626_v52  ;;  %v14630_v49 = vld [vmem:[#allocation43_spill] sm:$0xff] }
 0x60a   :  { %14620 = vst [vmem:[#allocation50_spill] sm:$0xff] %v11425_v34  ;;  %14621 = vst [vmem:[#allocation139_spill] sm:$0xff] %v11429_v33  ;;  %v4691_v13 = vld [vmem:[#allocation2 + $0x18] sm:$0xff]  ;;  %v4692_v34 = vld [vmem:[#allocation2 + $0x20] sm:$0xff]  ;;  %v11449_v33 = vadd.f32 %v14617_v37, %v14628_v14  ;;  %v11457_v15 = vadd.f32 %v14617_v37, %v11209_v36  ;;  %v11461_v12 = vadd.f32 %v14617_v37, %v11213_v51 }
 0x60b   :  { %14622 = vst [vmem:[#allocation9_spill] sm:$0xff] %v11433_v43  ;;  %14623 = vst [vmem:[#allocation51_spill] sm:$0xff] %v11437_v63  ;;  %v11453_v43 = vadd.f32 %v14617_v37, %v14630_v49  ;;  %v11467_v52 = vadd.f32 %v14617_v37, %v11217_v56  ;;  %v11471_v14 = vadd.f32 %v14617_v37, %v11221_v61  ;;  %v14632_v49 = vld [vmem:[#allocation138_spill] sm:$0xff] }
 0x60c   :  { %14625 = vst [vmem:[#allocation157_spill] sm:$0xff] %v11441_v40  ;;  %14627 = vst [vmem:[#allocation48_spill] sm:$0xff] %v11445_v58  ;;  %v11475_v36 = vadd.f32 %v14617_v37, %v11225_v5  ;;  %v11479_v51 = vadd.f32 %v14617_v37, %v14632_v49  ;;  %v11487_v56 = vadd.f32 %v14617_v37, %v11237_v31  ;;  %v4358_v49 = vsel %vm163_vm2, %v4135_v42, 0.0 }
 0x60d   :  { %14629 = vst [vmem:[#allocation140_spill] sm:$0xff] %v11449_v33  ;;  %14631 = vst [vmem:[#allocation202_spill] sm:$0xff] %v11461_v12  ;;  %v14633_v12 = vld [vmem:[#allocation41_spill] sm:$0xff]  ;;  %v11491_v61 = vadd.f32 %v14617_v37, %v11241_v7  ;;  %v11495_v5 = vadd.f32 %v14617_v37, %v11245_v23  ;;  %v14649_v40 = vmax.f32 %v11268_v38, 0.0  ;;  %v14651_v42 = vmax.f32 %v11275_v48, 0.0 }
 0x60e   :  { %4739 = vst.msk [vmem:[#allocation3] sm:$0xff] %vm2362_vm0, %v4691_v13  ;;  %4740 = vst.msk [vmem:[#allocation3 + $0x8] sm:$0xff] %vm2362_vm0, %v4692_v34  ;;  %v11483_v13 = vadd.f32 %v14617_v37, %v14633_v12  ;;  %v11499_v34 = vadd.f32 %v14617_v37, %v11249_v30  ;;  %v4008_v12 = vmax.f32 %v11257_v44, 0.0  ;;  %v14644_v31 = vmov %v11487_v56 }
 0x60f   :  { %14635 = vst [vmem:[#allocation203_spill] sm:$0xff] %v11487_v56  ;;  %14636 = vst [vmem:[#allocation142_spill] sm:$0xff] %v11491_v61  ;;  %v14647_v37 = vmax.f32 %v11265_v9, 0.0  ;;  %v11585_v29 = vrot.slane %v14649_v40, 7  ;;  %v14653_v9 = vmax.f32 %v11283_v50, 0.0  ;;  %v14655_v48 = vmax.f32 %v11291_v0, 0.0 }
 0x610   :  { %14634 = vst [vmem:[#allocation141_spill] sm:$0xff] %v11483_v13  ;;  %14637 = vst [vmem:[#allocation46_spill] sm:$0xff] %v11495_v5  ;;  %v4009_v13 = vmax.f32 %v11261_v55, 0.0  ;;  %v4137_v23 = vrot.slane %v4008_v12, 7  ;;  %v14658_v50 = vmax.f32 %v11303_v59, 0.0  ;;  %v14660_v0 = vmax.f32 %v11311_v26, 0.0 }
 0x611   :  { %14638 = vst [vmem:[#allocation204_spill] sm:$0xff] %v11499_v34  ;;  %4396 = vst.msk [vmem:[#allocation2 + $0x28] sm:$0x3] %vm4392_vm1, %v4358_v49  ;;  %v11604_v38 = vrot.slane %v14653_v9, 7  ;;  %v14663_v59 = vmax.f32 %v11325_v46, 0.0  ;;  %v14665_v26 = vmax.f32 %v11335_v3, 0.0 }
 0x612   :  { %v11509_v5 = vrot.slane %v4009_v13, 7  ;;  %v4327_v49 = vsel %vm163_vm2, 0.0, %v4137_v23  ;;  %v14668_v46 = vmax.f32 %v11347_v41, 0.0  ;;  %v14670_v3 = vmax.f32 %v11355_v21, 0.0 }
 0x613   :  { %4397 = vst.msk [vmem:[#allocation2 + $0x30] sm:$0xff] %vm2362_vm0, %v4327_v49  ;;  %v14639_v49 = vld [vmem:[#allocation50_spill] sm:$0xff]  ;;  %v14673_v41 = vmax.f32 %v11367_v60, 0.0  ;;  %v14675_v21 = vmax.f32 %v11375_v39, 0.0  ;;  %v14679_v60 = vmax.f32 %v11387_v57, 0.0  ;;  %v14687_v57 = vmax.f32 %v11407_v35, 0.0 }
 0x614   :  { %v4139_v61 = vsel %vm163_vm2, %v4137_v23, %v11509_v5  ;;  %v14642_v12 = vld [vmem:[#allocation202_spill] sm:$0xff]  ;;  %v4359_v56 = vsel %vm163_vm2, %v11509_v5, 0.0  ;;  %v11579_v23 = vrot.slane %v14647_v37, 7  ;;  %v14652_v5 = vmax.f32 %v11279_v17, 0.0 }
 0x615   :  { %4398 = vst.msk [vmem:[#allocation2 + $0x38] sm:$0xff] %vm2362_vm0, %v4139_v61  ;;  %v4787_v30 = vld [vmem:[#allocation3] ss:$2 sm:$0xff]  ;;  %v4803_v55 = vld [vmem:[#allocation3 + $0x1] ss:$2 sm:$0xff]  ;;  %v11612_v37 = vrot.slane %v14655_v48, 7 }
 0x616   :  { %5124 = vrot.lane.b32.xlu1 %v4787_v30, %s6940_s27  ;;  %v14645_v58 = vld [vmem:[#allocation142_spill] sm:$0xff]  ;;  %v11593_v30 = vrot.slane %v14651_v42, 7  ;;  %v11597_v34 = vrot.slane %v14652_v5, 7  ;;  %4399 = vst.msk [vmem:[#allocation2 + $0x40] sm:$0x3] %vm4392_vm1, %v4359_v56  ;;  %v14656_v17 = vmax.f32 %v11295_v53, 0.0 }
 0x617   :  { %v14643_v63 = vld [vmem:[#allocation141_spill] sm:$0xff]  ;;  %v14646_v33 = vld [vmem:[#allocation46_spill] sm:$0xff]  ;;  %v14657_v56 = vmax.f32 %v11299_v45, 0.0  ;;  %v11632_v5 = vrot.slane %v14660_v0, 7  ;;  %v14661_v53 = vmax.f32 %v11315_v8, 0.0  ;;  %v14662_v45 = vmax.f32 %v11319_v18, 0.0 }
 0x618   :  { %v4693_v44 = vld [vmem:[#allocation2 + $0x28] sm:$0x3]  ;;  %v11616_v42 = vrot.slane %v14656_v17, 7  ;;  %v11644_v17 = vrot.slane %v14663_v59, 7  ;;  %v14666_v8 = vmax.f32 %v11339_v22, 0.0  ;;  %v14667_v18 = vmax.f32 %v11343_v62, 0.0 }
 0x619   :  { %4741 = vst.msk [vmem:[#allocation3 + $0x10] sm:$0x3] %vm4392_vm1, %v4693_v44  ;;  %v11640_v48 = vrot.slane %v14662_v45, 7  ;;  %v14671_v22 = vmax.f32 %v11359_v4, 0.0  ;;  %v14672_v62 = vmax.f32 %v11363_v2, 0.0  ;;  %v14676_v4 = vmax.f32 %v11379_v32, 0.0 }
 0x61a   :  { %5188 = vrot.lane.b32.xlu1 %v4803_v55, %s6942_s1  ;;  %v4502_v7 = vld [vmem:[#allocation2 + $0x30] sm:$0xff]  ;;  %v14650_v55 = vmax.f32 %v11271_v11, 0.0  ;;  %v14654_v11 = vmax.f32 %v11287_v16, 0.0  ;;  %v14659_v16 = vmax.f32 %v11307_v24, 0.0  ;;  %v14664_v24 = vmax.f32 %v11329_v6, 0.0 }
 0x61b   :  { %4550 = vst.msk [vmem:[#allocation3 + $0x18] sm:$0xff] %vm2362_vm0, %v4502_v7  ;;  %v11661_v0 = vrot.slane %v14667_v18, 7  ;;  %v14669_v6 = vmax.f32 %v11351_v25, 0.0  ;;  %v11677_v59 = vrot.slane %v14671_v22, 7  ;;  %v14674_v25 = vmax.f32 %v11371_v47, 0.0 }
 0x61c   :  { %v4503_v44 = vld [vmem:[#allocation2 + $0x38] sm:$0xff]  ;;  %v11589_v61 = vrot.slane %v14650_v55, 7  ;;  %v11608_v40 = vrot.slane %v14654_v11, 7  ;;  %v11628_v55 = vrot.slane %v14659_v16, 7  ;;  %v11636_v11 = vrot.slane %v14661_v53, 7 }
 0x61d   :  { %4551 = vst.msk [vmem:[#allocation3 + $0x20] sm:$0xff] %vm2362_vm0, %v4503_v44  ;;  %v11657_v16 = vrot.slane %v14666_v8, 7  ;;  %v11665_v53 = vrot.slane %v14668_v46, 7  ;;  %v11669_v45 = vrot.slane %v14669_v6, 7  ;;  %v11689_v8 = vrot.slane %v14674_v25, 7 }
 0x61e   :  { %v11693_v18 = vrot.slane %v14675_v21, 7  ;;  %v11697_v46 = vrot.slane %v14676_v4, 7  ;;  %v14677_v2 = vmax.f32 %v11383_v27, 0.0  ;;  %v14680_v47 = vmax.f32 %v11391_v20, 0.0  ;;  %v4504_v25 = vld [vmem:[#allocation2 + $0x40] sm:$0x3] }
 0x61f   :  { %v14684_v32 = vmax.f32 %v11399_v19, 0.0  ;;  %v14686_v27 = vmax.f32 %v11403_v1, 0.0  ;;  %v14689_v20 = vmax.f32 %v11411_v54, 0.0  ;;  %4552 = vst.msk [vmem:[#allocation3 + $0x28] sm:$0x3] %vm4392_vm1, %v4504_v25  ;;  %v14699_v25 = vld [vmem:[#allocation9_spill] sm:$0xff] }
 0x620   :  { %v11581_v13 = vld [vmem:[#allocation3 + $0x2] ss:$2 sm:$0xff]  ;;  %v11701_v6 = vrot.slane %v14677_v2, 7  ;;  %v11709_v22 = vrot.slane %v14680_v47, 7  ;;  %v11725_v2 = vrot.slane %v14687_v57, 7 }
 0x621   :  { %14648 = vst [vmem:[#allocation5_spill] sm:$0xff] %v11581_v13  ;;  %4884 = vst.msk [vmem:[#allocation3] sm:$0xff] %vm2362_vm0, %v4502_v7  ;;  %v11620_v7 = vrot.slane %v14657_v56, 7  ;;  %v11648_v56 = vrot.slane %v14664_v24, 7  ;;  %v11681_v24 = vrot.slane %v14672_v62, 7  ;;  %v14682_v62 = vld [vmem:[#allocation8_spill] sm:$0xff] }
 0x622   :  { %4885 = vst.msk [vmem:[#allocation3 + $0x8] sm:$0xff] %vm2362_vm0, %v4503_v44  ;;  %v11624_v44 = vrot.slane %v14658_v50, 7  ;;  %v11653_v50 = vrot.slane %v14665_v26, 7  ;;  %v11685_v26 = vrot.slane %v14673_v41, 7  ;;  %14678 = vst [vmem:[#allocation47_spill] sm:$0xff] %v11701_v6  ;;  %v14683_v39 = vmax.f32 %v14682_v62, 0.0 }
 0x623   :  { %14681 = vst [vmem:[#allocation143_spill] sm:$0xff] %v11709_v22  ;;  %v11717_v21 = vrot.slane %v14684_v32, 7  ;;  %v11721_v4 = vrot.slane %v14686_v27, 7  ;;  %14688 = vst [vmem:[#allocation125_spill] sm:$0xff] %v11725_v2  ;;  %v4838_v47 = vld [vmem:[#allocation2 + $0x40] sm:$0x3] }
 0x624   :  { %v4629_v9 = vld [vmem:[#allocation3 + $0x19] ss:$2 sm:$0xff]  ;;  %v11713_v41 = vrot.slane %v14683_v39, 7  ;;  %v14691_v62 = vmax.f32 %v11417_v28, 0.0  ;;  %v14692_v39 = vmax.f32 %v11421_v10, 0.0  ;;  %v14694_v32 = vmax.f32 %v14639_v49, 0.0 }
 0x625   :  { %4998 = vrot.lane.b32.xlu0 %v4629_v9, %s6936_s19  ;;  %v11673_v9 = vrot.slane %v14670_v3, 7  ;;  %v11705_v3 = vrot.slane %v14679_v60, 7  ;;  %14685 = vst [vmem:[#allocation54_spill] sm:$0xff] %v11717_v21  ;;  %v11729_v60 = vrot.slane %v14689_v20, 7  ;;  %v14696_v27 = vld [vmem:[#allocation139_spill] sm:$0xff]  ;;  %v14700_v20 = vmax.f32 %v14699_v25, 0.0 }
 0x626   :  { %v11734_v19 = vrot.slane %v14691_v62, 7  ;;  %v11738_v1 = vrot.slane %v14692_v39, 7  ;;  %v11742_v35 = vrot.slane %v14694_v32, 7  ;;  %v14697_v57 = vmax.f32 %v14696_v27, 0.0  ;;  %4886 = vst.msk [vmem:[#allocation3 + $0x10] sm:$0x3] %vm4392_vm1, %v4838_v47 }
 0x627   :  { %14690 = vst [vmem:[#allocation10_spill] sm:$0xff] %v11729_v60  ;;  %v11751_v13 = vrot.slane %v14700_v20, 7  ;;  %v14701_v28 = vld [vmem:[#allocation51_spill] sm:$0xff]  ;;  %v14703_v10 = vld [vmem:[#allocation157_spill] sm:$0xff]  ;;  %v14705_v49 = vld [vmem:[#allocation48_spill] sm:$0xff]  ;;  %v14709_v47 = vmax.f32 %v11453_v43, 0.0 }
 0x628   :  { %14693 = vst [vmem:[#allocation55_spill] sm:$0xff] %v11738_v1  ;;  %14695 = vst [vmem:[#allocation160_spill] sm:$0xff] %v11742_v35  ;;  %v11746_v54 = vrot.slane %v14697_v57, 7  ;;  %v14702_v62 = vmax.f32 %v14701_v28, 0.0  ;;  %v14704_v39 = vmax.f32 %v14703_v10, 0.0  ;;  %v14706_v32 = vmax.f32 %v14705_v49, 0.0 }
 0x629   :  { %v14707_v27 = vld [vmem:[#allocation140_spill] sm:$0xff]  ;;  %v11771_v25 = vrot.slane %v14709_v47, 7  ;;  %v14710_v20 = vmax.f32 %v11457_v15, 0.0  ;;  %v14714_v43 = vmax.f32 %v11475_v36, 0.0  ;;  %v14715_v15 = vmax.f32 %v11479_v51, 0.0 }
 0x62a   :  { %14698 = vst [vmem:[#allocation163_spill] sm:$0xff] %v11746_v54  ;;  %v11755_v60 = vrot.slane %v14702_v62, 7  ;;  %v11759_v1 = vrot.slane %v14704_v39, 7  ;;  %v11763_v35 = vrot.slane %v14706_v32, 7  ;;  %v14708_v57 = vmax.f32 %v14707_v27, 0.0 }
 0x62b   :  { %v11775_v28 = vrot.slane %v14710_v20, 7  ;;  %v14711_v62 = vmax.f32 %v14642_v12, 0.0  ;;  %v14712_v39 = vmax.f32 %v11467_v52, 0.0  ;;  %v14713_v32 = vmax.f32 %v11471_v14, 0.0 }
 0x62c   :  { %v11767_v54 = vrot.slane %v14708_v57, 7  ;;  %v11791_v57 = vrot.slane %v14714_v43, 7  ;;  %v11795_v47 = vrot.slane %v14715_v15, 7  ;;  %v14716_v12 = vmax.f32 %v14643_v63, 0.0  ;;  %v14721_v43 = vld [vmem:[#allocation204_spill] sm:$0xff] }
 0x62d   :  { %v11779_v10 = vrot.slane %v14711_v62, 7  ;;  %v11783_v49 = vrot.slane %v14712_v39, 7  ;;  %v11787_v27 = vrot.slane %v14713_v32, 7  ;;  %v14717_v52 = vmax.f32 %v14644_v31, 0.0 }
 0x62e   :  { %v11799_v20 = vrot.slane %v14716_v12, 7  ;;  %v14718_v14 = vmax.f32 %v14645_v58, 0.0  ;;  %v14720_v36 = vmax.f32 %v14646_v33, 0.0  ;;  %v14722_v51 = vmax.f32 %v14721_v43, 0.0  ;;  %v4661_v33 = vld [vmem:[#allocation3 + $0x1a] ss:$2 sm:$0xff] }
 0x62f   :  { %v11803_v62 = vrot.slane %v14717_v52, 7  ;;  %v4142_v63 = vsel %vm163_vm2, %v11579_v23, %v11585_v29  ;;  %v4328_v31 = vsel %vm163_vm2, 0.0, %v11579_v23  ;;  %v4145_v58 = vsel %vm163_vm2, %v11589_v61, %v11593_v30  ;;  %5062 = vrot.lane.b32.xlu0 %v4661_v33, %s6938_s20 }
 0x630   :  { %v11807_v39 = vrot.slane %v14718_v14, 7  ;;  %v11811_v32 = vrot.slane %v14720_v36, 7  ;;  %v11815_v15 = vrot.slane %v14722_v51, 7  ;;  %4400 = vst.msk [vmem:[#allocation2 + $0x48] sm:$0xff] %vm2362_vm0, %v4328_v31  ;;  %4401 = vst.msk [vmem:[#allocation2 + $0x50] sm:$0xff] %vm2362_vm0, %v4142_v63  ;;  %v4148_v12 = vsel %vm163_vm2, %v11597_v34, %v11604_v38 }
 0x631   :  { %v4151_v52 = vsel %vm163_vm2, %v11608_v40, %v11612_v37  ;;  %v4154_v23 = vsel %vm163_vm2, %v11616_v42, %v11620_v7  ;;  %v4157_v14 = vsel %vm163_vm2, %v11624_v44, %v11628_v55  ;;  %4404 = vst.msk [vmem:[#allocation2 + $0x68] sm:$0xff] %vm2362_vm0, %v4145_v58  ;;  %v4160_v36 = vsel %vm163_vm2, %v11632_v5, %v11636_v11 }
 0x632   :  { %14719 = vst [vmem:[#allocation49_spill] sm:$0xff] %v11807_v39  ;;  %14723 = vst [vmem:[#allocation52_spill] sm:$0xff] %v11815_v15  ;;  %v4163_v43 = vsel %vm163_vm2, %v11640_v48, %v11644_v17  ;;  %v4166_v51 = vsel %vm163_vm2, %v11648_v56, %v11653_v50  ;;  %v4169_v63 = vsel %vm163_vm2, %v11657_v16, %v11661_v0 }
 0x633   :  { %4407 = vst.msk [vmem:[#allocation2 + $0x80] sm:$0xff] %vm2362_vm0, %v4148_v12  ;;  %4410 = vst.msk [vmem:[#allocation2 + $0x98] sm:$0xff] %vm2362_vm0, %v4151_v52  ;;  %v4172_v31 = vsel %vm163_vm2, %v11665_v53, %v11669_v45  ;;  %v4175_v58 = vsel %vm163_vm2, %v11673_v9, %v11677_v59  ;;  %v4178_v33 = vsel %vm163_vm2, %v11681_v24, %v11685_v26 }
 0x634   :  { %4413 = vst.msk [vmem:[#allocation2 + $0xb0] sm:$0xff] %vm2362_vm0, %v4154_v23  ;;  %4416 = vst.msk [vmem:[#allocation2 + $0xc8] sm:$0xff] %vm2362_vm0, %v4157_v14  ;;  %v4181_v12 = vsel %vm163_vm2, %v11689_v8, %v11693_v18  ;;  %v4184_v52 = vsel %vm163_vm2, %v11697_v46, %v11701_v6  ;;  %v4187_v23 = vsel %vm163_vm2, %v11705_v3, %v11709_v22  ;;  %v14726_v22 = vld [vmem:[#allocation55_spill] sm:$0xff] }
 0x635   :  { %4419 = vst.msk [vmem:[#allocation2 + $0xe0] sm:$0xff] %vm2362_vm0, %v4160_v36  ;;  %4422 = vst.msk [vmem:[#allocation2 + $0xf8] sm:$0xff] %vm2362_vm0, %v4163_v43  ;;  %v4190_v14 = vsel %vm163_vm2, %v11713_v41, %v11717_v21  ;;  %v4193_v36 = vsel %vm163_vm2, %v11721_v4, %v11725_v2  ;;  %v14724_v43 = vld [vmem:[#allocation10_spill] sm:$0xff]  ;;  %v14727_v6 = vld [vmem:[#allocation163_spill] sm:$0xff] }
 0x636   :  { %4425 = vst.msk [vmem:[#allocation2 + $0x110] sm:$0xff] %vm2362_vm0, %v4166_v51  ;;  %4428 = vst.msk [vmem:[#allocation2 + $0x128] sm:$0xff] %vm2362_vm0, %v4169_v63  ;;  %v4196_v51 = vsel %vm163_vm2, %v14724_v43, %v11734_v19  ;;  %v14725_v63 = vld [vmem:[#allocation160_spill] sm:$0xff]  ;;  %v4202_v2 = vsel %vm163_vm2, %v14727_v6, %v11751_v13 }
 0x637   :  { %4431 = vst.msk [vmem:[#allocation2 + $0x140] sm:$0xff] %vm2362_vm0, %v4172_v31  ;;  %4434 = vst.msk [vmem:[#allocation2 + $0x158] sm:$0xff] %vm2362_vm0, %v4175_v58  ;;  %v4199_v21 = vsel %vm163_vm2, %v14726_v22, %v14725_v63  ;;  %v4205_v31 = vsel %vm163_vm2, %v11755_v60, %v11759_v1  ;;  %v11905_v58 = vld [vmem:[#allocation3 + $0x18] ss:$2 sm:$0xff] }
 0x638   :  { %4437 = vst.msk [vmem:[#allocation2 + $0x170] sm:$0xff] %vm2362_vm0, %v4178_v33  ;;  %4440 = vst.msk [vmem:[#allocation2 + $0x188] sm:$0xff] %vm2362_vm0, %v4181_v12  ;;  %v4208_v33 = vsel %vm163_vm2, %v11763_v35, %v11767_v54  ;;  %v4211_v12 = vsel %vm163_vm2, %v11771_v25, %v11775_v28 }
 0x639   :  { %4449 = vst.msk [vmem:[#allocation2 + $0x1d0] sm:$0xff] %vm2362_vm0, %v4184_v52  ;;  %4452 = vst.msk [vmem:[#allocation2 + $0x1e8] sm:$0xff] %vm2362_vm0, %v4187_v23  ;;  %v4214_v52 = vsel %vm163_vm2, %v11779_v10, %v11783_v49  ;;  %v4217_v23 = vsel %vm163_vm2, %v11787_v27, %v11791_v57 }
 0x63a   :  { %4455 = vst.msk [vmem:[#allocation2 + $0x200] sm:$0xff] %vm2362_vm0, %v4190_v14  ;;  %4458 = vst.msk [vmem:[#allocation2 + $0x218] sm:$0xff] %vm2362_vm0, %v4193_v36  ;;  %v4220_v14 = vsel %vm163_vm2, %v11795_v47, %v11799_v20  ;;  %v4223_v36 = vsel %vm163_vm2, %v11803_v62, %v11807_v39  ;;  %v4331_v39 = vsel %vm163_vm2, 0.0, %v11608_v40  ;;  %v4335_v40 = vsel %vm163_vm2, 0.0, %v11640_v48 }
 0x63b   :  { %14728 = vst [vmem:[#allocation144_spill] sm:$0xff] %v11905_v58  ;;  %4461 = vst.msk [vmem:[#allocation2 + $0x230] sm:$0xff] %vm2362_vm0, %v4196_v51  ;;  %v4226_v58 = vsel %vm163_vm2, %v11811_v32, %v11815_v15  ;;  %v4329_v51 = vsel %vm163_vm2, 0.0, %v11589_v61  ;;  %v4332_v15 = vsel %vm163_vm2, 0.0, %v11616_v42  ;;  %v4333_v61 = vsel %vm163_vm2, 0.0, %v11624_v44 }
 0x63c   :  { %4464 = vst.msk [vmem:[#allocation2 + $0x248] sm:$0xff] %vm2362_vm0, %v4199_v21  ;;  %4467 = vst.msk [vmem:[#allocation2 + $0x260] sm:$0xff] %vm2362_vm0, %v4202_v2  ;;  %v4694_v21 = vld [vmem:[#allocation2 + $0x48] sm:$0xff]  ;;  %v4695_v2 = vld [vmem:[#allocation2 + $0x50] sm:$0xff]  ;;  %v4336_v42 = vsel %vm163_vm2, 0.0, %v11648_v56  ;;  %v4337_v44 = vsel %vm163_vm2, 0.0, %v11657_v16 }
 0x63d   :  { %4470 = vst.msk [vmem:[#allocation2 + $0x278] sm:$0xff] %vm2362_vm0, %v4205_v31  ;;  %4473 = vst.msk [vmem:[#allocation2 + $0x290] sm:$0xff] %vm2362_vm0, %v4208_v33  ;;  %v4330_v31 = vsel %vm163_vm2, 0.0, %v11597_v34  ;;  %v4334_v34 = vsel %vm163_vm2, 0.0, %v11632_v5  ;;  %v11966_v5 = vld [vmem:[#allocation2 + $0x98] sm:$0xff]  ;;  %v4338_v48 = vsel %vm163_vm2, 0.0, %v11665_v53 }
 0x63e   :  { %4476 = vst.msk [vmem:[#allocation2 + $0x2a8] sm:$0xff] %vm2362_vm0, %v4211_v12  ;;  %4479 = vst.msk [vmem:[#allocation2 + $0x2c0] sm:$0xff] %vm2362_vm0, %v4214_v52  ;;  %v4339_v56 = vsel %vm163_vm2, 0.0, %v11673_v9  ;;  %v4340_v16 = vsel %vm163_vm2, 0.0, %v11681_v24  ;;  %v4342_v53 = vsel %vm163_vm2, 0.0, %v11697_v46  ;;  %v4343_v9 = vsel %vm163_vm2, 0.0, %v11705_v3 }
 0x63f   :  { %4482 = vst.msk [vmem:[#allocation2 + $0x2d8] sm:$0xff] %vm2362_vm0, %v4217_v23  ;;  %4403 = vst.msk [vmem:[#allocation2 + $0x60] sm:$0xff] %vm2362_vm0, %v4329_v51  ;;  %v4344_v24 = vsel %vm163_vm2, 0.0, %v11713_v41  ;;  %v11998_v46 = vld [vmem:[#allocation2 + $0xf8] sm:$0xff]  ;;  %v4346_v3 = vsel %vm163_vm2, 0.0, %v14724_v43  ;;  %v4347_v41 = vsel %vm163_vm2, 0.0, %v14726_v22 }
 0x640   :  { %4485 = vst.msk [vmem:[#allocation2 + $0x2f0] sm:$0xff] %vm2362_vm0, %v4220_v14  ;;  %4488 = vst.msk [vmem:[#allocation2 + $0x308] sm:$0xff] %vm2362_vm0, %v4223_v36  ;;  %v4349_v33 = vsel %vm163_vm2, 0.0, %v11755_v60  ;;  %v4351_v22 = vsel %vm163_vm2, 0.0, %v11771_v25  ;;  %v4352_v60 = vsel %vm163_vm2, 0.0, %v11779_v10  ;;  %v4353_v43 = vsel %vm163_vm2, 0.0, %v11787_v27 }
 0x641   :  { %4491 = vst.msk [vmem:[#allocation2 + $0x320] sm:$0xff] %vm2362_vm0, %v4226_v58  ;;  %4742 = vst.msk [vmem:[#allocation3 + $0x18] sm:$0xff] %vm2362_vm0, %v4694_v21  ;;  %v11964_v58 = vld [vmem:[#allocation2 + $0x68] sm:$0xff]  ;;  %v4354_v25 = vsel %vm163_vm2, 0.0, %v11795_v47  ;;  %v4355_v10 = vsel %vm163_vm2, 0.0, %v11803_v62  ;;  %v4356_v27 = vsel %vm163_vm2, 0.0, %v11811_v32 }
 0x642   :  { %4743 = vst.msk [vmem:[#allocation3 + $0x20] sm:$0xff] %vm2362_vm0, %v4695_v2  ;;  %4406 = vst.msk [vmem:[#allocation2 + $0x78] sm:$0xff] %vm2362_vm0, %v4330_v31  ;;  %v12028_v12 = vld [vmem:[#allocation2 + $0x128] sm:$0xff]  ;;  %v4360_v52 = vsel %vm163_vm2, %v11585_v29, 0.0  ;;  %v4361_v47 = vsel %vm163_vm2, %v11593_v30, 0.0  ;;  %v4362_v29 = vsel %vm163_vm2, %v11604_v38, 0.0 }
 0x643   :  { %4409 = vst.msk [vmem:[#allocation2 + $0x90] sm:$0xff] %vm2362_vm0, %v4331_v39  ;;  %4412 = vst.msk [vmem:[#allocation2 + $0xa8] sm:$0xff] %vm2362_vm0, %v4332_v15  ;;  %v4341_v39 = vsel %vm163_vm2, 0.0, %v11689_v8  ;;  %v4345_v8 = vsel %vm163_vm2, 0.0, %v11721_v4  ;;  %v11996_v15 = vld [vmem:[#allocation2 + $0xc8] sm:$0xff]  ;;  %v4348_v4 = vsel %vm163_vm2, 0.0, %v14727_v6 }
 0x644   :  { %4415 = vst.msk [vmem:[#allocation2 + $0xc0] sm:$0xff] %vm2362_vm0, %v4333_v61  ;;  %4418 = vst.msk [vmem:[#allocation2 + $0xd8] sm:$0xff] %vm2362_vm0, %v4334_v34  ;;  %v4350_v6 = vsel %vm163_vm2, 0.0, %v11763_v35  ;;  %v12030_v35 = vld [vmem:[#allocation2 + $0x158] sm:$0xff]  ;;  %v4363_v62 = vsel %vm163_vm2, %v11612_v37, 0.0  ;;  %v4364_v32 = vsel %vm163_vm2, %v11620_v7, 0.0 }
 0x645   :  { %4421 = vst.msk [vmem:[#allocation2 + $0xf0] sm:$0xff] %vm2362_vm0, %v4335_v40  ;;  %4424 = vst.msk [vmem:[#allocation2 + $0x108] sm:$0xff] %vm2362_vm0, %v4336_v42  ;;  %v12062_v30 = vld [vmem:[#allocation2 + $0x1e8] sm:$0xff]  ;;  %v4365_v38 = vsel %vm163_vm2, %v11628_v55, 0.0  ;;  %v4366_v37 = vsel %vm163_vm2, %v11636_v11, 0.0  ;;  %v4367_v7 = vsel %vm163_vm2, %v11644_v17, 0.0 }
 0x646   :  { %4427 = vst.msk [vmem:[#allocation2 + $0x120] sm:$0xff] %vm2362_vm0, %v4337_v44  ;;  %4554 = vst.msk [vmem:[#allocation3 + $0x38] sm:$0xff] %vm2362_vm0, %v11964_v58  ;;  %v12060_v23 = vld [vmem:[#allocation2 + $0x60] sm:$0xff]  ;;  %v4368_v14 = vsel %vm163_vm2, %v11653_v50, 0.0  ;;  %v4369_v55 = vsel %vm163_vm2, %v11661_v0, 0.0  ;;  %v4370_v11 = vsel %vm163_vm2, %v11669_v45, 0.0 }
 0x647   :  { %4557 = vst.msk [vmem:[#allocation3 + $0x50] sm:$0xff] %vm2362_vm0, %v11966_v5  ;;  %4430 = vst.msk [vmem:[#allocation2 + $0x138] sm:$0xff] %vm2362_vm0, %v4338_v48  ;;  %v4371_v17 = vsel %vm163_vm2, %v11677_v59, 0.0  ;;  %v4372_v50 = vsel %vm163_vm2, %v11685_v26, 0.0  ;;  %v4373_v45 = vsel %vm163_vm2, %v11693_v18, 0.0  ;;  %v14729_v59 = vld [vmem:[#allocation47_spill] sm:$0xff] }
 0x648   :  { %4433 = vst.msk [vmem:[#allocation2 + $0x150] sm:$0xff] %vm2362_vm0, %v4339_v56  ;;  %4436 = vst.msk [vmem:[#allocation2 + $0x168] sm:$0xff] %vm2362_vm0, %v4340_v16  ;;  %v4374_v26 = vsel %vm163_vm2, %v14729_v59, 0.0  ;;  %v14730_v21 = vld [vmem:[#allocation143_spill] sm:$0xff]  ;;  %v14731_v31 = vld [vmem:[#allocation54_spill] sm:$0xff]  ;;  %v4378_v44 = vsel %vm163_vm2, %v11734_v19, 0.0 }
 0x649   :  { %4439 = vst.msk [vmem:[#allocation2 + $0x180] sm:$0xff] %vm2362_vm0, %v4341_v39  ;;  %4448 = vst.msk [vmem:[#allocation2 + $0x1c8] sm:$0xff] %vm2362_vm0, %v4342_v53  ;;  %v4788_v36 = vld [vmem:[#allocation3 + $0x18] ss:$2 sm:$0xff]  ;;  %v4375_v2 = vsel %vm163_vm2, %v14730_v21, 0.0  ;;  %v4376_v61 = vsel %vm163_vm2, %v14731_v31, 0.0 }
 0x64a   :  { %4451 = vst.msk [vmem:[#allocation2 + $0x1e0] sm:$0xff] %vm2362_vm0, %v4343_v9  ;;  %4454 = vst.msk [vmem:[#allocation2 + $0x1f8] sm:$0xff] %vm2362_vm0, %v4344_v24  ;;  %5126 = vrot.lane.b32.xlu0 %v4788_v36, %s6940_s27  ;;  %v12093_v0 = vld [vmem:[#allocation2 + $0x90] sm:$0xff]  ;;  %v14732_v40 = vld [vmem:[#allocation125_spill] sm:$0xff]  ;;  %v4379_v48 = vsel %vm163_vm2, %v14725_v63, 0.0  ;;  %v4380_v56 = vsel %vm163_vm2, %v11751_v13, 0.0 }
 0x64b   :  { %4457 = vst.msk [vmem:[#allocation2 + $0x210] sm:$0xff] %vm2362_vm0, %v4345_v8  ;;  %4560 = vst.msk [vmem:[#allocation3 + $0x68] sm:$0xff] %vm2362_vm0, %v11996_v15  ;;  %v12095_v51 = vld [vmem:[#allocation2 + $0xc0] sm:$0xff]  ;;  %v4377_v42 = vsel %vm163_vm2, %v14732_v40, 0.0  ;;  %v4381_v19 = vsel %vm163_vm2, %v11759_v1, 0.0  ;;  %v4382_v13 = vsel %vm163_vm2, %v11767_v54, 0.0 }
 0x64c   :  { %4563 = vst.msk [vmem:[#allocation3 + $0x80] sm:$0xff] %vm2362_vm0, %v11998_v46  ;;  %4460 = vst.msk [vmem:[#allocation2 + $0x228] sm:$0xff] %vm2362_vm0, %v4346_v3  ;;  %v12109_v34 = vld [vmem:[#allocation2 + $0xf0] sm:$0xff]  ;;  %v4383_v63 = vsel %vm163_vm2, %v11775_v28, 0.0  ;;  %v4384_v39 = vsel %vm163_vm2, %v11783_v49, 0.0  ;;  %v4385_v54 = vsel %vm163_vm2, %v11791_v57, 0.0 }
 0x64d   :  { %4463 = vst.msk [vmem:[#allocation2 + $0x240] sm:$0xff] %vm2362_vm0, %v4347_v41  ;;  %4466 = vst.msk [vmem:[#allocation2 + $0x258] sm:$0xff] %vm2362_vm0, %v4348_v4  ;;  %v12111_v18 = vld [vmem:[#allocation2 + $0x120] sm:$0xff]  ;;  %v4386_v28 = vsel %vm163_vm2, %v11799_v20, 0.0  ;;  %v14734_v24 = vld [vmem:[#allocation52_spill] sm:$0xff] }
 0x64e   :  { %4469 = vst.msk [vmem:[#allocation2 + $0x270] sm:$0xff] %vm2362_vm0, %v4349_v33  ;;  %4472 = vst.msk [vmem:[#allocation2 + $0x288] sm:$0xff] %vm2362_vm0, %v4350_v6  ;;  %v14733_v49 = vld [vmem:[#allocation49_spill] sm:$0xff]  ;;  %v4388_v8 = vsel %vm163_vm2, %v14734_v24, 0.0  ;;  %v4707_v21 = vld [vmem:[#allocation2 + $0x110] sm:$0xff] }
 0x64f   :  { %4475 = vst.msk [vmem:[#allocation2 + $0x2a0] sm:$0xff] %vm2362_vm0, %v4351_v22  ;;  %4478 = vst.msk [vmem:[#allocation2 + $0x2b8] sm:$0xff] %vm2362_vm0, %v4352_v60  ;;  %v12129_v16 = vld [vmem:[#allocation2 + $0x150] sm:$0xff]  ;;  %v4387_v9 = vsel %vm163_vm2, %v14733_v49, 0.0  ;;  %v4804_v33 = vld [vmem:[#allocation3 + $0x19] ss:$2 sm:$0xff] }
 0x650   :  { %4481 = vst.msk [vmem:[#allocation2 + $0x2d0] sm:$0xff] %vm2362_vm0, %v4353_v43  ;;  %4566 = vst.msk [vmem:[#allocation3 + $0x98] sm:$0xff] %vm2362_vm0, %v12028_v12  ;;  %5190 = vrot.lane.b32.xlu1 %v4804_v33, %s6942_s1  ;;  %v4710_v24 = vld [vmem:[#allocation2 + $0x140] sm:$0xff]  ;;  %vm5607_vm2 = vcmask 523264  }
 0x651   :  { %4569 = vst.msk [vmem:[#allocation3 + $0xb0] sm:$0xff] %vm2362_vm0, %v12030_v35  ;;  %4484 = vst.msk [vmem:[#allocation2 + $0x2e8] sm:$0xff] %vm2362_vm0, %v4354_v25  ;;  %v12147_v53 = vld [vmem:[#allocation2 + $0x1e0] sm:$0xff] }
 0x652   :  { %4402 = vst.msk [vmem:[#allocation2 + $0x58] sm:$0x3] %vm4392_vm1, %v4360_v52  ;;  %4405 = vst.msk [vmem:[#allocation2 + $0x70] sm:$0x3] %vm4392_vm1, %v4361_v47  ;;  %v12149_v1 = vld [vmem:[#allocation2 + $0x210] sm:$0xff] }
 0x653   :  { %4487 = vst.msk [vmem:[#allocation2 + $0x300] sm:$0xff] %vm2362_vm0, %v4355_v10  ;;  %4490 = vst.msk [vmem:[#allocation2 + $0x318] sm:$0xff] %vm2362_vm0, %v4356_v27 }
 0x654   :  { %4408 = vst.msk [vmem:[#allocation2 + $0x88] sm:$0x3] %vm4392_vm1, %v4362_v29  ;;  %4411 = vst.msk [vmem:[#allocation2 + $0xa0] sm:$0x3] %vm4392_vm1, %v4363_v62  ;;  %v12165_v3 = vld [vmem:[#allocation2 + $0x240] sm:$0xff] }
 0x655   :  { %4414 = vst.msk [vmem:[#allocation2 + $0xb8] sm:$0x3] %vm4392_vm1, %v4364_v32  ;;  %4417 = vst.msk [vmem:[#allocation2 + $0xd0] sm:$0x3] %vm4392_vm1, %v4365_v38  ;;  %v12167_v57 = vld [vmem:[#allocation2 + $0x270] sm:$0xff] }
 0x656   :  { %4553 = vst.msk [vmem:[#allocation3 + $0x30] sm:$0xff] %vm2362_vm0, %v12060_v23  ;;  %4575 = vst.msk [vmem:[#allocation3 + $0xe0] sm:$0xff] %vm2362_vm0, %v12062_v30  ;;  %v12177_v20 = vld [vmem:[#allocation2 + $0x2a0] sm:$0xff] }
 0x657   :  { %4420 = vst.msk [vmem:[#allocation2 + $0xe8] sm:$0x3] %vm4392_vm1, %v4366_v37  ;;  %4423 = vst.msk [vmem:[#allocation2 + $0x100] sm:$0x3] %vm4392_vm1, %v4367_v7  ;;  %v14735_v37 = vld [vmem:[#allocation5_spill] sm:$0xff] }
 0x658   :  { %4426 = vst.msk [vmem:[#allocation2 + $0x118] sm:$0x3] %vm4392_vm1, %v4368_v14  ;;  %4429 = vst.msk [vmem:[#allocation2 + $0x130] sm:$0x3] %vm4392_vm1, %v4369_v55  ;;  %v4698_v14 = vld [vmem:[#allocation2 + $0x80] sm:$0xff]  ;;  %v4701_v55 = vld [vmem:[#allocation2 + $0xb0] sm:$0xff] }
 0x659   :  { %4432 = vst.msk [vmem:[#allocation2 + $0x148] sm:$0x3] %vm4392_vm1, %v4370_v11  ;;  %4435 = vst.msk [vmem:[#allocation2 + $0x160] sm:$0x3] %vm4392_vm1, %v4371_v17  ;;  %v4507_v41 = vld [vmem:[#allocation2 + $0x70] sm:$0x3] }
 0x65a   :  { %4438 = vst.msk [vmem:[#allocation2 + $0x178] sm:$0x3] %vm4392_vm1, %v4372_v50  ;;  %4441 = vst.msk [vmem:[#allocation2 + $0x190] sm:$0x3] %vm4392_vm1, %v4373_v45  ;;  %v4696_v27 = vld [vmem:[#allocation2 + $0x58] sm:$0x3] }
 0x65b   :  { %4556 = vst.msk [vmem:[#allocation3 + $0x48] sm:$0xff] %vm2362_vm0, %v12093_v0  ;;  %4559 = vst.msk [vmem:[#allocation3 + $0x60] sm:$0xff] %vm2362_vm0, %v12095_v51  ;;  %v4510_v4 = vld [vmem:[#allocation2 + $0xa0] sm:$0x3]  ;;  %v4697_v11 = vld [vmem:[#allocation2 + $0x78] sm:$0xff] }
 0x65c   :  { %4450 = vst.msk [vmem:[#allocation2 + $0x1d8] sm:$0x3] %vm4392_vm1, %v4374_v26  ;;  %4453 = vst.msk [vmem:[#allocation2 + $0x1f0] sm:$0x3] %vm4392_vm1, %v4375_v2  ;;  %v4513_v6 = vld [vmem:[#allocation2 + $0xd0] sm:$0x3] }
 0x65d   :  { %4456 = vst.msk [vmem:[#allocation2 + $0x208] sm:$0x3] %vm4392_vm1, %v4376_v61  ;;  %4459 = vst.msk [vmem:[#allocation2 + $0x220] sm:$0x3] %vm4392_vm1, %v4377_v42  ;;  %v4631_v60 = vld [vmem:[#allocation3 + $0x31] ss:$2 sm:$0xff] }
 0x65e   :  { %4562 = vst.msk [vmem:[#allocation3 + $0x78] sm:$0xff] %vm2362_vm0, %v12109_v34  ;;  %4565 = vst.msk [vmem:[#allocation3 + $0x90] sm:$0xff] %vm2362_vm0, %v12111_v18  ;;  %v4516_v22 = vld [vmem:[#allocation2 + $0x100] sm:$0x3]  ;;  %5000 = vrot.lane.b32.xlu0 %v4631_v60, %s6936_s19  ;;  %v12202_v7 = vld [vmem:[#allocation3 + $0x30] ss:$2 sm:$0xff] }
 0x65f   :  { %4462 = vst.msk [vmem:[#allocation2 + $0x238] sm:$0x3] %vm4392_vm1, %v4378_v44  ;;  %4465 = vst.msk [vmem:[#allocation2 + $0x250] sm:$0x3] %vm4392_vm1, %v4379_v48  ;;  %v4519_v43 = vld [vmem:[#allocation2 + $0x130] sm:$0x3] }
 0x660   :  { %4468 = vst.msk [vmem:[#allocation2 + $0x268] sm:$0x3] %vm4392_vm1, %v4380_v56  ;;  %4471 = vst.msk [vmem:[#allocation2 + $0x280] sm:$0x3] %vm4392_vm1, %v4381_v19  ;;  %v4522_v25 = vld [vmem:[#allocation2 + $0x160] sm:$0x3] }
 0x661   :  { %4568 = vst.msk [vmem:[#allocation3 + $0xa8] sm:$0xff] %vm2362_vm0, %v12129_v16  ;;  %4574 = vst.msk [vmem:[#allocation3 + $0xd8] sm:$0xff] %vm2362_vm0, %v12147_v53  ;;  %v4700_v17 = vld [vmem:[#allocation2 + $0xa8] sm:$0xff]  ;;  %v4841_v2 = vld [vmem:[#allocation2 + $0x70] sm:$0x3] }
 0x662   :  { %4474 = vst.msk [vmem:[#allocation2 + $0x298] sm:$0x3] %vm4392_vm1, %v4382_v13  ;;  %4477 = vst.msk [vmem:[#allocation2 + $0x2b0] sm:$0x3] %vm4392_vm1, %v4383_v63  ;;  %v4633_v29 = vld [vmem:[#allocation3 + $0x49] ss:$2 sm:$0xff]  ;;  %5252 = vrot.lane.b32.xlu0 %v14735_v37, %s6943_s2 }
 0x663   :  { %4480 = vst.msk [vmem:[#allocation2 + $0x2c8] sm:$0x3] %vm4392_vm1, %v4384_v39  ;;  %4483 = vst.msk [vmem:[#allocation2 + $0x2e0] sm:$0x3] %vm4392_vm1, %v4385_v54  ;;  %v4528_v10 = vld [vmem:[#allocation2 + $0x1f0] sm:$0x3]  ;;  %5002 = vrot.lane.b32.xlu1 %v4633_v29, %s6936_s19 }
 0x664   :  { %4577 = vst.msk [vmem:[#allocation3 + $0xf0] sm:$0xff] %vm2362_vm0, %v12149_v1  ;;  %4580 = vst.msk [vmem:[#allocation3 + $0x108] sm:$0xff] %vm2362_vm0, %v12165_v3  ;;  %v4531_v52 = vld [vmem:[#allocation2 + $0x220] sm:$0x3]  ;;  %v12204_v36 = vld [vmem:[#allocation3 + $0x48] ss:$2 sm:$0xff] }
 0x665   :  { %4486 = vst.msk [vmem:[#allocation2 + $0x2f8] sm:$0x3] %vm4392_vm1, %v4386_v28  ;;  %4489 = vst.msk [vmem:[#allocation2 + $0x310] sm:$0x3] %vm4392_vm1, %v4387_v9  ;;  %v4699_v50 = vld [vmem:[#allocation2 + $0x88] sm:$0x3] }
 0x666   :  { %4492 = vst.msk [vmem:[#allocation2 + $0x328] sm:$0x3] %vm4392_vm1, %v4388_v8  ;;  %4555 = vst.msk [vmem:[#allocation3 + $0x40] sm:$0x3] %vm4392_vm1, %v4507_v41  ;;  %v4534_v47 = vld [vmem:[#allocation2 + $0x250] sm:$0x3] }
 0x667   :  { %4583 = vst.msk [vmem:[#allocation3 + $0x120] sm:$0xff] %vm2362_vm0, %v12167_v57  ;;  %4586 = vst.msk [vmem:[#allocation3 + $0x138] sm:$0xff] %vm2362_vm0, %v12177_v20  ;;  %v4537_v62 = vld [vmem:[#allocation2 + $0x280] sm:$0x3]  ;;  %v4702_v61 = vld [vmem:[#allocation2 + $0xb8] sm:$0x3] }
 0x668   :  { %4558 = vst.msk [vmem:[#allocation3 + $0x58] sm:$0x3] %vm4392_vm1, %v4510_v4  ;;  %4561 = vst.msk [vmem:[#allocation3 + $0x70] sm:$0x3] %vm4392_vm1, %v4513_v6  ;;  %v12207_v26 = vld [vmem:[#allocation3 + $0x79] ss:$2 sm:$0xff] }
 0x669   :  { %4564 = vst.msk [vmem:[#allocation3 + $0x88] sm:$0x3] %vm4392_vm1, %v4516_v22  ;;  %4567 = vst.msk [vmem:[#allocation3 + $0xa0] sm:$0x3] %vm4392_vm1, %v4519_v43  ;;  %v4540_v32 = vld [vmem:[#allocation2 + $0x2b0] sm:$0x3] }
 0x66a   :  { %4570 = vst.msk [vmem:[#allocation3 + $0xb8] sm:$0x3] %vm4392_vm1, %v4522_v25  ;;  %4576 = vst.msk [vmem:[#allocation3 + $0xe8] sm:$0x3] %vm4392_vm1, %v4528_v10  ;;  %v12213_v31 = vld [vmem:[#allocation3 + $0x61] ss:$2 sm:$0xff] }
 0x66b   :  { %4744 = vst.msk [vmem:[#allocation3 + $0x28] sm:$0x3] %vm4392_vm1, %v4696_v27  ;;  %4579 = vst.msk [vmem:[#allocation3 + $0x100] sm:$0x3] %vm4392_vm1, %v4531_v52  ;;  %v12216_v40 = vld [vmem:[#allocation3 + $0x78] ss:$2 sm:$0xff] }
 0x66c   :  { %4582 = vst.msk [vmem:[#allocation3 + $0x118] sm:$0x3] %vm4392_vm1, %v4534_v47  ;;  %v4546_v38 = vld [vmem:[#allocation2 + $0x310] sm:$0x3]  ;;  %4585 = vst.msk [vmem:[#allocation3 + $0x130] sm:$0x3] %vm4392_vm1, %v4537_v62 }
 0x66d   :  { %4588 = vst.msk [vmem:[#allocation3 + $0x148] sm:$0x3] %vm4392_vm1, %v4540_v32  ;;  %4594 = vst.msk [vmem:[#allocation3 + $0x178] sm:$0x3] %vm4392_vm1, %v4546_v38  ;;  %v4663_v45 = vld [vmem:[#allocation3 + $0x32] ss:$2 sm:$0xff] }
 0x66e   :  { %4745 = vst.msk [vmem:[#allocation3 + $0x30] sm:$0xff] %vm2362_vm0, %v4697_v11  ;;  %4746 = vst.msk [vmem:[#allocation3 + $0x38] sm:$0xff] %vm2362_vm0, %v4698_v14  ;;  %v4704_v42 = vld [vmem:[#allocation2 + $0xe0] sm:$0xff]  ;;  %5064 = vrot.lane.b32.xlu0 %v4663_v45, %s6938_s20  ;;  %v4706_v48 = vld [vmem:[#allocation2 + $0x108] sm:$0xff] }
 0x66f   :  { %v4665_v59 = vld [vmem:[#allocation3 + $0x4a] ss:$2 sm:$0xff]  ;;  %4747 = vst.msk [vmem:[#allocation3 + $0x40] sm:$0x3] %vm4392_vm1, %v4699_v50  ;;  %v4705_v54 = vld [vmem:[#allocation2 + $0xe8] sm:$0x3] }
 0x670   :  { %4748 = vst.msk [vmem:[#allocation3 + $0x48] sm:$0xff] %vm2362_vm0, %v4700_v17  ;;  %4749 = vst.msk [vmem:[#allocation3 + $0x50] sm:$0xff] %vm2362_vm0, %v4701_v55  ;;  %v12220_v44 = vld [vmem:[#allocation3 + $0x7a] ss:$2 sm:$0xff]  ;;  %v4713_v28 = vld [vmem:[#allocation2 + $0x170] sm:$0xff] }
 0x671   :  { %4750 = vst.msk [vmem:[#allocation3 + $0x58] sm:$0x3] %vm4392_vm1, %v4702_v61  ;;  %v12222_v56 = vld [vmem:[#allocation3 + $0x60] ss:$2 sm:$0xff]  ;;  %v4703_v63 = vld [vmem:[#allocation2 + $0xd8] sm:$0xff] }
 0x672   :  { %v4820_v19 = vld [vmem:[#allocation3 + $0x1a] ss:$2 sm:$0xff]  ;;  %4754 = vst.msk [vmem:[#allocation3 + $0x78] sm:$0xff] %vm2362_vm0, %v4706_v48  ;;  %4755 = vst.msk [vmem:[#allocation3 + $0x80] sm:$0xff] %vm2362_vm0, %v4707_v21  ;;  %v12236_v49 = vld [vmem:[#allocation3 + $0x91] ss:$2 sm:$0xff] }
 0x673   :  { %v12226_v13 = vld [vmem:[#allocation3 + $0x62] ss:$2 sm:$0xff]  ;;  %4887 = vst.msk [vmem:[#allocation3 + $0x18] sm:$0xff] %vm2362_vm0, %v12060_v23  ;;  %4888 = vst.msk [vmem:[#allocation3 + $0x20] sm:$0xff] %vm2362_vm0, %v11964_v58  ;;  %5254 = vrot.lane.b32.xlu1 %v4820_v19, %s6943_s2  ;;  %v12239_v9 = vld [vmem:[#allocation3 + $0xa9] ss:$2 sm:$0xff] }
 0x674   :  { %4889 = vst.msk [vmem:[#allocation3 + $0x28] sm:$0x3] %vm4392_vm1, %v4841_v2  ;;  %v4932_v39 = vld [vmem:[#allocation3] ss:$2 sm:$0xff]  ;;  %4753 = vst.msk [vmem:[#allocation3 + $0x70] sm:$0x3] %vm4392_vm1, %v4705_v54 }
 0x675   :  { %4751 = vst.msk [vmem:[#allocation3 + $0x60] sm:$0xff] %vm2362_vm0, %v4703_v63  ;;  %4752 = vst.msk [vmem:[#allocation3 + $0x68] sm:$0xff] %vm2362_vm0, %v4704_v42  ;;  %v4708_v23 = vld [vmem:[#allocation2 + $0x118] sm:$0x3]  ;;  %5316 = vrot.lane.b32.xlu0 %v4932_v39, %s6944_s3  ;;  %v12243_v58 = vld [vmem:[#allocation3 + $0xa8] ss:$2 sm:$0xff] }
 0x676   :  { %4756 = vst.msk [vmem:[#allocation3 + $0x88] sm:$0x3] %vm4392_vm1, %v4708_v23  ;;  %v12245_v8 = vld [vmem:[#allocation3 + $0xaa] ss:$2 sm:$0xff]  ;;  %v4844_v4 = vld [vmem:[#allocation2 + $0xa0] sm:$0x3] }
 0x677   :  { %v4712_v41 = vld [vmem:[#allocation2 + $0x168] sm:$0xff]  ;;  %v4847_v33 = vld [vmem:[#allocation2 + $0xd0] sm:$0x3]  ;;  %4761 = vst.msk [vmem:[#allocation3 + $0xb0] sm:$0xff] %vm2362_vm0, %v4713_v28  ;;  %v12251_v22 = vld [vmem:[#allocation3 + $0x92] ss:$2 sm:$0xff]  ;;  %5066 = vrot.lane.b32.xlu1 %v4665_v59, %s6938_s20 }
 0x678   :  { %4760 = vst.msk [vmem:[#allocation3 + $0xa8] sm:$0xff] %vm2362_vm0, %v4712_v41  ;;  %v12249_v6 = vld [vmem:[#allocation3 + $0x90] ss:$2 sm:$0xff]  ;;  %v4805_v10 = vld [vmem:[#allocation3 + $0x31] ss:$2 sm:$0xff]  ;;  %v4719_v48 = vld [vmem:[#allocation2 + $0x200] sm:$0xff] }
 0x679   :  { %v4709_v60 = vld [vmem:[#allocation2 + $0x138] sm:$0xff]  ;;  %v4790_v43 = vld [vmem:[#allocation3 + $0x48] ss:$2 sm:$0xff]  ;;  %4758 = vst.msk [vmem:[#allocation3 + $0x98] sm:$0xff] %vm2362_vm0, %v4710_v24  ;;  %v12258_v52 = vld [vmem:[#allocation3 + $0x49] ss:$2 sm:$0xff] }
 0x67a   :  { %v4789_v25 = vld [vmem:[#allocation3 + $0x30] ss:$2 sm:$0xff]  ;;  %4757 = vst.msk [vmem:[#allocation3 + $0x90] sm:$0xff] %vm2362_vm0, %v4709_v60  ;;  %v4850_v29 = vld [vmem:[#allocation2 + $0x100] sm:$0x3]  ;;  %v4858_v28 = vld [vmem:[#allocation2 + $0x188] sm:$0xff] }
 0x67b   :  { %v12256_v27 = vld [vmem:[#allocation3 + $0x32] ss:$2 sm:$0xff]  ;;  %5128 = vrot.lane.b32.xlu0 %v4789_v25, %s6940_s27  ;;  %v4711_v62 = vld [vmem:[#allocation2 + $0x148] sm:$0x3]  ;;  %v12275_v37 = vld [vmem:[#allocation3 + $0x79] ss:$2 sm:$0xff] }
 0x67c   :  { %v12260_v47 = vld [vmem:[#allocation3 + $0x4a] ss:$2 sm:$0xff]  ;;  %4890 = vst.msk [vmem:[#allocation3 + $0x30] sm:$0xff] %vm2362_vm0, %v12093_v0  ;;  %4891 = vst.msk [vmem:[#allocation3 + $0x38] sm:$0xff] %vm2362_vm0, %v11966_v5  ;;  %v12281_v0 = vld [vmem:[#allocation3 + $0x61] ss:$2 sm:$0xff] }
 0x67d   :  { %4892 = vst.msk [vmem:[#allocation3 + $0x40] sm:$0x3] %vm4392_vm1, %v4844_v4  ;;  %4895 = vst.msk [vmem:[#allocation3 + $0x58] sm:$0x3] %vm4392_vm1, %v4847_v33  ;;  %v4933_v32 = vld [vmem:[#allocation3 + $0x18] ss:$2 sm:$0xff] }
 0x67e   :  { %4893 = vst.msk [vmem:[#allocation3 + $0x48] sm:$0xff] %vm2362_vm0, %v12095_v51  ;;  %4894 = vst.msk [vmem:[#allocation3 + $0x50] sm:$0xff] %vm2362_vm0, %v11996_v15  ;;  %v12273_v38 = vld [vmem:[#allocation3 + $0x78] ss:$2 sm:$0xff]  ;;  %5318 = vrot.lane.b32.xlu1 %v4933_v32, %s6944_s3  ;;  %v4948_v15 = vld [vmem:[#allocation3 + $0x1] ss:$2 sm:$0xff] }
 0x67f   :  { %4759 = vst.msk [vmem:[#allocation3 + $0xa0] sm:$0x3] %vm4392_vm1, %v4711_v62  ;;  %v12279_v5 = vld [vmem:[#allocation3 + $0x60] ss:$2 sm:$0xff]  ;;  %v4853_v55 = vld [vmem:[#allocation2 + $0x130] sm:$0x3]  ;;  %5380 = vrot.lane.b32.xlu0 %v4948_v15, %s6945_s30 }
 0x680   :  { %v12283_v51 = vld [vmem:[#allocation3 + $0x62] ss:$2 sm:$0xff]  ;;  %v12302_v11 = vld [vmem:[#allocation3 + $0xd9] ss:$2 sm:$0xff]  ;;  %v12327_v39 = vld [vmem:[#allocation3 + $0xa9] ss:$2 sm:$0xff] }
 0x681   :  { %4896 = vst.msk [vmem:[#allocation3 + $0x60] sm:$0xff] %vm2362_vm0, %v12109_v34  ;;  %4897 = vst.msk [vmem:[#allocation3 + $0x68] sm:$0xff] %vm2362_vm0, %v11998_v46  ;;  %v12290_v14 = vld [vmem:[#allocation3 + $0x7a] ss:$2 sm:$0xff]  ;;  %v4714_v34 = vld [vmem:[#allocation2 + $0x178] sm:$0x3] }
 0x682   :  { %4898 = vst.msk [vmem:[#allocation3 + $0x70] sm:$0x3] %vm4392_vm1, %v4850_v29  ;;  %4901 = vst.msk [vmem:[#allocation3 + $0x88] sm:$0x3] %vm4392_vm1, %v4853_v55  ;;  %5130 = vrot.lane.b32.xlu1 %v4790_v43, %s6940_s27  ;;  %v12300_v46 = vld [vmem:[#allocation3 + $0x90] ss:$2 sm:$0xff] }
 0x683   :  { %4899 = vst.msk [vmem:[#allocation3 + $0x78] sm:$0xff] %vm2362_vm0, %v12111_v18  ;;  %4900 = vst.msk [vmem:[#allocation3 + $0x80] sm:$0xff] %vm2362_vm0, %v12028_v12  ;;  %v12304_v17 = vld [vmem:[#allocation3 + $0x91] ss:$2 sm:$0xff]  ;;  %v12306_v50 = vld [vmem:[#allocation3 + $0xd8] ss:$2 sm:$0xff]  ;;  %5192 = vrot.lane.b32.xlu0 %v4805_v10, %s6942_s1 }
 0x684   :  { %4762 = vst.msk [vmem:[#allocation3 + $0xb8] sm:$0x3] %vm4392_vm1, %v4714_v34  ;;  %14736 = vst [vmem:[#allocation59_spill] sm:$0xff] %v12306_v50  ;;  %v12308_v45 = vld [vmem:[#allocation3 + $0xda] ss:$2 sm:$0xff]  ;;  %v4716_v41 = vld [vmem:[#allocation2 + $0x1d0] sm:$0xff] }
 0x685   :  { %v4949_v18 = vld [vmem:[#allocation3 + $0x19] ss:$2 sm:$0xff]  ;;  %v12313_v21 = vld [vmem:[#allocation3 + $0xc0] ss:$2 sm:$0xff]  ;;  %4767 = vst.msk [vmem:[#allocation3 + $0xe0] sm:$0xff] %vm2362_vm0, %v4719_v48  ;;  %v5630_v10 = vld [vmem:[%s13648_s4 + $0x30] sm:$0xff] }
 0x686   :  { %v12311_v12 = vld [vmem:[#allocation3 + $0xc1] ss:$2 sm:$0xff]  ;;  %14737 = vst [vmem:[#allocation205_spill] sm:$0xff] %v12313_v21  ;;  %v12315_v2 = vld [vmem:[#allocation3 + $0xc2] ss:$2 sm:$0xff]  ;;  %v4718_v42 = vld [vmem:[#allocation2 + $0x1f8] sm:$0xff]  ;;  %5382 = vrot.lane.b32.xlu1 %v4949_v18, %s6945_s30 }
 0x687   :  { %v4856_v59 = vld [vmem:[#allocation2 + $0x160] sm:$0x3]  ;;  %v4964_v19 = vld [vmem:[#allocation3 + $0x2] ss:$2 sm:$0xff]  ;;  %4766 = vst.msk [vmem:[#allocation3 + $0xd8] sm:$0xff] %vm2362_vm0, %v4718_v42  ;;  %4764 = vst.msk [vmem:[#allocation3 + $0xc8] sm:$0xff] %vm2362_vm0, %v4716_v41 }
 0x688   :  { %v12317_v61 = vld [vmem:[#allocation3 + $0x92] ss:$2 sm:$0xff]  ;;  %v4859_v23 = vld [vmem:[#allocation2 + $0x190] sm:$0x3]  ;;  %5444 = vrot.lane.b32.xlu0 %v4964_v19, %s6946_s11  ;;  %v12343_v33 = vld [vmem:[#allocation2 + $0x248] sm:$0xff] }
 0x689   :  { %v12320_v63 = vld [vmem:[#allocation3 + $0xa8] ss:$2 sm:$0xff]  ;;  %4902 = vst.msk [vmem:[#allocation3 + $0x90] sm:$0xff] %vm2362_vm0, %v12129_v16  ;;  %4903 = vst.msk [vmem:[#allocation3 + $0x98] sm:$0xff] %vm2362_vm0, %v12030_v35  ;;  %v4857_v54 = vld [vmem:[#allocation2 + $0x180] sm:$0xff] }
 0x68a   :  { %4904 = vst.msk [vmem:[#allocation3 + $0xa0] sm:$0x3] %vm4392_vm1, %v4856_v59  ;;  %v4715_v16 = vld [vmem:[#allocation2 + $0x1c8] sm:$0xff]  ;;  %v4530_v35 = vld [vmem:[#allocation2 + $0x218] sm:$0xff]  ;;  %5004 = vrot.lane.b32.xlu1 %v12213_v31, %s6936_s19  ;;  %v5632_v43 = vld [vmem:[%s13648_s4 + $0x40] sm:$0xff] }
 0x68b   :  { %v12332_v24 = vld [vmem:[#allocation3 + $0xaa] ss:$2 sm:$0xff]  ;;  %4763 = vst.msk [vmem:[#allocation3 + $0xc0] sm:$0xff] %vm2362_vm0, %v4715_v16  ;;  %4578 = vst.msk [vmem:[#allocation3 + $0xf8] sm:$0xff] %vm2362_vm0, %v4530_v35  ;;  %v4720_v60 = vld [vmem:[#allocation2 + $0x208] sm:$0x3]  ;;  %6837 = vmatprep.subr.mxu1 %v5632_v43 }
 0x68c   :  { %4905 = vst.msk [vmem:[#allocation3 + $0xa8] sm:$0xff] %vm2362_vm0, %v4857_v54  ;;  %4906 = vst.msk [vmem:[#allocation3 + $0xb0] sm:$0xff] %vm2362_vm0, %v4858_v28  ;;  %v4717_v4 = vld [vmem:[#allocation2 + $0x1d8] sm:$0x3]  ;;  %5194 = vrot.lane.b32.xlu0 %v12258_v52, %s6942_s1  ;;  %6838 = vmatpush3.msra.mxu1 %v5632_v43  ;;  %v4965_v25 = vld [vmem:[#allocation3 + $0x1a] ss:$2 sm:$0xff] }
 0x68d   :  { %4907 = vst.msk [vmem:[#allocation3 + $0xb8] sm:$0x3] %vm4392_vm1, %v4859_v23  ;;  %4765 = vst.msk [vmem:[#allocation3 + $0xd0] sm:$0x3] %vm4392_vm1, %v4717_v4  ;;  %v5631_v31 = vld [vmem:[%s13648_s4 + $0x38] sm:$0xff]  ;;  %v5629_v32 = vld [vmem:[%s13648_s4 + $0x28] sm:$0xff] }
 0x68e   :  { %4581 = vst.msk [vmem:[#allocation3 + $0x110] sm:$0xff] %vm2362_vm0, %v12343_v33  ;;  %5256 = vrot.lane.b32.xlu1 %v12256_v27, %s6943_s2  ;;  %6839 = vmatprep.subr.mxu1 %v5631_v31  ;;  %v12361_v29 = vld [vmem:[#allocation3 + $0xd8] ss:$2 sm:$0xff]  ;;  %v4862_v62 = vld [vmem:[#allocation2 + $0x1f0] sm:$0x3]  ;;  %v12419_v4 = vld [vmem:[#allocation2 + $0x2a8] sm:$0xff] }
 0x68f   :  { %4768 = vst.msk [vmem:[#allocation3 + $0xe8] sm:$0x3] %vm4392_vm1, %v4720_v60  ;;  %6840 = vmatpush3.msra.mxu1 %v5631_v31  ;;  %v12369_v15 = vld [vmem:[#allocation3 + $0xd9] ss:$2 sm:$0xff]  ;;  %v4722_v16 = vld [vmem:[#allocation2 + $0x230] sm:$0xff]  ;;  %v5625_v31 = vld [vmem:[%s13648_s4 + $0x8] sm:$0xff] }
 0x690   :  { %5446 = vrot.lane.b32.xlu0 %v4965_v25, %s6946_s11  ;;  %v4865_v27 = vld [vmem:[#allocation2 + $0x220] sm:$0x3]  ;;  %6841 = vmatprep.subr.mxu1 %v5630_v10  ;;  %v4724_v59 = vld [vmem:[#allocation2 + $0x258] sm:$0xff]  ;;  %v5626_v41 = vld [vmem:[%s13648_s4 + $0x10] sm:$0xff]  ;;  %4587 = vst.msk [vmem:[#allocation3 + $0x140] sm:$0xff] %vm2362_vm0, %v12419_v4 }
 0x691   :  { %v5628_v55 = vld [vmem:[%s13648_s4 + $0x20] sm:$0xff]  ;;  %6842 = vmatpush3.msra.mxu1 %v5630_v10  ;;  %v5627_v48 = vld [vmem:[%s13648_s4 + $0x18] sm:$0xff]  ;;  %v4726_v60 = vld [vmem:[#allocation2 + $0x268] sm:$0x3] }
 0x692   :  { %v12367_v52 = vld [vmem:[#allocation3 + $0xc0] ss:$2 sm:$0xff]  ;;  %v12374_v34 = vld [vmem:[#allocation3 + $0xc1] ss:$2 sm:$0xff]  ;;  %5006 = vrot.lane.b32.xlu1 %v12207_v26, %s6936_s19  ;;  %v12383_v19 = vld [vmem:[#allocation3 + $0xf1] ss:$2 sm:$0xff]  ;;  %6843 = vmatprep.subr.mxu1 %v5629_v32 }
 0x693   :  { %v4725_v42 = vld [vmem:[#allocation2 + $0x260] sm:$0xff]  ;;  %v12402_v23 = vld [vmem:[#allocation3 + $0xf0] ss:$2 sm:$0xff]  ;;  %6844 = vmatpush3.msra.mxu1 %v5629_v32 }
 0x694   :  { %v12376_v18 = vld [vmem:[#allocation3 + $0xc2] ss:$2 sm:$0xff]  ;;  %14739 = vst [vmem:[#allocation145_spill] sm:$0xff] %v12402_v23  ;;  %5068 = vrot.lane.b32.xlu0 %v12226_v13, %s6938_s20  ;;  %6845 = vmatprep.subr.mxu1 %v5628_v55  ;;  %v4723_v13 = vld [vmem:[#allocation2 + $0x238] sm:$0x3] }
 0x695   :  { %4908 = vst.msk [vmem:[#allocation3 + $0xc0] sm:$0xff] %vm2362_vm0, %v12147_v53  ;;  %4909 = vst.msk [vmem:[#allocation3 + $0xc8] sm:$0xff] %vm2362_vm0, %v12062_v30  ;;  %v12390_v54 = vld [vmem:[#allocation3 + $0x109] ss:$2 sm:$0xff]  ;;  %v12398_v26 = vld [vmem:[#allocation3 + $0x108] ss:$2 sm:$0xff]  ;;  %6846 = vmatpush3.msra.mxu1 %v5628_v55 }
 0x696   :  { %4910 = vst.msk [vmem:[#allocation3 + $0xd0] sm:$0x3] %vm4392_vm1, %v4862_v62  ;;  %v12392_v28 = vld [vmem:[#allocation3 + $0xda] ss:$2 sm:$0xff]  ;;  %14738 = vst [vmem:[#allocation62_spill] sm:$0xff] %v12398_v26  ;;  %5258 = vrot.lane.b32.xlu1 %v12260_v47, %s6943_s2  ;;  %6847 = vmatprep.subr.mxu1 %v5627_v48  ;;  %v4541_v47 = vld [vmem:[#allocation2 + $0x2d0] sm:$0xff] }
 0x697   :  { %4911 = vst.msk [vmem:[#allocation3 + $0xd8] sm:$0xff] %vm2362_vm0, %v12149_v1  ;;  %4912 = vst.msk [vmem:[#allocation3 + $0xe0] sm:$0xff] %vm2362_vm0, %v4530_v35  ;;  %v12400_v53 = vld [vmem:[#allocation3 + $0x10a] ss:$2 sm:$0xff]  ;;  %6848 = vmatpush3.msra.mxu1 %v5627_v48  ;;  %v5624_v25 = vld [vmem:[%s13648_s4] sm:$0xff] }
 0x698   :  { %4913 = vst.msk [vmem:[#allocation3 + $0xe8] sm:$0x3] %vm4392_vm1, %v4865_v27  ;;  %v12408_v30 = vld [vmem:[#allocation3 + $0xf2] ss:$2 sm:$0xff]  ;;  %v4721_v1 = vld [vmem:[#allocation2 + $0x228] sm:$0xff]  ;;  %6849 = vmatprep.subr.mxu1 %v5626_v41 }
 0x699   :  { %4772 = vst.msk [vmem:[#allocation3 + $0x108] sm:$0xff] %vm2362_vm0, %v4724_v59  ;;  %4773 = vst.msk [vmem:[#allocation3 + $0x110] sm:$0xff] %vm2362_vm0, %v4725_v42  ;;  %v4536_v35 = vld [vmem:[#allocation2 + $0x278] sm:$0xff]  ;;  %6850 = vmatpush3.msra.mxu1 %v5626_v41  ;;  %v4935_v10 = vld [vmem:[#allocation3 + $0x48] ss:$2 sm:$0xff] }
 0x69a   :  { %4769 = vst.msk [vmem:[#allocation3 + $0xf0] sm:$0xff] %vm2362_vm0, %v4721_v1  ;;  %4770 = vst.msk [vmem:[#allocation3 + $0xf8] sm:$0xff] %vm2362_vm0, %v4722_v16  ;;  %v4934_v43 = vld [vmem:[#allocation3 + $0x30] ss:$2 sm:$0xff]  ;;  %5070 = vrot.lane.b32.xlu1 %v12220_v44, %s6938_s20  ;;  %6851 = vmatprep.subr.mxu1 %v5625_v31  ;;  %v4871_v48 = vld [vmem:[#allocation2 + $0x280] sm:$0x3] }
 0x69b   :  { %4584 = vst.msk [vmem:[#allocation3 + $0x128] sm:$0xff] %vm2362_vm0, %v4536_v35  ;;  %5320 = vrot.lane.b32.xlu0 %v4934_v43, %s6944_s3  ;;  %4589 = vst.msk [vmem:[#allocation3 + $0x150] sm:$0xff] %vm2362_vm0, %v4541_v47  ;;  %6852 = vmatpush3.msra.mxu1 %v5625_v31  ;;  %v4868_v32 = vld [vmem:[#allocation2 + $0x250] sm:$0x3]  ;;  %v12436_v27 = vld [vmem:[#allocation2 + $0x2d8] sm:$0xff] }
 0x69c   :  { %4771 = vst.msk [vmem:[#allocation3 + $0x100] sm:$0x3] %vm4392_vm1, %v4723_v13  ;;  %4774 = vst.msk [vmem:[#allocation3 + $0x118] sm:$0x3] %vm4392_vm1, %v4726_v60  ;;  %6853 = vmatprep.subr.mxu1 %v5624_v25  ;;  %v4950_v44 = vld [vmem:[#allocation3 + $0x31] ss:$2 sm:$0xff] }
 0x69d   :  { %4590 = vst.msk [vmem:[#allocation3 + $0x158] sm:$0xff] %vm2362_vm0, %v12436_v27  ;;  %6854 = vmatpush3.msra.mxu1 %v5624_v25  ;;  %v4730_v41 = vld [vmem:[#allocation2 + $0x2b8] sm:$0xff]  ;;  %v4731_v13 = vld [vmem:[#allocation2 + $0x2c0] sm:$0xff]  ;;  %v4727_v60 = vld [vmem:[#allocation2 + $0x288] sm:$0xff] }
 0x69e   :  { %v4728_v43 = vld [vmem:[#allocation2 + $0x290] sm:$0xff]  ;;  %5322 = vrot.lane.b32.xlu1 %v4935_v10, %s6944_s3  ;;  %v12460_v31 = vld [vmem:[#allocation3 + $0x139] ss:$2 sm:$0xff]  ;;  %v12464_v25 = vld [vmem:[#allocation3 + $0x138] ss:$2 sm:$0xff] }
 0x69f   :  { %5132 = vrot.lane.b32.xlu0 %v12279_v5, %s6940_s27  ;;  %14741 = vst [vmem:[#allocation206_spill] sm:$0xff] %v12464_v25  ;;  %v12470_v10 = vld [vmem:[#allocation3 + $0x13a] ss:$2 sm:$0xff] }
 0x6a0   :  { %v12434_v62 = vld [vmem:[#allocation3 + $0x108] ss:$2 sm:$0xff]  ;;  %v12444_v42 = vld [vmem:[#allocation3 + $0x109] ss:$2 sm:$0xff]  ;;  %4778 = vst.msk [vmem:[#allocation3 + $0x138] sm:$0xff] %vm2362_vm0, %v4730_v41  ;;  %4779 = vst.msk [vmem:[#allocation3 + $0x140] sm:$0xff] %vm2362_vm0, %v4731_v13 }
 0x6a1   :  { %v12440_v55 = vld [vmem:[#allocation3 + $0xf0] ss:$2 sm:$0xff]  ;;  %v12442_v59 = vld [vmem:[#allocation3 + $0xf1] ss:$2 sm:$0xff] }
 0x6a2   :  { %v12448_v1 = vld [vmem:[#allocation3 + $0x121] ss:$2 sm:$0xff]  ;;  %v12452_v5 = vld [vmem:[#allocation3 + $0x120] ss:$2 sm:$0xff]  ;;  %5134 = vrot.lane.b32.xlu1 %v12273_v38, %s6940_s27  ;;  %v4736_v25 = vld [vmem:[#allocation2 + $0x318] sm:$0xff] }
 0x6a3   :  { %v12450_v16 = vld [vmem:[#allocation3 + $0xf2] ss:$2 sm:$0xff]  ;;  %14740 = vst [vmem:[#allocation164_spill] sm:$0xff] %v12452_v5  ;;  %5384 = vrot.lane.b32.xlu0 %v4950_v44, %s6945_s30  ;;  %v4951_v44 = vld [vmem:[#allocation3 + $0x49] ss:$2 sm:$0xff] }
 0x6a4   :  { %4914 = vst.msk [vmem:[#allocation3 + $0xf0] sm:$0xff] %vm2362_vm0, %v12165_v3  ;;  %4915 = vst.msk [vmem:[#allocation3 + $0xf8] sm:$0xff] %vm2362_vm0, %v12343_v33  ;;  %v12462_v47 = vld [vmem:[#allocation3 + $0x10a] ss:$2 sm:$0xff]  ;;  %v12492_v13 = vld [vmem:[#allocation3 + $0x151] ss:$2 sm:$0xff] }
 0x6a5   :  { %4916 = vst.msk [vmem:[#allocation3 + $0x100] sm:$0x3] %vm4392_vm1, %v4868_v32  ;;  %4919 = vst.msk [vmem:[#allocation3 + $0x118] sm:$0x3] %vm4392_vm1, %v4871_v48  ;;  %v12472_v3 = vld [vmem:[#allocation3 + $0x122] ss:$2 sm:$0xff] }
 0x6a6   :  { %4917 = vst.msk [vmem:[#allocation3 + $0x108] sm:$0xff] %vm2362_vm0, %v12167_v57  ;;  %4918 = vst.msk [vmem:[#allocation3 + $0x110] sm:$0xff] %vm2362_vm0, %v4536_v35  ;;  %v4729_v33 = vld [vmem:[#allocation2 + $0x298] sm:$0x3]  ;;  %v4544_v57 = vld [vmem:[#allocation2 + $0x300] sm:$0xff]  ;;  %5386 = vrot.lane.b32.xlu1 %v4951_v44, %s6945_s30 }
 0x6a7   :  { %4775 = vst.msk [vmem:[#allocation3 + $0x120] sm:$0xff] %vm2362_vm0, %v4727_v60  ;;  %4776 = vst.msk [vmem:[#allocation3 + $0x128] sm:$0xff] %vm2362_vm0, %v4728_v43  ;;  %v12480_v35 = vld [vmem:[#allocation2 + $0x308] sm:$0xff]  ;;  %v4543_v48 = vld [vmem:[#allocation2 + $0x2e0] sm:$0x3]  ;;  %5196 = vrot.lane.b32.xlu0 %v12281_v0, %s6942_s1 }
 0x6a8   :  { %4777 = vst.msk [vmem:[#allocation3 + $0x130] sm:$0x3] %vm4392_vm1, %v4729_v33  ;;  %v4732_v32 = vld [vmem:[#allocation2 + $0x2c8] sm:$0x3]  ;;  %4591 = vst.msk [vmem:[#allocation3 + $0x160] sm:$0x3] %vm4392_vm1, %v4543_v48 }
 0x6a9   :  { %4592 = vst.msk [vmem:[#allocation3 + $0x168] sm:$0xff] %vm2362_vm0, %v4544_v57  ;;  %4593 = vst.msk [vmem:[#allocation3 + $0x170] sm:$0xff] %vm2362_vm0, %v12480_v35  ;;  %v4966_v41 = vld [vmem:[#allocation3 + $0x32] ss:$2 sm:$0xff]  ;;  %v4874_v60 = vld [vmem:[#allocation2 + $0x2b0] sm:$0x3] }
 0x6aa   :  { %4780 = vst.msk [vmem:[#allocation3 + $0x148] sm:$0x3] %vm4392_vm1, %v4732_v32  ;;  %v12494_v43 = vld [vmem:[#allocation3 + $0x150] ss:$2 sm:$0xff]  ;;  %v4877_v48 = vld [vmem:[#allocation2 + $0x2e0] sm:$0x3]  ;;  %5008 = vrot.lane.b32.xlu1 %v12236_v49, %s6936_s19 }
 0x6ab   :  { %14742 = vst [vmem:[#allocation58_spill] sm:$0xff] %v12494_v43  ;;  %v4875_v33 = vld [vmem:[#allocation2 + $0x2d0] sm:$0xff]  ;;  %v12496_v57 = vld [vmem:[#allocation3 + $0x138] ss:$2 sm:$0xff]  ;;  %v4738_v0 = vld [vmem:[#allocation2 + $0x328] sm:$0x3]  ;;  %5448 = vrot.lane.b32.xlu0 %v4966_v41, %s6946_s11 }
 0x6ac   :  { %v4737_v5 = vld [vmem:[#allocation2 + $0x320] sm:$0xff]  ;;  %v4733_v43 = vld [vmem:[#allocation2 + $0x2e8] sm:$0xff] }
 0x6ad   :  { %v12507_v23 = vld [vmem:[#allocation3 + $0x139] ss:$2 sm:$0xff]  ;;  %v4967_v49 = vld [vmem:[#allocation3 + $0x4a] ss:$2 sm:$0xff] }
 0x6ae   :  { %v12498_v32 = vld [vmem:[#allocation3 + $0x120] ss:$2 sm:$0xff]  ;;  %v12500_v38 = vld [vmem:[#allocation3 + $0x121] ss:$2 sm:$0xff]  ;;  %5260 = vrot.lane.b32.xlu1 %v12283_v51, %s6943_s2 }
 0x6af   :  { %v12503_v26 = vld [vmem:[#allocation3 + $0x122] ss:$2 sm:$0xff]  ;;  %5198 = vrot.lane.b32.xlu0 %v12275_v37, %s6942_s1 }
 0x6b0   :  { %v12505_v44 = vld [vmem:[#allocation3 + $0x169] ss:$2 sm:$0xff]  ;;  %4920 = vst.msk [vmem:[#allocation3 + $0x120] sm:$0xff] %vm2362_vm0, %v12177_v20  ;;  %4921 = vst.msk [vmem:[#allocation3 + $0x128] sm:$0xff] %vm2362_vm0, %v12419_v4  ;;  %v12516_v21 = vld [vmem:[#allocation3 + $0x168] ss:$2 sm:$0xff] }
 0x6b1   :  { %4922 = vst.msk [vmem:[#allocation3 + $0x130] sm:$0x3] %vm4392_vm1, %v4874_v60  ;;  %v12514_v50 = vld [vmem:[#allocation3 + $0x13a] ss:$2 sm:$0xff]  ;;  %v12518_v41 = vld [vmem:[#allocation3 + $0x16a] ss:$2 sm:$0xff] }
 0x6b2   :  { %4923 = vst.msk [vmem:[#allocation3 + $0x138] sm:$0xff] %vm2362_vm0, %v4875_v33  ;;  %4924 = vst.msk [vmem:[#allocation3 + $0x140] sm:$0xff] %vm2362_vm0, %v12436_v27  ;;  %v12528_v20 = vld [vmem:[#allocation3 + $0x152] ss:$2 sm:$0xff]  ;;  %5010 = vrot.lane.b32.xlu1 %v12239_v9, %s6936_s19 }
 0x6b3   :  { %4925 = vst.msk [vmem:[#allocation3 + $0x148] sm:$0x3] %vm4392_vm1, %v4877_v48  ;;  %v4734_v4 = vld [vmem:[#allocation2 + $0x2f0] sm:$0xff]  ;;  %v4735_v60 = vld [vmem:[#allocation2 + $0x2f8] sm:$0x3]  ;;  %5450 = vrot.lane.b32.xlu0 %v4967_v49, %s6946_s11  ;;  %v4997_v49 = vpop.permute.xlu1 %4996 }
 0x6b4   :  { %4784 = vst.msk [vmem:[#allocation3 + $0x168] sm:$0xff] %vm2362_vm0, %v4736_v25  ;;  %4785 = vst.msk [vmem:[#allocation3 + $0x170] sm:$0xff] %vm2362_vm0, %v4737_v5  ;;  %v4881_v27 = vld [vmem:[#allocation2 + $0x330] sm:$0xff]  ;;  %v4882_v33 = vld [vmem:[#allocation2 + $0x338] sm:$0xff] }
 0x6b5   :  { %4786 = vst.msk [vmem:[#allocation3 + $0x178] sm:$0x3] %vm4392_vm1, %v4738_v0  ;;  %4783 = vst.msk [vmem:[#allocation3 + $0x160] sm:$0x3] %vm4392_vm1, %v4735_v60  ;;  %v4880_v5 = vld [vmem:[#allocation2 + $0x310] sm:$0x3] }
 0x6b6   :  { %4781 = vst.msk [vmem:[#allocation3 + $0x150] sm:$0xff] %vm2362_vm0, %v4733_v43  ;;  %4782 = vst.msk [vmem:[#allocation3 + $0x158] sm:$0xff] %vm2362_vm0, %v4734_v4  ;;  %v4883_v48 = vld [vmem:[#allocation2 + $0x340] sm:$0x3]  ;;  %5262 = vrot.lane.b32.xlu1 %v12290_v14, %s6943_s2 }
 0x6b7   :  { %v4878_v4 = vld [vmem:[#allocation2 + $0x300] sm:$0xff]  ;;  %5072 = vrot.lane.b32.xlu0 %v12251_v22, %s6938_s20 }
 0x6b8   :  { %v4936_v9 = vld [vmem:[#allocation3 + $0x60] ss:$2 sm:$0xff]  ;;  %v4953_v14 = vld [vmem:[#allocation3 + $0x79] ss:$2 sm:$0xff] }
 0x6b9   :  { %v4937_v22 = vld [vmem:[#allocation3 + $0x78] ss:$2 sm:$0xff] }
 0x6ba   :  { %5074 = vrot.lane.b32.xlu1 %v12245_v8, %s6938_s20  ;;  %v4968_v8 = vld [vmem:[#allocation3 + $0x62] ss:$2 sm:$0xff] }
 0x6bb   :  { %v12539_v25 = vld [vmem:[#allocation3 + $0x168] ss:$2 sm:$0xff]  ;;  %v12547_v37 = vld [vmem:[#allocation3 + $0x169] ss:$2 sm:$0xff]  ;;  %5324 = vrot.lane.b32.xlu0 %v4936_v9, %s6944_s3 }
 0x6bc   :  { %v12552_v60 = vld [vmem:[#allocation3 + $0x16a] ss:$2 sm:$0xff] }
 0x6bd   :  { %v12543_v43 = vld [vmem:[#allocation3 + $0x152] ss:$2 sm:$0xff]  ;;  %v12550_v51 = vld [vmem:[#allocation3 + $0x151] ss:$2 sm:$0xff]  ;;  %4929 = vst.msk [vmem:[#allocation3 + $0x168] sm:$0xff] %vm2362_vm0, %v4881_v27  ;;  %4930 = vst.msk [vmem:[#allocation3 + $0x170] sm:$0xff] %vm2362_vm0, %v4882_v33  ;;  %v4999_v27 = vpop.permute.xlu0 %4998 }
 0x6be   :  { %v12545_v0 = vld [vmem:[#allocation3 + $0x150] ss:$2 sm:$0xff]  ;;  %4928 = vst.msk [vmem:[#allocation3 + $0x160] sm:$0x3] %vm4392_vm1, %v4880_v5  ;;  %4931 = vst.msk [vmem:[#allocation3 + $0x178] sm:$0x3] %vm4392_vm1, %v4883_v48  ;;  %5326 = vrot.lane.b32.xlu1 %v4937_v22, %s6944_s3 }
 0x6bf   :  { %4926 = vst.msk [vmem:[#allocation3 + $0x150] sm:$0xff] %vm2362_vm0, %v4878_v4  ;;  %4927 = vst.msk [vmem:[#allocation3 + $0x158] sm:$0xff] %vm2362_vm0, %v12480_v35  ;;  %5136 = vrot.lane.b32.xlu0 %v12300_v46, %s6940_s27  ;;  %v4952_v35 = vld [vmem:[#allocation3 + $0x61] ss:$2 sm:$0xff]  ;;  %v5061_v46 = vpop.permute.xlu1 %5060  ;;  %v4970_v9 = vld [vmem:[#allocation3 + $0x92] ss:$2 sm:$0xff] }
 0x6c0   :  { %vm5590_vm1 = vcmask 457728  }
 0x6c1   :  { %v5063_v5 = vpop.permute.xlu0 %5062 }
 0x6c2   :  { %5138 = vrot.lane.b32.xlu1 %v12320_v63, %s6940_s27  ;;  %v4969_v63 = vld [vmem:[#allocation3 + $0x7a] ss:$2 sm:$0xff] }
 0x6c3   :  { %5388 = vrot.lane.b32.xlu0 %v4952_v35, %s6945_s30 }
 0x6c5   :  { %v5127_v33 = vpop.permute.xlu0 %5126 }
 0x6c6   :  { %5390 = vrot.lane.b32.xlu1 %v4953_v14, %s6945_s30  ;;  %v4971_v14 = vld [vmem:[#allocation3 + $0xaa] ss:$2 sm:$0xff] }
 0x6c7   :  { %5200 = vrot.lane.b32.xlu0 %v12304_v17, %s6942_s1  ;;  %v5125_v17 = vpop.permute.xlu1 %5124 }
 0x6ca   :  { %5012 = vrot.lane.b32.xlu1 %v12311_v12, %s6936_s19 }
 0x6cb   :  { %5452 = vrot.lane.b32.xlu0 %v4968_v8, %s6946_s11  ;;  %v5189_v12 = vpop.permute.xlu1 %5188  ;;  %v14743_v8 = vld [vmem:[#allocation42_spill] sm:$0xff] }
 0x6ce   :  { %5264 = vrot.lane.b32.xlu1 %v12317_v61, %s6943_s2  ;;  %v4939_v61 = vld [vmem:[#allocation3 + $0xa8] ss:$2 sm:$0xff] }
 0x6cf   :  { %5202 = vrot.lane.b32.xlu0 %v12327_v39, %s6942_s1  ;;  %v4938_v39 = vld [vmem:[#allocation3 + $0x90] ss:$2 sm:$0xff] }
 0x6d0   :  { %v12596_v48 = vpop.permute.xlu0 %5000 }
 0x6d2   :  { %5014 = vrot.lane.b32.xlu1 %v12302_v11, %s6936_s19  ;;  %v5191_v11 = vpop.permute.xlu1 %5190 }
 0x6d3   :  { %5454 = vrot.lane.b32.xlu0 %v4969_v63, %s6946_s11  ;;  %v5492_v63 = vsel %vm2362_vm0, %v14743_v8, %v4997_v49 }
 0x6d4   :  { %v5253_v4 = vpop.permute.xlu0 %5252 }
 0x6d6   :  { %5266 = vrot.lane.b32.xlu1 %v12332_v24, %s6943_s2  ;;  %v12601_v24 = vpop.permute.xlu1 %5002 }
 0x6d7   :  { %5076 = vrot.lane.b32.xlu0 %v12315_v2, %s6938_s20  ;;  %v4954_v2 = vld [vmem:[#allocation3 + $0x91] ss:$2 sm:$0xff] }
 0x6da   :  { %5078 = vrot.lane.b32.xlu1 %v12308_v45, %s6938_s20  ;;  %v4955_v45 = vld [vmem:[#allocation3 + $0xa9] ss:$2 sm:$0xff] }
 0x6db   :  { %5328 = vrot.lane.b32.xlu0 %v4938_v39, %s6944_s3 }
 0x6de   :  { %5330 = vrot.lane.b32.xlu1 %v4939_v61, %s6944_s3  ;;  %v5508_v61 = vsel %vm2489_vm8, %v5492_v63, %v5061_v46 }
 0x6df   :  { %5140 = vrot.lane.b32.xlu0 %v12367_v52, %s6940_s27 }
 0x6e0   :  { %v12606_v52 = vpop.permute.xlu0 %5064 }
 0x6e2   :  { %5142 = vrot.lane.b32.xlu1 %v12361_v29, %s6940_s27 }
 0x6e3   :  { %5392 = vrot.lane.b32.xlu0 %v4954_v2, %s6945_s30 }
 0x6e5   :  { %v5255_v22 = vpop.permute.xlu1 %5254 }
 0x6e6   :  { %5394 = vrot.lane.b32.xlu1 %v4955_v45, %s6945_s30 }
 0x6e7   :  { %5204 = vrot.lane.b32.xlu0 %v12374_v34, %s6942_s1  ;;  %v5317_v35 = vpop.permute.xlu0 %5316 }
 0x6e9   :  { %v12611_v29 = vpop.permute.xlu1 %5066 }
 0x6ea   :  { %5016 = vrot.lane.b32.xlu1 %v12383_v19, %s6936_s19 }
 0x6eb   :  { %5456 = vrot.lane.b32.xlu0 %v4970_v9, %s6946_s11  ;;  %v14744_v9 = vld [vmem:[#allocation144_spill] sm:$0xff] }
 0x6ed   :  { %v12617_v34 = vpop.permute.xlu0 %5128 }
 0x6ee   :  { %5268 = vrot.lane.b32.xlu1 %v12376_v18, %s6943_s2 }
 0x6ef   :  { %5206 = vrot.lane.b32.xlu0 %v12369_v15, %s6942_s1  ;;  %v5524_v15 = vsel %vm2619_vm10, %v5508_v61, %v5125_v17  ;;  %v5493_v17 = vsel %vm2362_vm0, %v14744_v9, %v4999_v27  ;;  %v4941_v27 = vld [vmem:[#allocation3 + $0xd8] ss:$2 sm:$0xff] }
 0x6f0   :  { %v5319_v39 = vpop.permute.xlu1 %5318  ;;  %v5540_v49 = vsel %vm2749_vm12, %v5524_v15, %v5189_v12  ;;  %v5509_v12 = vsel %vm2489_vm8, %v5493_v17, %v5063_v5 }
 0x6f1   :  { %v5381_v19 = vpop.permute.xlu0 %5380  ;;  %v5557_v45 = vsel %vm5556_vm14, %v5540_v49, %v5253_v4  ;;  %v5525_v8 = vsel %vm2619_vm10, %v5509_v12, %v5127_v33  ;;  %v4942_v12 = vld [vmem:[#allocation3 + $0xf0] ss:$2 sm:$0xff] }
 0x6f2   :  { %5018 = vrot.lane.b32.xlu1 %v12390_v54, %s6936_s19  ;;  %v4940_v54 = vld [vmem:[#allocation3 + $0xc0] ss:$2 sm:$0xff] }
 0x6f3   :  { %5458 = vrot.lane.b32.xlu0 %v4971_v14, %s6946_s11 }
 0x6f4   :  { %v12625_v2 = vpop.permute.xlu1 %5130 }
 0x6f5   :  { %v5193_v18 = vpop.permute.xlu0 %5192 }
 0x6f6   :  { %5270 = vrot.lane.b32.xlu1 %v12392_v28, %s6943_s2 }
 0x6f7   :  { %5080 = vrot.lane.b32.xlu0 %v12408_v30, %s6938_s20  ;;  %v5574_v30 = vsel %vm5573_vm15, %v5557_v45, %v5317_v35 }
 0x6f8   :  { %v5383_v46 = vpop.permute.xlu1 %5382  ;;  %v5591_v14 = vsel %vm5590_vm1, %v5574_v30, %v5381_v19  ;;  %v4956_v19 = vld [vmem:[#allocation3 + $0xc1] ss:$2 sm:$0xff]  ;;  %v4973_v30 = vld [vmem:[#allocation3 + $0xda] ss:$2 sm:$0xff] }
 0x6fa   :  { %5082 = vrot.lane.b32.xlu1 %v12400_v53, %s6938_s20  ;;  %v5445_v28 = vpop.permute.xlu0 %5444  ;;  %v5541_v53 = vsel %vm2749_vm12, %v5525_v8, %v5191_v11  ;;  %v4957_v11 = vld [vmem:[#allocation3 + $0xd9] ss:$2 sm:$0xff] }
 0x6fb   :  { %5332 = vrot.lane.b32.xlu0 %v4940_v54, %s6944_s3  ;;  %v5608_v4 = vsel %vm5607_vm2, %v5591_v14, %v5445_v28  ;;  %v5558_v5 = vsel %vm5556_vm14, %v5541_v53, %v5255_v22 }
 0x6fc   :  { %v12644_v63 = vpop.permute.xlu1 %5004  ;;  %6855 = vmatprep.mubr.msk.f32.mxu1 %vm5633_vm3, %v5608_v4  ;;  %v5575_v33 = vsel %vm5573_vm15, %v5558_v5, %v5319_v39  ;;  %v4972_v39 = vld [vmem:[#allocation3 + $0xc2] ss:$2 sm:$0xff] }
 0x6fd   :  { %v5592_v15 = vsel %vm5590_vm1, %v5575_v33, %v5383_v46 }
 0x6fe   :  { %5334 = vrot.lane.b32.xlu1 %v4941_v27, %s6944_s3  ;;  %v5195_v35 = vpop.permute.xlu0 %5194  ;;  %v4943_v27 = vld [vmem:[#allocation3 + $0x108] ss:$2 sm:$0xff] }
 0x6ff   :  { %5144 = vrot.lane.b32.xlu0 %v12440_v55, %s6940_s27 }
 0x700   :  { %v5257_v61 = vpop.permute.xlu1 %5256 }
 0x702   :  { %5146 = vrot.lane.b32.xlu1 %v12434_v62, %s6940_s27  ;;  %v5447_v55 = vpop.permute.xlu0 %5446 }
 0x703   :  { %5396 = vrot.lane.b32.xlu0 %v4956_v19, %s6945_s30  ;;  %v5609_v49 = vsel %vm5607_vm2, %v5592_v15, %v5447_v55  ;;  %v4974_v55 = vld [vmem:[#allocation3 + $0xf2] ss:$2 sm:$0xff] }
 0x704   :  { %v12658_v54 = vpop.permute.xlu1 %5006  ;;  %6856 = vmatmul.mubr.msk.f32.vlgmr.msra.gmra.mxu1 %vm5633_vm3, %v5609_v49 }
 0x706   :  { %5398 = vrot.lane.b32.xlu1 %v4957_v11, %s6945_s30  ;;  %v12664_v22 = vpop.permute.xlu0 %5068 }
 0x707   :  { %5208 = vrot.lane.b32.xlu0 %v12442_v59, %s6942_s1 }
 0x708   :  { %v5259_v45 = vpop.permute.xlu1 %5258 }
 0x70a   :  { %5020 = vrot.lane.b32.xlu1 %v12448_v1, %s6936_s19  ;;  %v5494_v1 = vsel %vm2362_vm0, %v12202_v7, %v12596_v48 }
 0x70b   :  { %5460 = vrot.lane.b32.xlu0 %v4972_v39, %s6946_s11  ;;  %v4975_v39 = vld [vmem:[#allocation3 + $0x10a] ss:$2 sm:$0xff] }
 0x70c   :  { %v12669_v46 = vpop.permute.xlu1 %5070 }
 0x70d   :  { %v5321_v62 = vpop.permute.xlu0 %5320 }
 0x70e   :  { %5272 = vrot.lane.b32.xlu1 %v12450_v16, %s6943_s2 }
 0x70f   :  { %5210 = vrot.lane.b32.xlu0 %v12444_v42, %s6942_s1  ;;  %v5510_v42 = vsel %vm2489_vm8, %v5494_v1, %v12606_v52 }
 0x710   :  { %v5323_v9 = vpop.permute.xlu1 %5322  ;;  %v5526_v16 = vsel %vm2619_vm10, %v5510_v42, %v12617_v34  ;;  %v5497_v42 = vsel %vm2362_vm0, %v12216_v40, %v12658_v54  ;;  %v4960_v54 = vld [vmem:[#allocation3 + $0x121] ss:$2 sm:$0xff] }
 0x711   :  { %v12675_v59 = vpop.permute.xlu0 %5132  ;;  %v5542_v28 = vsel %vm2749_vm12, %v5526_v16, %v5193_v18 }
 0x712   :  { %5022 = vrot.lane.b32.xlu1 %v12460_v31, %s6936_s19  ;;  %v5559_v7 = vsel %vm5556_vm14, %v5542_v28, %v5257_v61 }
 0x713   :  { %5462 = vrot.lane.b32.xlu0 %v4973_v30, %s6946_s11 }
 0x714   :  { %v12683_v14 = vpop.permute.xlu1 %5134 }
 0x715   :  { %v5385_v17 = vpop.permute.xlu0 %5384 }
 0x716   :  { %5274 = vrot.lane.b32.xlu1 %v12462_v47, %s6943_s2  ;;  %v5495_v47 = vsel %vm2362_vm0, %v12204_v36, %v12601_v24  ;;  %v4958_v36 = vld [vmem:[#allocation3 + $0xf1] ss:$2 sm:$0xff] }
 0x717   :  { %5084 = vrot.lane.b32.xlu0 %v12472_v3, %s6938_s20  ;;  %v5576_v3 = vsel %vm5573_vm15, %v5559_v7, %v5321_v62  ;;  %v5511_v8 = vsel %vm2489_vm8, %v5495_v47, %v12611_v29  ;;  %v4976_v47 = vld [vmem:[#allocation3 + $0x122] ss:$2 sm:$0xff] }
 0x718   :  { %v5387_v48 = vpop.permute.xlu1 %5386  ;;  %v5593_v4 = vsel %vm5590_vm1, %v5576_v3, %v5385_v17  ;;  %v4944_v17 = vld [vmem:[#allocation3 + $0x120] ss:$2 sm:$0xff] }
 0x719   :  { %v5197_v31 = vpop.permute.xlu0 %5196 }
 0x71a   :  { %5086 = vrot.lane.b32.xlu1 %v12470_v10, %s6938_s20  ;;  %v5527_v10 = vsel %vm2619_vm10, %v5511_v8, %v12625_v2 }
 0x71b   :  { %5336 = vrot.lane.b32.xlu0 %v4942_v12, %s6944_s3  ;;  %v5543_v19 = vsel %vm2749_vm12, %v5527_v10, %v5195_v35  ;;  %v4959_v35 = vld [vmem:[#allocation3 + $0x109] ss:$2 sm:$0xff] }
 0x71c   :  { %v12704_v18 = vpop.permute.xlu1 %5008  ;;  %v5560_v24 = vsel %vm5556_vm14, %v5543_v19, %v5259_v45  ;;  %v6001_v19 = vld [vmem:[%s13644_s0 + $0x8] sm:$0xff] }
 0x71d   :  { %v5449_v52 = vpop.permute.xlu0 %5448  ;;  %6033 = vst.msk [vmem:[#allocation4 + $0x8] sm:$0xff] %vm2300_vm6, %v6001_v19 }
 0x71e   :  { %v5610_v34 = vsel %vm5607_vm2, %v5593_v4, %v5449_v52  ;;  %5338 = vrot.lane.b32.xlu1 %v4943_v27, %s6944_s3  ;;  %v4961_v52 = vld [vmem:[#allocation3 + $0x139] ss:$2 sm:$0xff] }
 0x71f   :  { %5148 = vrot.lane.b32.xlu0 %v12498_v32, %s6940_s27  ;;  %6858 = vmatprep.mubr.msk.f32.mxu1 %vm5633_vm3, %v5610_v34  ;;  %v5577_v32 = vsel %vm5573_vm15, %v5560_v24, %v5323_v9 }
 0x720   :  { %v5261_v5 = vpop.permute.xlu1 %5260  ;;  %v5594_v61 = vsel %vm5590_vm1, %v5577_v32, %v5387_v48  ;;  %v5498_v32 = vsel %vm2362_vm0, %v12249_v6, %v12704_v18  ;;  %v6006_v6 = vld [vmem:[%s13644_s0 + $0x60] sm:$0xff]  ;;  %v6007_v18 = vld [vmem:[%s13644_s0 + $0x68] sm:$0xff] }
 0x721   :  { %v5199_v53 = vpop.permute.xlu0 %5198  ;;  %6038 = vst.msk [vmem:[#allocation4 + $0x30] sm:$0xff] %vm2300_vm6, %v6006_v6  ;;  %6039 = vst.msk [vmem:[#allocation4 + $0x38] sm:$0xff] %vm2300_vm6, %v6007_v18  ;;  %v14745_v18 = vld [vmem:[#allocation205_spill] sm:$0xff] }
 0x722   :  { %5150 = vrot.lane.b32.xlu1 %v12496_v57, %s6940_s27 }
 0x723   :  { %5400 = vrot.lane.b32.xlu0 %v4958_v36, %s6945_s30  ;;  %v4946_v36 = vld [vmem:[#allocation3 + $0x150] ss:$2 sm:$0xff] }
 0x724   :  { %v12722_v33 = vpop.permute.xlu1 %5010 }
 0x725   :  { %v5451_v29 = vpop.permute.xlu0 %5450 }
 0x726   :  { %v5611_v2 = vsel %vm5607_vm2, %v5594_v61, %v5451_v29  ;;  %5402 = vrot.lane.b32.xlu1 %v4959_v35, %s6945_s30  ;;  %v6004_v29 = vld [vmem:[%s13644_s0 + $0x40] sm:$0xff] }
 0x727   :  { %5212 = vrot.lane.b32.xlu0 %v12500_v38, %s6942_s1  ;;  %6859 = vmatmul.mubr.msk.f32.gmra.mxu1 %vm5633_vm3, %v5611_v2  ;;  %v6005_v2 = vld [vmem:[%s13644_s0 + $0x48] sm:$0xff]  ;;  %6036 = vst.msk [vmem:[#allocation4 + $0x20] sm:$0xff] %vm2300_vm6, %v6004_v29  ;;  %v6030_v29 = vld [vmem:[%s13644_s0 + $0x1e0] sm:$0xff] }
 0x728   :  { %v5263_v49 = vpop.permute.xlu1 %5262  ;;  %6037 = vst.msk [vmem:[#allocation4 + $0x28] sm:$0xff] %vm2300_vm6, %v6005_v2  ;;  %v6031_v2 = vld [vmem:[%s13644_s0 + $0x1e8] sm:$0xff]  ;;  %6062 = vst.msk [vmem:[#allocation4 + $0xf0] sm:$0xff] %vm2300_vm6, %v6030_v29 }
 0x729   :  { %v12728_v15 = vpop.permute.xlu0 %5072  ;;  %6063 = vst.msk [vmem:[#allocation4 + $0xf8] sm:$0xff] %vm2300_vm6, %v6031_v2 }
 0x72a   :  { %5024 = vrot.lane.b32.xlu1 %v12492_v13, %s6936_s19  ;;  %v5496_v13 = vsel %vm2362_vm0, %v12222_v56, %v12644_v63  ;;  %v5514_v35 = vsel %vm2489_vm8, %v5498_v32, %v12728_v15  ;;  %v6029_v32 = vld [vmem:[%s13644_s0 + $0x1c8] sm:$0xff] }
 0x72b   :  { %5464 = vrot.lane.b32.xlu0 %v4974_v55, %s6946_s11  ;;  %v4962_v55 = vld [vmem:[#allocation3 + $0x151] ss:$2 sm:$0xff]  ;;  %6061 = vst.msk [vmem:[#allocation4 + $0xe8] sm:$0xff] %vm2300_vm6, %v6029_v32 }
 0x72c   :  { %v12733_v11 = vpop.permute.xlu1 %5074 }
 0x72d   :  { %v5325_v57 = vpop.permute.xlu0 %5324 }
 0x72e   :  { %5276 = vrot.lane.b32.xlu1 %v12503_v26, %s6943_s2  ;;  %v5512_v26 = vsel %vm2489_vm8, %v5496_v13, %v12664_v22  ;;  %v6009_v13 = vld [vmem:[%s13644_s0 + $0x88] sm:$0xff] }
 0x72f   :  { %5214 = vrot.lane.b32.xlu0 %v12507_v23, %s6942_s1  ;;  %v5528_v23 = vsel %vm2619_vm10, %v5512_v26, %v12675_v59  ;;  %6041 = vst.msk [vmem:[#allocation4 + $0x48] sm:$0xff] %vm2300_vm6, %v6009_v13 }
 0x730   :  { %v5327_v45 = vpop.permute.xlu1 %5326  ;;  %v5544_v9 = vsel %vm2749_vm12, %v5528_v23, %v5197_v31  ;;  %v4945_v31 = vld [vmem:[#allocation3 + $0x138] ss:$2 sm:$0xff] }
 0x731   :  { %v12739_v38 = vpop.permute.xlu0 %5136  ;;  %v5561_v56 = vsel %vm5556_vm14, %v5544_v9, %v5261_v5  ;;  %v4947_v5 = vld [vmem:[#allocation3 + $0x168] ss:$2 sm:$0xff] }
 0x732   :  { %5026 = vrot.lane.b32.xlu1 %v12505_v44, %s6936_s19  ;;  %v4978_v23 = vld [vmem:[#allocation3 + $0x152] ss:$2 sm:$0xff]  ;;  %v6011_v9 = vld [vmem:[%s13644_s0 + $0xa8] sm:$0xff] }
 0x733   :  { %5466 = vrot.lane.b32.xlu0 %v4975_v39, %s6946_s11  ;;  %v4963_v39 = vld [vmem:[#allocation3 + $0x169] ss:$2 sm:$0xff]  ;;  %6043 = vst.msk [vmem:[#allocation4 + $0x58] sm:$0xff] %vm2300_vm6, %v6011_v9 }
 0x734   :  { %v12747_v30 = vpop.permute.xlu1 %5138 }
 0x735   :  { %v5389_v62 = vpop.permute.xlu0 %5388 }
 0x736   :  { %5278 = vrot.lane.b32.xlu1 %v12514_v50, %s6943_s2  ;;  %v6095_v50 = vld [vmem:[%s13649_s7] sm:$0xf] }
 0x737   :  { %5088 = vrot.lane.b32.xlu0 %v12528_v20, %s6938_s20  ;;  %v5578_v20 = vsel %vm5573_vm15, %v5561_v56, %v5325_v57  ;;  %6879 = vmatprep.subr.msk.mxu1 %vm3012_vm5, %v6095_v50 }
 0x738   :  { %v5391_v63 = vpop.permute.xlu1 %5390  ;;  %v5595_v22 = vsel %vm5590_vm1, %v5578_v20, %v5389_v62  ;;  %6880 = vmatpush3.msk.msra.mxu1 %vm3012_vm5, %v6095_v50  ;;  %v4979_v20 = vld [vmem:[#allocation3 + $0x16a] ss:$2 sm:$0xff]  ;;  %v6012_v50 = vld [vmem:[%s13644_s0 + $0xc0] sm:$0xff] }
 0x739   :  { %v12757_v44 = vpop.permute.xlu0 %5200  ;;  %6044 = vst.msk [vmem:[#allocation4 + $0x60] sm:$0xff] %vm2300_vm6, %v6012_v50 }
 0x73a   :  { %5090 = vrot.lane.b32.xlu1 %v12518_v41, %s6938_s20  ;;  %v5513_v41 = vsel %vm2489_vm8, %v5497_v42, %v12669_v46 }
 0x73b   :  { %5340 = vrot.lane.b32.xlu0 %v4944_v17, %s6944_s3  ;;  %v5529_v28 = vsel %vm2619_vm10, %v5513_v41, %v12683_v14 }
 0x73c   :  { %v12774_v16 = vpop.permute.xlu1 %5012  ;;  %v5545_v40 = vsel %vm2749_vm12, %v5529_v28, %v5199_v53 }
 0x73d   :  { %v5453_v59 = vpop.permute.xlu0 %5452 }
 0x73e   :  { %v5612_v1 = vsel %vm5607_vm2, %v5595_v22, %v5453_v59  ;;  %5342 = vrot.lane.b32.xlu1 %v4945_v31, %s6944_s3  ;;  %v5499_v22 = vsel %vm2362_vm0, %v12243_v58, %v12722_v33  ;;  %v6014_v58 = vld [vmem:[%s13644_s0 + $0xe0] sm:$0xff]  ;;  %v6015_v33 = vld [vmem:[%s13644_s0 + $0xe8] sm:$0xff] }
 0x73f   :  { %5152 = vrot.lane.b32.xlu0 %v12545_v0, %s6940_s27  ;;  %6861 = vmatprep.mubr.msk.f32.mxu1 %vm5633_vm3, %v5612_v1  ;;  %v5562_v0 = vsel %vm5556_vm14, %v5545_v40, %v5263_v49  ;;  %v5530_v49 = vsel %vm2619_vm10, %v5514_v35, %v12739_v38  ;;  %v6008_v38 = vld [vmem:[%s13644_s0 + $0x80] sm:$0xff]  ;;  %v6013_v1 = vld [vmem:[%s13644_s0 + $0xc8] sm:$0xff]  ;;  %v5515_v42 = vsel %vm2489_vm8, %v5499_v22, %v12733_v11 }
 0x740   :  { %v5265_v7 = vpop.permute.xlu1 %5264  ;;  %v5579_v46 = vsel %vm5573_vm15, %v5562_v0, %v5327_v45  ;;  %v5546_v15 = vsel %vm2749_vm12, %v5530_v49, %v12757_v44  ;;  %6040 = vst.msk [vmem:[#allocation4 + $0x40] sm:$0xff] %vm2300_vm6, %v6008_v38  ;;  %v6010_v44 = vld [vmem:[%s13644_s0 + $0xa0] sm:$0xff]  ;;  %6045 = vst.msk [vmem:[#allocation4 + $0x68] sm:$0xff] %vm2300_vm6, %v6013_v1  ;;  %v5531_v41 = vsel %vm2619_vm10, %v5515_v42, %v12747_v30  ;;  %v6017_v30 = vld [vmem:[%s13644_s0 + $0x108] sm:$0xff] }
 0x741   :  { %v12785_v12 = vpop.permute.xlu0 %5202  ;;  %v5596_v48 = vsel %vm5590_vm1, %v5579_v46, %v5391_v63  ;;  %v5563_v45 = vsel %vm5556_vm14, %v5546_v15, %v5265_v7  ;;  %6042 = vst.msk [vmem:[#allocation4 + $0x50] sm:$0xff] %vm2300_vm6, %v6010_v44  ;;  %6046 = vst.msk [vmem:[#allocation4 + $0x70] sm:$0xff] %vm2300_vm6, %v6014_v58  ;;  %v5500_v49 = vsel %vm2362_vm0, %v14745_v18, %v12774_v16 }
 0x742   :  { %5154 = vrot.lane.b32.xlu1 %v12539_v25, %s6940_s27  ;;  %6047 = vst.msk [vmem:[#allocation4 + $0x78] sm:$0xff] %vm2300_vm6, %v6015_v33  ;;  %v5547_v11 = vsel %vm2749_vm12, %v5531_v41, %v12785_v12  ;;  %6049 = vst.msk [vmem:[#allocation4 + $0x88] sm:$0xff] %vm2300_vm6, %v6017_v30 }
 0x743   :  { %5404 = vrot.lane.b32.xlu0 %v4960_v54, %s6945_s30  ;;  %v6016_v54 = vld [vmem:[%s13644_s0 + $0x100] sm:$0xff] }
 0x744   :  { %v12795_v4 = vpop.permute.xlu1 %5014  ;;  %6048 = vst.msk [vmem:[#allocation4 + $0x80] sm:$0xff] %vm2300_vm6, %v6016_v54  ;;  %v14747_v54 = vld [vmem:[#allocation145_spill] sm:$0xff] }
 0x745   :  { %v5455_v14 = vpop.permute.xlu0 %5454 }
 0x746   :  { %v5613_v3 = vsel %vm5607_vm2, %v5596_v48, %v5455_v14  ;;  %5406 = vrot.lane.b32.xlu1 %v4961_v52, %s6945_s30  ;;  %v6018_v14 = vld [vmem:[%s13644_s0 + $0x120] sm:$0xff] }
 0x747   :  { %5216 = vrot.lane.b32.xlu0 %v12550_v51, %s6942_s1  ;;  %6862 = vmatmul.mubr.msk.f32.gmra.mxu1 %vm5633_vm3, %v5613_v3  ;;  %v4977_v51 = vld [vmem:[#allocation3 + $0x13a] ss:$2 sm:$0xff]  ;;  %6050 = vst.msk [vmem:[#allocation4 + $0x90] sm:$0xff] %vm2300_vm6, %v6018_v14 }
 0x748   :  { %v12803_v8 = vpop.permute.xlu1 %5266  ;;  %v6019_v3 = vld [vmem:[%s13644_s0 + $0x128] sm:$0xff] }
 0x749   :  { %v12801_v34 = vpop.permute.xlu0 %5076  ;;  %v5564_v28 = vsel %vm5556_vm14, %v5547_v11, %v12803_v8  ;;  %6051 = vst.msk [vmem:[#allocation4 + $0x98] sm:$0xff] %vm2300_vm6, %v6019_v3  ;;  %v6020_v8 = vld [vmem:[%s13644_s0 + $0x140] sm:$0xff] }
 0x74a   :  { %5218 = vrot.lane.b32.xlu1 %v12547_v37, %s6942_s1  ;;  %v6000_v37 = vld [vmem:[%s13644_s0] sm:$0xff]  ;;  %6052 = vst.msk [vmem:[#allocation4 + $0xa0] sm:$0xff] %vm2300_vm6, %v6020_v8 }
 0x74b   :  { %5468 = vrot.lane.b32.xlu0 %v4976_v47, %s6946_s11  ;;  %6032 = vst.msk [vmem:[#allocation4] sm:$0xff] %vm2300_vm6, %v6000_v37  ;;  %v6024_v37 = vld [vmem:[%s13644_s0 + $0x180] sm:$0xff] }
 0x74c   :  { %v12808_v27 = vpop.permute.xlu1 %5078  ;;  %6056 = vst.msk [vmem:[#allocation4 + $0xc0] sm:$0xff] %vm2300_vm6, %v6024_v37 }
 0x74d   :  { %v5329_v25 = vpop.permute.xlu0 %5328 }
 0x74e   :  { %5470 = vrot.lane.b32.xlu1 %v4977_v51, %s6946_s11  ;;  %v5580_v26 = vsel %vm5573_vm15, %v5563_v45, %v5329_v25  ;;  %v6021_v25 = vld [vmem:[%s13644_s0 + $0x148] sm:$0xff]  ;;  %v6022_v51 = vld [vmem:[%s13644_s0 + $0x160] sm:$0xff] }
 0x74f   :  { %5280 = vrot.lane.b32.xlu0 %v12543_v43, %s6943_s2  ;;  %v6002_v43 = vld [vmem:[%s13644_s0 + $0x20] sm:$0xff]  ;;  %6053 = vst.msk [vmem:[#allocation4 + $0xa8] sm:$0xff] %vm2300_vm6, %v6021_v25  ;;  %6054 = vst.msk [vmem:[#allocation4 + $0xb0] sm:$0xff] %vm2300_vm6, %v6022_v51 }
 0x750   :  { %v12815_v53 = vpop.permute.xlu1 %5330  ;;  %6034 = vst.msk [vmem:[#allocation4 + $0x10] sm:$0xff] %vm2300_vm6, %v6002_v43  ;;  %v6026_v43 = vld [vmem:[%s13644_s0 + $0x1a0] sm:$0xff] }
 0x751   :  { %v12813_v10 = vpop.permute.xlu0 %5140  ;;  %v5581_v0 = vsel %vm5573_vm15, %v5564_v28, %v12815_v53  ;;  %v6023_v53 = vld [vmem:[%s13644_s0 + $0x168] sm:$0xff]  ;;  %6058 = vst.msk [vmem:[#allocation4 + $0xd0] sm:$0xff] %vm2300_vm6, %v6026_v43 }
 0x752   :  { %5344 = vrot.lane.b32.xlu1 %v4946_v36, %s6944_s3  ;;  %6055 = vst.msk [vmem:[#allocation4 + $0xb8] sm:$0xff] %vm2300_vm6, %v6023_v53  ;;  %v6025_v36 = vld [vmem:[%s13644_s0 + $0x188] sm:$0xff] }
 0x753   :  { %5282 = vrot.lane.b32.xlu0 %v12552_v60, %s6943_s2  ;;  %v6003_v60 = vld [vmem:[%s13644_s0 + $0x28] sm:$0xff]  ;;  %6057 = vst.msk [vmem:[#allocation4 + $0xc8] sm:$0xff] %vm2300_vm6, %v6025_v36 }
 0x754   :  { %6035 = vst.msk [vmem:[#allocation4 + $0x18] sm:$0xff] %vm2300_vm6, %v6003_v60  ;;  %v12839_v61 = vpop.permute.xlu1 %5142  ;;  %v6027_v60 = vld [vmem:[%s13644_s0 + $0x1a8] sm:$0xff] }
 0x755   :  { %v5393_v24 = vpop.permute.xlu0 %5392  ;;  %6059 = vst.msk [vmem:[#allocation4 + $0xd8] sm:$0xff] %vm2300_vm6, %v6027_v60 }
 0x756   :  { %5408 = vrot.lane.b32.xlu1 %v4962_v55, %s6945_s30  ;;  %v5597_v17 = vsel %vm5590_vm1, %v5580_v26, %v5393_v24 }
 0x757   :  { %5346 = vrot.lane.b32.xlu0 %v4947_v5, %s6944_s3  ;;  %v6028_v5 = vld [vmem:[%s13644_s0 + $0x1c0] sm:$0xff] }
 0x758   :  { %v5395_v62 = vpop.permute.xlu1 %5394  ;;  %6060 = vst.msk [vmem:[#allocation4 + $0xe0] sm:$0xff] %vm2300_vm6, %v6028_v5 }
 0x759   :  { %v12861_v57 = vpop.permute.xlu0 %5204  ;;  %v5598_v12 = vsel %vm5590_vm1, %v5581_v0, %v5395_v62 }
 0x75a   :  { %5472 = vrot.lane.b32.xlu1 %v4978_v23, %s6946_s11 }
 0x75b   :  { %5410 = vrot.lane.b32.xlu0 %v4963_v39, %s6945_s30  ;;  %v5516_v39 = vsel %vm2489_vm8, %v5500_v49, %v12801_v34 }
 0x75c   :  { %v12892_v59 = vpop.permute.xlu1 %5016  ;;  %v5532_v45 = vsel %vm2619_vm10, %v5516_v39, %v12813_v10 }
 0x75d   :  { %v5457_v56 = vpop.permute.xlu0 %5456  ;;  %v5548_v38 = vsel %vm2749_vm12, %v5532_v45, %v12861_v57  ;;  %v5502_v30 = vsel %vm2362_vm0, %v14747_v54, %v12892_v59  ;;  %v14748_v59 = vld [vmem:[#allocation62_spill] sm:$0xff] }
 0x75e   :  { %v5614_v63 = vsel %vm5607_vm2, %v5597_v17, %v5457_v56  ;;  %v14746_v17 = vld [vmem:[#allocation59_spill] sm:$0xff] }
 0x75f   :  { %5474 = vrot.lane.b32.xlu0 %v4979_v20, %s6946_s11  ;;  %6864 = vmatprep.mubr.msk.f32.mxu1 %vm5633_vm3, %v5614_v63  ;;  %v5501_v34 = vsel %vm2362_vm0, %v14746_v17, %v12795_v4 }
 0x760   :  { %v5269_v40 = vpop.permute.xlu1 %5268  ;;  %v5517_v10 = vsel %vm2489_vm8, %v5501_v34, %v12808_v27 }
 0x761   :  { %v12914_v31 = vpop.permute.xlu0 %5206  ;;  %v5565_v13 = vsel %vm5556_vm14, %v5548_v38, %v5269_v40  ;;  %v5533_v57 = vsel %vm2619_vm10, %v5517_v10, %v12839_v61  ;;  %v14750_v10 = vld [vmem:[#allocation206_spill] sm:$0xff] }
 0x762   :  { %v5549_v20 = vsel %vm2749_vm12, %v5533_v57, %v12914_v31 }
 0x764   :  { %v12934_v48 = vpop.permute.xlu1 %5018 }
 0x765   :  { %v5459_v7 = vpop.permute.xlu0 %5458  ;;  %v5503_v37 = vsel %vm2362_vm0, %v14748_v59, %v12934_v48 }
 0x766   :  { %v5615_v46 = vsel %vm5607_vm2, %v5598_v12, %v5459_v7 }
 0x767   :  { %6865 = vmatmul.mubr.msk.f32.gmra.mxu1 %vm5633_vm3, %v5615_v46 }
 0x768   :  { %v5271_v47 = vpop.permute.xlu1 %5270 }
 0x769   :  { %v12943_v52 = vpop.permute.xlu0 %5080  ;;  %v5566_v22 = vsel %vm5556_vm14, %v5549_v20, %v5271_v47 }
 0x76a   :  { %v5518_v12 = vsel %vm2489_vm8, %v5502_v30, %v12943_v52 }
 0x76c   :  { %v5083_v24 = vpop.permute.xlu1 %5082 }
 0x76d   :  { %v5333_v19 = vpop.permute.xlu0 %5332 }
 0x76e   :  { %v5582_v23 = vsel %vm5573_vm15, %v5565_v13, %v5333_v19  ;;  %v5519_v19 = vsel %vm2489_vm8, %v5503_v37, %v5083_v24 }
 0x770   :  { %v5335_v55 = vpop.permute.xlu1 %5334 }
 0x771   :  { %v5145_v35 = vpop.permute.xlu0 %5144  ;;  %v5583_v1 = vsel %vm5573_vm15, %v5566_v22, %v5335_v55 }
 0x772   :  { %v5534_v7 = vsel %vm2619_vm10, %v5518_v12, %v5145_v35 }
 0x774   :  { %v5147_v15 = vpop.permute.xlu1 %5146 }
 0x775   :  { %v5397_v6 = vpop.permute.xlu0 %5396  ;;  %v5535_v36 = vsel %vm2619_vm10, %v5519_v19, %v5147_v15 }
 0x776   :  { %v5599_v44 = vsel %vm5590_vm1, %v5582_v23, %v5397_v6 }
 0x778   :  { %v5399_v26 = vpop.permute.xlu1 %5398 }
 0x779   :  { %v5209_v62 = vpop.permute.xlu0 %5208  ;;  %v5600_v4 = vsel %vm5590_vm1, %v5583_v1, %v5399_v26 }
 0x77a   :  { %v5550_v14 = vsel %vm2749_vm12, %v5534_v7, %v5209_v62  ;;  %v14749_v62 = vld [vmem:[#allocation164_spill] sm:$0xff] }
 0x77c   :  { %v5021_v56 = vpop.permute.xlu1 %5020 }
 0x77d   :  { %v5461_v9 = vpop.permute.xlu0 %5460  ;;  %v5504_v38 = vsel %vm2362_vm0, %v14749_v62, %v5021_v56  ;;  %v6094_v62 = vld [vmem:[#allocation4 + $0xf0] ss:$2 sm:$0xff] }
 0x77e   :  { %v5616_v16 = vsel %vm5607_vm2, %v5599_v44, %v5461_v9 }
 0x77f   :  { %6867 = vmatprep.mubr.msk.f32.mxu1 %vm5633_vm3, %v5616_v16 }
 0x780   :  { %v5273_v50 = vpop.permute.xlu1 %5272 }
 0x781   :  { %v5211_v63 = vpop.permute.xlu0 %5210  ;;  %v5567_v3 = vsel %vm5556_vm14, %v5550_v14, %v5273_v50 }
 0x782   :  { %v5551_v60 = vsel %vm2749_vm12, %v5535_v36, %v5211_v63 }
 0x784   :  { %v5023_v33 = vpop.permute.xlu1 %5022 }
 0x785   :  { %v5463_v42 = vpop.permute.xlu0 %5462  ;;  %v5505_v57 = vsel %vm2362_vm0, %v14750_v10, %v5023_v33 }
 0x786   :  { %v5617_v58 = vsel %vm5607_vm2, %v5600_v4, %v5463_v42 }
 0x787   :  { %6868 = vmatmul.mubr.msk.f32.gmra.mxu1 %vm5633_vm3, %v5617_v58 }
 0x788   :  { %v5275_v41 = vpop.permute.xlu1 %5274 }
 0x789   :  { %v5085_v27 = vpop.permute.xlu0 %5084  ;;  %v5568_v5 = vsel %vm5556_vm14, %v5551_v60, %v5275_v41 }
 0x78a   :  { %v5520_v26 = vsel %vm2489_vm8, %v5504_v38, %v5085_v27 }
 0x78c   :  { %v5087_v11 = vpop.permute.xlu1 %5086 }
 0x78d   :  { %v5337_v61 = vpop.permute.xlu0 %5336  ;;  %v5521_v56 = vsel %vm2489_vm8, %v5505_v57, %v5087_v11 }
 0x78e   :  { %v5584_v8 = vsel %vm5573_vm15, %v5567_v3, %v5337_v61 }
 0x790   :  { %v5339_v40 = vpop.permute.xlu1 %5338 }
 0x791   :  { %v5149_v28 = vpop.permute.xlu0 %5148  ;;  %v5585_v29 = vsel %vm5573_vm15, %v5568_v5, %v5339_v40  ;;  %v6066_v5 = vld [vmem:[#allocation4 + $0x10] ss:$2 sm:$0xff] }
 0x792   :  { %v5536_v23 = vsel %vm2619_vm10, %v5520_v26, %v5149_v28  ;;  %v14751_v28 = vld [vmem:[#allocation58_spill] sm:$0xff] }
 0x794   :  { %v5151_v0 = vpop.permute.xlu1 %5150 }
 0x795   :  { %v5401_v31 = vpop.permute.xlu0 %5400  ;;  %v5537_v50 = vsel %vm2619_vm10, %v5521_v56, %v5151_v0 }
 0x796   :  { %v5601_v25 = vsel %vm5590_vm1, %v5584_v8, %v5401_v31 }
 0x798   :  { %v5403_v47 = vpop.permute.xlu1 %5402 }
 0x799   :  { %v5213_v46 = vpop.permute.xlu0 %5212  ;;  %v5602_v2 = vsel %vm5590_vm1, %v5585_v29, %v5403_v47  ;;  %v6070_v29 = vld [vmem:[#allocation4 + $0x30] ss:$2 sm:$0xff] }
 0x79a   :  { %v5552_v9 = vsel %vm2749_vm12, %v5536_v23, %v5213_v46 }
 0x79c   :  { %v5025_v52 = vpop.permute.xlu1 %5024 }
 0x79d   :  { %v5465_v51 = vpop.permute.xlu0 %5464  ;;  %v5506_v40 = vsel %vm2362_vm0, %v14751_v28, %v5025_v52 }
 0x79e   :  { %v5618_v53 = vsel %vm5607_vm2, %v5601_v25, %v5465_v51 }
 0x79f   :  { %6870 = vmatprep.mubr.msk.f32.mxu1 %vm5633_vm3, %v5618_v53 }
 0x7a0   :  { %v5277_v32 = vpop.permute.xlu1 %5276 }
 0x7a1   :  { %v5215_v43 = vpop.permute.xlu0 %5214  ;;  %v5569_v16 = vsel %vm5556_vm14, %v5552_v9, %v5277_v32  ;;  %v6068_v32 = vld [vmem:[#allocation4 + $0x20] ss:$2 sm:$0xff] }
 0x7a2   :  { %v5553_v4 = vsel %vm2749_vm12, %v5537_v50, %v5215_v43  ;;  %v6064_v43 = vld [vmem:[#allocation4] ss:$2 sm:$0xff] }
 0x7a4   :  { %v5027_v55 = vpop.permute.xlu1 %5026 }
 0x7a5   :  { %v5467_v35 = vpop.permute.xlu0 %5466  ;;  %v5507_v7 = vsel %vm2362_vm0, %v12516_v21, %v5027_v55  ;;  %v6078_v55 = vld [vmem:[#allocation4 + $0x70] ss:$2 sm:$0xff] }
 0x7a6   :  { %v5619_v48 = vsel %vm5607_vm2, %v5602_v2, %v5467_v35  ;;  %v6072_v2 = vld [vmem:[#allocation4 + $0x40] ss:$2 sm:$0xff]  ;;  %v6074_v35 = vld [vmem:[#allocation4 + $0x50] ss:$2 sm:$0xff] }
 0x7a7   :  { %6871 = vmatmul.mubr.msk.f32.gmra.mxu1 %vm5633_vm3, %v5619_v48  ;;  %v6076_v48 = vld [vmem:[#allocation4 + $0x60] ss:$2 sm:$0xff] }
 0x7a8   :  { %v5279_v24 = vpop.permute.xlu1 %5278 }
 0x7a9   :  { %v5089_v6 = vpop.permute.xlu0 %5088  ;;  %v5570_v42 = vsel %vm5556_vm14, %v5553_v4, %v5279_v24  ;;  %v6082_v24 = vld [vmem:[#allocation4 + $0x90] ss:$2 sm:$0xff] }
 0x7aa   :  { %v5522_v54 = vsel %vm2489_vm8, %v5506_v40, %v5089_v6  ;;  %v6080_v6 = vld [vmem:[#allocation4 + $0x80] ss:$2 sm:$0xff] }
 0x7ac   :  { %v5091_v49 = vpop.permute.xlu1 %5090 }
 0x7ad   :  { %v5341_v18 = vpop.permute.xlu0 %5340  ;;  %v5523_v3 = vsel %vm2489_vm8, %v5507_v7, %v5091_v49  ;;  %v6086_v49 = vld [vmem:[#allocation4 + $0xb0] ss:$2 sm:$0xff] }
 0x7ae   :  { %v5586_v34 = vsel %vm5573_vm15, %v5569_v16, %v5341_v18  ;;  %v6084_v18 = vld [vmem:[#allocation4 + $0xa0] ss:$2 sm:$0xff] }
 0x7b0   :  { %v5343_v39 = vpop.permute.xlu1 %5342 }
 0x7b1   :  { %v5153_v15 = vpop.permute.xlu0 %5152  ;;  %v5587_v27 = vsel %vm5573_vm15, %v5570_v42, %v5343_v39  ;;  %v6090_v39 = vld [vmem:[#allocation4 + $0xd0] ss:$2 sm:$0xff] }
 0x7b2   :  { %v5538_v30 = vsel %vm2619_vm10, %v5522_v54, %v5153_v15  ;;  %v6088_v15 = vld [vmem:[#allocation4 + $0xc0] ss:$2 sm:$0xff] }
 0x7b4   :  { %v5155_v13 = vpop.permute.xlu1 %5154 }
 0x7b5   :  { %v5405_v45 = vpop.permute.xlu0 %5404  ;;  %v5539_v47 = vsel %vm2619_vm10, %v5523_v3, %v5155_v13 }
 0x7b6   :  { %v5603_v63 = vsel %vm5590_vm1, %v5586_v34, %v5405_v45  ;;  %v6092_v45 = vld [vmem:[#allocation4 + $0xe0] ss:$2 sm:$0xff] }
 0x7b8   :  { %v5407_v17 = vpop.permute.xlu1 %5406 }
 0x7b9   :  { %v5217_v44 = vpop.permute.xlu0 %5216  ;;  %v5604_v33 = vsel %vm5590_vm1, %v5587_v27, %v5407_v17 }
 0x7ba   :  { %v5554_v12 = vsel %vm2749_vm12, %v5538_v30, %v5217_v44 }
 0x7bc   :  { %v5219_v1 = vpop.permute.xlu1 %5218 }
 0x7bd   :  { %v5469_v20 = vpop.permute.xlu0 %5468  ;;  %v5555_v25 = vsel %vm2749_vm12, %v5539_v47, %v5219_v1 }
 0x7be   :  { %v5620_v22 = vsel %vm5607_vm2, %v5603_v63, %v5469_v20 }
 0x7bf   :  { %6873 = vmatprep.mubr.msk.f32.mxu1 %vm5633_vm3, %v5620_v22 }
 0x7c0   :  { %v5471_v41 = vpop.permute.xlu1 %5470 }
 0x7c1   :  { %v5281_v58 = vpop.permute.xlu0 %5280  ;;  %v5621_v61 = vsel %vm5607_vm2, %v5604_v33, %v5471_v41 }
 0x7c2   :  { %6874 = vmatmul.mubr.msk.f32.gmra.mxu1 %vm5633_vm3, %v5621_v61  ;;  %v5571_v46 = vsel %vm5556_vm14, %v5554_v12, %v5281_v58 }
 0x7c4   :  { %v5345_v31 = vpop.permute.xlu1 %5344  ;;  %v13102_v38 = vpop.f32.mrf.mxu1 }
 0x7c5   :  { %v5283_v11 = vpop.permute.xlu0 %5282  ;;  %v5588_v51 = vsel %vm5573_vm15, %v5571_v46, %v5345_v31  ;;  %v5830_v16 = vsel %vm2362_vm0, %v13102_v38, 0.0 }
 0x7c6   :  { %v5572_v59 = vsel %vm5556_vm14, %v5555_v25, %v5283_v11  ;;  %v13104_v13 = vpop.f32.mrf.mxu1 }
 0x7c7   :  { %v5829_v44 = vsel %vm2362_vm0, %v13104_v13, 0.0 }
 0x7c8   :  { %v5409_v14 = vpop.permute.xlu1 %5408  ;;  %v5831_v34 = vadd.f32 %v5830_v16, %v5829_v44 }
 0x7c9   :  { %v5347_v0 = vpop.permute.xlu0 %5346  ;;  %v5605_v53 = vsel %vm5590_vm1, %v5588_v51, %v5409_v14 }
 0x7ca   :  { %v5589_v21 = vsel %vm5573_vm15, %v5572_v59, %v5347_v0 }
 0x7cc   :  { %v5473_v37 = vpop.permute.xlu1 %5472 }
 0x7cd   :  { %v5411_v8 = vpop.permute.xlu0 %5410  ;;  %v5622_v52 = vsel %vm5607_vm2, %v5605_v53, %v5473_v37 }
 0x7ce   :  { %6876 = vmatprep.mubr.msk.f32.mxu1 %vm5633_vm3, %v5622_v52  ;;  %v5606_v19 = vsel %vm5590_vm1, %v5589_v21, %v5411_v8 }
 0x7d1   :  { %v5475_v36 = vpop.permute.xlu0 %5474 }
 0x7d2   :  { %v5623_v60 = vsel %vm5607_vm2, %v5606_v19, %v5475_v36 }
 0x7d3   :  { %6877 = vmatmul.mubr.msk.f32.gmra.mxu1 %vm5633_vm3, %v5623_v60 }
 0x7d4   :  { %6881 = vmatprep.mubr.msk.f32.mxu1 %vm2300_vm6, %v6064_v43 }
 0x7d7   :  { %6882 = vmatmul.mubr.msk.f32.vlgmr.msra.gmra.mxu1 %vm2300_vm6, %v6066_v5 }
 0x7d8   :  { %6884 = vmatprep.mubr.msk.f32.mxu1 %vm2300_vm6, %v6068_v32 }
 0x7db   :  { %6885 = vmatmul.mubr.msk.f32.gmra.mxu1 %vm2300_vm6, %v6070_v29 }
 0x7dc   :  { %6887 = vmatprep.mubr.msk.f32.mxu1 %vm2300_vm6, %v6072_v2 }
 0x7df   :  { %6888 = vmatmul.mubr.msk.f32.gmra.mxu1 %vm2300_vm6, %v6074_v35 }
 0x7e0   :  { %6890 = vmatprep.mubr.msk.f32.mxu1 %vm2300_vm6, %v6076_v48 }
 0x7e3   :  { %6891 = vmatmul.mubr.msk.f32.gmra.mxu1 %vm2300_vm6, %v6078_v55 }
 0x7e4   :  { %6893 = vmatprep.mubr.msk.f32.mxu1 %vm2300_vm6, %v6080_v6 }
 0x7e7   :  { %6894 = vmatmul.mubr.msk.f32.gmra.mxu1 %vm2300_vm6, %v6082_v24  ;;  %v13106_v26 = vpop.f32.mrf.mxu1 }
 0x7e8   :  { %6896 = vmatprep.mubr.msk.f32.mxu1 %vm2300_vm6, %v6084_v18  ;;  %v5834_v20 = vsel %vm2362_vm0, %v13106_v26, 0.0 }
 0x7e9   :  { %v13108_v23 = vpop.f32.mrf.mxu1 }
 0x7ea   :  { %v5832_v17 = vsel %vm2362_vm0, %v13108_v23, 0.0 }
 0x7eb   :  { %6897 = vmatmul.mubr.msk.f32.gmra.mxu1 %vm2300_vm6, %v6086_v49  ;;  %v5833_v10 = vadd.f32 %v5832_v17, %v5831_v34 }
 0x7ec   :  { %6899 = vmatprep.mubr.msk.f32.mxu1 %vm2300_vm6, %v6088_v15 }
 0x7ed   :  { %v5835_v22 = vadd.f32 %v5834_v20, %v5833_v10 }
 0x7ef   :  { %6900 = vmatmul.mubr.msk.f32.gmra.mxu1 %vm2300_vm6, %v6090_v39 }
 0x7f0   :  { %6902 = vmatprep.mubr.msk.f32.mxu1 %vm2300_vm6, %v6092_v45 }
 0x7f3   :  { %6903 = vmatmul.mubr.msk.f32.gmra.mxu1 %vm2300_vm6, %v6094_v62 }
 0x807   :  { %v13112_v9 = vpop.f32.mrf.mxu1 }
 0x808   :  { %v5838_v42 = vsel %vm2362_vm0, %v13112_v9, 0.0 }
 0x809   :  { %v13118_v57 = vpop.f32.mrf.mxu1 }
 0x80a   :  { %v5836_v56 = vsel %vm2362_vm0, %v13118_v57, 0.0 }
 0x80b   :  { %v5837_v50 = vadd.f32 %v5836_v56, %v5835_v22 }
 0x80d   :  { %v5839_v27 = vadd.f32 %v5838_v42, %v5837_v50 }
 0x827   :  { %v13120_v63 = vpop.f32.mrf.mxu1 }
 0x828   :  { %v5842_v11 = vsel %vm2362_vm0, %v13120_v63, 0.0 }
 0x829   :  { %v13126_v1 = vpop.f32.mrf.mxu1 }
 0x82a   :  { %v5840_v58 = vsel %vm2362_vm0, %v13126_v1, 0.0 }
 0x82b   :  { %v5841_v33 = vadd.f32 %v5840_v58, %v5839_v27 }
 0x82d   :  { %v5843_v40 = vadd.f32 %v5842_v11, %v5841_v33 }
 0x847   :  { %v13128_v4 = vpop.f32.mrf.mxu1 }
 0x848   :  { %v5846_v0 = vsel %vm2362_vm0, %v13128_v4, 0.0 }
 0x849   :  { %v13134_v41 = vpop.f32.mrf.mxu1 }
 0x84a   :  { %v5844_v28 = vsel %vm2362_vm0, %v13134_v41, 0.0 }
 0x84b   :  { %v5845_v31 = vadd.f32 %v5844_v28, %v5843_v40 }
 0x84d   :  { %v5847_v7 = vadd.f32 %v5846_v0, %v5845_v31 }
 0x867   :  { %v13136_v61 = vpop.f32.mrf.mxu1 }
 0x868   :  { %v5850_v3 = vsel %vm2362_vm0, %v13136_v61, 0.0 }
 0x869   :  { %v13142_v54 = vpop.f32.mrf.mxu1 }
 0x86a   :  { %v5848_v12 = vsel %vm2362_vm0, %v13142_v54, 0.0 }
 0x86b   :  { %v5849_v46 = vadd.f32 %v5848_v12, %v5847_v7 }
 0x86d   :  { %v5851_v8 = vadd.f32 %v5850_v3, %v5849_v46 }
 0x882   :  { %v13144_v30 = vpop.f32.mrf.mxu1 }
 0x883   :  { %v5854_v53 = vsel %vm2362_vm0, %v13144_v30, 0.0 }
 0x884   :  { %v13150_v14 = vpop.f32.mrf.mxu1 }
 0x885   :  { %v5852_v47 = vsel %vm2362_vm0, %v13150_v14, 0.0 }
 0x886   :  { %v5853_v25 = vadd.f32 %v5852_v47, %v5851_v8 }
 0x888   :  { %v5855_v37 = vadd.f32 %v5854_v53, %v5853_v25 }
 0x893   :  { %v13156_v51 = vpop.f32.mrf.mxu1 }
 0x894   :  { %v5858_v36 = vsel %vm2362_vm0, %v13156_v51, 0.0 }
 0x895   :  { %v13160_v59 = vpop.f32.mrf.mxu1 }
 0x896   :  { %v5856_v52 = vsel %vm2362_vm0, %v13160_v59, 0.0 }
 0x897   :  { %v5857_v21 = vadd.f32 %v5856_v52, %v5855_v37  ;;  %v13164_v19 = vpop.f32.mrf.mxu1 }
 0x898   :  { %v6295_v35 = vsel %vm2362_vm0, %v13164_v19, 0.0 }
 0x899   :  { %v5859_v43 = vadd.f32 %v5858_v36, %v5857_v21  ;;  %v13168_v60 = vpop.f32.mrf.mxu1 }
 0x89a   :  { %v6294_v32 = vsel %vm2362_vm0, %v13168_v60, 0.0 }
 0x89b   :  { %v5860_v5 = vrot.slane %v5859_v43, 4  ;;  %v13172_v29 = vpop.f32.mrf.mxu1  ;;  %v6296_v55 = vadd.f32 %v6295_v35, %v6294_v32 }
 0x89c   :  { %v6299_v62 = vsel %vm2362_vm0, %v13172_v29, 0.0 }
 0x89d   :  { %v5861_v2 = vadd.f32 %v5860_v5, %v5859_v43  ;;  %v13176_v48 = vpop.f32.mrf.mxu1 }
 0x89e   :  { %v6297_v6 = vsel %vm2362_vm0, %v13176_v48, 0.0 }
 0x89f   :  { %v5862_v24 = vrot.slane %v5861_v2, 2  ;;  %v13180_v18 = vpop.f32.mrf.mxu1  ;;  %v6298_v49 = vadd.f32 %v6297_v6, %v6296_v55 }
 0x8a0   :  { %v6303_v33 = vsel %vm2362_vm0, %v13180_v18, 0.0 }
 0x8a1   :  { %v5863_v15 = vadd.f32 %v5862_v24, %v5861_v2  ;;  %v13182_v39 = vpop.f32.mrf.mxu1  ;;  %v6300_v16 = vadd.f32 %v6299_v62, %v6298_v49 }
 0x8a2   :  { %v6301_v34 = vsel %vm2362_vm0, %v13182_v39, 0.0 }
 0x8a3   :  { %v5864_v45 = vrot.slane %v5863_v15, 1  ;;  %v13186_v44 = vpop.f32.mrf.mxu1  ;;  %v6302_v22 = vadd.f32 %v6301_v34, %v6300_v16 }
 0x8a4   :  { %v6307_v21 = vsel %vm2362_vm0, %v13186_v44, 0.0 }
 0x8a5   :  { %v5865_v17 = vadd.f32 %v5864_v45, %v5863_v15  ;;  %v13190_v10 = vpop.f32.mrf.mxu1  ;;  %v6304_v28 = vadd.f32 %v6303_v33, %v6302_v22 }
 0x8a7   :  { %v13192_v20 = vmul.f32 0.0078125, %v5865_v17  ;;  %v13194_v56 = vpop.f32.mrf.mxu1 }
 0x8a8   :  { %v6311_v49 = vsel %vm2362_vm0, %v13194_v56, 0.0 }
 0x8a9   :  { %v13198_v50 = vsub.f32 %v13104_v13, %v13192_v20  ;;  %v13202_v42 = vsub.f32 %v13102_v38, %v13192_v20  ;;  %v13204_v58 = vpop.f32.mrf.mxu1  ;;  %v13208_v27 = vsub.f32 %v13108_v23, %v13192_v20  ;;  %v13216_v13 = vsub.f32 %v13106_v26, %v13192_v20 }
 0x8aa   :  { %v6305_v23 = vsel %vm2362_vm0, %v13190_v10, 0.0  ;;  %v13228_v0 = vsub.f32 %v13118_v57, %v13192_v20  ;;  %v13234_v7 = vsub.f32 %v13112_v9, %v13192_v20  ;;  %v13244_v57 = vsub.f32 %v13126_v1, %v13192_v20 }
 0x8ab   :  { %v13212_v11 = vpop.f32.mrf.mxu1  ;;  %v5884_v38 = vmul.f32 %v13198_v50, %v13198_v50  ;;  %v5885_v40 = vmul.f32 %v13202_v42, %v13202_v42  ;;  %v5886_v12 = vmul.f32 %v13208_v27, %v13208_v27  ;;  %v6306_v26 = vadd.f32 %v6305_v23, %v6304_v28 }
 0x8ac   :  { %v5887_v46 = vmul.f32 %v13216_v13, %v13216_v13  ;;  %v5888_v53 = vmul.f32 %v13228_v0, %v13228_v0  ;;  %v13251_v37 = vsub.f32 %v13120_v63, %v13192_v20  ;;  %v5889_v36 = vmul.f32 %v13234_v7, %v13234_v7 }
 0x8ad   :  { %v13224_v31 = vpop.f32.mrf.mxu1  ;;  %v5900_v3 = vsel %vm2362_vm0, %v5884_v38, 0.0  ;;  %v5901_v47 = vsel %vm2362_vm0, %v5885_v40, 0.0  ;;  %v5903_v9 = vsel %vm2362_vm0, %v5886_v12, 0.0  ;;  %v6308_v1 = vadd.f32 %v6307_v21, %v6306_v26 }
 0x8ae   :  { %v5902_v25 = vadd.f32 %v5901_v47, %v5900_v3  ;;  %v5905_v43 = vsel %vm2362_vm0, %v5887_v46, 0.0  ;;  %v6309_v5 = vsel %vm2362_vm0, %v13204_v58, 0.0  ;;  %v13264_v63 = vsub.f32 %v13134_v41, %v13192_v20 }
 0x8af   :  { %v13240_v8 = vpop.f32.mrf.mxu1  ;;  %v5890_v35 = vmul.f32 %v13244_v57, %v13244_v57  ;;  %v5907_v55 = vsel %vm2362_vm0, %v5888_v53, 0.0  ;;  %v6310_v6 = vadd.f32 %v6309_v5, %v6308_v1  ;;  %v6313_v15 = vsel %vm2362_vm0, %v13224_v31, 0.0 }
 0x8b0   :  { %v5904_v52 = vadd.f32 %v5903_v9, %v5902_v25  ;;  %v13275_v45 = vsub.f32 %v13128_v4, %v13192_v20  ;;  %v5891_v41 = vmul.f32 %v13251_v37, %v13251_v37  ;;  %v5909_v62 = vsel %vm2362_vm0, %v5889_v36, 0.0 }
 0x8b1   :  { %v13260_v32 = vpop.f32.mrf.mxu1  ;;  %v6312_v16 = vadd.f32 %v6311_v49, %v6310_v6  ;;  %v13284_v22 = vsub.f32 %v13142_v54, %v13192_v20  ;;  %v5892_v33 = vmul.f32 %v13264_v63, %v13264_v63  ;;  %v5911_v28 = vsel %vm2362_vm0, %v5890_v35, 0.0 }
 0x8b2   :  { %v5906_v2 = vadd.f32 %v5905_v43, %v5904_v52  ;;  %v6315_v40 = vsel %vm2362_vm0, %v13212_v11, 0.0  ;;  %v6317_v23 = vsel %vm2362_vm0, %v13260_v32, 0.0  ;;  %v13295_v12 = vsub.f32 %v13136_v61, %v13192_v20 }
 0x8b3   :  { %v13280_v17 = vpop.f32.mrf.mxu1  ;;  %v6314_v4 = vadd.f32 %v6313_v15, %v6312_v16  ;;  %v5893_v54 = vmul.f32 %v13275_v45, %v13275_v45  ;;  %v5913_v26 = vsel %vm2362_vm0, %v5891_v41, 0.0  ;;  %v13304_v25 = vsub.f32 %v13150_v14, %v13192_v20 }
 0x8b4   :  { %v5908_v24 = vadd.f32 %v5907_v55, %v5906_v2  ;;  %v5894_v53 = vmul.f32 %v13284_v22, %v13284_v22  ;;  %v5915_v9 = vsel %vm2362_vm0, %v5892_v33, 0.0  ;;  %v6319_v21 = vsel %vm2362_vm0, %v13240_v8, 0.0 }
 0x8b5   :  { %v6316_v46 = vadd.f32 %v6315_v40, %v6314_v4  ;;  %v13300_v3 = vpop.f32.mrf.mxu1  ;;  %v13315_v43 = vsub.f32 %v13144_v30, %v13192_v20  ;;  %v5895_v14 = vmul.f32 %v13295_v12, %v13295_v12  ;;  %v5917_v1 = vsel %vm2362_vm0, %v5893_v54, 0.0 }
 0x8b6   :  { %v5910_v34 = vadd.f32 %v5909_v62, %v5908_v24  ;;  %v6321_v36 = vsel %vm2362_vm0, %v13300_v3, 0.0  ;;  %v13322_v35 = vsub.f32 %v13160_v59, %v13192_v20  ;;  %v5896_v55 = vmul.f32 %v13304_v25, %v13304_v25 }
 0x8b7   :  { %v6318_v61 = vadd.f32 %v6317_v23, %v6316_v46  ;;  %v5919_v6 = vsel %vm2362_vm0, %v5894_v53, 0.0  ;;  %v6323_v30 = vsel %vm2362_vm0, %v13280_v17, 0.0  ;;  %v13331_v15 = vsub.f32 %v13156_v51, %v13192_v20 }
 0x8b8   :  { %v5912_v38 = vadd.f32 %v5911_v28, %v5910_v34  ;;  %v5897_v41 = vmul.f32 %v13315_v43, %v13315_v43  ;;  %v5921_v59 = vsel %vm2362_vm0, %v5895_v14, 0.0  ;;  %v5898_v34 = vmul.f32 %v13322_v35, %v13322_v35 }
 0x8b9   :  { %v6320_v5 = vadd.f32 %v6319_v21, %v6318_v61  ;;  %v5923_v33 = vsel %vm2362_vm0, %v5896_v55, 0.0 }
 0x8ba   :  { %v5914_v47 = vadd.f32 %v5913_v26, %v5912_v38  ;;  %v5899_v38 = vmul.f32 %v13331_v15, %v13331_v15  ;;  %v5925_v51 = vsel %vm2362_vm0, %v5897_v41, 0.0  ;;  %v5927_v23 = vsel %vm2362_vm0, %v5898_v34, 0.0 }
 0x8bb   :  { %v6322_v24 = vadd.f32 %v6321_v36, %v6320_v5 }
 0x8bc   :  { %v5916_v52 = vadd.f32 %v5915_v9, %v5914_v47  ;;  %v5929_v46 = vsel %vm2362_vm0, %v5899_v38, 0.0 }
 0x8bd   :  { %v6324_v62 = vadd.f32 %v6323_v30, %v6322_v24 }
 0x8be   :  { %v5918_v2 = vadd.f32 %v5917_v1, %v5916_v52 }
 0x8bf   :  { %v6325_v28 = vrot.slane %v6324_v62, 4 }
 0x8c0   :  { %v5920_v49 = vadd.f32 %v5919_v6, %v5918_v2 }
 0x8c1   :  { %v6326_v20 = vadd.f32 %v6325_v28, %v6324_v62 }
 0x8c2   :  { %v5922_v16 = vadd.f32 %v5921_v59, %v5920_v49 }
 0x8c3   :  { %v6327_v54 = vrot.slane %v6326_v20, 2 }
 0x8c4   :  { %v5924_v4 = vadd.f32 %v5923_v33, %v5922_v16 }
 0x8c5   :  { %v6328_v47 = vadd.f32 %v6327_v54, %v6326_v20 }
 0x8c6   :  { %v5926_v40 = vadd.f32 %v5925_v51, %v5924_v4 }
 0x8c7   :  { %v6329_v9 = vrot.slane %v6328_v47, 1 }
 0x8c8   :  { %v5928_v26 = vadd.f32 %v5927_v23, %v5926_v40 }
 0x8c9   :  { %v6330_v52 = vadd.f32 %v6329_v9, %v6328_v47 }
 0x8ca   :  { %v5930_v53 = vadd.f32 %v5929_v46, %v5928_v26 }
 0x8cb   :  { %v13344_v36 = vmul.f32 0.0078125, %v6330_v52 }
 0x8cc   :  { %v5931_v61 = vrot.slane %v5930_v53, 4 }
 0x8cd   :  { %v13348_v5 = vsub.f32 %v13168_v60, %v13344_v36  ;;  %v13352_v2 = vsub.f32 %v13164_v19, %v13344_v36  ;;  %v13356_v6 = vsub.f32 %v13176_v48, %v13344_v36  ;;  %v13360_v49 = vsub.f32 %v13172_v29, %v13344_v36 }
 0x8ce   :  { %v5932_v21 = vadd.f32 %v5931_v61, %v5930_v53  ;;  %v13370_v59 = vsub.f32 %v13182_v39, %v13344_v36  ;;  %v13379_v28 = vsub.f32 %v13180_v18, %v13344_v36  ;;  %v13386_v20 = vsub.f32 %v13190_v10, %v13344_v36 }
 0x8cf   :  { %v6348_v30 = vmul.f32 %v13348_v5, %v13348_v5  ;;  %v6349_v60 = vmul.f32 %v13352_v2, %v13352_v2  ;;  %v6350_v19 = vmul.f32 %v13356_v6, %v13356_v6  ;;  %v6351_v62 = vmul.f32 %v13360_v49, %v13360_v49 }
 0x8d0   :  { %v5933_v14 = vrot.slane %v5932_v21, 2  ;;  %v6352_v39 = vmul.f32 %v13370_v59, %v13370_v59  ;;  %v6353_v40 = vmul.f32 %v13379_v28, %v13379_v28  ;;  %v13393_v18 = vsub.f32 %v13186_v44, %v13344_v36 }
 0x8d1   :  { %v6364_v29 = vsel %vm2362_vm0, %v6348_v30, 0.0  ;;  %v6365_v16 = vsel %vm2362_vm0, %v6349_v60, 0.0  ;;  %v6367_v33 = vsel %vm2362_vm0, %v6350_v19, 0.0  ;;  %v6369_v38 = vsel %vm2362_vm0, %v6351_v62, 0.0 }
 0x8d2   :  { %v5934_v1 = vadd.f32 %v5933_v14, %v5932_v21  ;;  %v6366_v34 = vadd.f32 %v6365_v16, %v6364_v29  ;;  %v6371_v23 = vsel %vm2362_vm0, %v6352_v39, 0.0  ;;  %v6354_v26 = vmul.f32 %v13386_v20, %v13386_v20 }
 0x8d3   :  { %v6373_v46 = vsel %vm2362_vm0, %v6353_v40, 0.0  ;;  %v13400_v10 = vsub.f32 %v13204_v58, %v13344_v36  ;;  %v6355_v53 = vmul.f32 %v13393_v18, %v13393_v18  ;;  %v13413_v14 = vsub.f32 %v13194_v56, %v13344_v36 }
 0x8d4   :  { %v5935_v55 = vrot.slane %v5934_v1, 1  ;;  %v6368_v4 = vadd.f32 %v6367_v33, %v6366_v34  ;;  %v6375_v61 = vsel %vm2362_vm0, %v6354_v26, 0.0  ;;  %v13436_v30 = vsub.f32 %v13224_v31, %v13344_v36 }
 0x8d5   :  { %v6356_v58 = vmul.f32 %v13400_v10, %v13400_v10  ;;  %v13453_v31 = vsub.f32 %v13240_v8, %v13344_v36  ;;  %v13460_v62 = vsub.f32 %v13300_v3, %v13344_v36  ;;  %v13467_v8 = vsub.f32 %v13280_v17, %v13344_v36 }
 0x8d6   :  { %v5936_v24 = vadd.f32 %v5935_v55, %v5934_v1  ;;  %v6370_v51 = vadd.f32 %v6369_v38, %v6368_v4  ;;  %v6377_v1 = vsel %vm2362_vm0, %v6355_v53, 0.0 }
 0x8d7   :  { %v6379_v60 = vsel %vm2362_vm0, %v6356_v58, 0.0  ;;  %v6361_v34 = vmul.f32 %v13453_v31, %v13453_v31  ;;  %v6362_v3 = vmul.f32 %v13460_v62, %v13460_v62 }
 0x8d8   :  { %v5937_v41 = vmul.f32 0.0078125, %v5936_v24  ;;  %v6372_v54 = vadd.f32 %v6371_v23, %v6370_v51  ;;  %v6363_v51 = vmul.f32 %v13467_v8, %v13467_v8 }
 0x8d9   :  { %v6389_v40 = vsel %vm2362_vm0, %v6361_v34, 0.0  ;;  %v6391_v17 = vsel %vm2362_vm0, %v6362_v3, 0.0 }
 0x8da   :  { %v5938_v48 = vadd.f32 1e-05, %v5937_v41  ;;  %v6374_v47 = vadd.f32 %v6373_v46, %v6372_v54  ;;  %v13447_v41 = vsub.f32 %v13260_v32, %v13344_v36  ;;  %v6393_v54 = vsel %vm2362_vm0, %v6363_v51, 0.0 }
 0x8dc   :  { %6930 = vrsqrt.f32 %v5938_v48  ;;  %v6376_v21 = vadd.f32 %v6375_v61, %v6374_v47  ;;  %v6360_v32 = vmul.f32 %v13447_v41, %v13447_v41 }
 0x8de   :  { %v6378_v24 = vadd.f32 %v6377_v1, %v6376_v21  ;;  %v6387_v4 = vsel %vm2362_vm0, %v6360_v32, 0.0 }
 0x8e9   :  { %v13404_v9 = vpop.eup %6930 }
 0x8ea   :  { %v5940_v44 = vmul.f32 %v13404_v9, %v13198_v50  ;;  %v5941_v52 = vmul.f32 %v13404_v9, %v13202_v42  ;;  %v13420_v55 = vmul.f32 %v13404_v9, %v13304_v25  ;;  %v13424_v50 = vmul.f32 %v13404_v9, %v13315_v43 }
 0x8eb   :  { %v13428_v42 = vmul.f32 %v13404_v9, %v13322_v35  ;;  %v13432_v56 = vmul.f32 %v13404_v9, %v13331_v15  ;;  %v13440_v25 = vsub.f32 %v13212_v11, %v13344_v36  ;;  %v6357_v43 = vmul.f32 %v13413_v14, %v13413_v14 }
 0x8ec   :  { %v6380_v35 = vadd.f32 %v6379_v60, %v6378_v24  ;;  %v6358_v15 = vmul.f32 %v13436_v30, %v13436_v30  ;;  %v5943_v60 = vmul.f32 %v13404_v9, %v13216_v13  ;;  %v5949_v13 = vmul.f32 %v13404_v9, %v13275_v45 }
 0x8ed   :  { %v6359_v11 = vmul.f32 %v13440_v25, %v13440_v25  ;;  %v6381_v19 = vsel %vm2362_vm0, %v6357_v43, 0.0  ;;  %v5942_v43 = vmul.f32 %v13404_v9, %v13208_v27  ;;  %v5948_v27 = vmul.f32 %v13404_v9, %v13264_v63 }
 0x8ee   :  { %v6382_v48 = vadd.f32 %v6381_v19, %v6380_v35  ;;  %v6383_v29 = vsel %vm2362_vm0, %v6358_v15, 0.0  ;;  %v6599_v35 = vld [vmem:[%s13650_s5] ss:$0 sm:$0xff]  ;;  %v5944_v15 = vmul.f32 %v13404_v9, %v13228_v0  ;;  %v5946_v19 = vmul.f32 %v13404_v9, %v13244_v57 }
 0x8ef   :  { %v6385_v33 = vsel %vm2362_vm0, %v6359_v11, 0.0  ;;  %v5945_v11 = vmul.f32 %v13404_v9, %v13234_v7  ;;  %v5950_v32 = vmul.f32 %v13404_v9, %v13284_v22  ;;  %v5951_v0 = vmul.f32 %v13404_v9, %v13295_v12  ;;  %v6600_v57 = vld [vmem:[%s13651_s6] ss:$0 sm:$0xff] }
 0x8f0   :  { %v6384_v16 = vadd.f32 %v6383_v29, %v6382_v48  ;;  %v5947_v48 = vmul.f32 %v13404_v9, %v13251_v37  ;;  %v5962_v29 = vmul.f32 %v6599_v35, %v5940_v44  ;;  %v5963_v7 = vmul.f32 %v6599_v35, %v5941_v52 }
 0x8f1   :  { %v5965_v34 = vmul.f32 %v6599_v35, %v5943_v60  ;;  %v5966_v37 = vmul.f32 %v6599_v35, %v5944_v15  ;;  %v5968_v63 = vmul.f32 %v6599_v35, %v5946_v19  ;;  %v5970_v3 = vmul.f32 %v6599_v35, %v5948_v27  ;;  %v6618_v60 = vld [vmem:[%s13652_s8] ss:$0 sm:$0xff] }
 0x8f2   :  { %v6386_v39 = vadd.f32 %v6385_v33, %v6384_v16  ;;  %v5964_v16 = vmul.f32 %v6599_v35, %v5942_v43  ;;  %v5967_v33 = vmul.f32 %v6599_v35, %v5945_v11  ;;  %v5971_v45 = vmul.f32 %v6599_v35, %v5949_v13 }
 0x8f3   :  { %v5974_v22 = vmul.f32 %v6599_v35, %v13420_v55  ;;  %v5975_v12 = vmul.f32 %v6599_v35, %v13424_v50  ;;  %v5976_v9 = vmul.f32 %v6599_v35, %v13428_v42  ;;  %v5977_v44 = vmul.f32 %v6599_v35, %v13432_v56 }
 0x8f4   :  { %v6388_v38 = vadd.f32 %v6387_v4, %v6386_v39  ;;  %v5969_v39 = vmul.f32 %v6599_v35, %v5947_v48  ;;  %v5972_v4 = vmul.f32 %v6599_v35, %v5950_v32  ;;  %v13510_v52 = vadd.f32 %v6600_v57, %v5962_v29 }
 0x8f5   :  { %v13512_v51 = vadd.f32 %v6600_v57, %v5963_v7  ;;  %v13526_v50 = vadd.f32 %v6600_v57, %v5970_v3  ;;  %v13528_v42 = vadd.f32 %v6600_v57, %v5971_v45 }
 0x8f6   :  { %v6390_v23 = vadd.f32 %v6389_v40, %v6388_v38  ;;  %v5973_v38 = vmul.f32 %v6599_v35, %v5951_v0  ;;  %v13514_v40 = vadd.f32 %v6600_v57, %v5964_v16  ;;  %v13524_v55 = vadd.f32 %v6600_v57, %v5969_v39 }
 0x8f7   :  { %v13530_v56 = vadd.f32 %v6600_v57, %v5972_v4 }
 0x8f8   :  { %v6392_v36 = vadd.f32 %v6391_v17, %v6390_v23  ;;  %v13516_v23 = vadd.f32 %v6600_v57, %v5965_v34  ;;  %v13518_v17 = vadd.f32 %v6600_v57, %v5966_v37 }
 0x8fa   :  { %v6394_v26 = vadd.f32 %v6393_v54, %v6392_v36  ;;  %v13520_v36 = vadd.f32 %v6600_v57, %v5967_v33  ;;  %v13522_v54 = vadd.f32 %v6600_v57, %v5968_v63 }
 0x8fc   :  { %v6395_v46 = vrot.slane %v6394_v26, 4 }
 0x8fe   :  { %v6396_v47 = vadd.f32 %v6395_v46, %v6394_v26  ;;  %v13532_v26 = vadd.f32 %v6600_v57, %v5973_v38 }
 0x900   :  { %v6397_v53 = vrot.slane %v6396_v47, 2 }
 0x902   :  { %v6398_v61 = vadd.f32 %v6397_v53, %v6396_v47  ;;  %v13534_v47 = vadd.f32 %v6600_v57, %v5974_v22  ;;  %v13536_v53 = vadd.f32 %v6600_v57, %v5975_v12 }
 0x904   :  { %v6399_v21 = vrot.slane %v6398_v61, 1 }
 0x906   :  { %v6400_v58 = vadd.f32 %v6399_v21, %v6398_v61  ;;  %v13538_v61 = vadd.f32 %v6600_v57, %v5976_v9  ;;  %v13540_v21 = vadd.f32 %v6600_v57, %v5977_v44 }
 0x908   :  { %v6401_v1 = vmul.f32 0.0078125, %v6400_v58 }
 0x90a   :  { %v6402_v24 = vadd.f32 1e-05, %v6401_v1 }
 0x90c   :  { %6932 = vrsqrt.f32 %v6402_v24 }
 0x919   :  { %v6933_v46 = vpop.eup %6932 }
 0x91a   :  { %v6404_v58 = vmul.f32 %v6933_v46, %v13348_v5  ;;  %v6405_v1 = vmul.f32 %v6933_v46, %v13352_v2  ;;  %v6406_v24 = vmul.f32 %v6933_v46, %v13356_v6  ;;  %v6407_v43 = vmul.f32 %v6933_v46, %v13360_v49 }
 0x91b   :  { %v6408_v35 = vmul.f32 %v6933_v46, %v13370_v59  ;;  %v6409_v15 = vmul.f32 %v6933_v46, %v13379_v28  ;;  %v6410_v11 = vmul.f32 %v6933_v46, %v13386_v20  ;;  %v6411_v19 = vmul.f32 %v6933_v46, %v13393_v18 }
 0x91c   :  { %v6412_v5 = vmul.f32 %v6933_v46, %v13400_v10  ;;  %v6413_v2 = vmul.f32 %v6933_v46, %v13413_v14  ;;  %v6414_v6 = vmul.f32 %v6933_v46, %v13436_v30  ;;  %v6415_v49 = vmul.f32 %v6933_v46, %v13440_v25  ;;  %v6619_v10 = vld [vmem:[%s13653_s9] ss:$0 sm:$0xff] }
 0x91d   :  { %v6416_v48 = vmul.f32 %v6933_v46, %v13447_v41  ;;  %v6417_v27 = vmul.f32 %v6933_v46, %v13453_v31  ;;  %v6418_v59 = vmul.f32 %v6933_v46, %v13460_v62  ;;  %v6419_v28 = vmul.f32 %v6933_v46, %v13467_v8 }
 0x91e   :  { %v6426_v13 = vmul.f32 %v6618_v60, %v6404_v58  ;;  %v6427_v20 = vmul.f32 %v6618_v60, %v6405_v1  ;;  %v6428_v32 = vmul.f32 %v6618_v60, %v6406_v24  ;;  %v6429_v18 = vmul.f32 %v6618_v60, %v6407_v43 }
 0x91f   :  { %v6430_v14 = vmul.f32 %v6618_v60, %v6408_v35  ;;  %v6431_v30 = vmul.f32 %v6618_v60, %v6409_v15  ;;  %v6432_v0 = vmul.f32 %v6618_v60, %v6410_v11  ;;  %v6433_v25 = vmul.f32 %v6618_v60, %v6411_v19 }
 0x920   :  { %v6434_v29 = vmul.f32 %v6618_v60, %v6412_v5  ;;  %v6435_v41 = vmul.f32 %v6618_v60, %v6413_v2  ;;  %v6436_v7 = vmul.f32 %v6618_v60, %v6414_v6  ;;  %v6437_v31 = vmul.f32 %v6618_v60, %v6415_v49 }
 0x921   :  { %v6438_v16 = vmul.f32 %v6618_v60, %v6416_v48  ;;  %v6439_v62 = vmul.f32 %v6618_v60, %v6417_v27  ;;  %v6440_v34 = vmul.f32 %v6618_v60, %v6418_v59  ;;  %v6441_v8 = vmul.f32 %v6618_v60, %v6419_v28 }
 0x922   :  { %v6448_v57 = vadd.f32 %v6619_v10, %v6426_v13  ;;  %v6449_v37 = vadd.f32 %v6619_v10, %v6427_v20  ;;  %v6450_v33 = vadd.f32 %v6619_v10, %v6428_v32  ;;  %v6451_v63 = vadd.f32 %v6619_v10, %v6429_v18 }
 0x923   :  { %v6452_v39 = vadd.f32 %v6619_v10, %v6430_v14  ;;  %v6453_v3 = vadd.f32 %v6619_v10, %v6431_v30  ;;  %v6454_v45 = vadd.f32 %v6619_v10, %v6432_v0  ;;  %v6455_v4 = vadd.f32 %v6619_v10, %v6433_v25 }
 0x924   :  { %v6456_v38 = vadd.f32 %v6619_v10, %v6434_v29  ;;  %v6457_v22 = vadd.f32 %v6619_v10, %v6435_v41  ;;  %v6458_v12 = vadd.f32 %v6619_v10, %v6436_v7  ;;  %v6459_v9 = vadd.f32 %v6619_v10, %v6437_v31 }
 0x925   :  { %v6460_v44 = vadd.f32 %v6619_v10, %v6438_v16  ;;  %v6461_v46 = vadd.f32 %v6619_v10, %v6439_v62  ;;  %v6462_v58 = vadd.f32 %v6619_v10, %v6440_v34  ;;  %v6463_v1 = vadd.f32 %v6619_v10, %v6441_v8 }
 0x926   :  { %v6464_v24 = vadd.f32 %v6448_v57, %v13510_v52  ;;  %v6465_v43 = vadd.f32 %v6449_v37, %v13512_v51  ;;  %v6466_v60 = vadd.f32 %v6450_v33, %v13514_v40  ;;  %v6467_v35 = vadd.f32 %v6451_v63, %v13516_v23 }
 0x927   :  { %v6468_v15 = vadd.f32 %v6452_v39, %v13518_v17  ;;  %v6469_v11 = vadd.f32 %v6453_v3, %v13520_v36  ;;  %v6470_v19 = vadd.f32 %v6454_v45, %v13522_v54  ;;  %v6471_v5 = vadd.f32 %v6455_v4, %v13524_v55 }
 0x928   :  { %v6472_v2 = vadd.f32 %v6456_v38, %v13526_v50  ;;  %v6473_v6 = vadd.f32 %v6457_v22, %v13528_v42  ;;  %v6474_v52 = vadd.f32 %v6458_v12, %v13530_v56  ;;  %v6475_v51 = vadd.f32 %v6459_v9, %v13532_v26 }
 0x929   :  { %v6476_v40 = vadd.f32 %v6460_v44, %v13534_v47  ;;  %v6477_v23 = vadd.f32 %v6461_v46, %v13536_v53  ;;  %v6478_v17 = vadd.f32 %v6462_v58, %v13538_v61  ;;  %v6479_v36 = vadd.f32 %v6463_v1, %v13540_v21 }
 0x92a   :  { %v6480_v49 = vmax.f32 %v6464_v24, 0.0  ;;  %v6481_v54 = vmax.f32 %v6465_v43, 0.0  ;;  %v6482_v48 = vmax.f32 %v6466_v60, 0.0  ;;  %v6483_v55 = vmax.f32 %v6467_v35, 0.0 }
 0x92b   :  { %v6484_v27 = vmax.f32 %v6468_v15, 0.0  ;;  %v6485_v50 = vmax.f32 %v6469_v11, 0.0  ;;  %v6486_v59 = vmax.f32 %v6470_v19, 0.0  ;;  %v6487_v42 = vmax.f32 %v6471_v5, 0.0 }
 0x92c   :  { %v6488_v28 = vmax.f32 %v6472_v2, 0.0  ;;  %v6489_v56 = vmax.f32 %v6473_v6, 0.0  ;;  %v6490_v13 = vmax.f32 %v6474_v52, 0.0  ;;  %v6491_v26 = vmax.f32 %v6475_v51, 0.0  ;;  %6496 = vst.msk [vmem:[%s13654_s10] sm:$0xff] %vm2362_vm0, %v6480_v49  ;;  %6497 = vst.msk [vmem:[%s13654_s10 + $0x8] sm:$0xff] %vm2362_vm0, %v6481_v54 }
 0x92d   :  { %6498 = vst.msk [vmem:[%s13654_s10 + $0x10] sm:$0xff] %vm2362_vm0, %v6482_v48  ;;  %6499 = vst.msk [vmem:[%s13654_s10 + $0x18] sm:$0xff] %vm2362_vm0, %v6483_v55  ;;  %v6492_v47 = vmax.f32 %v6476_v40, 0.0  ;;  %v6493_v53 = vmax.f32 %v6477_v23, 0.0  ;;  %v6494_v61 = vmax.f32 %v6478_v17, 0.0  ;;  %v6495_v21 = vmax.f32 %v6479_v36, 0.0 }
 0x92e   :  { %6500 = vst.msk [vmem:[%s13654_s10 + $0x20] sm:$0xff] %vm2362_vm0, %v6484_v27  ;;  %6501 = vst.msk [vmem:[%s13654_s10 + $0x28] sm:$0xff] %vm2362_vm0, %v6485_v50 }
 0x92f   :  { %6502 = vst.msk [vmem:[%s13654_s10 + $0x30] sm:$0xff] %vm2362_vm0, %v6486_v59  ;;  %6503 = vst.msk [vmem:[%s13654_s10 + $0x38] sm:$0xff] %vm2362_vm0, %v6487_v42 }
 0x930   :  { %6504 = vst.msk [vmem:[%s13654_s10 + $0x40] sm:$0xff] %vm2362_vm0, %v6488_v28  ;;  %6505 = vst.msk [vmem:[%s13654_s10 + $0x48] sm:$0xff] %vm2362_vm0, %v6489_v56 }
 0x931   :  { %6506 = vst.msk [vmem:[%s13654_s10 + $0x50] sm:$0xff] %vm2362_vm0, %v6490_v13  ;;  %6507 = vst.msk [vmem:[%s13654_s10 + $0x58] sm:$0xff] %vm2362_vm0, %v6491_v26 }
 0x932   :  { %6508 = vst.msk [vmem:[%s13654_s10 + $0x60] sm:$0xff] %vm2362_vm0, %v6492_v47  ;;  %6509 = vst.msk [vmem:[%s13654_s10 + $0x68] sm:$0xff] %vm2362_vm0, %v6493_v53 }
 0x933   :  { %6510 = vst.msk [vmem:[%s13654_s10 + $0x70] sm:$0xff] %vm2362_vm0, %v6494_v61  ;;  %6511 = vst.msk [vmem:[%s13654_s10 + $0x78] sm:$0xff] %vm2362_vm0, %v6495_v21 }

</bundles_post_ra>
